<compile_context>
chip_gen: v6e
topology: v6e:2x2x1
jax: 0.10.0
libtpu: 0.0.40
codegen_flags: <defaults>
</compile_context>

<pallas_src>
import numpy as np
import jax
import jax.numpy as jnp
from jax import lax
from jax.experimental import pallas as pl
from jax.experimental.pallas import tpu as pltpu

BN_EPS = 1e-5


# --------------------------- host-side constants ---------------------------- #
def build_shift_mats(n_batch, H, W, r_pad):
    """0/1 matrices S_t[r_src, r_dst] implementing the 9 SAME-padded 3x3 taps.

    out(n,h,w) for tap t=(kh,kw) reads in(n, h+kh-1, w+kw-1); invalid (border)
    and pad-lane destinations get all-zero columns, so zero padding is free and
    pad lanes never feed real lanes.
    """
    hw = H * W
    mats = np.zeros((9, r_pad, r_pad), np.float32)
    for t in range(9):
        kh, kw = t // 3, t % 3
        dh, dw = kh - 1, kw - 1
        for n in range(n_batch):
            for h in range(H):
                for w in range(W):
                    hh, ww = h + dh, w + dw
                    if 0 <= hh < H and 0 <= ww < W:
                        mats[t, n * hw + hh * W + ww, n * hw + h * W + w] = 1.0
    return jnp.asarray(mats)


# ------------------------------ Pallas kernel ------------------------------- #
def make_kernel(num_blocks, policy_hidden, r_pad):
    f32 = jnp.float32

    def conv3x3(act, taps, bias, smat_ref):
        """act:[Cin,R]  taps: list of 9 [Cout,Cin]  bias:[Cout,1] -> [Cout,R]."""
        cout = bias.shape[0]
        acc = jnp.zeros((cout, r_pad), f32)
        for t in range(9):
            shifted = jnp.dot(act, smat_ref[t], preferred_element_type=f32)
            acc = acc + jnp.dot(taps[t], shifted, preferred_element_type=f32)
        return acc + bias

    def kernel(x_ref, smat_ref, w_in_ref, b_in_ref, w_blk_ref, b_blk_ref,
               w_head_ref, b_head_ref, wp_ref, pb_ref, w1_ref, b1_ref,
               w2_ref, b2_ref, p_ref, v_ref):
        # ---- trunk: input conv + BN + ReLU ----
        y = conv3x3(x_ref[...], [w_in_ref[t] for t in range(9)],
                    b_in_ref[...], smat_ref)
        y = jnp.maximum(y, 0.0)

        # ---- residual blocks ----
        for blk in range(num_blocks):
            c1, c2 = 2 * blk, 2 * blk + 1
            h = conv3x3(y, [w_blk_ref[c1, t] for t in range(9)],
                        b_blk_ref[c1], smat_ref)
            h = jnp.maximum(h, 0.0)
            o = conv3x3(h, [w_blk_ref[c2, t] for t in range(9)],
                        b_blk_ref[c2], smat_ref)
            y = jnp.maximum(o + y, 0.0)

        # ---- fused 1x1 head convs (+BN, conv-bias folded) + ReLU ----
        # rows 0..P-1: policy channels, row P: value channel
        hf = jnp.dot(w_head_ref[...], y, preferred_element_type=f32) + b_head_ref[...]
        hf = jnp.maximum(hf, 0.0)

        # ---- policy head: Flatten + Linear via block-diagonal lane weights ----
        p = pb_ref[...]                                    # [1, N*n_pawns]
        for c in range(policy_hidden):
            p = p + jnp.dot(hf[c:c + 1, :], wp_ref[c],
                            preferred_element_type=f32)
        p_ref[...] = p

        # ---- value head: Flatten + Linear + ReLU + Linear + Tanh ----
        hv = hf[policy_hidden:policy_hidden + 1, :]        # [1, R]
        vh = jnp.dot(hv, w1_ref[...], preferred_element_type=f32) + b1_ref[...]
        vh = jnp.maximum(vh, 0.0)                          # [1, N*value_hidden]
        v = jnp.dot(vh, w2_ref[...], preferred_element_type=f32) + b2_ref[...]
        v_ref[...] = jnp.tanh(v)                           # [1, N*n_heads]

    return kernel


# ----------------------------- parameter folding ---------------------------- #
def bn_fold(bn):
    scale = bn["gamma"] / jnp.sqrt(bn["var"] + BN_EPS)
    bias = bn["beta"] - bn["mean"] * scale
    return scale, bias


def conv3x3_taps(w_oihw, scale):
    """torch [Cout,Cin,3,3] (BN scale folded) -> [9, Cout, Cin], tap t=kh*3+kw."""
    cout, cin = w_oihw.shape[0], w_oihw.shape[1]
    w = w_oihw * scale[:, None, None, None]
    return jnp.transpose(w, (2, 3, 0, 1)).reshape(9, cout, cin)


# ------------------------------- forward pass ------------------------------- #
def pallas_forward(x_nchw, params, shift_mats):
    N, cin, H, W = x_nchw.shape
    hw = H * W
    rows = N * hw
    r_pad = shift_mats.shape[-1]
    assert rows <= r_pad
    num_blocks = len(params["blocks"])
    P = params["policy_conv_w"].shape[0]
    n_pawns = params["policy_lin_w"].shape[0]
    VH = params["value_lin1_w"].shape[0]
    n_heads = params["value_lin2_w"].shape[0]

    # activations enter as [C, R_pad] (channels x flat spatial), zero pad lanes
    x = jnp.transpose(x_nchw, (1, 0, 2, 3)).reshape(cin, rows)
    x = jnp.pad(x, ((0, 0), (0, r_pad - rows)))

    # trunk weights: BN scale folded into taps, bias as [Cout, 1]
    s_in, b_in_v = bn_fold(params["input_bn"])
    w_in = conv3x3_taps(params["input_conv_w"], s_in)
    b_in = b_in_v[:, None]
    w_blk, b_blk = [], []
    for blk in params["blocks"]:
        s1, bb1 = bn_fold(blk["bn1"])
        s2, bb2 = bn_fold(blk["bn2"])
        w_blk += [conv3x3_taps(blk["conv1_w"], s1), conv3x3_taps(blk["conv2_w"], s2)]
        b_blk += [bb1[:, None], bb2[:, None]]
    w_blk = jnp.stack(w_blk)                       # [2*num_blocks, 9, C, C]
    b_blk = jnp.stack(b_blk)                       # [2*num_blocks, C, 1]

    # fused 1x1 head convs (policy P rows + value 1 row), conv bias + BN folded
    sp, bp = bn_fold(params["policy_bn"])
    sv, bv = bn_fold(params["value_bn"])
    wp_conv = params["policy_conv_w"][:, :, 0, 0] * sp[:, None]
    wv_conv = params["value_conv_w"][:, :, 0, 0] * sv[:, None]
    bp_head = params["policy_conv_b"] * sp + bp
    bv_head = params["value_conv_b"] * sv + bv
    w_head = jnp.concatenate([wp_conv, wv_conv], axis=0)            # [P+1, C]
    b_head = jnp.concatenate([bp_head, bv_head], axis=0)[:, None]   # [P+1, 1]

    # policy linear: torch flatten order is feature = c*HW + s; build per-channel
    # block-diagonal-over-batch lane weights so no in-kernel flatten is needed.
    wl3 = params["policy_lin_w"].reshape(n_pawns, P, hw).transpose(1, 2, 0)  # [P,hw,np]
    wp_exp = jnp.zeros((P, r_pad, N * n_pawns), jnp.float32)
    for n in range(N):
        wp_exp = wp_exp.at[:, n * hw:(n + 1) * hw,
                           n * n_pawns:(n + 1) * n_pawns].set(wl3)
    pb_exp = jnp.tile(params["policy_lin_b"], N)[None, :]

    # value linears with the same block-diagonal-over-batch trick
    w1_exp = jnp.zeros((r_pad, N * VH), jnp.float32)
    w2_exp = jnp.zeros((N * VH, N * n_heads), jnp.float32)
    for n in range(N):
        w1_exp = w1_exp.at[n * hw:(n + 1) * hw,
                           n * VH:(n + 1) * VH].set(params["value_lin1_w"].T)
        w2_exp = w2_exp.at[n * VH:(n + 1) * VH,
                           n * n_heads:(n + 1) * n_heads].set(params["value_lin2_w"].T)
    b1_exp = jnp.tile(params["value_lin1_b"], N)[None, :]
    b2_exp = jnp.tile(params["value_lin2_b"], N)[None, :]

    kernel = make_kernel(num_blocks, P, r_pad)
    vmem = pl.BlockSpec(memory_space=pltpu.MemorySpace.VMEM)
    p_row, v_row = pl.pallas_call(
        kernel,
        out_shape=(jax.ShapeDtypeStruct((1, N * n_pawns), jnp.float32),
                   jax.ShapeDtypeStruct((1, N * n_heads), jnp.float32)),
        in_specs=[vmem] * 14,
        out_specs=(vmem, vmem),
    )(x, shift_mats, w_in, b_in, w_blk, b_blk, w_head, b_head,
      wp_exp, pb_exp, w1_exp, b1_exp, w2_exp, b2_exp)

    return p_row.reshape(N, n_pawns), v_row.reshape(N, n_heads)


# --------------------------- deterministic params --------------------------- #
def init_params(key, in_channels, hidden, num_blocks, policy_hidden,
                value_hidden, n_pawns, grid_dim, n_value_heads):
    keys = iter(jax.random.split(key, 64))

    def conv_w(cout, cin, k):
        fan_in = cin * k * k
        return jax.random.normal(next(keys), (cout, cin, k, k),
                                 jnp.float32) / np.sqrt(fan_in)

    def bn_p(c):
        return dict(
            gamma=jax.random.uniform(next(keys), (c,), jnp.float32, 0.5, 1.5),
            beta=jax.random.normal(next(keys), (c,), jnp.float32) * 0.1,
            mean=jax.random.normal(next(keys), (c,), jnp.float32) * 0.1,
            var=jax.random.uniform(next(keys), (c,), jnp.float32, 0.5, 1.5),
        )

    def lin(cout, cin):
        w = jax.random.normal(next(keys), (cout, cin), jnp.float32) / np.sqrt(cin)
        b = jax.random.normal(next(keys), (cout,), jnp.float32) * 0.1
        return w, b

    params = {}
    params["input_conv_w"] = conv_w(hidden, in_channels, 3)
    params["input_bn"] = bn_p(hidden)
    params["blocks"] = []
    for _ in range(num_blocks):
        params["blocks"].append(dict(
            conv1_w=conv_w(hidden, hidden, 3), bn1=bn_p(hidden),
            conv2_w=conv_w(hidden, hidden, 3), bn2=bn_p(hidden)))
    params["policy_conv_w"] = conv_w(policy_hidden, hidden, 1)
    params["policy_conv_b"] = jax.random.normal(next(keys), (policy_hidden,),
                                                jnp.float32) * 0.1
    params["policy_bn"] = bn_p(policy_hidden)
    params["policy_lin_w"], params["policy_lin_b"] = lin(
        n_pawns, policy_hidden * grid_dim ** 2)
    params["value_conv_w"] = conv_w(1, hidden, 1)
    params["value_conv_b"] = jax.random.normal(next(keys), (1,), jnp.float32) * 0.1
    params["value_bn"] = bn_p(1)
    params["value_lin1_w"], params["value_lin1_b"] = lin(value_hidden, grid_dim ** 2)
    params["value_lin2_w"], params["value_lin2_b"] = lin(n_value_heads, value_hidden)
    return params


# ------------------------- pure-JAX reference check ------------------------- #
def ref_forward(x, params):
    def conv(x, w, pad):
        return lax.conv_general_dilated(
            x, w, (1, 1), [(pad, pad), (pad, pad)],
            dimension_numbers=("NCHW", "OIHW", "NCHW"),
            precision=lax.Precision.HIGHEST)

    def bn(x, p):
        s = p["gamma"] / jnp.sqrt(p["var"] + BN_EPS)
        b = p["beta"] - p["mean"] * s
        return x * s[None, :, None, None] + b[None, :, None, None]

    relu = lambda z: jnp.maximum(z, 0.0)
    y = relu(bn(conv(x, params["input_conv_w"], 1), params["input_bn"]))
    for blk in params["blocks"]:
        h = relu(bn(conv(y, blk["conv1_w"], 1), blk["bn1"]))
        y = relu(bn(conv(h, blk["conv2_w"], 1), blk["bn2"]) + y)
    p = conv(y, params["policy_conv_w"], 0) + params["policy_conv_b"][None, :, None, None]
    p = relu(bn(p, params["policy_bn"])).reshape(y.shape[0], -1)
    p = p @ params["policy_lin_w"].T + params["policy_lin_b"]
    v = conv(y, params["value_conv_w"], 0) + params["value_conv_b"][None, :, None, None]
    v = relu(bn(v, params["value_bn"])).reshape(y.shape[0], -1)
    v = relu(v @ params["value_lin1_w"].T + params["value_lin1_b"])
    v = jnp.tanh(v @ params["value_lin2_w"].T + params["value_lin2_b"])
    return p, v


if __name__ == "__main__":
    # small, module-consistent config: n_pawns=5 => grid_dim=7
    n_pawns = 5
    grid_dim = n_pawns + 2          # 7
    in_channels = 4                 # get_num_channels(...) stand-in
    cnn_hidden_dim = 32
    num_blocks = 2
    policy_hidden_dim = 8
    value_hidden_dim = 32
    n_value_heads = 1               # double_value_head = False
    batch = 2

    key = jax.random.PRNGKey(0)
    kx, kp = jax.random.split(key)
    x = jax.random.normal(kx, (batch, in_channels, grid_dim, grid_dim), jnp.float32)
    params = init_params(kp, in_channels, cnn_hidden_dim, num_blocks,
                         policy_hidden_dim, value_hidden_dim, n_pawns,
                         grid_dim, n_value_heads)

    rows = batch * grid_dim * grid_dim
    r_pad = ((rows + 127) // 128) * 128
    shift_mats = build_shift_mats(batch, grid_dim, grid_dim, r_pad)

    fwd = jax.jit(pallas_forward)
    p, v = fwd(x, params, shift_mats)
    (p, v) = jax.block_until_ready((p, v))

    p_ref, v_ref = ref_forward(x, params)
    np.testing.assert_allclose(np.asarray(p), np.asarray(p_ref), rtol=2e-2, atol=2e-2)
    np.testing.assert_allclose(np.asarray(v), np.asarray(v_ref), rtol=2e-2, atol=2e-2)

    print("KERNEL_OK")
</pallas_src>

<mosaic_0001>
module attributes {stable_mosaic.version = 11 : i64} {
  func.func @kernel(%arg0: memref<4x128xf32, #tpu.memory_space<vmem>>, %arg1: memref<9x128x128xf32, #tpu.memory_space<vmem>>, %arg2: memref<9x32x4xf32, #tpu.memory_space<vmem>>, %arg3: memref<32x1xf32, #tpu.memory_space<vmem>>, %arg4: memref<4x9x32x32xf32, #tpu.memory_space<vmem>>, %arg5: memref<4x32x1xf32, #tpu.memory_space<vmem>>, %arg6: memref<9x32xf32, #tpu.memory_space<vmem>>, %arg7: memref<9x1xf32, #tpu.memory_space<vmem>>, %arg8: memref<8x128x10xf32, #tpu.memory_space<vmem>>, %arg9: memref<1x10xf32, #tpu.memory_space<vmem>>, %arg10: memref<128x64xf32, #tpu.memory_space<vmem>>, %arg11: memref<1x64xf32, #tpu.memory_space<vmem>>, %arg12: memref<64x2xf32, #tpu.memory_space<vmem>>, %arg13: memref<1x2xf32, #tpu.memory_space<vmem>>, %arg14: memref<1x10xf32, #tpu.memory_space<vmem>>, %arg15: memref<1x2xf32, #tpu.memory_space<vmem>>) attributes {dimension_semantics = [], scalar_prefetch = 0 : i64, scratch_operands = 0 : i64, tpu.core_type = #tpu.core_type<tc>} {
    %c0 = arith.constant 0 : index
    %c0_0 = arith.constant 0 : index
    %0 = vector.load %arg0[%c0, %c0_0] : memref<4x128xf32, #tpu.memory_space<vmem>>, vector<4x128xf32>
    %c0_1 = arith.constant 0 : index
    %c0_2 = arith.constant 0 : index
    %c0_3 = arith.constant 0 : index
    %1 = vector.load %arg2[%c0_1, %c0_2, %c0_3] : memref<9x32x4xf32, #tpu.memory_space<vmem>>, vector<1x32x4xf32>
    %2 = vector.shape_cast %1 : vector<1x32x4xf32> to vector<32x4xf32>
    %c1 = arith.constant 1 : index
    %c0_4 = arith.constant 0 : index
    %c0_5 = arith.constant 0 : index
    %3 = vector.load %arg2[%c1, %c0_4, %c0_5] : memref<9x32x4xf32, #tpu.memory_space<vmem>>, vector<1x32x4xf32>
    %4 = vector.shape_cast %3 : vector<1x32x4xf32> to vector<32x4xf32>
    %c2 = arith.constant 2 : index
    %c0_6 = arith.constant 0 : index
    %c0_7 = arith.constant 0 : index
    %5 = vector.load %arg2[%c2, %c0_6, %c0_7] : memref<9x32x4xf32, #tpu.memory_space<vmem>>, vector<1x32x4xf32>
    %6 = vector.shape_cast %5 : vector<1x32x4xf32> to vector<32x4xf32>
    %c3 = arith.constant 3 : index
    %c0_8 = arith.constant 0 : index
    %c0_9 = arith.constant 0 : index
    %7 = vector.load %arg2[%c3, %c0_8, %c0_9] : memref<9x32x4xf32, #tpu.memory_space<vmem>>, vector<1x32x4xf32>
    %8 = vector.shape_cast %7 : vector<1x32x4xf32> to vector<32x4xf32>
    %c4 = arith.constant 4 : index
    %c0_10 = arith.constant 0 : index
    %c0_11 = arith.constant 0 : index
    %9 = vector.load %arg2[%c4, %c0_10, %c0_11] : memref<9x32x4xf32, #tpu.memory_space<vmem>>, vector<1x32x4xf32>
    %10 = vector.shape_cast %9 : vector<1x32x4xf32> to vector<32x4xf32>
    %c5 = arith.constant 5 : index
    %c0_12 = arith.constant 0 : index
    %c0_13 = arith.constant 0 : index
    %11 = vector.load %arg2[%c5, %c0_12, %c0_13] : memref<9x32x4xf32, #tpu.memory_space<vmem>>, vector<1x32x4xf32>
    %12 = vector.shape_cast %11 : vector<1x32x4xf32> to vector<32x4xf32>
    %c6 = arith.constant 6 : index
    %c0_14 = arith.constant 0 : index
    %c0_15 = arith.constant 0 : index
    %13 = vector.load %arg2[%c6, %c0_14, %c0_15] : memref<9x32x4xf32, #tpu.memory_space<vmem>>, vector<1x32x4xf32>
    %14 = vector.shape_cast %13 : vector<1x32x4xf32> to vector<32x4xf32>
    %c7 = arith.constant 7 : index
    %c0_16 = arith.constant 0 : index
    %c0_17 = arith.constant 0 : index
    %15 = vector.load %arg2[%c7, %c0_16, %c0_17] : memref<9x32x4xf32, #tpu.memory_space<vmem>>, vector<1x32x4xf32>
    %16 = vector.shape_cast %15 : vector<1x32x4xf32> to vector<32x4xf32>
    %c8 = arith.constant 8 : index
    %c0_18 = arith.constant 0 : index
    %c0_19 = arith.constant 0 : index
    %17 = vector.load %arg2[%c8, %c0_18, %c0_19] : memref<9x32x4xf32, #tpu.memory_space<vmem>>, vector<1x32x4xf32>
    %18 = vector.shape_cast %17 : vector<1x32x4xf32> to vector<32x4xf32>
    %c0_20 = arith.constant 0 : index
    %c0_21 = arith.constant 0 : index
    %19 = vector.load %arg3[%c0_20, %c0_21] : memref<32x1xf32, #tpu.memory_space<vmem>>, vector<32x1xf32>
    %cst = arith.constant 0.000000e+00 : f32
    %20 = vector.broadcast %cst : f32 to vector<32x128xf32>
    %c0_22 = arith.constant 0 : index
    %c0_23 = arith.constant 0 : index
    %c0_24 = arith.constant 0 : index
    %21 = vector.load %arg1[%c0_22, %c0_23, %c0_24] : memref<9x128x128xf32, #tpu.memory_space<vmem>>, vector<1x128x128xf32>
    %22 = vector.shape_cast %21 : vector<1x128x128xf32> to vector<128x128xf32>
    %cst_25 = arith.constant dense<0.000000e+00> : vector<4x128xf32>
    %23 = tpu.matmul %0, %22, %cst_25 {dimension_numbers = #tpu.dot_dimension_numbers<[1], [0], [0], [1], [0, 0, 1, 1], [], []>} : vector<4x128xf32>, vector<128x128xf32>, vector<4x128xf32> -> vector<4x128xf32>
    %cst_26 = arith.constant dense<0.000000e+00> : vector<32x128xf32>
    %24 = tpu.matmul %2, %23, %cst_26 {dimension_numbers = #tpu.dot_dimension_numbers<[1], [0], [0], [1], [0, 0, 1, 1], [], []>} : vector<32x4xf32>, vector<4x128xf32>, vector<32x128xf32> -> vector<32x128xf32>
    %25 = arith.addf %20, %24 : vector<32x128xf32>
    %c1_27 = arith.constant 1 : index
    %c0_28 = arith.constant 0 : index
    %c0_29 = arith.constant 0 : index
    %26 = vector.load %arg1[%c1_27, %c0_28, %c0_29] : memref<9x128x128xf32, #tpu.memory_space<vmem>>, vector<1x128x128xf32>
    %27 = vector.shape_cast %26 : vector<1x128x128xf32> to vector<128x128xf32>
    %cst_30 = arith.constant dense<0.000000e+00> : vector<4x128xf32>
    %28 = tpu.matmul %0, %27, %cst_30 {dimension_numbers = #tpu.dot_dimension_numbers<[1], [0], [0], [1], [0, 0, 1, 1], [], []>} : vector<4x128xf32>, vector<128x128xf32>, vector<4x128xf32> -> vector<4x128xf32>
    %cst_31 = arith.constant dense<0.000000e+00> : vector<32x128xf32>
    %29 = tpu.matmul %4, %28, %cst_31 {dimension_numbers = #tpu.dot_dimension_numbers<[1], [0], [0], [1], [0, 0, 1, 1], [], []>} : vector<32x4xf32>, vector<4x128xf32>, vector<32x128xf32> -> vector<32x128xf32>
    %30 = arith.addf %25, %29 : vector<32x128xf32>
    %c2_32 = arith.constant 2 : index
    %c0_33 = arith.constant 0 : index
    %c0_34 = arith.constant 0 : index
    %31 = vector.load %arg1[%c2_32, %c0_33, %c0_34] : memref<9x128x128xf32, #tpu.memory_space<vmem>>, vector<1x128x128xf32>
    %32 = vector.shape_cast %31 : vector<1x128x128xf32> to vector<128x128xf32>
    %cst_35 = arith.constant dense<0.000000e+00> : vector<4x128xf32>
    %33 = tpu.matmul %0, %32, %cst_35 {dimension_numbers = #tpu.dot_dimension_numbers<[1], [0], [0], [1], [0, 0, 1, 1], [], []>} : vector<4x128xf32>, vector<128x128xf32>, vector<4x128xf32> -> vector<4x128xf32>
    %cst_36 = arith.constant dense<0.000000e+00> : vector<32x128xf32>
    %34 = tpu.matmul %6, %33, %cst_36 {dimension_numbers = #tpu.dot_dimension_numbers<[1], [0], [0], [1], [0, 0, 1, 1], [], []>} : vector<32x4xf32>, vector<4x128xf32>, vector<32x128xf32> -> vector<32x128xf32>
    %35 = arith.addf %30, %34 : vector<32x128xf32>
    %c3_37 = arith.constant 3 : index
    %c0_38 = arith.constant 0 : index
    %c0_39 = arith.constant 0 : index
    %36 = vector.load %arg1[%c3_37, %c0_38, %c0_39] : memref<9x128x128xf32, #tpu.memory_space<vmem>>, vector<1x128x128xf32>
    %37 = vector.shape_cast %36 : vector<1x128x128xf32> to vector<128x128xf32>
    %cst_40 = arith.constant dense<0.000000e+00> : vector<4x128xf32>
    %38 = tpu.matmul %0, %37, %cst_40 {dimension_numbers = #tpu.dot_dimension_numbers<[1], [0], [0], [1], [0, 0, 1, 1], [], []>} : vector<4x128xf32>, vector<128x128xf32>, vector<4x128xf32> -> vector<4x128xf32>
    %cst_41 = arith.constant dense<0.000000e+00> : vector<32x128xf32>
    %39 = tpu.matmul %8, %38, %cst_41 {dimension_numbers = #tpu.dot_dimension_numbers<[1], [0], [0], [1], [0, 0, 1, 1], [], []>} : vector<32x4xf32>, vector<4x128xf32>, vector<32x128xf32> -> vector<32x128xf32>
    %40 = arith.addf %35, %39 : vector<32x128xf32>
    %c4_42 = arith.constant 4 : index
    %c0_43 = arith.constant 0 : index
    %c0_44 = arith.constant 0 : index
    %41 = vector.load %arg1[%c4_42, %c0_43, %c0_44] : memref<9x128x128xf32, #tpu.memory_space<vmem>>, vector<1x128x128xf32>
    %42 = vector.shape_cast %41 : vector<1x128x128xf32> to vector<128x128xf32>
    %cst_45 = arith.constant dense<0.000000e+00> : vector<4x128xf32>
    %43 = tpu.matmul %0, %42, %cst_45 {dimension_numbers = #tpu.dot_dimension_numbers<[1], [0], [0], [1], [0, 0, 1, 1], [], []>} : vector<4x128xf32>, vector<128x128xf32>, vector<4x128xf32> -> vector<4x128xf32>
    %cst_46 = arith.constant dense<0.000000e+00> : vector<32x128xf32>
    %44 = tpu.matmul %10, %43, %cst_46 {dimension_numbers = #tpu.dot_dimension_numbers<[1], [0], [0], [1], [0, 0, 1, 1], [], []>} : vector<32x4xf32>, vector<4x128xf32>, vector<32x128xf32> -> vector<32x128xf32>
    %45 = arith.addf %40, %44 : vector<32x128xf32>
    %c5_47 = arith.constant 5 : index
    %c0_48 = arith.constant 0 : index
    %c0_49 = arith.constant 0 : index
    %46 = vector.load %arg1[%c5_47, %c0_48, %c0_49] : memref<9x128x128xf32, #tpu.memory_space<vmem>>, vector<1x128x128xf32>
    %47 = vector.shape_cast %46 : vector<1x128x128xf32> to vector<128x128xf32>
    %cst_50 = arith.constant dense<0.000000e+00> : vector<4x128xf32>
    %48 = tpu.matmul %0, %47, %cst_50 {dimension_numbers = #tpu.dot_dimension_numbers<[1], [0], [0], [1], [0, 0, 1, 1], [], []>} : vector<4x128xf32>, vector<128x128xf32>, vector<4x128xf32> -> vector<4x128xf32>
    %cst_51 = arith.constant dense<0.000000e+00> : vector<32x128xf32>
    %49 = tpu.matmul %12, %48, %cst_51 {dimension_numbers = #tpu.dot_dimension_numbers<[1], [0], [0], [1], [0, 0, 1, 1], [], []>} : vector<32x4xf32>, vector<4x128xf32>, vector<32x128xf32> -> vector<32x128xf32>
    %50 = arith.addf %45, %49 : vector<32x128xf32>
    %c6_52 = arith.constant 6 : index
    %c0_53 = arith.constant 0 : index
    %c0_54 = arith.constant 0 : index
    %51 = vector.load %arg1[%c6_52, %c0_53, %c0_54] : memref<9x128x128xf32, #tpu.memory_space<vmem>>, vector<1x128x128xf32>
    %52 = vector.shape_cast %51 : vector<1x128x128xf32> to vector<128x128xf32>
    %cst_55 = arith.constant dense<0.000000e+00> : vector<4x128xf32>
    %53 = tpu.matmul %0, %52, %cst_55 {dimension_numbers = #tpu.dot_dimension_numbers<[1], [0], [0], [1], [0, 0, 1, 1], [], []>} : vector<4x128xf32>, vector<128x128xf32>, vector<4x128xf32> -> vector<4x128xf32>
    %cst_56 = arith.constant dense<0.000000e+00> : vector<32x128xf32>
    %54 = tpu.matmul %14, %53, %cst_56 {dimension_numbers = #tpu.dot_dimension_numbers<[1], [0], [0], [1], [0, 0, 1, 1], [], []>} : vector<32x4xf32>, vector<4x128xf32>, vector<32x128xf32> -> vector<32x128xf32>
    %55 = arith.addf %50, %54 : vector<32x128xf32>
    %c7_57 = arith.constant 7 : index
    %c0_58 = arith.constant 0 : index
    %c0_59 = arith.constant 0 : index
    %56 = vector.load %arg1[%c7_57, %c0_58, %c0_59] : memref<9x128x128xf32, #tpu.memory_space<vmem>>, vector<1x128x128xf32>
    %57 = vector.shape_cast %56 : vector<1x128x128xf32> to vector<128x128xf32>
    %cst_60 = arith.constant dense<0.000000e+00> : vector<4x128xf32>
    %58 = tpu.matmul %0, %57, %cst_60 {dimension_numbers = #tpu.dot_dimension_numbers<[1], [0], [0], [1], [0, 0, 1, 1], [], []>} : vector<4x128xf32>, vector<128x128xf32>, vector<4x128xf32> -> vector<4x128xf32>
    %cst_61 = arith.constant dense<0.000000e+00> : vector<32x128xf32>
    %59 = tpu.matmul %16, %58, %cst_61 {dimension_numbers = #tpu.dot_dimension_numbers<[1], [0], [0], [1], [0, 0, 1, 1], [], []>} : vector<32x4xf32>, vector<4x128xf32>, vector<32x128xf32> -> vector<32x128xf32>
    %60 = arith.addf %55, %59 : vector<32x128xf32>
    %c8_62 = arith.constant 8 : index
    %c0_63 = arith.constant 0 : index
    %c0_64 = arith.constant 0 : index
    %61 = vector.load %arg1[%c8_62, %c0_63, %c0_64] : memref<9x128x128xf32, #tpu.memory_space<vmem>>, vector<1x128x128xf32>
    %62 = vector.shape_cast %61 : vector<1x128x128xf32> to vector<128x128xf32>
    %cst_65 = arith.constant dense<0.000000e+00> : vector<4x128xf32>
    %63 = tpu.matmul %0, %62, %cst_65 {dimension_numbers = #tpu.dot_dimension_numbers<[1], [0], [0], [1], [0, 0, 1, 1], [], []>} : vector<4x128xf32>, vector<128x128xf32>, vector<4x128xf32> -> vector<4x128xf32>
    %cst_66 = arith.constant dense<0.000000e+00> : vector<32x128xf32>
    %64 = tpu.matmul %18, %63, %cst_66 {dimension_numbers = #tpu.dot_dimension_numbers<[1], [0], [0], [1], [0, 0, 1, 1], [], []>} : vector<32x4xf32>, vector<4x128xf32>, vector<32x128xf32> -> vector<32x128xf32>
    %65 = arith.addf %60, %64 : vector<32x128xf32>
    %66 = vector.broadcast %19 : vector<32x1xf32> to vector<32x128xf32>
    %67 = arith.addf %65, %66 : vector<32x128xf32>
    %cst_67 = arith.constant 0.000000e+00 : f32
    %68 = vector.broadcast %cst_67 : f32 to vector<32x128xf32>
    %69 = arith.maximumf %67, %68 : vector<32x128xf32>
    %c0_68 = arith.constant 0 : index
    %c0_69 = arith.constant 0 : index
    %c0_70 = arith.constant 0 : index
    %c0_71 = arith.constant 0 : index
    %70 = vector.load %arg4[%c0_68, %c0_69, %c0_70, %c0_71] : memref<4x9x32x32xf32, #tpu.memory_space<vmem>>, vector<1x1x32x32xf32>
    %71 = vector.shape_cast %70 : vector<1x1x32x32xf32> to vector<32x32xf32>
    %c0_72 = arith.constant 0 : index
    %c1_73 = arith.constant 1 : index
    %c0_74 = arith.constant 0 : index
    %c0_75 = arith.constant 0 : index
    %72 = vector.load %arg4[%c0_72, %c1_73, %c0_74, %c0_75] : memref<4x9x32x32xf32, #tpu.memory_space<vmem>>, vector<1x1x32x32xf32>
    %73 = vector.shape_cast %72 : vector<1x1x32x32xf32> to vector<32x32xf32>
    %c0_76 = arith.constant 0 : index
    %c2_77 = arith.constant 2 : index
    %c0_78 = arith.constant 0 : index
    %c0_79 = arith.constant 0 : index
    %74 = vector.load %arg4[%c0_76, %c2_77, %c0_78, %c0_79] : memref<4x9x32x32xf32, #tpu.memory_space<vmem>>, vector<1x1x32x32xf32>
    %75 = vector.shape_cast %74 : vector<1x1x32x32xf32> to vector<32x32xf32>
    %c0_80 = arith.constant 0 : index
    %c3_81 = arith.constant 3 : index
    %c0_82 = arith.constant 0 : index
    %c0_83 = arith.constant 0 : index
    %76 = vector.load %arg4[%c0_80, %c3_81, %c0_82, %c0_83] : memref<4x9x32x32xf32, #tpu.memory_space<vmem>>, vector<1x1x32x32xf32>
    %77 = vector.shape_cast %76 : vector<1x1x32x32xf32> to vector<32x32xf32>
    %c0_84 = arith.constant 0 : index
    %c4_85 = arith.constant 4 : index
    %c0_86 = arith.constant 0 : index
    %c0_87 = arith.constant 0 : index
    %78 = vector.load %arg4[%c0_84, %c4_85, %c0_86, %c0_87] : memref<4x9x32x32xf32, #tpu.memory_space<vmem>>, vector<1x1x32x32xf32>
    %79 = vector.shape_cast %78 : vector<1x1x32x32xf32> to vector<32x32xf32>
    %c0_88 = arith.constant 0 : index
    %c5_89 = arith.constant 5 : index
    %c0_90 = arith.constant 0 : index
    %c0_91 = arith.constant 0 : index
    %80 = vector.load %arg4[%c0_88, %c5_89, %c0_90, %c0_91] : memref<4x9x32x32xf32, #tpu.memory_space<vmem>>, vector<1x1x32x32xf32>
    %81 = vector.shape_cast %80 : vector<1x1x32x32xf32> to vector<32x32xf32>
    %c0_92 = arith.constant 0 : index
    %c6_93 = arith.constant 6 : index
    %c0_94 = arith.constant 0 : index
    %c0_95 = arith.constant 0 : index
    %82 = vector.load %arg4[%c0_92, %c6_93, %c0_94, %c0_95] : memref<4x9x32x32xf32, #tpu.memory_space<vmem>>, vector<1x1x32x32xf32>
    %83 = vector.shape_cast %82 : vector<1x1x32x32xf32> to vector<32x32xf32>
    %c0_96 = arith.constant 0 : index
    %c7_97 = arith.constant 7 : index
    %c0_98 = arith.constant 0 : index
    %c0_99 = arith.constant 0 : index
    %84 = vector.load %arg4[%c0_96, %c7_97, %c0_98, %c0_99] : memref<4x9x32x32xf32, #tpu.memory_space<vmem>>, vector<1x1x32x32xf32>
    %85 = vector.shape_cast %84 : vector<1x1x32x32xf32> to vector<32x32xf32>
    %c0_100 = arith.constant 0 : index
    %c8_101 = arith.constant 8 : index
    %c0_102 = arith.constant 0 : index
    %c0_103 = arith.constant 0 : index
    %86 = vector.load %arg4[%c0_100, %c8_101, %c0_102, %c0_103] : memref<4x9x32x32xf32, #tpu.memory_space<vmem>>, vector<1x1x32x32xf32>
    %87 = vector.shape_cast %86 : vector<1x1x32x32xf32> to vector<32x32xf32>
    %c0_104 = arith.constant 0 : index
    %c0_105 = arith.constant 0 : index
    %c0_106 = arith.constant 0 : index
    %88 = vector.load %arg5[%c0_104, %c0_105, %c0_106] : memref<4x32x1xf32, #tpu.memory_space<vmem>>, vector<1x32x1xf32>
    %89 = vector.shape_cast %88 : vector<1x32x1xf32> to vector<32x1xf32>
    %cst_107 = arith.constant 0.000000e+00 : f32
    %90 = vector.broadcast %cst_107 : f32 to vector<32x128xf32>
    %c0_108 = arith.constant 0 : index
    %c0_109 = arith.constant 0 : index
    %c0_110 = arith.constant 0 : index
    %91 = vector.load %arg1[%c0_108, %c0_109, %c0_110] : memref<9x128x128xf32, #tpu.memory_space<vmem>>, vector<1x128x128xf32>
    %92 = vector.shape_cast %91 : vector<1x128x128xf32> to vector<128x128xf32>
    %cst_111 = arith.constant dense<0.000000e+00> : vector<32x128xf32>
    %93 = tpu.matmul %69, %92, %cst_111 {dimension_numbers = #tpu.dot_dimension_numbers<[1], [0], [0], [1], [0, 0, 1, 1], [], []>} : vector<32x128xf32>, vector<128x128xf32>, vector<32x128xf32> -> vector<32x128xf32>
    %cst_112 = arith.constant dense<0.000000e+00> : vector<32x128xf32>
    %94 = tpu.matmul %71, %93, %cst_112 {dimension_numbers = #tpu.dot_dimension_numbers<[1], [0], [0], [1], [0, 0, 1, 1], [], []>} : vector<32x32xf32>, vector<32x128xf32>, vector<32x128xf32> -> vector<32x128xf32>
    %95 = arith.addf %90, %94 : vector<32x128xf32>
    %c1_113 = arith.constant 1 : index
    %c0_114 = arith.constant 0 : index
    %c0_115 = arith.constant 0 : index
    %96 = vector.load %arg1[%c1_113, %c0_114, %c0_115] : memref<9x128x128xf32, #tpu.memory_space<vmem>>, vector<1x128x128xf32>
    %97 = vector.shape_cast %96 : vector<1x128x128xf32> to vector<128x128xf32>
    %cst_116 = arith.constant dense<0.000000e+00> : vector<32x128xf32>
    %98 = tpu.matmul %69, %97, %cst_116 {dimension_numbers = #tpu.dot_dimension_numbers<[1], [0], [0], [1], [0, 0, 1, 1], [], []>} : vector<32x128xf32>, vector<128x128xf32>, vector<32x128xf32> -> vector<32x128xf32>
    %cst_117 = arith.constant dense<0.000000e+00> : vector<32x128xf32>
    %99 = tpu.matmul %73, %98, %cst_117 {dimension_numbers = #tpu.dot_dimension_numbers<[1], [0], [0], [1], [0, 0, 1, 1], [], []>} : vector<32x32xf32>, vector<32x128xf32>, vector<32x128xf32> -> vector<32x128xf32>
    %100 = arith.addf %95, %99 : vector<32x128xf32>
    %c2_118 = arith.constant 2 : index
    %c0_119 = arith.constant 0 : index
    %c0_120 = arith.constant 0 : index
    %101 = vector.load %arg1[%c2_118, %c0_119, %c0_120] : memref<9x128x128xf32, #tpu.memory_space<vmem>>, vector<1x128x128xf32>
    %102 = vector.shape_cast %101 : vector<1x128x128xf32> to vector<128x128xf32>
    %cst_121 = arith.constant dense<0.000000e+00> : vector<32x128xf32>
    %103 = tpu.matmul %69, %102, %cst_121 {dimension_numbers = #tpu.dot_dimension_numbers<[1], [0], [0], [1], [0, 0, 1, 1], [], []>} : vector<32x128xf32>, vector<128x128xf32>, vector<32x128xf32> -> vector<32x128xf32>
    %cst_122 = arith.constant dense<0.000000e+00> : vector<32x128xf32>
    %104 = tpu.matmul %75, %103, %cst_122 {dimension_numbers = #tpu.dot_dimension_numbers<[1], [0], [0], [1], [0, 0, 1, 1], [], []>} : vector<32x32xf32>, vector<32x128xf32>, vector<32x128xf32> -> vector<32x128xf32>
    %105 = arith.addf %100, %104 : vector<32x128xf32>
    %c3_123 = arith.constant 3 : index
    %c0_124 = arith.constant 0 : index
    %c0_125 = arith.constant 0 : index
    %106 = vector.load %arg1[%c3_123, %c0_124, %c0_125] : memref<9x128x128xf32, #tpu.memory_space<vmem>>, vector<1x128x128xf32>
    %107 = vector.shape_cast %106 : vector<1x128x128xf32> to vector<128x128xf32>
    %cst_126 = arith.constant dense<0.000000e+00> : vector<32x128xf32>
    %108 = tpu.matmul %69, %107, %cst_126 {dimension_numbers = #tpu.dot_dimension_numbers<[1], [0], [0], [1], [0, 0, 1, 1], [], []>} : vector<32x128xf32>, vector<128x128xf32>, vector<32x128xf32> -> vector<32x128xf32>
    %cst_127 = arith.constant dense<0.000000e+00> : vector<32x128xf32>
    %109 = tpu.matmul %77, %108, %cst_127 {dimension_numbers = #tpu.dot_dimension_numbers<[1], [0], [0], [1], [0, 0, 1, 1], [], []>} : vector<32x32xf32>, vector<32x128xf32>, vector<32x128xf32> -> vector<32x128xf32>
    %110 = arith.addf %105, %109 : vector<32x128xf32>
    %c4_128 = arith.constant 4 : index
    %c0_129 = arith.constant 0 : index
    %c0_130 = arith.constant 0 : index
    %111 = vector.load %arg1[%c4_128, %c0_129, %c0_130] : memref<9x128x128xf32, #tpu.memory_space<vmem>>, vector<1x128x128xf32>
    %112 = vector.shape_cast %111 : vector<1x128x128xf32> to vector<128x128xf32>
    %cst_131 = arith.constant dense<0.000000e+00> : vector<32x128xf32>
    %113 = tpu.matmul %69, %112, %cst_131 {dimension_numbers = #tpu.dot_dimension_numbers<[1], [0], [0], [1], [0, 0, 1, 1], [], []>} : vector<32x128xf32>, vector<128x128xf32>, vector<32x128xf32> -> vector<32x128xf32>
    %cst_132 = arith.constant dense<0.000000e+00> : vector<32x128xf32>
    %114 = tpu.matmul %79, %113, %cst_132 {dimension_numbers = #tpu.dot_dimension_numbers<[1], [0], [0], [1], [0, 0, 1, 1], [], []>} : vector<32x32xf32>, vector<32x128xf32>, vector<32x128xf32> -> vector<32x128xf32>
    %115 = arith.addf %110, %114 : vector<32x128xf32>
    %c5_133 = arith.constant 5 : index
    %c0_134 = arith.constant 0 : index
    %c0_135 = arith.constant 0 : index
    %116 = vector.load %arg1[%c5_133, %c0_134, %c0_135] : memref<9x128x128xf32, #tpu.memory_space<vmem>>, vector<1x128x128xf32>
    %117 = vector.shape_cast %116 : vector<1x128x128xf32> to vector<128x128xf32>
    %cst_136 = arith.constant dense<0.000000e+00> : vector<32x128xf32>
    %118 = tpu.matmul %69, %117, %cst_136 {dimension_numbers = #tpu.dot_dimension_numbers<[1], [0], [0], [1], [0, 0, 1, 1], [], []>} : vector<32x128xf32>, vector<128x128xf32>, vector<32x128xf32> -> vector<32x128xf32>
    %cst_137 = arith.constant dense<0.000000e+00> : vector<32x128xf32>
    %119 = tpu.matmul %81, %118, %cst_137 {dimension_numbers = #tpu.dot_dimension_numbers<[1], [0], [0], [1], [0, 0, 1, 1], [], []>} : vector<32x32xf32>, vector<32x128xf32>, vector<32x128xf32> -> vector<32x128xf32>
    %120 = arith.addf %115, %119 : vector<32x128xf32>
    %c6_138 = arith.constant 6 : index
    %c0_139 = arith.constant 0 : index
    %c0_140 = arith.constant 0 : index
    %121 = vector.load %arg1[%c6_138, %c0_139, %c0_140] : memref<9x128x128xf32, #tpu.memory_space<vmem>>, vector<1x128x128xf32>
    %122 = vector.shape_cast %121 : vector<1x128x128xf32> to vector<128x128xf32>
    %cst_141 = arith.constant dense<0.000000e+00> : vector<32x128xf32>
    %123 = tpu.matmul %69, %122, %cst_141 {dimension_numbers = #tpu.dot_dimension_numbers<[1], [0], [0], [1], [0, 0, 1, 1], [], []>} : vector<32x128xf32>, vector<128x128xf32>, vector<32x128xf32> -> vector<32x128xf32>
    %cst_142 = arith.constant dense<0.000000e+00> : vector<32x128xf32>
    %124 = tpu.matmul %83, %123, %cst_142 {dimension_numbers = #tpu.dot_dimension_numbers<[1], [0], [0], [1], [0, 0, 1, 1], [], []>} : vector<32x32xf32>, vector<32x128xf32>, vector<32x128xf32> -> vector<32x128xf32>
    %125 = arith.addf %120, %124 : vector<32x128xf32>
    %c7_143 = arith.constant 7 : index
    %c0_144 = arith.constant 0 : index
    %c0_145 = arith.constant 0 : index
    %126 = vector.load %arg1[%c7_143, %c0_144, %c0_145] : memref<9x128x128xf32, #tpu.memory_space<vmem>>, vector<1x128x128xf32>
    %127 = vector.shape_cast %126 : vector<1x128x128xf32> to vector<128x128xf32>
    %cst_146 = arith.constant dense<0.000000e+00> : vector<32x128xf32>
    %128 = tpu.matmul %69, %127, %cst_146 {dimension_numbers = #tpu.dot_dimension_numbers<[1], [0], [0], [1], [0, 0, 1, 1], [], []>} : vector<32x128xf32>, vector<128x128xf32>, vector<32x128xf32> -> vector<32x128xf32>
    %cst_147 = arith.constant dense<0.000000e+00> : vector<32x128xf32>
    %129 = tpu.matmul %85, %128, %cst_147 {dimension_numbers = #tpu.dot_dimension_numbers<[1], [0], [0], [1], [0, 0, 1, 1], [], []>} : vector<32x32xf32>, vector<32x128xf32>, vector<32x128xf32> -> vector<32x128xf32>
    %130 = arith.addf %125, %129 : vector<32x128xf32>
    %c8_148 = arith.constant 8 : index
    %c0_149 = arith.constant 0 : index
    %c0_150 = arith.constant 0 : index
    %131 = vector.load %arg1[%c8_148, %c0_149, %c0_150] : memref<9x128x128xf32, #tpu.memory_space<vmem>>, vector<1x128x128xf32>
    %132 = vector.shape_cast %131 : vector<1x128x128xf32> to vector<128x128xf32>
    %cst_151 = arith.constant dense<0.000000e+00> : vector<32x128xf32>
    %133 = tpu.matmul %69, %132, %cst_151 {dimension_numbers = #tpu.dot_dimension_numbers<[1], [0], [0], [1], [0, 0, 1, 1], [], []>} : vector<32x128xf32>, vector<128x128xf32>, vector<32x128xf32> -> vector<32x128xf32>
    %cst_152 = arith.constant dense<0.000000e+00> : vector<32x128xf32>
    %134 = tpu.matmul %87, %133, %cst_152 {dimension_numbers = #tpu.dot_dimension_numbers<[1], [0], [0], [1], [0, 0, 1, 1], [], []>} : vector<32x32xf32>, vector<32x128xf32>, vector<32x128xf32> -> vector<32x128xf32>
    %135 = arith.addf %130, %134 : vector<32x128xf32>
    %136 = vector.broadcast %89 : vector<32x1xf32> to vector<32x128xf32>
    %137 = arith.addf %135, %136 : vector<32x128xf32>
    %cst_153 = arith.constant 0.000000e+00 : f32
    %138 = vector.broadcast %cst_153 : f32 to vector<32x128xf32>
    %139 = arith.maximumf %137, %138 : vector<32x128xf32>
    %c1_154 = arith.constant 1 : index
    %c0_155 = arith.constant 0 : index
    %c0_156 = arith.constant 0 : index
    %c0_157 = arith.constant 0 : index
    %140 = vector.load %arg4[%c1_154, %c0_155, %c0_156, %c0_157] : memref<4x9x32x32xf32, #tpu.memory_space<vmem>>, vector<1x1x32x32xf32>
    %141 = vector.shape_cast %140 : vector<1x1x32x32xf32> to vector<32x32xf32>
    %c1_158 = arith.constant 1 : index
    %c1_159 = arith.constant 1 : index
    %c0_160 = arith.constant 0 : index
    %c0_161 = arith.constant 0 : index
    %142 = vector.load %arg4[%c1_158, %c1_159, %c0_160, %c0_161] : memref<4x9x32x32xf32, #tpu.memory_space<vmem>>, vector<1x1x32x32xf32>
    %143 = vector.shape_cast %142 : vector<1x1x32x32xf32> to vector<32x32xf32>
    %c1_162 = arith.constant 1 : index
    %c2_163 = arith.constant 2 : index
    %c0_164 = arith.constant 0 : index
    %c0_165 = arith.constant 0 : index
    %144 = vector.load %arg4[%c1_162, %c2_163, %c0_164, %c0_165] : memref<4x9x32x32xf32, #tpu.memory_space<vmem>>, vector<1x1x32x32xf32>
    %145 = vector.shape_cast %144 : vector<1x1x32x32xf32> to vector<32x32xf32>
    %c1_166 = arith.constant 1 : index
    %c3_167 = arith.constant 3 : index
    %c0_168 = arith.constant 0 : index
    %c0_169 = arith.constant 0 : index
    %146 = vector.load %arg4[%c1_166, %c3_167, %c0_168, %c0_169] : memref<4x9x32x32xf32, #tpu.memory_space<vmem>>, vector<1x1x32x32xf32>
    %147 = vector.shape_cast %146 : vector<1x1x32x32xf32> to vector<32x32xf32>
    %c1_170 = arith.constant 1 : index
    %c4_171 = arith.constant 4 : index
    %c0_172 = arith.constant 0 : index
    %c0_173 = arith.constant 0 : index
    %148 = vector.load %arg4[%c1_170, %c4_171, %c0_172, %c0_173] : memref<4x9x32x32xf32, #tpu.memory_space<vmem>>, vector<1x1x32x32xf32>
    %149 = vector.shape_cast %148 : vector<1x1x32x32xf32> to vector<32x32xf32>
    %c1_174 = arith.constant 1 : index
    %c5_175 = arith.constant 5 : index
    %c0_176 = arith.constant 0 : index
    %c0_177 = arith.constant 0 : index
    %150 = vector.load %arg4[%c1_174, %c5_175, %c0_176, %c0_177] : memref<4x9x32x32xf32, #tpu.memory_space<vmem>>, vector<1x1x32x32xf32>
    %151 = vector.shape_cast %150 : vector<1x1x32x32xf32> to vector<32x32xf32>
    %c1_178 = arith.constant 1 : index
    %c6_179 = arith.constant 6 : index
    %c0_180 = arith.constant 0 : index
    %c0_181 = arith.constant 0 : index
    %152 = vector.load %arg4[%c1_178, %c6_179, %c0_180, %c0_181] : memref<4x9x32x32xf32, #tpu.memory_space<vmem>>, vector<1x1x32x32xf32>
    %153 = vector.shape_cast %152 : vector<1x1x32x32xf32> to vector<32x32xf32>
    %c1_182 = arith.constant 1 : index
    %c7_183 = arith.constant 7 : index
    %c0_184 = arith.constant 0 : index
    %c0_185 = arith.constant 0 : index
    %154 = vector.load %arg4[%c1_182, %c7_183, %c0_184, %c0_185] : memref<4x9x32x32xf32, #tpu.memory_space<vmem>>, vector<1x1x32x32xf32>
    %155 = vector.shape_cast %154 : vector<1x1x32x32xf32> to vector<32x32xf32>
    %c1_186 = arith.constant 1 : index
    %c8_187 = arith.constant 8 : index
    %c0_188 = arith.constant 0 : index
    %c0_189 = arith.constant 0 : index
    %156 = vector.load %arg4[%c1_186, %c8_187, %c0_188, %c0_189] : memref<4x9x32x32xf32, #tpu.memory_space<vmem>>, vector<1x1x32x32xf32>
    %157 = vector.shape_cast %156 : vector<1x1x32x32xf32> to vector<32x32xf32>
    %c1_190 = arith.constant 1 : index
    %c0_191 = arith.constant 0 : index
    %c0_192 = arith.constant 0 : index
    %158 = vector.load %arg5[%c1_190, %c0_191, %c0_192] : memref<4x32x1xf32, #tpu.memory_space<vmem>>, vector<1x32x1xf32>
    %159 = vector.shape_cast %158 : vector<1x32x1xf32> to vector<32x1xf32>
    %cst_193 = arith.constant 0.000000e+00 : f32
    %160 = vector.broadcast %cst_193 : f32 to vector<32x128xf32>
    %c0_194 = arith.constant 0 : index
    %c0_195 = arith.constant 0 : index
    %c0_196 = arith.constant 0 : index
    %161 = vector.load %arg1[%c0_194, %c0_195, %c0_196] : memref<9x128x128xf32, #tpu.memory_space<vmem>>, vector<1x128x128xf32>
    %162 = vector.shape_cast %161 : vector<1x128x128xf32> to vector<128x128xf32>
    %cst_197 = arith.constant dense<0.000000e+00> : vector<32x128xf32>
    %163 = tpu.matmul %139, %162, %cst_197 {dimension_numbers = #tpu.dot_dimension_numbers<[1], [0], [0], [1], [0, 0, 1, 1], [], []>} : vector<32x128xf32>, vector<128x128xf32>, vector<32x128xf32> -> vector<32x128xf32>
    %cst_198 = arith.constant dense<0.000000e+00> : vector<32x128xf32>
    %164 = tpu.matmul %141, %163, %cst_198 {dimension_numbers = #tpu.dot_dimension_numbers<[1], [0], [0], [1], [0, 0, 1, 1], [], []>} : vector<32x32xf32>, vector<32x128xf32>, vector<32x128xf32> -> vector<32x128xf32>
    %165 = arith.addf %160, %164 : vector<32x128xf32>
    %c1_199 = arith.constant 1 : index
    %c0_200 = arith.constant 0 : index
    %c0_201 = arith.constant 0 : index
    %166 = vector.load %arg1[%c1_199, %c0_200, %c0_201] : memref<9x128x128xf32, #tpu.memory_space<vmem>>, vector<1x128x128xf32>
    %167 = vector.shape_cast %166 : vector<1x128x128xf32> to vector<128x128xf32>
    %cst_202 = arith.constant dense<0.000000e+00> : vector<32x128xf32>
    %168 = tpu.matmul %139, %167, %cst_202 {dimension_numbers = #tpu.dot_dimension_numbers<[1], [0], [0], [1], [0, 0, 1, 1], [], []>} : vector<32x128xf32>, vector<128x128xf32>, vector<32x128xf32> -> vector<32x128xf32>
    %cst_203 = arith.constant dense<0.000000e+00> : vector<32x128xf32>
    %169 = tpu.matmul %143, %168, %cst_203 {dimension_numbers = #tpu.dot_dimension_numbers<[1], [0], [0], [1], [0, 0, 1, 1], [], []>} : vector<32x32xf32>, vector<32x128xf32>, vector<32x128xf32> -> vector<32x128xf32>
    %170 = arith.addf %165, %169 : vector<32x128xf32>
    %c2_204 = arith.constant 2 : index
    %c0_205 = arith.constant 0 : index
    %c0_206 = arith.constant 0 : index
    %171 = vector.load %arg1[%c2_204, %c0_205, %c0_206] : memref<9x128x128xf32, #tpu.memory_space<vmem>>, vector<1x128x128xf32>
    %172 = vector.shape_cast %171 : vector<1x128x128xf32> to vector<128x128xf32>
    %cst_207 = arith.constant dense<0.000000e+00> : vector<32x128xf32>
    %173 = tpu.matmul %139, %172, %cst_207 {dimension_numbers = #tpu.dot_dimension_numbers<[1], [0], [0], [1], [0, 0, 1, 1], [], []>} : vector<32x128xf32>, vector<128x128xf32>, vector<32x128xf32> -> vector<32x128xf32>
    %cst_208 = arith.constant dense<0.000000e+00> : vector<32x128xf32>
    %174 = tpu.matmul %145, %173, %cst_208 {dimension_numbers = #tpu.dot_dimension_numbers<[1], [0], [0], [1], [0, 0, 1, 1], [], []>} : vector<32x32xf32>, vector<32x128xf32>, vector<32x128xf32> -> vector<32x128xf32>
    %175 = arith.addf %170, %174 : vector<32x128xf32>
    %c3_209 = arith.constant 3 : index
    %c0_210 = arith.constant 0 : index
    %c0_211 = arith.constant 0 : index
    %176 = vector.load %arg1[%c3_209, %c0_210, %c0_211] : memref<9x128x128xf32, #tpu.memory_space<vmem>>, vector<1x128x128xf32>
    %177 = vector.shape_cast %176 : vector<1x128x128xf32> to vector<128x128xf32>
    %cst_212 = arith.constant dense<0.000000e+00> : vector<32x128xf32>
    %178 = tpu.matmul %139, %177, %cst_212 {dimension_numbers = #tpu.dot_dimension_numbers<[1], [0], [0], [1], [0, 0, 1, 1], [], []>} : vector<32x128xf32>, vector<128x128xf32>, vector<32x128xf32> -> vector<32x128xf32>
    %cst_213 = arith.constant dense<0.000000e+00> : vector<32x128xf32>
    %179 = tpu.matmul %147, %178, %cst_213 {dimension_numbers = #tpu.dot_dimension_numbers<[1], [0], [0], [1], [0, 0, 1, 1], [], []>} : vector<32x32xf32>, vector<32x128xf32>, vector<32x128xf32> -> vector<32x128xf32>
    %180 = arith.addf %175, %179 : vector<32x128xf32>
    %c4_214 = arith.constant 4 : index
    %c0_215 = arith.constant 0 : index
    %c0_216 = arith.constant 0 : index
    %181 = vector.load %arg1[%c4_214, %c0_215, %c0_216] : memref<9x128x128xf32, #tpu.memory_space<vmem>>, vector<1x128x128xf32>
    %182 = vector.shape_cast %181 : vector<1x128x128xf32> to vector<128x128xf32>
    %cst_217 = arith.constant dense<0.000000e+00> : vector<32x128xf32>
    %183 = tpu.matmul %139, %182, %cst_217 {dimension_numbers = #tpu.dot_dimension_numbers<[1], [0], [0], [1], [0, 0, 1, 1], [], []>} : vector<32x128xf32>, vector<128x128xf32>, vector<32x128xf32> -> vector<32x128xf32>
    %cst_218 = arith.constant dense<0.000000e+00> : vector<32x128xf32>
    %184 = tpu.matmul %149, %183, %cst_218 {dimension_numbers = #tpu.dot_dimension_numbers<[1], [0], [0], [1], [0, 0, 1, 1], [], []>} : vector<32x32xf32>, vector<32x128xf32>, vector<32x128xf32> -> vector<32x128xf32>
    %185 = arith.addf %180, %184 : vector<32x128xf32>
    %c5_219 = arith.constant 5 : index
    %c0_220 = arith.constant 0 : index
    %c0_221 = arith.constant 0 : index
    %186 = vector.load %arg1[%c5_219, %c0_220, %c0_221] : memref<9x128x128xf32, #tpu.memory_space<vmem>>, vector<1x128x128xf32>
    %187 = vector.shape_cast %186 : vector<1x128x128xf32> to vector<128x128xf32>
    %cst_222 = arith.constant dense<0.000000e+00> : vector<32x128xf32>
    %188 = tpu.matmul %139, %187, %cst_222 {dimension_numbers = #tpu.dot_dimension_numbers<[1], [0], [0], [1], [0, 0, 1, 1], [], []>} : vector<32x128xf32>, vector<128x128xf32>, vector<32x128xf32> -> vector<32x128xf32>
    %cst_223 = arith.constant dense<0.000000e+00> : vector<32x128xf32>
    %189 = tpu.matmul %151, %188, %cst_223 {dimension_numbers = #tpu.dot_dimension_numbers<[1], [0], [0], [1], [0, 0, 1, 1], [], []>} : vector<32x32xf32>, vector<32x128xf32>, vector<32x128xf32> -> vector<32x128xf32>
    %190 = arith.addf %185, %189 : vector<32x128xf32>
    %c6_224 = arith.constant 6 : index
    %c0_225 = arith.constant 0 : index
    %c0_226 = arith.constant 0 : index
    %191 = vector.load %arg1[%c6_224, %c0_225, %c0_226] : memref<9x128x128xf32, #tpu.memory_space<vmem>>, vector<1x128x128xf32>
    %192 = vector.shape_cast %191 : vector<1x128x128xf32> to vector<128x128xf32>
    %cst_227 = arith.constant dense<0.000000e+00> : vector<32x128xf32>
    %193 = tpu.matmul %139, %192, %cst_227 {dimension_numbers = #tpu.dot_dimension_numbers<[1], [0], [0], [1], [0, 0, 1, 1], [], []>} : vector<32x128xf32>, vector<128x128xf32>, vector<32x128xf32> -> vector<32x128xf32>
    %cst_228 = arith.constant dense<0.000000e+00> : vector<32x128xf32>
    %194 = tpu.matmul %153, %193, %cst_228 {dimension_numbers = #tpu.dot_dimension_numbers<[1], [0], [0], [1], [0, 0, 1, 1], [], []>} : vector<32x32xf32>, vector<32x128xf32>, vector<32x128xf32> -> vector<32x128xf32>
    %195 = arith.addf %190, %194 : vector<32x128xf32>
    %c7_229 = arith.constant 7 : index
    %c0_230 = arith.constant 0 : index
    %c0_231 = arith.constant 0 : index
    %196 = vector.load %arg1[%c7_229, %c0_230, %c0_231] : memref<9x128x128xf32, #tpu.memory_space<vmem>>, vector<1x128x128xf32>
    %197 = vector.shape_cast %196 : vector<1x128x128xf32> to vector<128x128xf32>
    %cst_232 = arith.constant dense<0.000000e+00> : vector<32x128xf32>
    %198 = tpu.matmul %139, %197, %cst_232 {dimension_numbers = #tpu.dot_dimension_numbers<[1], [0], [0], [1], [0, 0, 1, 1], [], []>} : vector<32x128xf32>, vector<128x128xf32>, vector<32x128xf32> -> vector<32x128xf32>
    %cst_233 = arith.constant dense<0.000000e+00> : vector<32x128xf32>
    %199 = tpu.matmul %155, %198, %cst_233 {dimension_numbers = #tpu.dot_dimension_numbers<[1], [0], [0], [1], [0, 0, 1, 1], [], []>} : vector<32x32xf32>, vector<32x128xf32>, vector<32x128xf32> -> vector<32x128xf32>
    %200 = arith.addf %195, %199 : vector<32x128xf32>
    %c8_234 = arith.constant 8 : index
    %c0_235 = arith.constant 0 : index
    %c0_236 = arith.constant 0 : index
    %201 = vector.load %arg1[%c8_234, %c0_235, %c0_236] : memref<9x128x128xf32, #tpu.memory_space<vmem>>, vector<1x128x128xf32>
    %202 = vector.shape_cast %201 : vector<1x128x128xf32> to vector<128x128xf32>
    %cst_237 = arith.constant dense<0.000000e+00> : vector<32x128xf32>
    %203 = tpu.matmul %139, %202, %cst_237 {dimension_numbers = #tpu.dot_dimension_numbers<[1], [0], [0], [1], [0, 0, 1, 1], [], []>} : vector<32x128xf32>, vector<128x128xf32>, vector<32x128xf32> -> vector<32x128xf32>
    %cst_238 = arith.constant dense<0.000000e+00> : vector<32x128xf32>
    %204 = tpu.matmul %157, %203, %cst_238 {dimension_numbers = #tpu.dot_dimension_numbers<[1], [0], [0], [1], [0, 0, 1, 1], [], []>} : vector<32x32xf32>, vector<32x128xf32>, vector<32x128xf32> -> vector<32x128xf32>
    %205 = arith.addf %200, %204 : vector<32x128xf32>
    %206 = vector.broadcast %159 : vector<32x1xf32> to vector<32x128xf32>
    %207 = arith.addf %205, %206 : vector<32x128xf32>
    %208 = arith.addf %207, %69 : vector<32x128xf32>
    %cst_239 = arith.constant 0.000000e+00 : f32
    %209 = vector.broadcast %cst_239 : f32 to vector<32x128xf32>
    %210 = arith.maximumf %208, %209 : vector<32x128xf32>
    %c2_240 = arith.constant 2 : index
    %c0_241 = arith.constant 0 : index
    %c0_242 = arith.constant 0 : index
    %c0_243 = arith.constant 0 : index
    %211 = vector.load %arg4[%c2_240, %c0_241, %c0_242, %c0_243] : memref<4x9x32x32xf32, #tpu.memory_space<vmem>>, vector<1x1x32x32xf32>
    %212 = vector.shape_cast %211 : vector<1x1x32x32xf32> to vector<32x32xf32>
    %c2_244 = arith.constant 2 : index
    %c1_245 = arith.constant 1 : index
    %c0_246 = arith.constant 0 : index
    %c0_247 = arith.constant 0 : index
    %213 = vector.load %arg4[%c2_244, %c1_245, %c0_246, %c0_247] : memref<4x9x32x32xf32, #tpu.memory_space<vmem>>, vector<1x1x32x32xf32>
    %214 = vector.shape_cast %213 : vector<1x1x32x32xf32> to vector<32x32xf32>
    %c2_248 = arith.constant 2 : index
    %c2_249 = arith.constant 2 : index
    %c0_250 = arith.constant 0 : index
    %c0_251 = arith.constant 0 : index
    %215 = vector.load %arg4[%c2_248, %c2_249, %c0_250, %c0_251] : memref<4x9x32x32xf32, #tpu.memory_space<vmem>>, vector<1x1x32x32xf32>
    %216 = vector.shape_cast %215 : vector<1x1x32x32xf32> to vector<32x32xf32>
    %c2_252 = arith.constant 2 : index
    %c3_253 = arith.constant 3 : index
    %c0_254 = arith.constant 0 : index
    %c0_255 = arith.constant 0 : index
    %217 = vector.load %arg4[%c2_252, %c3_253, %c0_254, %c0_255] : memref<4x9x32x32xf32, #tpu.memory_space<vmem>>, vector<1x1x32x32xf32>
    %218 = vector.shape_cast %217 : vector<1x1x32x32xf32> to vector<32x32xf32>
    %c2_256 = arith.constant 2 : index
    %c4_257 = arith.constant 4 : index
    %c0_258 = arith.constant 0 : index
    %c0_259 = arith.constant 0 : index
    %219 = vector.load %arg4[%c2_256, %c4_257, %c0_258, %c0_259] : memref<4x9x32x32xf32, #tpu.memory_space<vmem>>, vector<1x1x32x32xf32>
    %220 = vector.shape_cast %219 : vector<1x1x32x32xf32> to vector<32x32xf32>
    %c2_260 = arith.constant 2 : index
    %c5_261 = arith.constant 5 : index
    %c0_262 = arith.constant 0 : index
    %c0_263 = arith.constant 0 : index
    %221 = vector.load %arg4[%c2_260, %c5_261, %c0_262, %c0_263] : memref<4x9x32x32xf32, #tpu.memory_space<vmem>>, vector<1x1x32x32xf32>
    %222 = vector.shape_cast %221 : vector<1x1x32x32xf32> to vector<32x32xf32>
    %c2_264 = arith.constant 2 : index
    %c6_265 = arith.constant 6 : index
    %c0_266 = arith.constant 0 : index
    %c0_267 = arith.constant 0 : index
    %223 = vector.load %arg4[%c2_264, %c6_265, %c0_266, %c0_267] : memref<4x9x32x32xf32, #tpu.memory_space<vmem>>, vector<1x1x32x32xf32>
    %224 = vector.shape_cast %223 : vector<1x1x32x32xf32> to vector<32x32xf32>
    %c2_268 = arith.constant 2 : index
    %c7_269 = arith.constant 7 : index
    %c0_270 = arith.constant 0 : index
    %c0_271 = arith.constant 0 : index
    %225 = vector.load %arg4[%c2_268, %c7_269, %c0_270, %c0_271] : memref<4x9x32x32xf32, #tpu.memory_space<vmem>>, vector<1x1x32x32xf32>
    %226 = vector.shape_cast %225 : vector<1x1x32x32xf32> to vector<32x32xf32>
    %c2_272 = arith.constant 2 : index
    %c8_273 = arith.constant 8 : index
    %c0_274 = arith.constant 0 : index
    %c0_275 = arith.constant 0 : index
    %227 = vector.load %arg4[%c2_272, %c8_273, %c0_274, %c0_275] : memref<4x9x32x32xf32, #tpu.memory_space<vmem>>, vector<1x1x32x32xf32>
    %228 = vector.shape_cast %227 : vector<1x1x32x32xf32> to vector<32x32xf32>
    %c2_276 = arith.constant 2 : index
    %c0_277 = arith.constant 0 : index
    %c0_278 = arith.constant 0 : index
    %229 = vector.load %arg5[%c2_276, %c0_277, %c0_278] : memref<4x32x1xf32, #tpu.memory_space<vmem>>, vector<1x32x1xf32>
    %230 = vector.shape_cast %229 : vector<1x32x1xf32> to vector<32x1xf32>
    %cst_279 = arith.constant 0.000000e+00 : f32
    %231 = vector.broadcast %cst_279 : f32 to vector<32x128xf32>
    %c0_280 = arith.constant 0 : index
    %c0_281 = arith.constant 0 : index
    %c0_282 = arith.constant 0 : index
    %232 = vector.load %arg1[%c0_280, %c0_281, %c0_282] : memref<9x128x128xf32, #tpu.memory_space<vmem>>, vector<1x128x128xf32>
    %233 = vector.shape_cast %232 : vector<1x128x128xf32> to vector<128x128xf32>
    %cst_283 = arith.constant dense<0.000000e+00> : vector<32x128xf32>
    %234 = tpu.matmul %210, %233, %cst_283 {dimension_numbers = #tpu.dot_dimension_numbers<[1], [0], [0], [1], [0, 0, 1, 1], [], []>} : vector<32x128xf32>, vector<128x128xf32>, vector<32x128xf32> -> vector<32x128xf32>
    %cst_284 = arith.constant dense<0.000000e+00> : vector<32x128xf32>
    %235 = tpu.matmul %212, %234, %cst_284 {dimension_numbers = #tpu.dot_dimension_numbers<[1], [0], [0], [1], [0, 0, 1, 1], [], []>} : vector<32x32xf32>, vector<32x128xf32>, vector<32x128xf32> -> vector<32x128xf32>
    %236 = arith.addf %231, %235 : vector<32x128xf32>
    %c1_285 = arith.constant 1 : index
    %c0_286 = arith.constant 0 : index
    %c0_287 = arith.constant 0 : index
    %237 = vector.load %arg1[%c1_285, %c0_286, %c0_287] : memref<9x128x128xf32, #tpu.memory_space<vmem>>, vector<1x128x128xf32>
    %238 = vector.shape_cast %237 : vector<1x128x128xf32> to vector<128x128xf32>
    %cst_288 = arith.constant dense<0.000000e+00> : vector<32x128xf32>
    %239 = tpu.matmul %210, %238, %cst_288 {dimension_numbers = #tpu.dot_dimension_numbers<[1], [0], [0], [1], [0, 0, 1, 1], [], []>} : vector<32x128xf32>, vector<128x128xf32>, vector<32x128xf32> -> vector<32x128xf32>
    %cst_289 = arith.constant dense<0.000000e+00> : vector<32x128xf32>
    %240 = tpu.matmul %214, %239, %cst_289 {dimension_numbers = #tpu.dot_dimension_numbers<[1], [0], [0], [1], [0, 0, 1, 1], [], []>} : vector<32x32xf32>, vector<32x128xf32>, vector<32x128xf32> -> vector<32x128xf32>
    %241 = arith.addf %236, %240 : vector<32x128xf32>
    %c2_290 = arith.constant 2 : index
    %c0_291 = arith.constant 0 : index
    %c0_292 = arith.constant 0 : index
    %242 = vector.load %arg1[%c2_290, %c0_291, %c0_292] : memref<9x128x128xf32, #tpu.memory_space<vmem>>, vector<1x128x128xf32>
    %243 = vector.shape_cast %242 : vector<1x128x128xf32> to vector<128x128xf32>
    %cst_293 = arith.constant dense<0.000000e+00> : vector<32x128xf32>
    %244 = tpu.matmul %210, %243, %cst_293 {dimension_numbers = #tpu.dot_dimension_numbers<[1], [0], [0], [1], [0, 0, 1, 1], [], []>} : vector<32x128xf32>, vector<128x128xf32>, vector<32x128xf32> -> vector<32x128xf32>
    %cst_294 = arith.constant dense<0.000000e+00> : vector<32x128xf32>
    %245 = tpu.matmul %216, %244, %cst_294 {dimension_numbers = #tpu.dot_dimension_numbers<[1], [0], [0], [1], [0, 0, 1, 1], [], []>} : vector<32x32xf32>, vector<32x128xf32>, vector<32x128xf32> -> vector<32x128xf32>
    %246 = arith.addf %241, %245 : vector<32x128xf32>
    %c3_295 = arith.constant 3 : index
    %c0_296 = arith.constant 0 : index
    %c0_297 = arith.constant 0 : index
    %247 = vector.load %arg1[%c3_295, %c0_296, %c0_297] : memref<9x128x128xf32, #tpu.memory_space<vmem>>, vector<1x128x128xf32>
    %248 = vector.shape_cast %247 : vector<1x128x128xf32> to vector<128x128xf32>
    %cst_298 = arith.constant dense<0.000000e+00> : vector<32x128xf32>
    %249 = tpu.matmul %210, %248, %cst_298 {dimension_numbers = #tpu.dot_dimension_numbers<[1], [0], [0], [1], [0, 0, 1, 1], [], []>} : vector<32x128xf32>, vector<128x128xf32>, vector<32x128xf32> -> vector<32x128xf32>
    %cst_299 = arith.constant dense<0.000000e+00> : vector<32x128xf32>
    %250 = tpu.matmul %218, %249, %cst_299 {dimension_numbers = #tpu.dot_dimension_numbers<[1], [0], [0], [1], [0, 0, 1, 1], [], []>} : vector<32x32xf32>, vector<32x128xf32>, vector<32x128xf32> -> vector<32x128xf32>
    %251 = arith.addf %246, %250 : vector<32x128xf32>
    %c4_300 = arith.constant 4 : index
    %c0_301 = arith.constant 0 : index
    %c0_302 = arith.constant 0 : index
    %252 = vector.load %arg1[%c4_300, %c0_301, %c0_302] : memref<9x128x128xf32, #tpu.memory_space<vmem>>, vector<1x128x128xf32>
    %253 = vector.shape_cast %252 : vector<1x128x128xf32> to vector<128x128xf32>
    %cst_303 = arith.constant dense<0.000000e+00> : vector<32x128xf32>
    %254 = tpu.matmul %210, %253, %cst_303 {dimension_numbers = #tpu.dot_dimension_numbers<[1], [0], [0], [1], [0, 0, 1, 1], [], []>} : vector<32x128xf32>, vector<128x128xf32>, vector<32x128xf32> -> vector<32x128xf32>
    %cst_304 = arith.constant dense<0.000000e+00> : vector<32x128xf32>
    %255 = tpu.matmul %220, %254, %cst_304 {dimension_numbers = #tpu.dot_dimension_numbers<[1], [0], [0], [1], [0, 0, 1, 1], [], []>} : vector<32x32xf32>, vector<32x128xf32>, vector<32x128xf32> -> vector<32x128xf32>
    %256 = arith.addf %251, %255 : vector<32x128xf32>
    %c5_305 = arith.constant 5 : index
    %c0_306 = arith.constant 0 : index
    %c0_307 = arith.constant 0 : index
    %257 = vector.load %arg1[%c5_305, %c0_306, %c0_307] : memref<9x128x128xf32, #tpu.memory_space<vmem>>, vector<1x128x128xf32>
    %258 = vector.shape_cast %257 : vector<1x128x128xf32> to vector<128x128xf32>
    %cst_308 = arith.constant dense<0.000000e+00> : vector<32x128xf32>
    %259 = tpu.matmul %210, %258, %cst_308 {dimension_numbers = #tpu.dot_dimension_numbers<[1], [0], [0], [1], [0, 0, 1, 1], [], []>} : vector<32x128xf32>, vector<128x128xf32>, vector<32x128xf32> -> vector<32x128xf32>
    %cst_309 = arith.constant dense<0.000000e+00> : vector<32x128xf32>
    %260 = tpu.matmul %222, %259, %cst_309 {dimension_numbers = #tpu.dot_dimension_numbers<[1], [0], [0], [1], [0, 0, 1, 1], [], []>} : vector<32x32xf32>, vector<32x128xf32>, vector<32x128xf32> -> vector<32x128xf32>
    %261 = arith.addf %256, %260 : vector<32x128xf32>
    %c6_310 = arith.constant 6 : index
    %c0_311 = arith.constant 0 : index
    %c0_312 = arith.constant 0 : index
    %262 = vector.load %arg1[%c6_310, %c0_311, %c0_312] : memref<9x128x128xf32, #tpu.memory_space<vmem>>, vector<1x128x128xf32>
    %263 = vector.shape_cast %262 : vector<1x128x128xf32> to vector<128x128xf32>
    %cst_313 = arith.constant dense<0.000000e+00> : vector<32x128xf32>
    %264 = tpu.matmul %210, %263, %cst_313 {dimension_numbers = #tpu.dot_dimension_numbers<[1], [0], [0], [1], [0, 0, 1, 1], [], []>} : vector<32x128xf32>, vector<128x128xf32>, vector<32x128xf32> -> vector<32x128xf32>
    %cst_314 = arith.constant dense<0.000000e+00> : vector<32x128xf32>
    %265 = tpu.matmul %224, %264, %cst_314 {dimension_numbers = #tpu.dot_dimension_numbers<[1], [0], [0], [1], [0, 0, 1, 1], [], []>} : vector<32x32xf32>, vector<32x128xf32>, vector<32x128xf32> -> vector<32x128xf32>
    %266 = arith.addf %261, %265 : vector<32x128xf32>
    %c7_315 = arith.constant 7 : index
    %c0_316 = arith.constant 0 : index
    %c0_317 = arith.constant 0 : index
    %267 = vector.load %arg1[%c7_315, %c0_316, %c0_317] : memref<9x128x128xf32, #tpu.memory_space<vmem>>, vector<1x128x128xf32>
    %268 = vector.shape_cast %267 : vector<1x128x128xf32> to vector<128x128xf32>
    %cst_318 = arith.constant dense<0.000000e+00> : vector<32x128xf32>
    %269 = tpu.matmul %210, %268, %cst_318 {dimension_numbers = #tpu.dot_dimension_numbers<[1], [0], [0], [1], [0, 0, 1, 1], [], []>} : vector<32x128xf32>, vector<128x128xf32>, vector<32x128xf32> -> vector<32x128xf32>
    %cst_319 = arith.constant dense<0.000000e+00> : vector<32x128xf32>
    %270 = tpu.matmul %226, %269, %cst_319 {dimension_numbers = #tpu.dot_dimension_numbers<[1], [0], [0], [1], [0, 0, 1, 1], [], []>} : vector<32x32xf32>, vector<32x128xf32>, vector<32x128xf32> -> vector<32x128xf32>
    %271 = arith.addf %266, %270 : vector<32x128xf32>
    %c8_320 = arith.constant 8 : index
    %c0_321 = arith.constant 0 : index
    %c0_322 = arith.constant 0 : index
    %272 = vector.load %arg1[%c8_320, %c0_321, %c0_322] : memref<9x128x128xf32, #tpu.memory_space<vmem>>, vector<1x128x128xf32>
    %273 = vector.shape_cast %272 : vector<1x128x128xf32> to vector<128x128xf32>
    %cst_323 = arith.constant dense<0.000000e+00> : vector<32x128xf32>
    %274 = tpu.matmul %210, %273, %cst_323 {dimension_numbers = #tpu.dot_dimension_numbers<[1], [0], [0], [1], [0, 0, 1, 1], [], []>} : vector<32x128xf32>, vector<128x128xf32>, vector<32x128xf32> -> vector<32x128xf32>
    %cst_324 = arith.constant dense<0.000000e+00> : vector<32x128xf32>
    %275 = tpu.matmul %228, %274, %cst_324 {dimension_numbers = #tpu.dot_dimension_numbers<[1], [0], [0], [1], [0, 0, 1, 1], [], []>} : vector<32x32xf32>, vector<32x128xf32>, vector<32x128xf32> -> vector<32x128xf32>
    %276 = arith.addf %271, %275 : vector<32x128xf32>
    %277 = vector.broadcast %230 : vector<32x1xf32> to vector<32x128xf32>
    %278 = arith.addf %276, %277 : vector<32x128xf32>
    %cst_325 = arith.constant 0.000000e+00 : f32
    %279 = vector.broadcast %cst_325 : f32 to vector<32x128xf32>
    %280 = arith.maximumf %278, %279 : vector<32x128xf32>
    %c3_326 = arith.constant 3 : index
    %c0_327 = arith.constant 0 : index
    %c0_328 = arith.constant 0 : index
    %c0_329 = arith.constant 0 : index
    %281 = vector.load %arg4[%c3_326, %c0_327, %c0_328, %c0_329] : memref<4x9x32x32xf32, #tpu.memory_space<vmem>>, vector<1x1x32x32xf32>
    %282 = vector.shape_cast %281 : vector<1x1x32x32xf32> to vector<32x32xf32>
    %c3_330 = arith.constant 3 : index
    %c1_331 = arith.constant 1 : index
    %c0_332 = arith.constant 0 : index
    %c0_333 = arith.constant 0 : index
    %283 = vector.load %arg4[%c3_330, %c1_331, %c0_332, %c0_333] : memref<4x9x32x32xf32, #tpu.memory_space<vmem>>, vector<1x1x32x32xf32>
    %284 = vector.shape_cast %283 : vector<1x1x32x32xf32> to vector<32x32xf32>
    %c3_334 = arith.constant 3 : index
    %c2_335 = arith.constant 2 : index
    %c0_336 = arith.constant 0 : index
    %c0_337 = arith.constant 0 : index
    %285 = vector.load %arg4[%c3_334, %c2_335, %c0_336, %c0_337] : memref<4x9x32x32xf32, #tpu.memory_space<vmem>>, vector<1x1x32x32xf32>
    %286 = vector.shape_cast %285 : vector<1x1x32x32xf32> to vector<32x32xf32>
    %c3_338 = arith.constant 3 : index
    %c3_339 = arith.constant 3 : index
    %c0_340 = arith.constant 0 : index
    %c0_341 = arith.constant 0 : index
    %287 = vector.load %arg4[%c3_338, %c3_339, %c0_340, %c0_341] : memref<4x9x32x32xf32, #tpu.memory_space<vmem>>, vector<1x1x32x32xf32>
    %288 = vector.shape_cast %287 : vector<1x1x32x32xf32> to vector<32x32xf32>
    %c3_342 = arith.constant 3 : index
    %c4_343 = arith.constant 4 : index
    %c0_344 = arith.constant 0 : index
    %c0_345 = arith.constant 0 : index
    %289 = vector.load %arg4[%c3_342, %c4_343, %c0_344, %c0_345] : memref<4x9x32x32xf32, #tpu.memory_space<vmem>>, vector<1x1x32x32xf32>
    %290 = vector.shape_cast %289 : vector<1x1x32x32xf32> to vector<32x32xf32>
    %c3_346 = arith.constant 3 : index
    %c5_347 = arith.constant 5 : index
    %c0_348 = arith.constant 0 : index
    %c0_349 = arith.constant 0 : index
    %291 = vector.load %arg4[%c3_346, %c5_347, %c0_348, %c0_349] : memref<4x9x32x32xf32, #tpu.memory_space<vmem>>, vector<1x1x32x32xf32>
    %292 = vector.shape_cast %291 : vector<1x1x32x32xf32> to vector<32x32xf32>
    %c3_350 = arith.constant 3 : index
    %c6_351 = arith.constant 6 : index
    %c0_352 = arith.constant 0 : index
    %c0_353 = arith.constant 0 : index
    %293 = vector.load %arg4[%c3_350, %c6_351, %c0_352, %c0_353] : memref<4x9x32x32xf32, #tpu.memory_space<vmem>>, vector<1x1x32x32xf32>
    %294 = vector.shape_cast %293 : vector<1x1x32x32xf32> to vector<32x32xf32>
    %c3_354 = arith.constant 3 : index
    %c7_355 = arith.constant 7 : index
    %c0_356 = arith.constant 0 : index
    %c0_357 = arith.constant 0 : index
    %295 = vector.load %arg4[%c3_354, %c7_355, %c0_356, %c0_357] : memref<4x9x32x32xf32, #tpu.memory_space<vmem>>, vector<1x1x32x32xf32>
    %296 = vector.shape_cast %295 : vector<1x1x32x32xf32> to vector<32x32xf32>
    %c3_358 = arith.constant 3 : index
    %c8_359 = arith.constant 8 : index
    %c0_360 = arith.constant 0 : index
    %c0_361 = arith.constant 0 : index
    %297 = vector.load %arg4[%c3_358, %c8_359, %c0_360, %c0_361] : memref<4x9x32x32xf32, #tpu.memory_space<vmem>>, vector<1x1x32x32xf32>
    %298 = vector.shape_cast %297 : vector<1x1x32x32xf32> to vector<32x32xf32>
    %c3_362 = arith.constant 3 : index
    %c0_363 = arith.constant 0 : index
    %c0_364 = arith.constant 0 : index
    %299 = vector.load %arg5[%c3_362, %c0_363, %c0_364] : memref<4x32x1xf32, #tpu.memory_space<vmem>>, vector<1x32x1xf32>
    %300 = vector.shape_cast %299 : vector<1x32x1xf32> to vector<32x1xf32>
    %cst_365 = arith.constant 0.000000e+00 : f32
    %301 = vector.broadcast %cst_365 : f32 to vector<32x128xf32>
    %c0_366 = arith.constant 0 : index
    %c0_367 = arith.constant 0 : index
    %c0_368 = arith.constant 0 : index
    %302 = vector.load %arg1[%c0_366, %c0_367, %c0_368] : memref<9x128x128xf32, #tpu.memory_space<vmem>>, vector<1x128x128xf32>
    %303 = vector.shape_cast %302 : vector<1x128x128xf32> to vector<128x128xf32>
    %cst_369 = arith.constant dense<0.000000e+00> : vector<32x128xf32>
    %304 = tpu.matmul %280, %303, %cst_369 {dimension_numbers = #tpu.dot_dimension_numbers<[1], [0], [0], [1], [0, 0, 1, 1], [], []>} : vector<32x128xf32>, vector<128x128xf32>, vector<32x128xf32> -> vector<32x128xf32>
    %cst_370 = arith.constant dense<0.000000e+00> : vector<32x128xf32>
    %305 = tpu.matmul %282, %304, %cst_370 {dimension_numbers = #tpu.dot_dimension_numbers<[1], [0], [0], [1], [0, 0, 1, 1], [], []>} : vector<32x32xf32>, vector<32x128xf32>, vector<32x128xf32> -> vector<32x128xf32>
    %306 = arith.addf %301, %305 : vector<32x128xf32>
    %c1_371 = arith.constant 1 : index
    %c0_372 = arith.constant 0 : index
    %c0_373 = arith.constant 0 : index
    %307 = vector.load %arg1[%c1_371, %c0_372, %c0_373] : memref<9x128x128xf32, #tpu.memory_space<vmem>>, vector<1x128x128xf32>
    %308 = vector.shape_cast %307 : vector<1x128x128xf32> to vector<128x128xf32>
    %cst_374 = arith.constant dense<0.000000e+00> : vector<32x128xf32>
    %309 = tpu.matmul %280, %308, %cst_374 {dimension_numbers = #tpu.dot_dimension_numbers<[1], [0], [0], [1], [0, 0, 1, 1], [], []>} : vector<32x128xf32>, vector<128x128xf32>, vector<32x128xf32> -> vector<32x128xf32>
    %cst_375 = arith.constant dense<0.000000e+00> : vector<32x128xf32>
    %310 = tpu.matmul %284, %309, %cst_375 {dimension_numbers = #tpu.dot_dimension_numbers<[1], [0], [0], [1], [0, 0, 1, 1], [], []>} : vector<32x32xf32>, vector<32x128xf32>, vector<32x128xf32> -> vector<32x128xf32>
    %311 = arith.addf %306, %310 : vector<32x128xf32>
    %c2_376 = arith.constant 2 : index
    %c0_377 = arith.constant 0 : index
    %c0_378 = arith.constant 0 : index
    %312 = vector.load %arg1[%c2_376, %c0_377, %c0_378] : memref<9x128x128xf32, #tpu.memory_space<vmem>>, vector<1x128x128xf32>
    %313 = vector.shape_cast %312 : vector<1x128x128xf32> to vector<128x128xf32>
    %cst_379 = arith.constant dense<0.000000e+00> : vector<32x128xf32>
    %314 = tpu.matmul %280, %313, %cst_379 {dimension_numbers = #tpu.dot_dimension_numbers<[1], [0], [0], [1], [0, 0, 1, 1], [], []>} : vector<32x128xf32>, vector<128x128xf32>, vector<32x128xf32> -> vector<32x128xf32>
    %cst_380 = arith.constant dense<0.000000e+00> : vector<32x128xf32>
    %315 = tpu.matmul %286, %314, %cst_380 {dimension_numbers = #tpu.dot_dimension_numbers<[1], [0], [0], [1], [0, 0, 1, 1], [], []>} : vector<32x32xf32>, vector<32x128xf32>, vector<32x128xf32> -> vector<32x128xf32>
    %316 = arith.addf %311, %315 : vector<32x128xf32>
    %c3_381 = arith.constant 3 : index
    %c0_382 = arith.constant 0 : index
    %c0_383 = arith.constant 0 : index
    %317 = vector.load %arg1[%c3_381, %c0_382, %c0_383] : memref<9x128x128xf32, #tpu.memory_space<vmem>>, vector<1x128x128xf32>
    %318 = vector.shape_cast %317 : vector<1x128x128xf32> to vector<128x128xf32>
    %cst_384 = arith.constant dense<0.000000e+00> : vector<32x128xf32>
    %319 = tpu.matmul %280, %318, %cst_384 {dimension_numbers = #tpu.dot_dimension_numbers<[1], [0], [0], [1], [0, 0, 1, 1], [], []>} : vector<32x128xf32>, vector<128x128xf32>, vector<32x128xf32> -> vector<32x128xf32>
    %cst_385 = arith.constant dense<0.000000e+00> : vector<32x128xf32>
    %320 = tpu.matmul %288, %319, %cst_385 {dimension_numbers = #tpu.dot_dimension_numbers<[1], [0], [0], [1], [0, 0, 1, 1], [], []>} : vector<32x32xf32>, vector<32x128xf32>, vector<32x128xf32> -> vector<32x128xf32>
    %321 = arith.addf %316, %320 : vector<32x128xf32>
    %c4_386 = arith.constant 4 : index
    %c0_387 = arith.constant 0 : index
    %c0_388 = arith.constant 0 : index
    %322 = vector.load %arg1[%c4_386, %c0_387, %c0_388] : memref<9x128x128xf32, #tpu.memory_space<vmem>>, vector<1x128x128xf32>
    %323 = vector.shape_cast %322 : vector<1x128x128xf32> to vector<128x128xf32>
    %cst_389 = arith.constant dense<0.000000e+00> : vector<32x128xf32>
    %324 = tpu.matmul %280, %323, %cst_389 {dimension_numbers = #tpu.dot_dimension_numbers<[1], [0], [0], [1], [0, 0, 1, 1], [], []>} : vector<32x128xf32>, vector<128x128xf32>, vector<32x128xf32> -> vector<32x128xf32>
    %cst_390 = arith.constant dense<0.000000e+00> : vector<32x128xf32>
    %325 = tpu.matmul %290, %324, %cst_390 {dimension_numbers = #tpu.dot_dimension_numbers<[1], [0], [0], [1], [0, 0, 1, 1], [], []>} : vector<32x32xf32>, vector<32x128xf32>, vector<32x128xf32> -> vector<32x128xf32>
    %326 = arith.addf %321, %325 : vector<32x128xf32>
    %c5_391 = arith.constant 5 : index
    %c0_392 = arith.constant 0 : index
    %c0_393 = arith.constant 0 : index
    %327 = vector.load %arg1[%c5_391, %c0_392, %c0_393] : memref<9x128x128xf32, #tpu.memory_space<vmem>>, vector<1x128x128xf32>
    %328 = vector.shape_cast %327 : vector<1x128x128xf32> to vector<128x128xf32>
    %cst_394 = arith.constant dense<0.000000e+00> : vector<32x128xf32>
    %329 = tpu.matmul %280, %328, %cst_394 {dimension_numbers = #tpu.dot_dimension_numbers<[1], [0], [0], [1], [0, 0, 1, 1], [], []>} : vector<32x128xf32>, vector<128x128xf32>, vector<32x128xf32> -> vector<32x128xf32>
    %cst_395 = arith.constant dense<0.000000e+00> : vector<32x128xf32>
    %330 = tpu.matmul %292, %329, %cst_395 {dimension_numbers = #tpu.dot_dimension_numbers<[1], [0], [0], [1], [0, 0, 1, 1], [], []>} : vector<32x32xf32>, vector<32x128xf32>, vector<32x128xf32> -> vector<32x128xf32>
    %331 = arith.addf %326, %330 : vector<32x128xf32>
    %c6_396 = arith.constant 6 : index
    %c0_397 = arith.constant 0 : index
    %c0_398 = arith.constant 0 : index
    %332 = vector.load %arg1[%c6_396, %c0_397, %c0_398] : memref<9x128x128xf32, #tpu.memory_space<vmem>>, vector<1x128x128xf32>
    %333 = vector.shape_cast %332 : vector<1x128x128xf32> to vector<128x128xf32>
    %cst_399 = arith.constant dense<0.000000e+00> : vector<32x128xf32>
    %334 = tpu.matmul %280, %333, %cst_399 {dimension_numbers = #tpu.dot_dimension_numbers<[1], [0], [0], [1], [0, 0, 1, 1], [], []>} : vector<32x128xf32>, vector<128x128xf32>, vector<32x128xf32> -> vector<32x128xf32>
    %cst_400 = arith.constant dense<0.000000e+00> : vector<32x128xf32>
    %335 = tpu.matmul %294, %334, %cst_400 {dimension_numbers = #tpu.dot_dimension_numbers<[1], [0], [0], [1], [0, 0, 1, 1], [], []>} : vector<32x32xf32>, vector<32x128xf32>, vector<32x128xf32> -> vector<32x128xf32>
    %336 = arith.addf %331, %335 : vector<32x128xf32>
    %c7_401 = arith.constant 7 : index
    %c0_402 = arith.constant 0 : index
    %c0_403 = arith.constant 0 : index
    %337 = vector.load %arg1[%c7_401, %c0_402, %c0_403] : memref<9x128x128xf32, #tpu.memory_space<vmem>>, vector<1x128x128xf32>
    %338 = vector.shape_cast %337 : vector<1x128x128xf32> to vector<128x128xf32>
    %cst_404 = arith.constant dense<0.000000e+00> : vector<32x128xf32>
    %339 = tpu.matmul %280, %338, %cst_404 {dimension_numbers = #tpu.dot_dimension_numbers<[1], [0], [0], [1], [0, 0, 1, 1], [], []>} : vector<32x128xf32>, vector<128x128xf32>, vector<32x128xf32> -> vector<32x128xf32>
    %cst_405 = arith.constant dense<0.000000e+00> : vector<32x128xf32>
    %340 = tpu.matmul %296, %339, %cst_405 {dimension_numbers = #tpu.dot_dimension_numbers<[1], [0], [0], [1], [0, 0, 1, 1], [], []>} : vector<32x32xf32>, vector<32x128xf32>, vector<32x128xf32> -> vector<32x128xf32>
    %341 = arith.addf %336, %340 : vector<32x128xf32>
    %c8_406 = arith.constant 8 : index
    %c0_407 = arith.constant 0 : index
    %c0_408 = arith.constant 0 : index
    %342 = vector.load %arg1[%c8_406, %c0_407, %c0_408] : memref<9x128x128xf32, #tpu.memory_space<vmem>>, vector<1x128x128xf32>
    %343 = vector.shape_cast %342 : vector<1x128x128xf32> to vector<128x128xf32>
    %cst_409 = arith.constant dense<0.000000e+00> : vector<32x128xf32>
    %344 = tpu.matmul %280, %343, %cst_409 {dimension_numbers = #tpu.dot_dimension_numbers<[1], [0], [0], [1], [0, 0, 1, 1], [], []>} : vector<32x128xf32>, vector<128x128xf32>, vector<32x128xf32> -> vector<32x128xf32>
    %cst_410 = arith.constant dense<0.000000e+00> : vector<32x128xf32>
    %345 = tpu.matmul %298, %344, %cst_410 {dimension_numbers = #tpu.dot_dimension_numbers<[1], [0], [0], [1], [0, 0, 1, 1], [], []>} : vector<32x32xf32>, vector<32x128xf32>, vector<32x128xf32> -> vector<32x128xf32>
    %346 = arith.addf %341, %345 : vector<32x128xf32>
    %347 = vector.broadcast %300 : vector<32x1xf32> to vector<32x128xf32>
    %348 = arith.addf %346, %347 : vector<32x128xf32>
    %349 = arith.addf %348, %210 : vector<32x128xf32>
    %cst_411 = arith.constant 0.000000e+00 : f32
    %350 = vector.broadcast %cst_411 : f32 to vector<32x128xf32>
    %351 = arith.maximumf %349, %350 : vector<32x128xf32>
    %c0_412 = arith.constant 0 : index
    %c0_413 = arith.constant 0 : index
    %352 = vector.load %arg6[%c0_412, %c0_413] : memref<9x32xf32, #tpu.memory_space<vmem>>, vector<9x32xf32>
    %cst_414 = arith.constant dense<0.000000e+00> : vector<9x128xf32>
    %353 = tpu.matmul %352, %351, %cst_414 {dimension_numbers = #tpu.dot_dimension_numbers<[1], [0], [0], [1], [0, 0, 1, 1], [], []>} : vector<9x32xf32>, vector<32x128xf32>, vector<9x128xf32> -> vector<9x128xf32>
    %c0_415 = arith.constant 0 : index
    %c0_416 = arith.constant 0 : index
    %354 = vector.load %arg7[%c0_415, %c0_416] : memref<9x1xf32, #tpu.memory_space<vmem>>, vector<9x1xf32>
    %355 = vector.broadcast %354 : vector<9x1xf32> to vector<9x128xf32>
    %356 = arith.addf %353, %355 : vector<9x128xf32>
    %cst_417 = arith.constant 0.000000e+00 : f32
    %357 = vector.broadcast %cst_417 : f32 to vector<9x128xf32>
    %358 = arith.maximumf %356, %357 : vector<9x128xf32>
    %c0_418 = arith.constant 0 : index
    %c0_419 = arith.constant 0 : index
    %359 = vector.load %arg9[%c0_418, %c0_419] : memref<1x10xf32, #tpu.memory_space<vmem>>, vector<1x10xf32>
    %360 = vector.extract_strided_slice %358 {offsets = [0, 0], sizes = [1, 128], strides = [1, 1]} : vector<9x128xf32> to vector<1x128xf32>
    %c0_420 = arith.constant 0 : index
    %c0_421 = arith.constant 0 : index
    %c0_422 = arith.constant 0 : index
    %361 = vector.load %arg8[%c0_420, %c0_421, %c0_422] : memref<8x128x10xf32, #tpu.memory_space<vmem>>, vector<1x128x10xf32>
    %362 = vector.shape_cast %361 : vector<1x128x10xf32> to vector<128x10xf32>
    %cst_423 = arith.constant dense<0.000000e+00> : vector<1x10xf32>
    %363 = tpu.matmul %360, %362, %cst_423 {dimension_numbers = #tpu.dot_dimension_numbers<[1], [0], [0], [1], [0, 0, 1, 1], [], []>} : vector<1x128xf32>, vector<128x10xf32>, vector<1x10xf32> -> vector<1x10xf32>
    %364 = arith.addf %359, %363 : vector<1x10xf32>
    %365 = vector.extract_strided_slice %358 {offsets = [1, 0], sizes = [1, 128], strides = [1, 1]} : vector<9x128xf32> to vector<1x128xf32>
    %c1_424 = arith.constant 1 : index
    %c0_425 = arith.constant 0 : index
    %c0_426 = arith.constant 0 : index
    %366 = vector.load %arg8[%c1_424, %c0_425, %c0_426] : memref<8x128x10xf32, #tpu.memory_space<vmem>>, vector<1x128x10xf32>
    %367 = vector.shape_cast %366 : vector<1x128x10xf32> to vector<128x10xf32>
    %cst_427 = arith.constant dense<0.000000e+00> : vector<1x10xf32>
    %368 = tpu.matmul %365, %367, %cst_427 {dimension_numbers = #tpu.dot_dimension_numbers<[1], [0], [0], [1], [0, 0, 1, 1], [], []>} : vector<1x128xf32>, vector<128x10xf32>, vector<1x10xf32> -> vector<1x10xf32>
    %369 = arith.addf %364, %368 : vector<1x10xf32>
    %370 = vector.extract_strided_slice %358 {offsets = [2, 0], sizes = [1, 128], strides = [1, 1]} : vector<9x128xf32> to vector<1x128xf32>
    %c2_428 = arith.constant 2 : index
    %c0_429 = arith.constant 0 : index
    %c0_430 = arith.constant 0 : index
    %371 = vector.load %arg8[%c2_428, %c0_429, %c0_430] : memref<8x128x10xf32, #tpu.memory_space<vmem>>, vector<1x128x10xf32>
    %372 = vector.shape_cast %371 : vector<1x128x10xf32> to vector<128x10xf32>
    %cst_431 = arith.constant dense<0.000000e+00> : vector<1x10xf32>
    %373 = tpu.matmul %370, %372, %cst_431 {dimension_numbers = #tpu.dot_dimension_numbers<[1], [0], [0], [1], [0, 0, 1, 1], [], []>} : vector<1x128xf32>, vector<128x10xf32>, vector<1x10xf32> -> vector<1x10xf32>
    %374 = arith.addf %369, %373 : vector<1x10xf32>
    %375 = vector.extract_strided_slice %358 {offsets = [3, 0], sizes = [1, 128], strides = [1, 1]} : vector<9x128xf32> to vector<1x128xf32>
    %c3_432 = arith.constant 3 : index
    %c0_433 = arith.constant 0 : index
    %c0_434 = arith.constant 0 : index
    %376 = vector.load %arg8[%c3_432, %c0_433, %c0_434] : memref<8x128x10xf32, #tpu.memory_space<vmem>>, vector<1x128x10xf32>
    %377 = vector.shape_cast %376 : vector<1x128x10xf32> to vector<128x10xf32>
    %cst_435 = arith.constant dense<0.000000e+00> : vector<1x10xf32>
    %378 = tpu.matmul %375, %377, %cst_435 {dimension_numbers = #tpu.dot_dimension_numbers<[1], [0], [0], [1], [0, 0, 1, 1], [], []>} : vector<1x128xf32>, vector<128x10xf32>, vector<1x10xf32> -> vector<1x10xf32>
    %379 = arith.addf %374, %378 : vector<1x10xf32>
    %380 = vector.extract_strided_slice %358 {offsets = [4, 0], sizes = [1, 128], strides = [1, 1]} : vector<9x128xf32> to vector<1x128xf32>
    %c4_436 = arith.constant 4 : index
    %c0_437 = arith.constant 0 : index
    %c0_438 = arith.constant 0 : index
    %381 = vector.load %arg8[%c4_436, %c0_437, %c0_438] : memref<8x128x10xf32, #tpu.memory_space<vmem>>, vector<1x128x10xf32>
    %382 = vector.shape_cast %381 : vector<1x128x10xf32> to vector<128x10xf32>
    %cst_439 = arith.constant dense<0.000000e+00> : vector<1x10xf32>
    %383 = tpu.matmul %380, %382, %cst_439 {dimension_numbers = #tpu.dot_dimension_numbers<[1], [0], [0], [1], [0, 0, 1, 1], [], []>} : vector<1x128xf32>, vector<128x10xf32>, vector<1x10xf32> -> vector<1x10xf32>
    %384 = arith.addf %379, %383 : vector<1x10xf32>
    %385 = vector.extract_strided_slice %358 {offsets = [5, 0], sizes = [1, 128], strides = [1, 1]} : vector<9x128xf32> to vector<1x128xf32>
    %c5_440 = arith.constant 5 : index
    %c0_441 = arith.constant 0 : index
    %c0_442 = arith.constant 0 : index
    %386 = vector.load %arg8[%c5_440, %c0_441, %c0_442] : memref<8x128x10xf32, #tpu.memory_space<vmem>>, vector<1x128x10xf32>
    %387 = vector.shape_cast %386 : vector<1x128x10xf32> to vector<128x10xf32>
    %cst_443 = arith.constant dense<0.000000e+00> : vector<1x10xf32>
    %388 = tpu.matmul %385, %387, %cst_443 {dimension_numbers = #tpu.dot_dimension_numbers<[1], [0], [0], [1], [0, 0, 1, 1], [], []>} : vector<1x128xf32>, vector<128x10xf32>, vector<1x10xf32> -> vector<1x10xf32>
    %389 = arith.addf %384, %388 : vector<1x10xf32>
    %390 = vector.extract_strided_slice %358 {offsets = [6, 0], sizes = [1, 128], strides = [1, 1]} : vector<9x128xf32> to vector<1x128xf32>
    %c6_444 = arith.constant 6 : index
    %c0_445 = arith.constant 0 : index
    %c0_446 = arith.constant 0 : index
    %391 = vector.load %arg8[%c6_444, %c0_445, %c0_446] : memref<8x128x10xf32, #tpu.memory_space<vmem>>, vector<1x128x10xf32>
    %392 = vector.shape_cast %391 : vector<1x128x10xf32> to vector<128x10xf32>
    %cst_447 = arith.constant dense<0.000000e+00> : vector<1x10xf32>
    %393 = tpu.matmul %390, %392, %cst_447 {dimension_numbers = #tpu.dot_dimension_numbers<[1], [0], [0], [1], [0, 0, 1, 1], [], []>} : vector<1x128xf32>, vector<128x10xf32>, vector<1x10xf32> -> vector<1x10xf32>
    %394 = arith.addf %389, %393 : vector<1x10xf32>
    %395 = vector.extract_strided_slice %358 {offsets = [7, 0], sizes = [1, 128], strides = [1, 1]} : vector<9x128xf32> to vector<1x128xf32>
    %c7_448 = arith.constant 7 : index
    %c0_449 = arith.constant 0 : index
    %c0_450 = arith.constant 0 : index
    %396 = vector.load %arg8[%c7_448, %c0_449, %c0_450] : memref<8x128x10xf32, #tpu.memory_space<vmem>>, vector<1x128x10xf32>
    %397 = vector.shape_cast %396 : vector<1x128x10xf32> to vector<128x10xf32>
    %cst_451 = arith.constant dense<0.000000e+00> : vector<1x10xf32>
    %398 = tpu.matmul %395, %397, %cst_451 {dimension_numbers = #tpu.dot_dimension_numbers<[1], [0], [0], [1], [0, 0, 1, 1], [], []>} : vector<1x128xf32>, vector<128x10xf32>, vector<1x10xf32> -> vector<1x10xf32>
    %399 = arith.addf %394, %398 : vector<1x10xf32>
    %c0_452 = arith.constant 0 : index
    %c0_453 = arith.constant 0 : index
    %400 = vector.load %arg14[%c0_452, %c0_453] : memref<1x10xf32, #tpu.memory_space<vmem>>, vector<1x10xf32>
    tpu.vector_store %arg14[%c0_452, %c0_453], %399 {strides = array<i32>} : memref<1x10xf32, #tpu.memory_space<vmem>>, vector<1x10xf32>,
    %401 = vector.extract_strided_slice %358 {offsets = [8, 0], sizes = [1, 128], strides = [1, 1]} : vector<9x128xf32> to vector<1x128xf32>
    %c0_454 = arith.constant 0 : index
    %c0_455 = arith.constant 0 : index
    %402 = vector.load %arg10[%c0_454, %c0_455] : memref<128x64xf32, #tpu.memory_space<vmem>>, vector<128x64xf32>
    %cst_456 = arith.constant dense<0.000000e+00> : vector<1x64xf32>
    %403 = tpu.matmul %401, %402, %cst_456 {dimension_numbers = #tpu.dot_dimension_numbers<[1], [0], [0], [1], [0, 0, 1, 1], [], []>} : vector<1x128xf32>, vector<128x64xf32>, vector<1x64xf32> -> vector<1x64xf32>
    %c0_457 = arith.constant 0 : index
    %c0_458 = arith.constant 0 : index
    %404 = vector.load %arg11[%c0_457, %c0_458] : memref<1x64xf32, #tpu.memory_space<vmem>>, vector<1x64xf32>
    %405 = arith.addf %403, %404 : vector<1x64xf32>
    %cst_459 = arith.constant 0.000000e+00 : f32
    %406 = vector.broadcast %cst_459 : f32 to vector<1x64xf32>
    %407 = arith.maximumf %405, %406 : vector<1x64xf32>
    %c0_460 = arith.constant 0 : index
    %c0_461 = arith.constant 0 : index
    %408 = vector.load %arg12[%c0_460, %c0_461] : memref<64x2xf32, #tpu.memory_space<vmem>>, vector<64x2xf32>
    %cst_462 = arith.constant dense<0.000000e+00> : vector<1x2xf32>
    %409 = tpu.matmul %407, %408, %cst_462 {dimension_numbers = #tpu.dot_dimension_numbers<[1], [0], [0], [1], [0, 0, 1, 1], [], []>} : vector<1x64xf32>, vector<64x2xf32>, vector<1x2xf32> -> vector<1x2xf32>
    %c0_463 = arith.constant 0 : index
    %c0_464 = arith.constant 0 : index
    %410 = vector.load %arg13[%c0_463, %c0_464] : memref<1x2xf32, #tpu.memory_space<vmem>>, vector<1x2xf32>
    %411 = arith.addf %409, %410 : vector<1x2xf32>
    %412 = math.tanh %411 : vector<1x2xf32>
    %c0_465 = arith.constant 0 : index
    %c0_466 = arith.constant 0 : index
    %413 = vector.load %arg15[%c0_465, %c0_466] : memref<1x2xf32, #tpu.memory_space<vmem>>, vector<1x2xf32>
    tpu.vector_store %arg15[%c0_465, %c0_466], %412 {strides = array<i32>} : memref<1x2xf32, #tpu.memory_space<vmem>>, vector<1x2xf32>,
    return
  }
}

</mosaic_0001>

<bundles_post_ra>
// kernel: tile.18
= control target key start
LH: loop header
LB: loop body
LE: loop exit
PB: predicated region body
PF: predicated region fallthrough
CT: control target
= control target key end

     0   :  { %s22_s0 = inlined_call_operand.vmem [shape: f32[5], index: 0, kind: input, shape index: {}]   ;;  %s23_s1 = inlined_call_operand.vmem [shape: f32[2,5], index: 1, kind: output, shape index: {}]  }
   0x1   :  { %v4_v0 = vld [vmem:[%s22_s0] ss:$0 sm:$0xff] }
   0x2   :  { %5 = vst [vmem:[%s23_s1] sm:$0x3] %v4_v0 }

// kernel: tile.19
= control target key start
LH: loop header
LB: loop body
LE: loop exit
PB: predicated region body
PF: predicated region fallthrough
CT: control target
= control target key end

     0   :  { %vm8_vm0 = vcmask 39936   ;;  %vm14_vm1 = vcmask 80936   ;;  %s42_s0 = inlined_call_operand.vmem [shape: f32[2,5], index: 0, kind: input, shape index: {}]   ;;  %s43_s1 = inlined_call_operand.vmem [shape: f32[1,10], index: 1, kind: output, shape index: {}]  }
   0x1   :  { %v5_v0 = vld [vmem:[%s42_s0] sm:$0x3]  ;;  %s25_s0 = smov 5  }
   0x2   :  { %6 = vst [vmem:[#allocation1] sm:$0x3] %v5_v0 }
   0x9   :  { %v11_v1 = vld [vmem:[#allocation1 + $0x1] sm:$0x1]   ;;  %v7_v2 = vld [vmem:[#allocation1] sm:$0x1]  }
   0xa   :  { %12 = vrot.lane.b32.xlu0 %v11_v1, %s25_s0  ;;  %9 = vst.msk [vmem:[#allocation0] sm:$0x1] %vm8_vm0, %v7_v2  }
  0x7c   :  { %v13_v3 = vpop.permute.xlu0 %12  }
  0x7d   :  { %15 = vst.msk [vmem:[#allocation0] sm:$0x1] %vm14_vm1, %v13_v3  }
  0x84   :  { %v20_v4 = vld [vmem:[#allocation0] sm:$0x1] }
  0x85   :  { %23 = vst [vmem:[%s43_s1] sm:$0x1] %v20_v4 }

// kernel: tile.23
= control target key start
LH: loop header
LB: loop body
LE: loop exit
PB: predicated region body
PF: predicated region fallthrough
CT: control target
= control target key end

     0   :  { %s22_s0 = inlined_call_operand.vmem [shape: f32[32], index: 0, kind: input, shape index: {}]   ;;  %s23_s1 = inlined_call_operand.vmem [shape: f32[2,32], index: 1, kind: output, shape index: {}]  }
   0x1   :  { %v4_v0 = vld [vmem:[%s22_s0] ss:$0 sm:$0xff] }
   0x2   :  { %5 = vst [vmem:[%s23_s1] sm:$0x3] %v4_v0 }

// kernel: tile.24
= control target key start
LH: loop header
LB: loop body
LE: loop exit
PB: predicated region body
PF: predicated region fallthrough
CT: control target
= control target key end

     0   :  { %vm8_vm0 = vcmask 261120   ;;  %vm14_vm1 = vcmask 523520   ;;  %s42_s0 = inlined_call_operand.vmem [shape: f32[2,32], index: 0, kind: input, shape index: {}]   ;;  %s43_s1 = inlined_call_operand.vmem [shape: f32[1,64], index: 1, kind: output, shape index: {}]  }
   0x1   :  { %v5_v0 = vld [vmem:[%s42_s0] sm:$0x3]  ;;  %s25_s0 = smov 32  }
   0x2   :  { %6 = vst [vmem:[#allocation1] sm:$0x3] %v5_v0 }
   0x9   :  { %v11_v1 = vld [vmem:[#allocation1 + $0x1] sm:$0x1]   ;;  %v7_v2 = vld [vmem:[#allocation1] sm:$0x1]  }
   0xa   :  { %12 = vrot.lane.b32.xlu0 %v11_v1, %s25_s0  ;;  %9 = vst.msk [vmem:[#allocation0] sm:$0x1] %vm8_vm0, %v7_v2  }
  0x7c   :  { %v13_v3 = vpop.permute.xlu0 %12  }
  0x7d   :  { %15 = vst.msk [vmem:[#allocation0] sm:$0x1] %vm14_vm1, %v13_v3  }
  0x84   :  { %v20_v4 = vld [vmem:[#allocation0] sm:$0x1] }
  0x85   :  { %23 = vst [vmem:[%s43_s1] sm:$0x1] %v20_v4 }

// kernel: pallas_forward.1
= control target key start
LH: loop header
LB: loop body
LE: loop exit
PB: predicated region body
PF: predicated region fallthrough
CT: control target
= control target key end

     0   :  { %v15032_v2 = vmov 0.0   ;;  %s19542_s0 = inlined_call_operand.vmem [shape: f32[4,128], index: 0, kind: input, shape index: {}]   ;;  %s19543_s1 = inlined_call_operand.vmem [shape: f32[9,128,128], index: 1, kind: input, shape index: {}]   ;;  %s19544_s2 = inlined_call_operand.vmem [shape: f32[9,32,4], index: 2, kind: input, shape index: {}]   ;;  %s19545_s3 = inlined_call_operand.vmem [shape: f32[32,1], index: 3, kind: input, shape index: {}]   ;;  %s19546_s4 = inlined_call_operand.vmem [shape: f32[4,9,32,32], index: 4, kind: input, shape index: {}]   ;;  %s19547_s5 = inlined_call_operand.vmem [shape: f32[4,32,1], index: 5, kind: input, shape index: {}]   ;;  %s19548_s6 = inlined_call_operand.vmem [shape: f32[9,32], index: 6, kind: input, shape index: {}]   ;;  %s19549_s7 = inlined_call_operand.vmem [shape: f32[9,1], index: 7, kind: input, shape index: {}]   ;;  %s19550_s8 = inlined_call_operand.vmem [shape: f32[8,128,10], index: 8, kind: input, shape index: {}]   ;;  %s19551_s9 = inlined_call_operand.vmem [shape: f32[1,10], index: 9, kind: input, shape index: {}]   ;;  %s19552_s10 = inlined_call_operand.vmem [shape: f32[128,64], index: 10, kind: input, shape index: {}]   ;;  %s19553_s11 = inlined_call_operand.vmem [shape: f32[1,64], index: 11, kind: input, shape index: {}]   ;;  %s19554_s12 = inlined_call_operand.vmem [shape: f32[64,2], index: 12, kind: input, shape index: {}]   ;;  %s19555_s13 = inlined_call_operand.vmem [shape: f32[1,2], index: 13, kind: input, shape index: {}]   ;;  %s19556_s14 = inlined_call_operand.vmem [shape: f32[1,10], index: 14, kind: output, shape index: {0}]   ;;  %s19557_s15 = inlined_call_operand.hbm [shape: f32[1,2], index: 15, kind: output, shape index: {1}]  }
   0x1   :  { %v114_v0 = vld [vmem:[%s19543_s1 + $0x78] sm:$0xff]  ;;  %11822 = vmatprep.subr.mxu0 %v15032_v2  ;;  %11857 = vmatprep.subr.mxu1 %v15032_v2  ;;  %v113_v3 = vld [vmem:[%s19543_s1 + $0x70] sm:$0xff]  ;;  %v112_v5 = vld [vmem:[%s19543_s1 + $0x68] sm:$0xff] }
   0x2   :  { %v9879_v1 = vld [vmem:[%s19543_s1 + $0xf8] sm:$0xff]  ;;  %v9878_v4 = vld [vmem:[%s19543_s1 + $0xf0] sm:$0xff]  ;;  %11823 = vmatpush3.msra.mxu0 %v114_v0  ;;  %v9877_v6 = vld [vmem:[%s19543_s1 + $0xe8] sm:$0xff] }
   0x3   :  { %11858 = vmatpush3.msra.mxu1 %v9879_v1  ;;  %11824 = vmatprep.subr.mxu0 %v15032_v2  ;;  %v111_v7 = vld [vmem:[%s19543_s1 + $0x60] sm:$0xff]  ;;  %v110_v9 = vld [vmem:[%s19543_s1 + $0x58] sm:$0xff]  ;;  %v109_v11 = vld [vmem:[%s19543_s1 + $0x50] sm:$0xff] }
   0x4   :  { %11859 = vmatprep.subr.mxu1 %v15032_v2  ;;  %11825 = vmatpush3.msra.mxu0 %v113_v3  ;;  %v9876_v8 = vld [vmem:[%s19543_s1 + $0xe0] sm:$0xff]  ;;  %v9875_v10 = vld [vmem:[%s19543_s1 + $0xd8] sm:$0xff]  ;;  %v9874_v12 = vld [vmem:[%s19543_s1 + $0xd0] sm:$0xff] }
   0x5   :  { %11860 = vmatpush3.msra.mxu1 %v9878_v4  ;;  %11826 = vmatprep.subr.mxu0 %v15032_v2  ;;  %v108_v13 = vld [vmem:[%s19543_s1 + $0x48] sm:$0xff] }
   0x6   :  { %11861 = vmatprep.subr.mxu1 %v15032_v2  ;;  %11827 = vmatpush3.msra.mxu0 %v112_v5  ;;  %v9873_v14 = vld [vmem:[%s19543_s1 + $0xc8] sm:$0xff] }
   0x7   :  { %11862 = vmatpush3.msra.mxu1 %v9877_v6  ;;  %11828 = vmatprep.subr.mxu0 %v15032_v2 }
   0x8   :  { %11863 = vmatprep.subr.mxu1 %v15032_v2  ;;  %11829 = vmatpush3.msra.mxu0 %v111_v7 }
   0x9   :  { %11864 = vmatpush3.msra.mxu1 %v9876_v8  ;;  %11830 = vmatprep.subr.mxu0 %v15032_v2 }
   0xa   :  { %11865 = vmatprep.subr.mxu1 %v15032_v2  ;;  %11831 = vmatpush3.msra.mxu0 %v110_v9 }
   0xb   :  { %11866 = vmatpush3.msra.mxu1 %v9875_v10  ;;  %11832 = vmatprep.subr.mxu0 %v15032_v2 }
   0xc   :  { %11867 = vmatprep.subr.mxu1 %v15032_v2 }
   0xd   :  { %21 = vsyncpa [#allocation3], 0  ;;  %11833 = vmatpush3.msra.mxu0 %v109_v11  ;;  %11868 = vmatpush3.msra.mxu1 %v9874_v12  ;;  %v107_v15 = vld [vmem:[%s19543_s1 + $0x40] sm:$0xff]  ;;  %v106_v17 = vld [vmem:[%s19543_s1 + $0x38] sm:$0xff]  ;;  %vm15033_vm0 = vmmov 0   ;;  %vm272_vm1 = vcmask 31744  }
   0xe   :  { %11834 = vmatprep.subr.mxu0 %v15032_v2  ;;  %11869 = vmatprep.subr.mxu1 %v15032_v2  ;;  %v9872_v16 = vld [vmem:[%s19543_s1 + $0xc0] sm:$0xff]  ;;  %v9871_v18 = vld [vmem:[%s19543_s1 + $0xb8] sm:$0xff]  ;;  %v105_v19 = vld [vmem:[%s19543_s1 + $0x30] sm:$0xff]  ;;  %vm285_vm2 = vcmask 1043456   ;;  %vm2057_vm3 = vcmask 261120   ;;  %vm9638_vm4 = vcmask 73728  }
   0xf   :  { %11835 = vmatpush3.msra.mxu0 %v108_v13  ;;  %11870 = vmatpush3.msra.mxu1 %v9873_v14  ;;  %v9870_v20 = vld [vmem:[%s19543_s1 + $0xb0] sm:$0xff]  ;;  %v104_v21 = vld [vmem:[%s19543_s1 + $0x28] sm:$0xff]  ;;  %v103_v23 = vld [vmem:[%s19543_s1 + $0x20] sm:$0xff]  ;;  %vm9737_vm5 = vcmask 523264   ;;  %s15035_s21 = smov [#allocation2]   ;;  %vm9812_vm6 = vcmask 8192  }
  0x10   :  { %11836 = vmatprep.subr.mxu0 %v15032_v2  ;;  %11871 = vmatprep.subr.mxu1 %v15032_v2  ;;  %v9869_v22 = vld [vmem:[%s19543_s1 + $0xa8] sm:$0xff]  ;;  %v9868_v24 = vld [vmem:[%s19543_s1 + $0xa0] sm:$0xff]  ;;  %v102_v25 = vld [vmem:[%s19543_s1 + $0x18] sm:$0xff] }
  0x11   :  { %11837 = vmatpush3.msra.mxu0 %v107_v15  ;;  %11872 = vmatpush3.msra.mxu1 %v9872_v16  ;;  %v9867_v26 = vld [vmem:[%s19543_s1 + $0x98] sm:$0xff]  ;;  %v101_v27 = vld [vmem:[%s19543_s1 + $0x10] sm:$0xff]  ;;  %v100_v29 = vld [vmem:[%s19543_s1 + $0x8] sm:$0xff] }
  0x12   :  { %11838 = vmatprep.subr.mxu0 %v15032_v2  ;;  %11873 = vmatprep.subr.mxu1 %v15032_v2  ;;  %v9866_v28 = vld [vmem:[%s19543_s1 + $0x90] sm:$0xff]  ;;  %v9865_v30 = vld [vmem:[%s19543_s1 + $0x88] sm:$0xff]  ;;  %v99_v31 = vld [vmem:[%s19543_s1] sm:$0xff] }
  0x13   :  { %11839 = vmatpush3.msra.mxu0 %v106_v17  ;;  %11874 = vmatpush3.msra.mxu1 %v9871_v18  ;;  %v9864_v32 = vld [vmem:[%s19543_s1 + $0x80] sm:$0xff]  ;;  %v9833_v38 = vld [vmem:[%s19544_s2 + $0x28] sm:$0xff]  ;;  %v9834_v40 = vld [vmem:[%s19544_s2 + $0x30] sm:$0xff] }
  0x14   :  { %11840 = vmatprep.subr.mxu0 %v15032_v2  ;;  %11875 = vmatprep.subr.mxu1 %v15032_v2  ;;  %v15247_v33 = vld [vmem:[%s19542_s0] sm:$0xf]  ;;  %v52_v39 = vld [vmem:[%s19544_s2 + $0x8] sm:$0xff]  ;;  %v9905_v42 = vld [vmem:[%s19543_s1 + $0x178] sm:$0xff] }
  0x15   :  { %11841 = vmatpush3.msra.mxu0 %v105_v19  ;;  %11876 = vmatpush3.msra.mxu1 %v9870_v20  ;;  %v9832_v34 = vld [vmem:[%s19544_s2 + $0x20] sm:$0xff]  ;;  %v53_v43 = vld [vmem:[%s19544_s2 + $0x10] sm:$0xff]  ;;  %v54_v46 = vld [vmem:[%s19544_s2 + $0x18] sm:$0xff] }
  0x16   :  { %11842 = vmatprep.subr.mxu0 %v15032_v2  ;;  %11877 = vmatprep.subr.mxu1 %v15032_v2  ;;  %v51_v35 = vld [vmem:[%s19544_s2] sm:$0xff]  ;;  %v9904_v45 = vld [vmem:[%s19543_s1 + $0x170] sm:$0xff]  ;;  %v9835_v47 = vld [vmem:[%s19544_s2 + $0x38] sm:$0xff] }
  0x17   :  { %11843 = vmatpush3.msra.mxu0 %v104_v21  ;;  %11878 = vmatpush3.msra.mxu1 %v9869_v22  ;;  %v9903_v48 = vld [vmem:[%s19543_s1 + $0x168] sm:$0xff]  ;;  %v9902_v49 = vld [vmem:[%s19543_s1 + $0x160] sm:$0xff]  ;;  %v9901_v50 = vld [vmem:[%s19543_s1 + $0x158] sm:$0xff] }
  0x18   :  { %11844 = vmatprep.subr.mxu0 %v15032_v2  ;;  %11879 = vmatprep.subr.mxu1 %v15032_v2  ;;  %v9900_v51 = vld [vmem:[%s19543_s1 + $0x150] sm:$0xff]  ;;  %v9899_v52 = vld [vmem:[%s19543_s1 + $0x148] sm:$0xff]  ;;  %v9898_v53 = vld [vmem:[%s19543_s1 + $0x140] sm:$0xff] }
  0x19   :  { %11845 = vmatpush3.msra.mxu0 %v103_v23  ;;  %11880 = vmatpush3.msra.mxu1 %v9868_v24  ;;  %v9897_v54 = vld [vmem:[%s19543_s1 + $0x138] sm:$0xff]  ;;  %v9896_v55 = vld [vmem:[%s19543_s1 + $0x130] sm:$0xff]  ;;  %v9895_v56 = vld [vmem:[%s19543_s1 + $0x128] sm:$0xff] }
  0x1a   :  { %11846 = vmatprep.subr.mxu0 %v15032_v2  ;;  %11881 = vmatprep.subr.mxu1 %v15032_v2  ;;  %v9894_v57 = vld [vmem:[%s19543_s1 + $0x120] sm:$0xff]  ;;  %v9893_v58 = vld [vmem:[%s19543_s1 + $0x118] sm:$0xff]  ;;  %v9892_v59 = vld [vmem:[%s19543_s1 + $0x110] sm:$0xff] }
  0x1b   :  { %11847 = vmatpush3.msra.mxu0 %v102_v25  ;;  %11882 = vmatpush3.msra.mxu1 %v9867_v26  ;;  %v9891_v60 = vld [vmem:[%s19543_s1 + $0x108] sm:$0xff]  ;;  %v9890_v61 = vld [vmem:[%s19543_s1 + $0x100] sm:$0xff]  ;;  %v9926_v11 = vld [vmem:[%s19543_s1 + $0x1f8] sm:$0xff] }
  0x1c   :  { %11848 = vmatprep.subr.mxu0 %v15032_v2  ;;  %11883 = vmatprep.subr.mxu1 %v15032_v2  ;;  %v9836_v62 = vld [vmem:[%s19544_s2 + $0x40] sm:$0xff]  ;;  %v9837_v10 = vld [vmem:[%s19544_s2 + $0x48] sm:$0xff]  ;;  %v9838_v12 = vld [vmem:[%s19544_s2 + $0x50] sm:$0xff] }
  0x1d   :  { %11849 = vmatpush3.msra.mxu0 %v101_v27  ;;  %11884 = vmatpush3.msra.mxu1 %v9866_v28  ;;  %v9925_v14 = vld [vmem:[%s19543_s1 + $0x1f0] sm:$0xff]  ;;  %v9839_v15 = vld [vmem:[%s19544_s2 + $0x58] sm:$0xff]  ;;  %v9924_v16 = vld [vmem:[%s19543_s1 + $0x1e8] sm:$0xff] }
  0x1e   :  { %11850 = vmatprep.subr.mxu0 %v15032_v2  ;;  %11885 = vmatprep.subr.mxu1 %v15032_v2  ;;  %v9923_v17 = vld [vmem:[%s19543_s1 + $0x1e0] sm:$0xff]  ;;  %v9922_v18 = vld [vmem:[%s19543_s1 + $0x1d8] sm:$0xff]  ;;  %v9921_v19 = vld [vmem:[%s19543_s1 + $0x1d0] sm:$0xff] }
  0x1f   :  { %11851 = vmatpush3.msra.mxu0 %v100_v29  ;;  %11886 = vmatpush3.msra.mxu1 %v9865_v30  ;;  %v9920_v20 = vld [vmem:[%s19543_s1 + $0x1c8] sm:$0xff]  ;;  %v9919_v21 = vld [vmem:[%s19543_s1 + $0x1c0] sm:$0xff]  ;;  %v9918_v22 = vld [vmem:[%s19543_s1 + $0x1b8] sm:$0xff] }
  0x20   :  { %11852 = vmatprep.subr.mxu0 %v15032_v2  ;;  %11887 = vmatprep.subr.mxu1 %v15032_v2  ;;  %v9917_v23 = vld [vmem:[%s19543_s1 + $0x1b0] sm:$0xff]  ;;  %v9916_v24 = vld [vmem:[%s19543_s1 + $0x1a8] sm:$0xff]  ;;  %v9915_v25 = vld [vmem:[%s19543_s1 + $0x1a0] sm:$0xff] }
  0x21   :  { %11853 = vmatpush3.msra.mxu0 %v99_v31  ;;  %11854 = vmatprep.mubr.msk.f32.mxu0 %vm15033_vm0, %v15032_v2  ;;  %v9914_v26 = vld [vmem:[%s19543_s1 + $0x198] sm:$0xff]  ;;  %v9913_v27 = vld [vmem:[%s19543_s1 + $0x190] sm:$0xff]  ;;  %v9912_v28 = vld [vmem:[%s19543_s1 + $0x188] sm:$0xff] }
  0x22   :  { %11888 = vmatpush3.msra.mxu1 %v9864_v32  ;;  %11889 = vmatprep.mubr.msk.f32.mxu1 %vm15033_vm0, %v15032_v2  ;;  %v9911_v29 = vld [vmem:[%s19543_s1 + $0x180] sm:$0xff] }
  0x23   :  { %11855 = vmatmul.mubr.f32.vlgmr.msra.gmra.mxu0 %v15247_v33  ;;  %11890 = vmatmul.mubr.f32.vlgmr.msra.gmra.mxu1 %v15247_v33  ;;  %v9840_v30 = vld [vmem:[%s19544_s2 + $0x60] sm:$0xff] }
  0x24   :  { %11894 = vmatprep.mubr.msk.f32.mxu0 %vm272_vm1, %v9832_v34  ;;  %11902 = vmatprep.mubr.msk.f32.mxu1 %vm272_vm1, %v51_v35 }
  0xe3   :  { %v181_v36 = vpop.f32.mrf.mxu0  ;;  %v268_v37 = vpop.f32.mrf.mxu1 }
  0xe4   :  { %11892 = vmatprep.subr.msk.mxu0 %vm285_vm2, %v268_v37  ;;  %11900 = vmatprep.subr.msk.mxu1 %vm285_vm2, %v181_v36 }
  0xe5   :  { %v11891_v41 = vpop.f32.mrf.mxu1  ;;  %11893 = vmatpush3.msk.msra.mxu0 %vm285_vm2, %v268_v37  ;;  %11901 = vmatpush3.msk.msra.mxu1 %vm285_vm2, %v181_v36  ;;  %v11856_v44 = vpop.f32.mrf.mxu0 }
  0xe6   :  { %11895 = vmatmul.mubr.msk.f32.vlgmr.msra.gmra.mxu0 %vm272_vm1, %v9833_v38  ;;  %11903 = vmatmul.mubr.msk.f32.vlgmr.msra.gmra.mxu1 %vm272_vm1, %v52_v39  ;;  %v9947_v41 = vld [vmem:[%s19543_s1 + $0x278] sm:$0xff]  ;;  %v9946_v44 = vld [vmem:[%s19543_s1 + $0x270] sm:$0xff] }
  0xe7   :  { %11908 = vmatprep.subr.mxu0 %v15032_v2  ;;  %11897 = vmatprep.mubr.msk.f32.mxu0 %vm272_vm1, %v9834_v40  ;;  %v9841_v40 = vld [vmem:[%s19544_s2 + $0x68] sm:$0xff] }
  0xe8   :  { %11909 = vmatpush3.msra.mxu0 %v9905_v42  ;;  %11905 = vmatprep.mubr.msk.f32.mxu1 %vm272_vm1, %v53_v43  ;;  %v9842_v42 = vld [vmem:[%s19544_s2 + $0x70] sm:$0xff] }
  0xe9   :  { %11910 = vmatprep.subr.mxu0 %v15032_v2 }
  0xea   :  { %11911 = vmatpush3.msra.mxu0 %v9904_v45  ;;  %11906 = vmatmul.mubr.msk.f32.gmra.mxu1 %vm272_vm1, %v54_v46  ;;  %v9843_v45 = vld [vmem:[%s19544_s2 + $0x78] sm:$0xff]  ;;  %v9945_v46 = vld [vmem:[%s19543_s1 + $0x268] sm:$0xff] }
  0xeb   :  { %11912 = vmatprep.subr.mxu0 %v15032_v2  ;;  %11898 = vmatmul.mubr.msk.f32.gmra.mxu0 %vm272_vm1, %v9835_v47  ;;  %v9944_v47 = vld [vmem:[%s19543_s1 + $0x260] sm:$0xff] }
  0xec   :  { %11913 = vmatpush3.msra.mxu0 %v9903_v48  ;;  %11940 = vmatprep.mubr.msk.f32.mxu0 %vm15033_vm0, %v15032_v2  ;;  %v9943_v48 = vld [vmem:[%s19543_s1 + $0x258] sm:$0xff] }
  0xed   :  { %11914 = vmatprep.subr.mxu0 %v15032_v2  ;;  %11945 = vmatprep.mubr.msk.f32.mxu1 %vm272_vm1, %v9836_v62 }
  0xee   :  { %11915 = vmatpush3.msra.mxu0 %v9902_v49  ;;  %v9942_v49 = vld [vmem:[%s19543_s1 + $0x250] sm:$0xff] }
  0xef   :  { %11916 = vmatprep.subr.mxu0 %v15032_v2 }
  0xf0   :  { %11917 = vmatpush3.msra.mxu0 %v9901_v50  ;;  %v9941_v50 = vld [vmem:[%s19543_s1 + $0x248] sm:$0xff] }
  0xf1   :  { %11918 = vmatprep.subr.mxu0 %v15032_v2 }
  0xf2   :  { %11919 = vmatpush3.msra.mxu0 %v9900_v51  ;;  %v9940_v51 = vld [vmem:[%s19543_s1 + $0x240] sm:$0xff] }
  0xf3   :  { %11920 = vmatprep.subr.mxu0 %v15032_v2 }
  0xf4   :  { %11921 = vmatpush3.msra.mxu0 %v9899_v52  ;;  %v9939_v52 = vld [vmem:[%s19543_s1 + $0x238] sm:$0xff] }
  0xf5   :  { %11922 = vmatprep.subr.mxu0 %v15032_v2 }
  0xf6   :  { %11923 = vmatpush3.msra.mxu0 %v9898_v53  ;;  %v9938_v53 = vld [vmem:[%s19543_s1 + $0x230] sm:$0xff] }
  0xf7   :  { %11924 = vmatprep.subr.mxu0 %v15032_v2 }
  0xf8   :  { %11925 = vmatpush3.msra.mxu0 %v9897_v54  ;;  %v9937_v54 = vld [vmem:[%s19543_s1 + $0x228] sm:$0xff] }
  0xf9   :  { %11926 = vmatprep.subr.mxu0 %v15032_v2 }
  0xfa   :  { %11927 = vmatpush3.msra.mxu0 %v9896_v55  ;;  %v9936_v55 = vld [vmem:[%s19543_s1 + $0x220] sm:$0xff] }
  0xfb   :  { %11928 = vmatprep.subr.mxu0 %v15032_v2 }
  0xfc   :  { %11929 = vmatpush3.msra.mxu0 %v9895_v56  ;;  %v9935_v56 = vld [vmem:[%s19543_s1 + $0x218] sm:$0xff] }
  0xfd   :  { %11930 = vmatprep.subr.mxu0 %v15032_v2 }
  0xfe   :  { %11931 = vmatpush3.msra.mxu0 %v9894_v57  ;;  %v9934_v57 = vld [vmem:[%s19543_s1 + $0x210] sm:$0xff] }
  0xff   :  { %11932 = vmatprep.subr.mxu0 %v15032_v2 }
 0x100   :  { %11933 = vmatpush3.msra.mxu0 %v9893_v58  ;;  %v9933_v58 = vld [vmem:[%s19543_s1 + $0x208] sm:$0xff] }
 0x101   :  { %11934 = vmatprep.subr.mxu0 %v15032_v2 }
 0x102   :  { %11935 = vmatpush3.msra.mxu0 %v9892_v59  ;;  %v9932_v59 = vld [vmem:[%s19543_s1 + $0x200] sm:$0xff] }
 0x103   :  { %11936 = vmatprep.subr.mxu0 %v15032_v2 }
 0x104   :  { %11937 = vmatpush3.msra.mxu0 %v9891_v60  ;;  %v9844_v60 = vld [vmem:[%s19544_s2 + $0x80] sm:$0xff] }
 0x105   :  { %11938 = vmatprep.subr.mxu0 %v15032_v2 }
 0x106   :  { %11939 = vmatpush3.msra.mxu0 %v9890_v61 }
 0x107   :  { %11941 = vmatmul.mubr.f32.vlgmr.msra.gmra.mxu0 %v15247_v33 }
 0x108   :  { %11988 = vmatprep.mubr.msk.f32.mxu0 %vm272_vm1, %v9840_v30 }
 0x1a6   :  { %v11896_v63 = vpop.f32.mrf.mxu0  ;;  %v11904_v0 = vpop.f32.mrf.mxu1 }
 0x1a7   :  { %v15362_v1 = vadd.f32 %v11904_v0, %v11896_v63 }
 0x1a8   :  { %v15364_v3 = vpop.f32.mrf.mxu0  ;;  %v15366_v4 = vpop.f32.mrf.mxu1 }
 0x1aa   :  { %v11907_v6 = vpop.f32.mrf.mxu1 }
 0x1ab   :  { %v11899_v5 = vpop.f32.mrf.mxu0 }
 0x1ac   :  { %v15368_v7 = vadd.f32 %v11907_v6, %v11899_v5  ;;  %v15457_v31 = vpop.f32.mrf.mxu1 }
 0x1ad   :  { %v15370_v8 = vpop.f32.mrf.mxu0 }
 0x1c7   :  { %v557_v9 = vpop.f32.mrf.mxu0 }
 0x1c8   :  { %11943 = vmatprep.subr.msk.mxu1 %vm285_vm2, %v557_v9 }
 0x1c9   :  { %v11942_v13 = vpop.f32.mrf.mxu0  ;;  %11944 = vmatpush3.msk.msra.mxu1 %vm285_vm2, %v557_v9  ;;  %v9968_v9 = vld [vmem:[%s19543_s1 + $0x2f8] sm:$0xff] }
 0x1ca   :  { %11946 = vmatmul.mubr.msk.f32.vlgmr.msra.gmra.mxu1 %vm272_vm1, %v9837_v10  ;;  %11951 = vmatprep.subr.mxu1 %v15032_v2  ;;  %v9846_v10 = vld [vmem:[%s19544_s2 + $0x90] sm:$0xff]  ;;  %v9847_v13 = vld [vmem:[%s19544_s2 + $0x98] sm:$0xff] }
 0x1cb   :  { %11952 = vmatpush3.msra.mxu1 %v9926_v11  ;;  %11948 = vmatprep.mubr.msk.f32.mxu1 %vm272_vm1, %v9838_v12  ;;  %v9967_v12 = vld [vmem:[%s19543_s1 + $0x2f0] sm:$0xff] }
 0x1cc   :  { %11953 = vmatprep.subr.mxu1 %v15032_v2 }
 0x1cd   :  { %11954 = vmatpush3.msra.mxu1 %v9925_v14  ;;  %v9966_v14 = vld [vmem:[%s19543_s1 + $0x2e8] sm:$0xff] }
 0x1ce   :  { %11949 = vmatmul.mubr.msk.f32.gmra.mxu1 %vm272_vm1, %v9839_v15  ;;  %11955 = vmatprep.subr.mxu1 %v15032_v2  ;;  %v9965_v15 = vld [vmem:[%s19543_s1 + $0x2e0] sm:$0xff] }
 0x1cf   :  { %11956 = vmatpush3.msra.mxu1 %v9924_v16  ;;  %11983 = vmatprep.mubr.msk.f32.mxu1 %vm15033_vm0, %v15032_v2  ;;  %v9964_v16 = vld [vmem:[%s19543_s1 + $0x2d8] sm:$0xff] }
 0x1d0   :  { %11957 = vmatprep.subr.mxu1 %v15032_v2 }
 0x1d1   :  { %11958 = vmatpush3.msra.mxu1 %v9923_v17  ;;  %v9963_v17 = vld [vmem:[%s19543_s1 + $0x2d0] sm:$0xff] }
 0x1d2   :  { %11959 = vmatprep.subr.mxu1 %v15032_v2 }
 0x1d3   :  { %11960 = vmatpush3.msra.mxu1 %v9922_v18  ;;  %v9962_v18 = vld [vmem:[%s19543_s1 + $0x2c8] sm:$0xff] }
 0x1d4   :  { %11961 = vmatprep.subr.mxu1 %v15032_v2 }
 0x1d5   :  { %11962 = vmatpush3.msra.mxu1 %v9921_v19  ;;  %v9961_v19 = vld [vmem:[%s19543_s1 + $0x2c0] sm:$0xff] }
 0x1d6   :  { %11963 = vmatprep.subr.mxu1 %v15032_v2 }
 0x1d7   :  { %11964 = vmatpush3.msra.mxu1 %v9920_v20  ;;  %v9960_v20 = vld [vmem:[%s19543_s1 + $0x2b8] sm:$0xff] }
 0x1d8   :  { %11965 = vmatprep.subr.mxu1 %v15032_v2 }
 0x1d9   :  { %11966 = vmatpush3.msra.mxu1 %v9919_v21  ;;  %v9959_v21 = vld [vmem:[%s19543_s1 + $0x2b0] sm:$0xff] }
 0x1da   :  { %11967 = vmatprep.subr.mxu1 %v15032_v2 }
 0x1db   :  { %11968 = vmatpush3.msra.mxu1 %v9918_v22  ;;  %v9958_v22 = vld [vmem:[%s19543_s1 + $0x2a8] sm:$0xff] }
 0x1dc   :  { %11969 = vmatprep.subr.mxu1 %v15032_v2 }
 0x1dd   :  { %11970 = vmatpush3.msra.mxu1 %v9917_v23  ;;  %v9957_v23 = vld [vmem:[%s19543_s1 + $0x2a0] sm:$0xff] }
 0x1de   :  { %11971 = vmatprep.subr.mxu1 %v15032_v2 }
 0x1df   :  { %11972 = vmatpush3.msra.mxu1 %v9916_v24  ;;  %v9956_v24 = vld [vmem:[%s19543_s1 + $0x298] sm:$0xff] }
 0x1e0   :  { %11973 = vmatprep.subr.mxu1 %v15032_v2 }
 0x1e1   :  { %11974 = vmatpush3.msra.mxu1 %v9915_v25  ;;  %v9955_v25 = vld [vmem:[%s19543_s1 + $0x290] sm:$0xff] }
 0x1e2   :  { %11975 = vmatprep.subr.mxu1 %v15032_v2 }
 0x1e3   :  { %11976 = vmatpush3.msra.mxu1 %v9914_v26  ;;  %v9954_v26 = vld [vmem:[%s19543_s1 + $0x288] sm:$0xff] }
 0x1e4   :  { %11977 = vmatprep.subr.mxu1 %v15032_v2 }
 0x1e5   :  { %11978 = vmatpush3.msra.mxu1 %v9913_v27  ;;  %v9953_v27 = vld [vmem:[%s19543_s1 + $0x280] sm:$0xff] }
 0x1e6   :  { %11979 = vmatprep.subr.mxu1 %v15032_v2 }
 0x1e7   :  { %11980 = vmatpush3.msra.mxu1 %v9912_v28  ;;  %v9848_v28 = vld [vmem:[%s19544_s2 + $0xa0] sm:$0xff] }
 0x1e8   :  { %11981 = vmatprep.subr.mxu1 %v15032_v2 }
 0x1e9   :  { %11982 = vmatpush3.msra.mxu1 %v9911_v29 }
 0x1ea   :  { %11984 = vmatmul.mubr.f32.vlgmr.msra.gmra.mxu1 %v15247_v33 }
 0x1eb   :  { %12031 = vmatprep.mubr.msk.f32.mxu1 %vm272_vm1, %v9844_v60  ;;  %v9852_v60 = vld [vmem:[%s19544_s2 + $0xc0] sm:$0xff] }
 0x28a   :  { %v11947_v32 = vpop.f32.mrf.mxu1 }
 0x28b   :  { %v15460_v34 = vadd.f32 %v11947_v32, %v15362_v1 }
 0x28c   :  { %v15462_v35 = vpop.f32.mrf.mxu1 }
 0x28e   :  { %v11950_v36 = vpop.f32.mrf.mxu1 }
 0x28f   :  { %v15465_v37 = vadd.f32 %v11950_v36, %v15368_v7  ;;  %v9845_v7 = vld [vmem:[%s19544_s2 + $0x88] sm:$0xff] }
 0x290   :  { %v15467_v38 = vpop.f32.mrf.mxu1 }
 0x2aa   :  { %v748_v39 = vpop.f32.mrf.mxu1 }
 0x2ab   :  { %11986 = vmatprep.subr.msk.mxu0 %vm285_vm2, %v748_v39 }
 0x2ac   :  { %11987 = vmatpush3.msk.msra.mxu0 %vm285_vm2, %v748_v39  ;;  %v11985_v43 = vpop.f32.mrf.mxu1 }
 0x2ad   :  { %11989 = vmatmul.mubr.msk.f32.vlgmr.msra.gmra.mxu0 %vm272_vm1, %v9841_v40  ;;  %11994 = vmatprep.subr.mxu0 %v15032_v2  ;;  %v9849_v40 = vld [vmem:[%s19544_s2 + $0xa8] sm:$0xff] }
 0x2ae   :  { %11995 = vmatpush3.msra.mxu0 %v9947_v41  ;;  %11991 = vmatprep.mubr.msk.f32.mxu0 %vm272_vm1, %v9842_v42  ;;  %v9989_v41 = vld [vmem:[%s19543_s1 + $0x378] sm:$0xff]  ;;  %v9850_v42 = vld [vmem:[%s19544_s2 + $0xb0] sm:$0xff] }
 0x2af   :  { %11996 = vmatprep.subr.mxu0 %v15032_v2 }
 0x2b0   :  { %11997 = vmatpush3.msra.mxu0 %v9946_v44  ;;  %v9988_v44 = vld [vmem:[%s19543_s1 + $0x370] sm:$0xff] }
 0x2b1   :  { %11992 = vmatmul.mubr.msk.f32.gmra.mxu0 %vm272_vm1, %v9843_v45  ;;  %11998 = vmatprep.subr.mxu0 %v15032_v2  ;;  %v9851_v45 = vld [vmem:[%s19544_s2 + $0xb8] sm:$0xff] }
 0x2b2   :  { %11999 = vmatpush3.msra.mxu0 %v9945_v46  ;;  %12026 = vmatprep.mubr.msk.f32.mxu0 %vm15033_vm0, %v15032_v2  ;;  %v9987_v46 = vld [vmem:[%s19543_s1 + $0x368] sm:$0xff] }
 0x2b3   :  { %12000 = vmatprep.subr.mxu0 %v15032_v2 }
 0x2b4   :  { %12001 = vmatpush3.msra.mxu0 %v9944_v47  ;;  %v9986_v47 = vld [vmem:[%s19543_s1 + $0x360] sm:$0xff] }
 0x2b5   :  { %12002 = vmatprep.subr.mxu0 %v15032_v2 }
 0x2b6   :  { %12003 = vmatpush3.msra.mxu0 %v9943_v48  ;;  %v9985_v48 = vld [vmem:[%s19543_s1 + $0x358] sm:$0xff] }
 0x2b7   :  { %12004 = vmatprep.subr.mxu0 %v15032_v2 }
 0x2b8   :  { %12005 = vmatpush3.msra.mxu0 %v9942_v49  ;;  %v9984_v49 = vld [vmem:[%s19543_s1 + $0x350] sm:$0xff] }
 0x2b9   :  { %12006 = vmatprep.subr.mxu0 %v15032_v2 }
 0x2ba   :  { %12007 = vmatpush3.msra.mxu0 %v9941_v50  ;;  %v9983_v50 = vld [vmem:[%s19543_s1 + $0x348] sm:$0xff] }
 0x2bb   :  { %12008 = vmatprep.subr.mxu0 %v15032_v2 }
 0x2bc   :  { %12009 = vmatpush3.msra.mxu0 %v9940_v51  ;;  %v9982_v51 = vld [vmem:[%s19543_s1 + $0x340] sm:$0xff] }
 0x2bd   :  { %12010 = vmatprep.subr.mxu0 %v15032_v2 }
 0x2be   :  { %12011 = vmatpush3.msra.mxu0 %v9939_v52  ;;  %v9981_v52 = vld [vmem:[%s19543_s1 + $0x338] sm:$0xff] }
 0x2bf   :  { %12012 = vmatprep.subr.mxu0 %v15032_v2 }
 0x2c0   :  { %12013 = vmatpush3.msra.mxu0 %v9938_v53  ;;  %v9980_v53 = vld [vmem:[%s19543_s1 + $0x330] sm:$0xff] }
 0x2c1   :  { %12014 = vmatprep.subr.mxu0 %v15032_v2 }
 0x2c2   :  { %12015 = vmatpush3.msra.mxu0 %v9937_v54  ;;  %v9979_v54 = vld [vmem:[%s19543_s1 + $0x328] sm:$0xff] }
 0x2c3   :  { %12016 = vmatprep.subr.mxu0 %v15032_v2 }
 0x2c4   :  { %12017 = vmatpush3.msra.mxu0 %v9936_v55  ;;  %v9978_v55 = vld [vmem:[%s19543_s1 + $0x320] sm:$0xff] }
 0x2c5   :  { %12018 = vmatprep.subr.mxu0 %v15032_v2 }
 0x2c6   :  { %12019 = vmatpush3.msra.mxu0 %v9935_v56  ;;  %v9977_v56 = vld [vmem:[%s19543_s1 + $0x318] sm:$0xff] }
 0x2c7   :  { %12020 = vmatprep.subr.mxu0 %v15032_v2 }
 0x2c8   :  { %12021 = vmatpush3.msra.mxu0 %v9934_v57  ;;  %v9976_v57 = vld [vmem:[%s19543_s1 + $0x310] sm:$0xff] }
 0x2c9   :  { %12022 = vmatprep.subr.mxu0 %v15032_v2 }
 0x2ca   :  { %12023 = vmatpush3.msra.mxu0 %v9933_v58  ;;  %v9975_v58 = vld [vmem:[%s19543_s1 + $0x308] sm:$0xff] }
 0x2cb   :  { %12024 = vmatprep.subr.mxu0 %v15032_v2 }
 0x2cc   :  { %12025 = vmatpush3.msra.mxu0 %v9932_v59  ;;  %v9974_v59 = vld [vmem:[%s19543_s1 + $0x300] sm:$0xff] }
 0x2cd   :  { %12027 = vmatmul.mubr.f32.vlgmr.msra.gmra.mxu0 %v15247_v33 }
 0x2ce   :  { %12074 = vmatprep.mubr.msk.f32.mxu0 %vm272_vm1, %v9848_v28  ;;  %v9996_v28 = vld [vmem:[%s19543_s1 + $0x388] sm:$0xff] }
 0x36d   :  { %v11990_v61 = vpop.f32.mrf.mxu0 }
 0x36e   :  { %v15555_v62 = vadd.f32 %v11990_v61, %v15460_v34 }
 0x36f   :  { %v15557_v63 = vpop.f32.mrf.mxu0 }
 0x371   :  { %v11993_v0 = vpop.f32.mrf.mxu0 }
 0x372   :  { %v15560_v1 = vadd.f32 %v11993_v0, %v15465_v37 }
 0x373   :  { %v15562_v5 = vpop.f32.mrf.mxu0 }
 0x38d   :  { %v939_v6 = vpop.f32.mrf.mxu0 }
 0x38e   :  { %12029 = vmatprep.subr.msk.mxu1 %vm285_vm2, %v939_v6 }
 0x38f   :  { %12030 = vmatpush3.msk.msra.mxu1 %vm285_vm2, %v939_v6  ;;  %v12028_v11 = vpop.f32.mrf.mxu0 }
 0x390   :  { %12032 = vmatmul.mubr.msk.f32.vlgmr.msra.gmra.mxu1 %vm272_vm1, %v9845_v7  ;;  %12037 = vmatprep.subr.mxu1 %v15032_v2  ;;  %v10010_v11 = vld [vmem:[%s19543_s1 + $0x3f8] sm:$0xff] }
 0x391   :  { %12038 = vmatpush3.msra.mxu1 %v9968_v9  ;;  %12034 = vmatprep.mubr.msk.f32.mxu1 %vm272_vm1, %v9846_v10  ;;  %v9853_v10 = vld [vmem:[%s19544_s2 + $0xc8] sm:$0xff] }
 0x392   :  { %12039 = vmatprep.subr.mxu1 %v15032_v2 }
 0x393   :  { %12040 = vmatpush3.msra.mxu1 %v9967_v12  ;;  %v9854_v12 = vld [vmem:[%s19544_s2 + $0xd0] sm:$0xff] }
 0x394   :  { %12035 = vmatmul.mubr.msk.f32.gmra.mxu1 %vm272_vm1, %v9847_v13  ;;  %12041 = vmatprep.subr.mxu1 %v15032_v2 }
 0x395   :  { %12042 = vmatpush3.msra.mxu1 %v9966_v14  ;;  %12069 = vmatprep.mubr.msk.f32.mxu1 %vm15033_vm0, %v15032_v2  ;;  %v10009_v14 = vld [vmem:[%s19543_s1 + $0x3f0] sm:$0xff] }
 0x396   :  { %12043 = vmatprep.subr.mxu1 %v15032_v2 }
 0x397   :  { %12044 = vmatpush3.msra.mxu1 %v9965_v15  ;;  %v9855_v15 = vld [vmem:[%s19544_s2 + $0xd8] sm:$0xff] }
 0x398   :  { %12045 = vmatprep.subr.mxu1 %v15032_v2 }
 0x399   :  { %12046 = vmatpush3.msra.mxu1 %v9964_v16  ;;  %v10008_v16 = vld [vmem:[%s19543_s1 + $0x3e8] sm:$0xff] }
 0x39a   :  { %12047 = vmatprep.subr.mxu1 %v15032_v2 }
 0x39b   :  { %12048 = vmatpush3.msra.mxu1 %v9963_v17  ;;  %v10007_v17 = vld [vmem:[%s19543_s1 + $0x3e0] sm:$0xff] }
 0x39c   :  { %12049 = vmatprep.subr.mxu1 %v15032_v2 }
 0x39d   :  { %12050 = vmatpush3.msra.mxu1 %v9962_v18  ;;  %v10006_v18 = vld [vmem:[%s19543_s1 + $0x3d8] sm:$0xff] }
 0x39e   :  { %12051 = vmatprep.subr.mxu1 %v15032_v2 }
 0x39f   :  { %12052 = vmatpush3.msra.mxu1 %v9961_v19  ;;  %v10005_v19 = vld [vmem:[%s19543_s1 + $0x3d0] sm:$0xff] }
 0x3a0   :  { %12053 = vmatprep.subr.mxu1 %v15032_v2 }
 0x3a1   :  { %12054 = vmatpush3.msra.mxu1 %v9960_v20  ;;  %v10004_v20 = vld [vmem:[%s19543_s1 + $0x3c8] sm:$0xff] }
 0x3a2   :  { %12055 = vmatprep.subr.mxu1 %v15032_v2 }
 0x3a3   :  { %12056 = vmatpush3.msra.mxu1 %v9959_v21  ;;  %v10003_v21 = vld [vmem:[%s19543_s1 + $0x3c0] sm:$0xff] }
 0x3a4   :  { %12057 = vmatprep.subr.mxu1 %v15032_v2 }
 0x3a5   :  { %12058 = vmatpush3.msra.mxu1 %v9958_v22  ;;  %v10002_v22 = vld [vmem:[%s19543_s1 + $0x3b8] sm:$0xff] }
 0x3a6   :  { %12059 = vmatprep.subr.mxu1 %v15032_v2 }
 0x3a7   :  { %12060 = vmatpush3.msra.mxu1 %v9957_v23  ;;  %v10001_v23 = vld [vmem:[%s19543_s1 + $0x3b0] sm:$0xff] }
 0x3a8   :  { %12061 = vmatprep.subr.mxu1 %v15032_v2 }
 0x3a9   :  { %12062 = vmatpush3.msra.mxu1 %v9956_v24  ;;  %v10000_v24 = vld [vmem:[%s19543_s1 + $0x3a8] sm:$0xff] }
 0x3aa   :  { %12063 = vmatprep.subr.mxu1 %v15032_v2 }
 0x3ab   :  { %12064 = vmatpush3.msra.mxu1 %v9955_v25  ;;  %v9999_v25 = vld [vmem:[%s19543_s1 + $0x3a0] sm:$0xff] }
 0x3ac   :  { %12065 = vmatprep.subr.mxu1 %v15032_v2 }
 0x3ad   :  { %12066 = vmatpush3.msra.mxu1 %v9954_v26  ;;  %v9998_v26 = vld [vmem:[%s19543_s1 + $0x398] sm:$0xff] }
 0x3ae   :  { %12067 = vmatprep.subr.mxu1 %v15032_v2 }
 0x3af   :  { %12068 = vmatpush3.msra.mxu1 %v9953_v27  ;;  %v9997_v27 = vld [vmem:[%s19543_s1 + $0x390] sm:$0xff] }
 0x3b0   :  { %12070 = vmatmul.mubr.f32.vlgmr.msra.gmra.mxu1 %v15247_v33 }
 0x3b1   :  { %12117 = vmatprep.mubr.msk.f32.mxu1 %vm272_vm1, %v9852_v60  ;;  %v10019_v60 = vld [vmem:[%s19543_s1 + $0x418] sm:$0xff] }
 0x450   :  { %v12033_v29 = vpop.f32.mrf.mxu1 }
 0x451   :  { %v15650_v30 = vadd.f32 %v12033_v29, %v15555_v62  ;;  %v9995_v29 = vld [vmem:[%s19543_s1 + $0x380] sm:$0xff] }
 0x452   :  { %v15652_v32 = vpop.f32.mrf.mxu1 }
 0x454   :  { %v12036_v34 = vpop.f32.mrf.mxu1 }
 0x455   :  { %v15655_v36 = vadd.f32 %v12036_v34, %v15560_v1 }
 0x456   :  { %v15657_v37 = vpop.f32.mrf.mxu1 }
 0x470   :  { %v1130_v39 = vpop.f32.mrf.mxu1 }
 0x471   :  { %12072 = vmatprep.subr.msk.mxu0 %vm285_vm2, %v1130_v39 }
 0x472   :  { %12073 = vmatpush3.msk.msra.mxu0 %vm285_vm2, %v1130_v39  ;;  %v12071_v43 = vpop.f32.mrf.mxu1 }
 0x473   :  { %12075 = vmatmul.mubr.msk.f32.vlgmr.msra.gmra.mxu0 %vm272_vm1, %v9849_v40  ;;  %12080 = vmatprep.subr.mxu0 %v15032_v2 }
 0x474   :  { %12081 = vmatpush3.msra.mxu0 %v9989_v41  ;;  %12077 = vmatprep.mubr.msk.f32.mxu0 %vm272_vm1, %v9850_v42 }
 0x475   :  { %12082 = vmatprep.subr.mxu0 %v15032_v2 }
 0x476   :  { %12083 = vmatpush3.msra.mxu0 %v9988_v44  ;;  %v9857_v44 = vld [vmem:[%s19544_s2 + $0xe8] sm:$0xff] }
 0x477   :  { %12078 = vmatmul.mubr.msk.f32.gmra.mxu0 %vm272_vm1, %v9851_v45  ;;  %12084 = vmatprep.subr.mxu0 %v15032_v2  ;;  %v10031_v45 = vld [vmem:[%s19543_s1 + $0x478] sm:$0xff] }
 0x478   :  { %12085 = vmatpush3.msra.mxu0 %v9987_v46  ;;  %12112 = vmatprep.mubr.msk.f32.mxu0 %vm15033_vm0, %v15032_v2  ;;  %v9858_v46 = vld [vmem:[%s19544_s2 + $0xf0] sm:$0xff] }
 0x479   :  { %12086 = vmatprep.subr.mxu0 %v15032_v2 }
 0x47a   :  { %12087 = vmatpush3.msra.mxu0 %v9986_v47 }
 0x47b   :  { %12088 = vmatprep.subr.mxu0 %v15032_v2 }
 0x47c   :  { %12089 = vmatpush3.msra.mxu0 %v9985_v48  ;;  %v10030_v48 = vld [vmem:[%s19543_s1 + $0x470] sm:$0xff] }
 0x47d   :  { %12090 = vmatprep.subr.mxu0 %v15032_v2 }
 0x47e   :  { %12091 = vmatpush3.msra.mxu0 %v9984_v49  ;;  %v9859_v49 = vld [vmem:[%s19544_s2 + $0xf8] sm:$0xff] }
 0x47f   :  { %12092 = vmatprep.subr.mxu0 %v15032_v2 }
 0x480   :  { %12093 = vmatpush3.msra.mxu0 %v9983_v50  ;;  %v10029_v50 = vld [vmem:[%s19543_s1 + $0x468] sm:$0xff] }
 0x481   :  { %12094 = vmatprep.subr.mxu0 %v15032_v2 }
 0x482   :  { %12095 = vmatpush3.msra.mxu0 %v9982_v51  ;;  %v10028_v51 = vld [vmem:[%s19543_s1 + $0x460] sm:$0xff] }
 0x483   :  { %12096 = vmatprep.subr.mxu0 %v15032_v2 }
 0x484   :  { %12097 = vmatpush3.msra.mxu0 %v9981_v52  ;;  %v10027_v52 = vld [vmem:[%s19543_s1 + $0x458] sm:$0xff] }
 0x485   :  { %12098 = vmatprep.subr.mxu0 %v15032_v2 }
 0x486   :  { %12099 = vmatpush3.msra.mxu0 %v9980_v53  ;;  %v10026_v53 = vld [vmem:[%s19543_s1 + $0x450] sm:$0xff] }
 0x487   :  { %12100 = vmatprep.subr.mxu0 %v15032_v2 }
 0x488   :  { %12101 = vmatpush3.msra.mxu0 %v9979_v54  ;;  %v10025_v54 = vld [vmem:[%s19543_s1 + $0x448] sm:$0xff] }
 0x489   :  { %12102 = vmatprep.subr.mxu0 %v15032_v2 }
 0x48a   :  { %12103 = vmatpush3.msra.mxu0 %v9978_v55  ;;  %v10024_v55 = vld [vmem:[%s19543_s1 + $0x440] sm:$0xff] }
 0x48b   :  { %12104 = vmatprep.subr.mxu0 %v15032_v2 }
 0x48c   :  { %12105 = vmatpush3.msra.mxu0 %v9977_v56  ;;  %v10023_v56 = vld [vmem:[%s19543_s1 + $0x438] sm:$0xff] }
 0x48d   :  { %12106 = vmatprep.subr.mxu0 %v15032_v2 }
 0x48e   :  { %12107 = vmatpush3.msra.mxu0 %v9976_v57  ;;  %v10022_v57 = vld [vmem:[%s19543_s1 + $0x430] sm:$0xff] }
 0x48f   :  { %12108 = vmatprep.subr.mxu0 %v15032_v2 }
 0x490   :  { %12109 = vmatpush3.msra.mxu0 %v9975_v58  ;;  %v10021_v58 = vld [vmem:[%s19543_s1 + $0x428] sm:$0xff] }
 0x491   :  { %12110 = vmatprep.subr.mxu0 %v15032_v2 }
 0x492   :  { %12111 = vmatpush3.msra.mxu0 %v9974_v59  ;;  %v10020_v59 = vld [vmem:[%s19543_s1 + $0x420] sm:$0xff] }
 0x493   :  { %12113 = vmatmul.mubr.f32.vlgmr.msra.gmra.mxu0 %v15247_v33 }
 0x533   :  { %v12076_v61 = vpop.f32.mrf.mxu0 }
 0x534   :  { %v15745_v62 = vadd.f32 %v12076_v61, %v15650_v30  ;;  %v9856_v30 = vld [vmem:[%s19544_s2 + $0xe0] sm:$0xff]  ;;  %v10018_v61 = vld [vmem:[%s19543_s1 + $0x410] sm:$0xff] }
 0x535   :  { %v15747_v0 = vpop.f32.mrf.mxu0  ;;  %12160 = vmatprep.mubr.msk.f32.mxu0 %vm272_vm1, %v9856_v30  ;;  %v1884_v30 = vld [vmem:[%s19547_s5 + $0x8] sm:$0xff] }
 0x537   :  { %v12079_v1 = vpop.f32.mrf.mxu0 }
 0x538   :  { %v15750_v6 = vadd.f32 %v12079_v1, %v15655_v36  ;;  %v10016_v1 = vld [vmem:[%s19543_s1 + $0x400] sm:$0xff] }
 0x539   :  { %v15752_v7 = vpop.f32.mrf.mxu0 }
 0x553   :  { %v1321_v9 = vpop.f32.mrf.mxu0 }
 0x554   :  { %12115 = vmatprep.subr.msk.mxu1 %vm285_vm2, %v1321_v9 }
 0x555   :  { %12116 = vmatpush3.msk.msra.mxu1 %vm285_vm2, %v1321_v9  ;;  %v12114_v13 = vpop.f32.mrf.mxu0  ;;  %v14435_v9 = vld [vmem:[%s19543_s1 + $0xf0] sm:$0xff] }
 0x556   :  { %12118 = vmatmul.mubr.msk.f32.vlgmr.msra.gmra.mxu1 %vm272_vm1, %v9853_v10  ;;  %12123 = vmatprep.subr.mxu1 %v15032_v2  ;;  %v14436_v10 = vld [vmem:[%s19543_s1 + $0xe8] sm:$0xff] }
 0x557   :  { %12124 = vmatpush3.msra.mxu1 %v10010_v11  ;;  %12120 = vmatprep.mubr.msk.f32.mxu1 %vm272_vm1, %v9854_v12  ;;  %v14438_v11 = vld [vmem:[%s19543_s1 + $0xd8] sm:$0xff]  ;;  %v14439_v12 = vld [vmem:[%s19543_s1 + $0xd0] sm:$0xff]  ;;  %v14440_v13 = vld [vmem:[%s19543_s1 + $0xc8] sm:$0xff] }
 0x558   :  { %12125 = vmatprep.subr.mxu1 %v15032_v2 }
 0x559   :  { %12126 = vmatpush3.msra.mxu1 %v10009_v14  ;;  %v14441_v14 = vld [vmem:[%s19543_s1 + $0xc0] sm:$0xff] }
 0x55a   :  { %12121 = vmatmul.mubr.msk.f32.gmra.mxu1 %vm272_vm1, %v9855_v15  ;;  %12127 = vmatprep.subr.mxu1 %v15032_v2  ;;  %v14442_v15 = vld [vmem:[%s19543_s1 + $0xb8] sm:$0xff] }
 0x55b   :  { %12128 = vmatpush3.msra.mxu1 %v10008_v16  ;;  %12155 = vmatprep.mubr.msk.f32.mxu1 %vm15033_vm0, %v15032_v2  ;;  %v14443_v16 = vld [vmem:[%s19543_s1 + $0xb0] sm:$0xff] }
 0x55c   :  { %12129 = vmatprep.subr.mxu1 %v15032_v2 }
 0x55d   :  { %12130 = vmatpush3.msra.mxu1 %v10007_v17  ;;  %v14444_v17 = vld [vmem:[%s19543_s1 + $0xa8] sm:$0xff] }
 0x55e   :  { %12131 = vmatprep.subr.mxu1 %v15032_v2 }
 0x55f   :  { %12132 = vmatpush3.msra.mxu1 %v10006_v18  ;;  %v14445_v18 = vld [vmem:[%s19543_s1 + $0xa0] sm:$0xff] }
 0x560   :  { %12133 = vmatprep.subr.mxu1 %v15032_v2 }
 0x561   :  { %12134 = vmatpush3.msra.mxu1 %v10005_v19  ;;  %v14446_v19 = vld [vmem:[%s19543_s1 + $0x98] sm:$0xff] }
 0x562   :  { %12135 = vmatprep.subr.mxu1 %v15032_v2 }
 0x563   :  { %12136 = vmatpush3.msra.mxu1 %v10004_v20  ;;  %v14447_v20 = vld [vmem:[%s19543_s1 + $0x90] sm:$0xff] }
 0x564   :  { %12137 = vmatprep.subr.mxu1 %v15032_v2 }
 0x565   :  { %12138 = vmatpush3.msra.mxu1 %v10003_v21  ;;  %v14448_v21 = vld [vmem:[%s19543_s1 + $0x88] sm:$0xff] }
 0x566   :  { %12139 = vmatprep.subr.mxu1 %v15032_v2 }
 0x567   :  { %12140 = vmatpush3.msra.mxu1 %v10002_v22  ;;  %v14449_v22 = vld [vmem:[%s19543_s1 + $0x80] sm:$0xff] }
 0x568   :  { %12141 = vmatprep.subr.mxu1 %v15032_v2 }
 0x569   :  { %12142 = vmatpush3.msra.mxu1 %v10001_v23  ;;  %v9860_v23 = vld [vmem:[%s19544_s2 + $0x100] sm:$0xff] }
 0x56a   :  { %12143 = vmatprep.subr.mxu1 %v15032_v2 }
 0x56b   :  { %12144 = vmatpush3.msra.mxu1 %v10000_v24  ;;  %v95_v24 = vld [vmem:[%s19545_s3] sm:$0xff] }
 0x56c   :  { %12145 = vmatprep.subr.mxu1 %v15032_v2 }
 0x56d   :  { %12146 = vmatpush3.msra.mxu1 %v9999_v25  ;;  %v97_v25 = vld [vmem:[%s19545_s3 + $0x10] sm:$0xff] }
 0x56e   :  { %12147 = vmatprep.subr.mxu1 %v15032_v2 }
 0x56f   :  { %12148 = vmatpush3.msra.mxu1 %v9998_v26  ;;  %v15034_v26 = vmov 0  }
 0x570   :  { %12149 = vmatprep.subr.mxu1 %v15032_v2  ;;  %14430 = vset.pattern.permute.xlu0 %v15034_v26 }
 0x571   :  { %12150 = vmatpush3.msra.mxu1 %v9997_v27  ;;  %14431 = vset.pattern.permute.xlu1 %v15034_v26  ;;  %v96_v27 = vld [vmem:[%s19545_s3 + $0x8] sm:$0xff] }
 0x572   :  { %12151 = vmatprep.subr.mxu1 %v15032_v2  ;;  %1813 = vperm.xlu0 %14430, %v95_v24   ;;  %v14465_v24 = vld [vmem:[%s19543_s1] sm:$0xff] }
 0x573   :  { %12152 = vmatpush3.msra.mxu1 %v9996_v28  ;;  %1823 = vperm.xlu1 %14431, %v97_v25   ;;  %v98_v28 = vld [vmem:[%s19545_s3 + $0x18] sm:$0xff]  ;;  %v456_v25 = vadd.f32 %v15366_v4, %v15364_v3 }
 0x574   :  { %12153 = vmatprep.subr.mxu1 %v15032_v2 }
 0x575   :  { %12154 = vmatpush3.msra.mxu1 %v9995_v29  ;;  %v1883_v29 = vld [vmem:[%s19547_s5] sm:$0xff]  ;;  %v661_v26 = vadd.f32 %v15462_v35, %v456_v25  ;;  %v14479_v25 = vld [vmem:[%s19543_s1 + $0x110] sm:$0xff] }
 0x576   :  { %12156 = vmatmul.mubr.f32.vlgmr.msra.gmra.mxu1 %v15247_v33  ;;  %1818 = vperm.xlu0 %14430, %v96_v27   ;;  %v466_v27 = vadd.f32 %v15457_v31, %v15370_v8 }
 0x577   :  { %12203 = vmatprep.mubr.msk.f32.mxu1 %vm272_vm1, %v9860_v23  ;;  %1828 = vperm.xlu1 %14431, %v98_v28   ;;  %v14464_v23 = vld [vmem:[%s19543_s1 + $0x8] sm:$0xff]  ;;  %v852_v28 = vadd.f32 %v15557_v63, %v661_v26 }
 0x578   :  { %v14480_v26 = vld [vmem:[%s19543_s1 + $0x108] sm:$0xff] }
 0x57a   :  { %3556 = vperm.xlu0 %14430, %v1883_v29   ;;  %v663_v29 = vadd.f32 %v15467_v38, %v466_v27  ;;  %v14481_v27 = vld [vmem:[%s19543_s1 + $0x100] sm:$0xff] }
 0x57b   :  { %3561 = vperm.xlu1 %14431, %v1884_v30   ;;  %v1043_v30 = vadd.f32 %v15652_v32, %v852_v28  ;;  %v10041_v28 = vld [vmem:[%s19546_s4 + $0x40] sm:$0xff] }
 0x5ee   :  { %v1824_v31 = vpop.permute.xlu1 %1823 }
 0x616   :  { %v12119_v34 = vpop.f32.mrf.mxu1 }
 0x617   :  { %v15840_v36 = vadd.f32 %v12119_v34, %v15745_v62  ;;  %v10017_v62 = vld [vmem:[%s19543_s1 + $0x408] sm:$0xff]  ;;  %v1885_v34 = vld [vmem:[%s19547_s5 + $0x10] sm:$0xff] }
 0x618   :  { %v15842_v39 = vpop.f32.mrf.mxu1  ;;  %3566 = vperm.xlu0 %14430, %v1885_v34   ;;  %v854_v34 = vadd.f32 %v15562_v5, %v663_v29 }
 0x61a   :  { %v12122_v40 = vpop.f32.mrf.mxu1 }
 0x61b   :  { %v15845_v41 = vadd.f32 %v12122_v40, %v15750_v6  ;;  %v14434_v6 = vld [vmem:[%s19543_s1 + $0xf8] sm:$0xff] }
 0x61c   :  { %v15847_v42 = vpop.f32.mrf.mxu1  ;;  %v1886_v40 = vld [vmem:[%s19547_s5 + $0x18] sm:$0xff] }
 0x61d   :  { %3571 = vperm.xlu1 %14431, %v1886_v40   ;;  %v1234_v40 = vadd.f32 %v15747_v0, %v1043_v30 }
 0x61f   :  { %v1425_v3 = vadd.f32 %v15842_v39, %v1234_v40 }
 0x636   :  { %v1512_v43 = vpop.f32.mrf.mxu1 }
 0x637   :  { %12158 = vmatprep.subr.msk.mxu0 %vm285_vm2, %v1512_v43 }
 0x638   :  { %12159 = vmatpush3.msk.msra.mxu0 %vm285_vm2, %v1512_v43  ;;  %v12157_v47 = vpop.f32.mrf.mxu1  ;;  %v10141_v43 = vld [vmem:[%s19547_s5 + $0x20] sm:$0xff] }
 0x639   :  { %12161 = vmatmul.mubr.msk.f32.vlgmr.msra.gmra.mxu0 %vm272_vm1, %v9857_v44  ;;  %12166 = vmatprep.subr.mxu0 %v15032_v2  ;;  %v10142_v44 = vld [vmem:[%s19547_s5 + $0x28] sm:$0xff]  ;;  %v10217_v47 = vld [vmem:[%s19547_s5 + $0x40] sm:$0xff] }
 0x63a   :  { %12167 = vmatpush3.msra.mxu0 %v10031_v45  ;;  %12163 = vmatprep.mubr.msk.f32.mxu0 %vm272_vm1, %v9858_v46  ;;  %v10143_v45 = vld [vmem:[%s19547_s5 + $0x30] sm:$0xff]  ;;  %v10144_v46 = vld [vmem:[%s19547_s5 + $0x38] sm:$0xff] }
 0x63b   :  { %12168 = vmatprep.subr.mxu0 %v15032_v2  ;;  %5300 = vperm.xlu0 %14430, %v10141_v43   ;;  %v1814_v43 = vpop.permute.xlu0 %1813 }
 0x63c   :  { %12169 = vmatpush3.msra.mxu0 %v10030_v48  ;;  %5305 = vperm.xlu1 %14431, %v10142_v44   ;;  %v10218_v48 = vld [vmem:[%s19547_s5 + $0x48] sm:$0xff]  ;;  %v1045_v44 = vadd.f32 %v15657_v37, %v854_v34 }
 0x63d   :  { %12164 = vmatmul.mubr.msk.f32.gmra.mxu0 %vm272_vm1, %v9859_v49  ;;  %12170 = vmatprep.subr.mxu0 %v15032_v2  ;;  %v10219_v49 = vld [vmem:[%s19547_s5 + $0x50] sm:$0xff] }
 0x63e   :  { %12171 = vmatpush3.msra.mxu0 %v10029_v50  ;;  %12198 = vmatprep.mubr.msk.f32.mxu0 %vm15033_vm0, %v15032_v2  ;;  %v10220_v50 = vld [vmem:[%s19547_s5 + $0x58] sm:$0xff]  ;;  %v1236_v35 = vadd.f32 %v15752_v7, %v1045_v44 }
 0x63f   :  { %12172 = vmatprep.subr.mxu0 %v15032_v2  ;;  %5310 = vperm.xlu0 %14430, %v10143_v45   ;;  %v1819_v45 = vpop.permute.xlu0 %1818 }
 0x640   :  { %12173 = vmatpush3.msra.mxu0 %v10028_v51  ;;  %5315 = vperm.xlu1 %14431, %v10144_v46   ;;  %v10296_v51 = vld [vmem:[%s19547_s5 + $0x78] sm:$0xff]  ;;  %v1427_v32 = vadd.f32 %v15847_v42, %v1236_v35 }
 0x641   :  { %12174 = vmatprep.subr.mxu0 %v15032_v2 }
 0x642   :  { %12175 = vmatpush3.msra.mxu0 %v10027_v52  ;;  %v10295_v52 = vld [vmem:[%s19547_s5 + $0x70] sm:$0xff] }
 0x643   :  { %12176 = vmatprep.subr.mxu0 %v15032_v2  ;;  %7048 = vperm.xlu0 %14430, %v10217_v47  }
 0x644   :  { %12177 = vmatpush3.msra.mxu0 %v10026_v53  ;;  %7053 = vperm.xlu1 %14431, %v10218_v48   ;;  %v10294_v53 = vld [vmem:[%s19547_s5 + $0x68] sm:$0xff] }
 0x645   :  { %12178 = vmatprep.subr.mxu0 %v15032_v2 }
 0x646   :  { %12179 = vmatpush3.msra.mxu0 %v10025_v54  ;;  %v10293_v54 = vld [vmem:[%s19547_s5 + $0x60] sm:$0xff] }
 0x647   :  { %12180 = vmatprep.subr.mxu0 %v15032_v2  ;;  %7058 = vperm.xlu0 %14430, %v10219_v49   ;;  %v1829_v49 = vpop.permute.xlu1 %1828 }
 0x648   :  { %12181 = vmatpush3.msra.mxu0 %v10024_v55  ;;  %7063 = vperm.xlu1 %14431, %v10220_v50   ;;  %v8824_v55 = vld [vmem:[%s19549_s7] sm:$0xff] }
 0x649   :  { %12182 = vmatprep.subr.mxu0 %v15032_v2 }
 0x64a   :  { %12183 = vmatpush3.msra.mxu0 %v10023_v56  ;;  %v8825_v56 = vld [vmem:[%s19549_s7 + $0x8] sm:$0x1] }
 0x64b   :  { %12184 = vmatprep.subr.mxu0 %v15032_v2  ;;  %8807 = vperm.xlu0 %14430, %v10296_v51  }
 0x64c   :  { %12185 = vmatpush3.msra.mxu0 %v10022_v57  ;;  %8802 = vperm.xlu1 %14431, %v10295_v52  }
 0x64d   :  { %12186 = vmatprep.subr.mxu0 %v15032_v2 }
 0x64e   :  { %12187 = vmatpush3.msra.mxu0 %v10021_v58 }
 0x64f   :  { %12188 = vmatprep.subr.mxu0 %v15032_v2  ;;  %8797 = vperm.xlu0 %14430, %v10294_v53  }
 0x650   :  { %12189 = vmatpush3.msra.mxu0 %v10020_v59  ;;  %8792 = vperm.xlu1 %14431, %v10293_v54  }
 0x651   :  { %12190 = vmatprep.subr.mxu0 %v15032_v2 }
 0x652   :  { %12191 = vmatpush3.msra.mxu0 %v10019_v60 }
 0x653   :  { %12192 = vmatprep.subr.mxu0 %v15032_v2  ;;  %8828 = vperm.xlu0 %14430, %v8824_v55   ;;  %v10037_v55 = vld [vmem:[%s19546_s4 + $0x20] sm:$0xff] }
 0x654   :  { %12193 = vmatpush3.msra.mxu0 %v10018_v61  ;;  %8833 = vperm.xlu1 %14431, %v8825_v56  }
 0x655   :  { %12194 = vmatprep.subr.mxu0 %v15032_v2 }
 0x656   :  { %12195 = vmatpush3.msra.mxu0 %v10017_v62 }
 0x657   :  { %12196 = vmatprep.subr.mxu0 %v15032_v2 }
 0x658   :  { %12197 = vmatpush3.msra.mxu0 %v10016_v1 }
 0x659   :  { %12199 = vmatmul.mubr.f32.vlgmr.msra.gmra.mxu0 %v15247_v33  ;;  %12247 = vmatprep.subr.mxu0 %v14434_v6  ;;  %v14437_v33 = vld [vmem:[%s19543_s1 + $0xe0] sm:$0xff] }
 0x65a   :  { %12248 = vmatpush3.msra.mxu0 %v14434_v6  ;;  %v9861_v6 = vld [vmem:[%s19544_s2 + $0x108] sm:$0xff] }
 0x65b   :  { %12249 = vmatprep.subr.mxu0 %v14435_v9 }
 0x65c   :  { %12250 = vmatpush3.msra.mxu0 %v14435_v9 }
 0x65d   :  { %12251 = vmatprep.subr.mxu0 %v14436_v10 }
 0x65e   :  { %12252 = vmatpush3.msra.mxu0 %v14436_v10  ;;  %v9863_v10 = vld [vmem:[%s19544_s2 + $0x118] sm:$0xff] }
 0x65f   :  { %12253 = vmatprep.subr.mxu0 %v14437_v33 }
 0x660   :  { %12254 = vmatpush3.msra.mxu0 %v14437_v33  ;;  %v14451_v33 = vld [vmem:[%s19543_s1 + $0x70] sm:$0xff] }
 0x661   :  { %12255 = vmatprep.subr.mxu0 %v14438_v11 }
 0x662   :  { %12256 = vmatpush3.msra.mxu0 %v14438_v11  ;;  %v14452_v11 = vld [vmem:[%s19543_s1 + $0x68] sm:$0xff] }
 0x663   :  { %12257 = vmatprep.subr.mxu0 %v14439_v12 }
 0x664   :  { %12258 = vmatpush3.msra.mxu0 %v14439_v12  ;;  %v14453_v12 = vld [vmem:[%s19543_s1 + $0x60] sm:$0xff] }
 0x665   :  { %12259 = vmatprep.subr.mxu0 %v14440_v13 }
 0x666   :  { %12260 = vmatpush3.msra.mxu0 %v14440_v13  ;;  %v14454_v13 = vld [vmem:[%s19543_s1 + $0x58] sm:$0xff] }
 0x667   :  { %12261 = vmatprep.subr.mxu0 %v14441_v14 }
 0x668   :  { %12262 = vmatpush3.msra.mxu0 %v14441_v14  ;;  %v14455_v14 = vld [vmem:[%s19543_s1 + $0x50] sm:$0xff] }
 0x669   :  { %12263 = vmatprep.subr.mxu0 %v14442_v15 }
 0x66a   :  { %12264 = vmatpush3.msra.mxu0 %v14442_v15  ;;  %v14456_v15 = vld [vmem:[%s19543_s1 + $0x48] sm:$0xff] }
 0x66b   :  { %12265 = vmatprep.subr.mxu0 %v14443_v16 }
 0x66c   :  { %12266 = vmatpush3.msra.mxu0 %v14443_v16  ;;  %v14457_v16 = vld [vmem:[%s19543_s1 + $0x40] sm:$0xff] }
 0x66d   :  { %12267 = vmatprep.subr.mxu0 %v14444_v17 }
 0x66e   :  { %12268 = vmatpush3.msra.mxu0 %v14444_v17  ;;  %v14458_v17 = vld [vmem:[%s19543_s1 + $0x38] sm:$0xff] }
 0x66f   :  { %12269 = vmatprep.subr.mxu0 %v14445_v18 }
 0x670   :  { %12270 = vmatpush3.msra.mxu0 %v14445_v18  ;;  %v14459_v18 = vld [vmem:[%s19543_s1 + $0x30] sm:$0xff] }
 0x671   :  { %12271 = vmatprep.subr.mxu0 %v14446_v19 }
 0x672   :  { %12272 = vmatpush3.msra.mxu0 %v14446_v19  ;;  %v14460_v19 = vld [vmem:[%s19543_s1 + $0x28] sm:$0xff] }
 0x673   :  { %12273 = vmatprep.subr.mxu0 %v14447_v20 }
 0x674   :  { %12274 = vmatpush3.msra.mxu0 %v14447_v20  ;;  %v14461_v20 = vld [vmem:[%s19543_s1 + $0x20] sm:$0xff] }
 0x675   :  { %12275 = vmatprep.subr.mxu0 %v14448_v21 }
 0x676   :  { %12276 = vmatpush3.msra.mxu0 %v14448_v21  ;;  %v14462_v21 = vld [vmem:[%s19543_s1 + $0x18] sm:$0xff] }
 0x677   :  { %12277 = vmatprep.subr.mxu0 %v14449_v22 }
 0x678   :  { %12278 = vmatpush3.msra.mxu0 %v14449_v22  ;;  %v14463_v22 = vld [vmem:[%s19543_s1 + $0x10] sm:$0xff] }
 0x6f9   :  { %v12162_v57 = vpop.f32.mrf.mxu0 }
 0x6fa   :  { %v16049_v58 = vadd.f32 %v12162_v57, %v15840_v36  ;;  %v9862_v36 = vld [vmem:[%s19544_s2 + $0x110] sm:$0xff] }
 0x6fb   :  { %v16051_v59 = vpop.f32.mrf.mxu0 }
 0x6fc   :  { %v1616_v8 = vadd.f32 %v16051_v59, %v1425_v3 }
 0x6fd   :  { %v12165_v60 = vpop.f32.mrf.mxu0 }
 0x6fe   :  { %v16054_v61 = vadd.f32 %v12165_v60, %v15845_v41  ;;  %v14450_v41 = vld [vmem:[%s19543_s1 + $0x78] sm:$0xff] }
 0x6ff   :  { %v16056_v62 = vpop.f32.mrf.mxu0 }
 0x700   :  { %v1618_v47 = vadd.f32 %v16056_v62, %v1427_v32 }
 0x719   :  { %v1703_v1 = vpop.f32.mrf.mxu0 }
 0x71a   :  { %12201 = vmatprep.subr.msk.mxu1 %vm285_vm2, %v1703_v1 }
 0x71b   :  { %12202 = vmatpush3.msk.msra.mxu1 %vm285_vm2, %v1703_v1  ;;  %v12200_v9 = vpop.f32.mrf.mxu0  ;;  %v10038_v1 = vld [vmem:[%s19546_s4 + $0x28] sm:$0xff] }
 0x71c   :  { %12204 = vmatmul.mubr.msk.f32.vlgmr.msra.gmra.mxu1 %vm272_vm1, %v9861_v6  ;;  %12209 = vmatprep.subr.mxu1 %v14450_v41  ;;  %v10039_v6 = vld [vmem:[%s19546_s4 + $0x30] sm:$0xff]  ;;  %v10040_v9 = vld [vmem:[%s19546_s4 + $0x38] sm:$0xff] }
 0x71d   :  { %12206 = vmatprep.mubr.msk.f32.mxu1 %vm272_vm1, %v9862_v36  ;;  %12210 = vmatpush3.msra.mxu1 %v14450_v41  ;;  %v1839_v41 = vld [vmem:[%s19546_s4] sm:$0xff] }
 0x71e   :  { %12211 = vmatprep.subr.mxu1 %v14451_v33 }
 0x71f   :  { %12212 = vmatpush3.msra.mxu1 %v14451_v33  ;;  %v1841_v33 = vld [vmem:[%s19546_s4 + $0x10] sm:$0xff] }
 0x720   :  { %12207 = vmatmul.mubr.msk.f32.gmra.mxu1 %vm272_vm1, %v9863_v10  ;;  %12213 = vmatprep.subr.mxu1 %v14452_v11  ;;  %v1840_v10 = vld [vmem:[%s19546_s4 + $0x8] sm:$0xff] }
 0x721   :  { %12214 = vmatpush3.msra.mxu1 %v14452_v11  ;;  %v14466_v11 = vld [vmem:[%s19543_s1 + $0x178] sm:$0xff] }
 0x722   :  { %12215 = vmatprep.subr.mxu1 %v14453_v12 }
 0x723   :  { %12216 = vmatpush3.msra.mxu1 %v14453_v12  ;;  %v1842_v12 = vld [vmem:[%s19546_s4 + $0x18] sm:$0xff] }
 0x724   :  { %12217 = vmatprep.subr.mxu1 %v14454_v13 }
 0x725   :  { %12218 = vmatpush3.msra.mxu1 %v14454_v13  ;;  %v14467_v13 = vld [vmem:[%s19543_s1 + $0x170] sm:$0xff] }
 0x726   :  { %12219 = vmatprep.subr.mxu1 %v14455_v14 }
 0x727   :  { %12220 = vmatpush3.msra.mxu1 %v14455_v14  ;;  %v14468_v14 = vld [vmem:[%s19543_s1 + $0x168] sm:$0xff] }
 0x728   :  { %12221 = vmatprep.subr.mxu1 %v14456_v15 }
 0x729   :  { %12222 = vmatpush3.msra.mxu1 %v14456_v15  ;;  %v14469_v15 = vld [vmem:[%s19543_s1 + $0x160] sm:$0xff] }
 0x72a   :  { %12223 = vmatprep.subr.mxu1 %v14457_v16 }
 0x72b   :  { %12224 = vmatpush3.msra.mxu1 %v14457_v16  ;;  %v14470_v16 = vld [vmem:[%s19543_s1 + $0x158] sm:$0xff] }
 0x72c   :  { %12225 = vmatprep.subr.mxu1 %v14458_v17 }
 0x72d   :  { %12226 = vmatpush3.msra.mxu1 %v14458_v17  ;;  %v14471_v17 = vld [vmem:[%s19543_s1 + $0x150] sm:$0xff] }
 0x72e   :  { %12227 = vmatprep.subr.mxu1 %v14459_v18 }
 0x72f   :  { %12228 = vmatpush3.msra.mxu1 %v14459_v18  ;;  %v14472_v18 = vld [vmem:[%s19543_s1 + $0x148] sm:$0xff] }
 0x730   :  { %12229 = vmatprep.subr.mxu1 %v14460_v19 }
 0x731   :  { %12230 = vmatpush3.msra.mxu1 %v14460_v19  ;;  %v14473_v19 = vld [vmem:[%s19543_s1 + $0x140] sm:$0xff] }
 0x732   :  { %12231 = vmatprep.subr.mxu1 %v14461_v20 }
 0x733   :  { %12232 = vmatpush3.msra.mxu1 %v14461_v20  ;;  %v14474_v20 = vld [vmem:[%s19543_s1 + $0x138] sm:$0xff] }
 0x734   :  { %12233 = vmatprep.subr.mxu1 %v14462_v21 }
 0x735   :  { %12234 = vmatpush3.msra.mxu1 %v14462_v21  ;;  %v14475_v21 = vld [vmem:[%s19543_s1 + $0x130] sm:$0xff] }
 0x736   :  { %12235 = vmatprep.subr.mxu1 %v14463_v22 }
 0x737   :  { %12236 = vmatpush3.msra.mxu1 %v14463_v22  ;;  %v14476_v22 = vld [vmem:[%s19543_s1 + $0x128] sm:$0xff] }
 0x738   :  { %12237 = vmatprep.subr.mxu1 %v14464_v23 }
 0x739   :  { %12238 = vmatpush3.msra.mxu1 %v14464_v23  ;;  %v14477_v23 = vld [vmem:[%s19543_s1 + $0x120] sm:$0xff] }
 0x73a   :  { %12239 = vmatprep.subr.mxu1 %v14465_v24 }
 0x73b   :  { %12240 = vmatpush3.msra.mxu1 %v14465_v24  ;;  %v14478_v24 = vld [vmem:[%s19543_s1 + $0x118] sm:$0xff] }
 0x7dc   :  { %v12205_v4 = vpop.f32.mrf.mxu1 }
 0x7dd   :  { %v1808_v63 = vadd.f32 %v12205_v4, %v16049_v58 }
 0x7de   :  { %v1788_v38 = vpop.f32.mrf.mxu1 }
 0x7df   :  { %v1807_v5 = vadd.f32 %v1788_v38, %v1616_v8  ;;  %v1832_v46 = vadd.f32 %v1819_v45, %v1808_v63  ;;  %v10042_v45 = vld [vmem:[%s19546_s4 + $0x48] sm:$0xff] }
 0x7e0   :  { %v12208_v0 = vpop.f32.mrf.mxu1 }
 0x7e1   :  { %v1831_v37 = vadd.f32 %v1814_v43, %v1807_v5  ;;  %v1810_v39 = vadd.f32 %v12208_v0, %v16054_v61  ;;  %v16140_v51 = vmax.f32 %v1832_v46, 0.0  ;;  %v10043_v5 = vld [vmem:[%s19546_s4 + $0x50] sm:$0xff]  ;;  %v14482_v46 = vld [vmem:[%s19543_s1 + $0x1f8] sm:$0xff] }
 0x7e2   :  { %v1798_v48 = vpop.f32.mrf.mxu1  ;;  %v10044_v0 = vld [vmem:[%s19546_s4 + $0x58] sm:$0xff] }
 0x7e3   :  { %v16138_v7 = vmax.f32 %v1831_v37, 0.0  ;;  %v1809_v50 = vadd.f32 %v1798_v48, %v1618_v47  ;;  %v1834_v52 = vadd.f32 %v1829_v49, %v1810_v39  ;;  %v14483_v47 = vld [vmem:[%s19543_s1 + $0x1f0] sm:$0xff]  ;;  %v14484_v37 = vld [vmem:[%s19543_s1 + $0x1e8] sm:$0xff]  ;;  %v14485_v39 = vld [vmem:[%s19543_s1 + $0x1e0] sm:$0xff] }
 0x7e4   :  { %v14486_v48 = vld [vmem:[%s19543_s1 + $0x1d8] sm:$0xff]  ;;  %v14487_v49 = vld [vmem:[%s19543_s1 + $0x1d0] sm:$0xff] }
 0x7e5   :  { %v1833_v53 = vadd.f32 %v1824_v31, %v1809_v50  ;;  %12241 = vmatprep.mubr.f32.mxu1 %v16138_v7  ;;  %12279 = vmatprep.mubr.f32.mxu0 %v16138_v7  ;;  %v16148_v54 = vmax.f32 %v1834_v52, 0.0  ;;  %v14488_v50 = vld [vmem:[%s19543_s1 + $0x1c8] sm:$0xff]  ;;  %v14489_v52 = vld [vmem:[%s19543_s1 + $0x1c0] sm:$0xff] }
 0x7e6   :  { %12242 = vmatmul.mubr.f32.vlgmr.msra.gmra.mxu1 %v16140_v51  ;;  %12280 = vmatmul.mubr.f32.vlgmr.msra.gmra.mxu0 %v16140_v51 }
 0x7e7   :  { %v16146_v42 = vmax.f32 %v1833_v53, 0.0  ;;  %v14490_v53 = vld [vmem:[%s19543_s1 + $0x1b8] sm:$0xff] }
 0x7e9   :  { %12244 = vmatprep.mubr.f32.mxu1 %v16146_v42  ;;  %12282 = vmatprep.mubr.f32.mxu0 %v16146_v42 }
 0x7ea   :  { %12245 = vmatmul.mubr.f32.gmra.mxu1 %v16148_v54  ;;  %12283 = vmatmul.mubr.f32.gmra.mxu0 %v16148_v54 }
 0x7eb   :  { %12293 = vmatprep.mubr.msk.f32.mxu1 %vm2057_vm3, %v10037_v55  ;;  %12359 = vmatprep.mubr.msk.f32.mxu0 %vm2057_vm3, %v10041_v28  ;;  %v14491_v55 = vld [vmem:[%s19543_s1 + $0x1b0] sm:$0xff]  ;;  %v14509_v28 = vld [vmem:[%s19543_s1 + $0x220] sm:$0xff] }
 0x8a6   :  { %v12281_v56 = vpop.f32.mrf.mxu0  ;;  %v12243_v57 = vpop.f32.mrf.mxu1 }
 0x8a8   :  { %v2038_v58 = vpop.f32.mrf.mxu0  ;;  %v1953_v60 = vpop.f32.mrf.mxu1 }
 0x8aa   :  { %v12284_v59 = vpop.f32.mrf.mxu0  ;;  %v12246_v62 = vpop.f32.mrf.mxu1 }
 0x8ab   :  { %12285 = vmatprep.subr.mxu1 %v12284_v59 }
 0x8ac   :  { %v2048_v61 = vpop.f32.mrf.mxu0  ;;  %12286 = vmatpush3.msra.mxu1 %v12284_v59  ;;  %v1963_v36 = vpop.f32.mrf.mxu1  ;;  %v14495_v59 = vld [vmem:[%s19543_s1 + $0x190] sm:$0xff] }
 0x8ad   :  { %12287 = vmatprep.subr.mxu1 %v2048_v61 }
 0x8ae   :  { %12288 = vmatpush3.msra.mxu1 %v2048_v61  ;;  %v14497_v61 = vld [vmem:[%s19543_s1 + $0x180] sm:$0xff] }
 0x8af   :  { %12289 = vmatprep.subr.mxu1 %v12281_v56 }
 0x8b0   :  { %12290 = vmatpush3.msra.mxu1 %v12281_v56  ;;  %v14492_v56 = vld [vmem:[%s19543_s1 + $0x1a8] sm:$0xff] }
 0x8b1   :  { %12291 = vmatprep.subr.mxu1 %v2038_v58 }
 0x8b2   :  { %12292 = vmatpush3.msra.mxu1 %v2038_v58  ;;  %v14494_v58 = vld [vmem:[%s19543_s1 + $0x198] sm:$0xff] }
 0x8b3   :  { %12294 = vmatmul.mubr.msk.f32.vlgmr.msra.gmra.mxu1 %vm2057_vm3, %v10038_v1  ;;  %12299 = vmatprep.subr.mxu1 %v12246_v62 }
 0x8b4   :  { %12300 = vmatpush3.msra.mxu1 %v12246_v62  ;;  %12296 = vmatprep.mubr.msk.f32.mxu1 %vm2057_vm3, %v10039_v6  ;;  %v10045_v62 = vld [vmem:[%s19546_s4 + $0x60] sm:$0xff] }
 0x8b5   :  { %12301 = vmatprep.subr.mxu1 %v1963_v36 }
 0x8b6   :  { %12302 = vmatpush3.msra.mxu1 %v1963_v36 }
 0x8b7   :  { %12297 = vmatmul.mubr.msk.f32.gmra.mxu1 %vm2057_vm3, %v10040_v9  ;;  %12303 = vmatprep.subr.mxu1 %v12243_v57 }
 0x8b8   :  { %12304 = vmatpush3.msra.mxu1 %v12243_v57  ;;  %12307 = vmatprep.mubr.msk.f32.mxu1 %vm2057_vm3, %v1839_v41  ;;  %v14493_v57 = vld [vmem:[%s19543_s1 + $0x1a0] sm:$0xff] }
 0x8b9   :  { %12305 = vmatprep.subr.mxu1 %v1953_v60 }
 0x8ba   :  { %12306 = vmatpush3.msra.mxu1 %v1953_v60  ;;  %v14496_v60 = vld [vmem:[%s19543_s1 + $0x188] sm:$0xff] }
 0x8bb   :  { %12308 = vmatmul.mubr.msk.f32.vlgmr.msra.gmra.mxu1 %vm2057_vm3, %v1840_v10  ;;  %12313 = vmatprep.subr.mxu1 %v14466_v11 }
 0x8bc   :  { %12314 = vmatpush3.msra.mxu1 %v14466_v11  ;;  %12310 = vmatprep.mubr.msk.f32.mxu1 %vm2057_vm3, %v1841_v33 }
 0x8bd   :  { %12315 = vmatprep.subr.mxu1 %v14467_v13 }
 0x8be   :  { %12316 = vmatpush3.msra.mxu1 %v14467_v13 }
 0x8bf   :  { %12311 = vmatmul.mubr.msk.f32.gmra.mxu1 %vm2057_vm3, %v1842_v12  ;;  %12317 = vmatprep.subr.mxu1 %v14468_v14 }
 0x8c0   :  { %12318 = vmatpush3.msra.mxu1 %v14468_v14  ;;  %12345 = vmatprep.mubr.f32.mxu1 %v16138_v7  ;;  %v10046_v14 = vld [vmem:[%s19546_s4 + $0x68] sm:$0xff] }
 0x8c1   :  { %12319 = vmatprep.subr.mxu1 %v14469_v15 }
 0x8c2   :  { %12320 = vmatpush3.msra.mxu1 %v14469_v15  ;;  %v10047_v15 = vld [vmem:[%s19546_s4 + $0x70] sm:$0xff] }
 0x8c3   :  { %12321 = vmatprep.subr.mxu1 %v14470_v16 }
 0x8c4   :  { %12322 = vmatpush3.msra.mxu1 %v14470_v16  ;;  %v14498_v16 = vld [vmem:[%s19543_s1 + $0x278] sm:$0xff] }
 0x8c5   :  { %12323 = vmatprep.subr.mxu1 %v14471_v17 }
 0x8c6   :  { %12324 = vmatpush3.msra.mxu1 %v14471_v17  ;;  %v10048_v17 = vld [vmem:[%s19546_s4 + $0x78] sm:$0xff] }
 0x8c7   :  { %12325 = vmatprep.subr.mxu1 %v14472_v18 }
 0x8c8   :  { %12326 = vmatpush3.msra.mxu1 %v14472_v18  ;;  %v14499_v18 = vld [vmem:[%s19543_s1 + $0x270] sm:$0xff] }
 0x8c9   :  { %12327 = vmatprep.subr.mxu1 %v14473_v19 }
 0x8ca   :  { %12328 = vmatpush3.msra.mxu1 %v14473_v19  ;;  %v14500_v19 = vld [vmem:[%s19543_s1 + $0x268] sm:$0xff] }
 0x8cb   :  { %12329 = vmatprep.subr.mxu1 %v14474_v20 }
 0x8cc   :  { %12330 = vmatpush3.msra.mxu1 %v14474_v20  ;;  %v14501_v20 = vld [vmem:[%s19543_s1 + $0x260] sm:$0xff] }
 0x8cd   :  { %12331 = vmatprep.subr.mxu1 %v14475_v21 }
 0x8ce   :  { %12332 = vmatpush3.msra.mxu1 %v14475_v21  ;;  %v14502_v21 = vld [vmem:[%s19543_s1 + $0x258] sm:$0xff] }
 0x8cf   :  { %12333 = vmatprep.subr.mxu1 %v14476_v22 }
 0x8d0   :  { %12334 = vmatpush3.msra.mxu1 %v14476_v22  ;;  %v14503_v22 = vld [vmem:[%s19543_s1 + $0x250] sm:$0xff] }
 0x8d1   :  { %12335 = vmatprep.subr.mxu1 %v14477_v23 }
 0x8d2   :  { %12336 = vmatpush3.msra.mxu1 %v14477_v23  ;;  %v14504_v23 = vld [vmem:[%s19543_s1 + $0x248] sm:$0xff] }
 0x8d3   :  { %12337 = vmatprep.subr.mxu1 %v14478_v24 }
 0x8d4   :  { %12338 = vmatpush3.msra.mxu1 %v14478_v24  ;;  %v14505_v24 = vld [vmem:[%s19543_s1 + $0x240] sm:$0xff] }
 0x8d5   :  { %12339 = vmatprep.subr.mxu1 %v14479_v25 }
 0x8d6   :  { %12340 = vmatpush3.msra.mxu1 %v14479_v25  ;;  %v14506_v25 = vld [vmem:[%s19543_s1 + $0x238] sm:$0xff] }
 0x8d7   :  { %12341 = vmatprep.subr.mxu1 %v14480_v26 }
 0x8d8   :  { %12342 = vmatpush3.msra.mxu1 %v14480_v26  ;;  %v14507_v26 = vld [vmem:[%s19543_s1 + $0x230] sm:$0xff] }
 0x8d9   :  { %12343 = vmatprep.subr.mxu1 %v14481_v27 }
 0x8da   :  { %12344 = vmatpush3.msra.mxu1 %v14481_v27  ;;  %v14508_v27 = vld [vmem:[%s19543_s1 + $0x228] sm:$0xff] }
 0x8db   :  { %12346 = vmatmul.mubr.f32.vlgmr.msra.gmra.mxu1 %v16140_v51 }
 0x8dc   :  { %12348 = vmatprep.mubr.f32.mxu1 %v16146_v42 }
 0x8df   :  { %12349 = vmatmul.mubr.f32.gmra.mxu1 %v16148_v54 }
 0x8e0   :  { %12411 = vmatprep.mubr.msk.f32.mxu1 %vm2057_vm3, %v10045_v62  ;;  %v14525_v62 = vld [vmem:[%s19543_s1 + $0x2a0] sm:$0xff] }
 0x973   :  { %v12295_v29 = vpop.f32.mrf.mxu1 }
 0x975   :  { %v16242_v30 = vpop.f32.mrf.mxu1 }
 0x977   :  { %v12298_v34 = vpop.f32.mrf.mxu1 }
 0x979   :  { %v16244_v40 = vpop.f32.mrf.mxu1 }
 0x97b   :  { %v12309_v43 = vpop.f32.mrf.mxu1 }
 0x97c   :  { %v16246_v44 = vadd.f32 %v12309_v43, %v12295_v29  ;;  %v14510_v29 = vld [vmem:[%s19543_s1 + $0x218] sm:$0xff]  ;;  %v14512_v43 = vld [vmem:[%s19543_s1 + $0x208] sm:$0xff] }
 0x97d   :  { %v16248_v3 = vpop.f32.mrf.mxu1 }
 0x97f   :  { %v12312_v4 = vpop.f32.mrf.mxu1 }
 0x980   :  { %v16250_v35 = vadd.f32 %v12312_v4, %v12298_v34  ;;  %v14511_v34 = vld [vmem:[%s19543_s1 + $0x210] sm:$0xff]  ;;  %v10049_v4 = vld [vmem:[%s19546_s4 + $0x80] sm:$0xff] }
 0x981   :  { %v16252_v8 = vpop.f32.mrf.mxu1 }
 0x99b   :  { %v12347_v31 = vpop.f32.mrf.mxu1 }
 0x99d   :  { %v2318_v63 = vpop.f32.mrf.mxu1 }
 0x99f   :  { %v12350_v38 = vpop.f32.mrf.mxu1 }
 0x9a0   :  { %12351 = vmatprep.subr.mxu0 %v12350_v38 }
 0x9a1   :  { %v2328_v32 = vpop.f32.mrf.mxu1  ;;  %12352 = vmatpush3.msra.mxu0 %v12350_v38 }
 0x9a2   :  { %12353 = vmatprep.subr.mxu0 %v2328_v32 }
 0x9a3   :  { %12354 = vmatpush3.msra.mxu0 %v2328_v32 }
 0x9a4   :  { %12355 = vmatprep.subr.mxu0 %v12347_v31 }
 0x9a5   :  { %12356 = vmatpush3.msra.mxu0 %v12347_v31 }
 0x9a6   :  { %12357 = vmatprep.subr.mxu0 %v2318_v63 }
 0x9a7   :  { %12358 = vmatpush3.msra.mxu0 %v2318_v63 }
 0x9a8   :  { %12360 = vmatmul.mubr.msk.f32.vlgmr.msra.gmra.mxu0 %vm2057_vm3, %v10042_v45  ;;  %12365 = vmatprep.subr.mxu0 %v14482_v46 }
 0x9a9   :  { %12366 = vmatpush3.msra.mxu0 %v14482_v46  ;;  %12362 = vmatprep.mubr.msk.f32.mxu0 %vm2057_vm3, %v10043_v5 }
 0x9aa   :  { %12367 = vmatprep.subr.mxu0 %v14483_v47 }
 0x9ab   :  { %12368 = vmatpush3.msra.mxu0 %v14483_v47 }
 0x9ac   :  { %12363 = vmatmul.mubr.msk.f32.gmra.mxu0 %vm2057_vm3, %v10044_v0  ;;  %12369 = vmatprep.subr.mxu0 %v14484_v37 }
 0x9ad   :  { %12370 = vmatpush3.msra.mxu0 %v14484_v37  ;;  %12397 = vmatprep.mubr.f32.mxu0 %v16138_v7  ;;  %v10050_v37 = vld [vmem:[%s19546_s4 + $0x88] sm:$0xff] }
 0x9ae   :  { %12371 = vmatprep.subr.mxu0 %v14485_v39 }
 0x9af   :  { %12372 = vmatpush3.msra.mxu0 %v14485_v39  ;;  %v10051_v39 = vld [vmem:[%s19546_s4 + $0x90] sm:$0xff] }
 0x9b0   :  { %12373 = vmatprep.subr.mxu0 %v14486_v48 }
 0x9b1   :  { %12374 = vmatpush3.msra.mxu0 %v14486_v48  ;;  %v14514_v48 = vld [vmem:[%s19543_s1 + $0x2f8] sm:$0xff] }
 0x9b2   :  { %12375 = vmatprep.subr.mxu0 %v14487_v49 }
 0x9b3   :  { %12376 = vmatpush3.msra.mxu0 %v14487_v49  ;;  %v10052_v49 = vld [vmem:[%s19546_s4 + $0x98] sm:$0xff] }
 0x9b4   :  { %12377 = vmatprep.subr.mxu0 %v14488_v50 }
 0x9b5   :  { %12378 = vmatpush3.msra.mxu0 %v14488_v50  ;;  %v14515_v50 = vld [vmem:[%s19543_s1 + $0x2f0] sm:$0xff] }
 0x9b6   :  { %12379 = vmatprep.subr.mxu0 %v14489_v52 }
 0x9b7   :  { %12380 = vmatpush3.msra.mxu0 %v14489_v52  ;;  %v14516_v52 = vld [vmem:[%s19543_s1 + $0x2e8] sm:$0xff] }
 0x9b8   :  { %12381 = vmatprep.subr.mxu0 %v14490_v53 }
 0x9b9   :  { %12382 = vmatpush3.msra.mxu0 %v14490_v53  ;;  %v14517_v53 = vld [vmem:[%s19543_s1 + $0x2e0] sm:$0xff] }
 0x9ba   :  { %12383 = vmatprep.subr.mxu0 %v14491_v55 }
 0x9bb   :  { %12384 = vmatpush3.msra.mxu0 %v14491_v55  ;;  %v14518_v55 = vld [vmem:[%s19543_s1 + $0x2d8] sm:$0xff] }
 0x9bc   :  { %12385 = vmatprep.subr.mxu0 %v14492_v56 }
 0x9bd   :  { %12386 = vmatpush3.msra.mxu0 %v14492_v56  ;;  %v14519_v56 = vld [vmem:[%s19543_s1 + $0x2d0] sm:$0xff] }
 0x9be   :  { %12387 = vmatprep.subr.mxu0 %v14493_v57 }
 0x9bf   :  { %12388 = vmatpush3.msra.mxu0 %v14493_v57  ;;  %v14520_v57 = vld [vmem:[%s19543_s1 + $0x2c8] sm:$0xff] }
 0x9c0   :  { %12389 = vmatprep.subr.mxu0 %v14494_v58 }
 0x9c1   :  { %12390 = vmatpush3.msra.mxu0 %v14494_v58  ;;  %v14521_v58 = vld [vmem:[%s19543_s1 + $0x2c0] sm:$0xff] }
 0x9c2   :  { %12391 = vmatprep.subr.mxu0 %v14495_v59 }
 0x9c3   :  { %12392 = vmatpush3.msra.mxu0 %v14495_v59  ;;  %v14522_v59 = vld [vmem:[%s19543_s1 + $0x2b8] sm:$0xff] }
 0x9c4   :  { %12393 = vmatprep.subr.mxu0 %v14496_v60 }
 0x9c5   :  { %12394 = vmatpush3.msra.mxu0 %v14496_v60  ;;  %v14523_v60 = vld [vmem:[%s19543_s1 + $0x2b0] sm:$0xff] }
 0x9c6   :  { %12395 = vmatprep.subr.mxu0 %v14497_v61 }
 0x9c7   :  { %12396 = vmatpush3.msra.mxu0 %v14497_v61  ;;  %v14524_v61 = vld [vmem:[%s19543_s1 + $0x2a8] sm:$0xff] }
 0x9c8   :  { %12398 = vmatmul.mubr.f32.vlgmr.msra.gmra.mxu0 %v16140_v51 }
 0x9c9   :  { %12400 = vmatprep.mubr.f32.mxu0 %v16146_v42 }
 0x9cc   :  { %12401 = vmatmul.mubr.f32.gmra.mxu0 %v16148_v54 }
 0x9cd   :  { %12463 = vmatprep.mubr.msk.f32.mxu0 %vm2057_vm3, %v10049_v4  ;;  %v14539_v4 = vld [vmem:[%s19543_s1 + $0x330] sm:$0xff] }
 0xa68   :  { %v12361_v1 = vpop.f32.mrf.mxu0 }
 0xa69   :  { %v16323_v6 = vadd.f32 %v12361_v1, %v16246_v44  ;;  %v14513_v44 = vld [vmem:[%s19543_s1 + $0x200] sm:$0xff]  ;;  %v14526_v1 = vld [vmem:[%s19543_s1 + $0x298] sm:$0xff] }
 0xa6a   :  { %v16325_v36 = vpop.f32.mrf.mxu0 }
 0xa6c   :  { %v12364_v9 = vpop.f32.mrf.mxu0 }
 0xa6d   :  { %v16328_v41 = vadd.f32 %v12364_v9, %v16250_v35  ;;  %v14528_v9 = vld [vmem:[%s19543_s1 + $0x288] sm:$0xff] }
 0xa6e   :  { %v16330_v10 = vpop.f32.mrf.mxu0 }
 0xa88   :  { %v12399_v33 = vpop.f32.mrf.mxu0 }
 0xa8a   :  { %v2504_v11 = vpop.f32.mrf.mxu0 }
 0xa8c   :  { %v12402_v12 = vpop.f32.mrf.mxu0 }
 0xa8d   :  { %12403 = vmatprep.subr.mxu1 %v12402_v12 }
 0xa8e   :  { %v2514_v13 = vpop.f32.mrf.mxu0  ;;  %12404 = vmatpush3.msra.mxu1 %v12402_v12 }
 0xa8f   :  { %12405 = vmatprep.subr.mxu1 %v2514_v13 }
 0xa90   :  { %12406 = vmatpush3.msra.mxu1 %v2514_v13 }
 0xa91   :  { %12407 = vmatprep.subr.mxu1 %v12399_v33 }
 0xa92   :  { %12408 = vmatpush3.msra.mxu1 %v12399_v33  ;;  %v10053_v33 = vld [vmem:[%s19546_s4 + $0xa0] sm:$0xff] }
 0xa93   :  { %12409 = vmatprep.subr.mxu1 %v2504_v11 }
 0xa94   :  { %12410 = vmatpush3.msra.mxu1 %v2504_v11 }
 0xa95   :  { %12412 = vmatmul.mubr.msk.f32.vlgmr.msra.gmra.mxu1 %vm2057_vm3, %v10046_v14  ;;  %12417 = vmatprep.subr.mxu1 %v14498_v16 }
 0xa96   :  { %12418 = vmatpush3.msra.mxu1 %v14498_v16  ;;  %12414 = vmatprep.mubr.msk.f32.mxu1 %vm2057_vm3, %v10047_v15 }
 0xa97   :  { %12419 = vmatprep.subr.mxu1 %v14499_v18 }
 0xa98   :  { %12420 = vmatpush3.msra.mxu1 %v14499_v18 }
 0xa99   :  { %12415 = vmatmul.mubr.msk.f32.gmra.mxu1 %vm2057_vm3, %v10048_v17  ;;  %12421 = vmatprep.subr.mxu1 %v14500_v19 }
 0xa9a   :  { %12422 = vmatpush3.msra.mxu1 %v14500_v19  ;;  %12449 = vmatprep.mubr.f32.mxu1 %v16138_v7 }
 0xa9b   :  { %12423 = vmatprep.subr.mxu1 %v14501_v20 }
 0xa9c   :  { %12424 = vmatpush3.msra.mxu1 %v14501_v20 }
 0xa9d   :  { %12425 = vmatprep.subr.mxu1 %v14502_v21 }
 0xa9e   :  { %12426 = vmatpush3.msra.mxu1 %v14502_v21  ;;  %v10054_v21 = vld [vmem:[%s19546_s4 + $0xa8] sm:$0xff] }
 0xa9f   :  { %12427 = vmatprep.subr.mxu1 %v14503_v22 }
 0xaa0   :  { %12428 = vmatpush3.msra.mxu1 %v14503_v22  ;;  %v10055_v22 = vld [vmem:[%s19546_s4 + $0xb0] sm:$0xff] }
 0xaa1   :  { %12429 = vmatprep.subr.mxu1 %v14504_v23 }
 0xaa2   :  { %12430 = vmatpush3.msra.mxu1 %v14504_v23  ;;  %v14530_v23 = vld [vmem:[%s19543_s1 + $0x378] sm:$0xff] }
 0xaa3   :  { %12431 = vmatprep.subr.mxu1 %v14505_v24 }
 0xaa4   :  { %12432 = vmatpush3.msra.mxu1 %v14505_v24  ;;  %v10056_v24 = vld [vmem:[%s19546_s4 + $0xb8] sm:$0xff] }
 0xaa5   :  { %12433 = vmatprep.subr.mxu1 %v14506_v25 }
 0xaa6   :  { %12434 = vmatpush3.msra.mxu1 %v14506_v25  ;;  %v14531_v25 = vld [vmem:[%s19543_s1 + $0x370] sm:$0xff] }
 0xaa7   :  { %12435 = vmatprep.subr.mxu1 %v14507_v26 }
 0xaa8   :  { %12436 = vmatpush3.msra.mxu1 %v14507_v26  ;;  %v14532_v26 = vld [vmem:[%s19543_s1 + $0x368] sm:$0xff] }
 0xaa9   :  { %12437 = vmatprep.subr.mxu1 %v14508_v27 }
 0xaaa   :  { %12438 = vmatpush3.msra.mxu1 %v14508_v27  ;;  %v14533_v27 = vld [vmem:[%s19543_s1 + $0x360] sm:$0xff] }
 0xaab   :  { %12439 = vmatprep.subr.mxu1 %v14509_v28 }
 0xaac   :  { %12440 = vmatpush3.msra.mxu1 %v14509_v28  ;;  %v14534_v28 = vld [vmem:[%s19543_s1 + $0x358] sm:$0xff] }
 0xaad   :  { %12441 = vmatprep.subr.mxu1 %v14510_v29 }
 0xaae   :  { %12442 = vmatpush3.msra.mxu1 %v14510_v29  ;;  %v14535_v29 = vld [vmem:[%s19543_s1 + $0x350] sm:$0xff] }
 0xaaf   :  { %12443 = vmatprep.subr.mxu1 %v14511_v34 }
 0xab0   :  { %12444 = vmatpush3.msra.mxu1 %v14511_v34  ;;  %v14536_v34 = vld [vmem:[%s19543_s1 + $0x348] sm:$0xff] }
 0xab1   :  { %12445 = vmatprep.subr.mxu1 %v14512_v43 }
 0xab2   :  { %12446 = vmatpush3.msra.mxu1 %v14512_v43  ;;  %v14537_v43 = vld [vmem:[%s19543_s1 + $0x340] sm:$0xff] }
 0xab3   :  { %12447 = vmatprep.subr.mxu1 %v14513_v44 }
 0xab4   :  { %12448 = vmatpush3.msra.mxu1 %v14513_v44  ;;  %v14538_v44 = vld [vmem:[%s19543_s1 + $0x338] sm:$0xff] }
 0xab5   :  { %12450 = vmatmul.mubr.f32.vlgmr.msra.gmra.mxu1 %v16140_v51 }
 0xab6   :  { %12452 = vmatprep.mubr.f32.mxu1 %v16146_v42 }
 0xab9   :  { %12453 = vmatmul.mubr.f32.gmra.mxu1 %v16148_v54 }
 0xaba   :  { %12515 = vmatprep.mubr.msk.f32.mxu1 %vm2057_vm3, %v10053_v33  ;;  %v14553_v33 = vld [vmem:[%s19543_s1 + $0x3c0] sm:$0xff] }
 0xb55   :  { %v12413_v35 = vpop.f32.mrf.mxu1 }
 0xb56   :  { %v16401_v31 = vadd.f32 %v12413_v35, %v16323_v6  ;;  %v14527_v6 = vld [vmem:[%s19543_s1 + $0x290] sm:$0xff]  ;;  %v14540_v35 = vld [vmem:[%s19543_s1 + $0x328] sm:$0xff] }
 0xb57   :  { %v16403_v63 = vpop.f32.mrf.mxu1 }
 0xb59   :  { %v12416_v38 = vpop.f32.mrf.mxu1 }
 0xb5a   :  { %v16406_v32 = vadd.f32 %v12416_v38, %v16328_v41  ;;  %v14529_v41 = vld [vmem:[%s19543_s1 + $0x280] sm:$0xff]  ;;  %v14542_v38 = vld [vmem:[%s19543_s1 + $0x318] sm:$0xff] }
 0xb5b   :  { %v16408_v45 = vpop.f32.mrf.mxu1 }
 0xb75   :  { %v12451_v5 = vpop.f32.mrf.mxu1 }
 0xb77   :  { %v2690_v46 = vpop.f32.mrf.mxu1 }
 0xb79   :  { %v12454_v0 = vpop.f32.mrf.mxu1 }
 0xb7a   :  { %12455 = vmatprep.subr.mxu0 %v12454_v0 }
 0xb7b   :  { %v2700_v47 = vpop.f32.mrf.mxu1  ;;  %12456 = vmatpush3.msra.mxu0 %v12454_v0  ;;  %v10057_v0 = vld [vmem:[%s19546_s4 + $0xc0] sm:$0xff] }
 0xb7c   :  { %12457 = vmatprep.subr.mxu0 %v2700_v47 }
 0xb7d   :  { %12458 = vmatpush3.msra.mxu0 %v2700_v47 }
 0xb7e   :  { %12459 = vmatprep.subr.mxu0 %v12451_v5 }
 0xb7f   :  { %12460 = vmatpush3.msra.mxu0 %v12451_v5  ;;  %v14544_v5 = vld [vmem:[%s19543_s1 + $0x308] sm:$0xff] }
 0xb80   :  { %12461 = vmatprep.subr.mxu0 %v2690_v46 }
 0xb81   :  { %12462 = vmatpush3.msra.mxu0 %v2690_v46  ;;  %v14545_v46 = vld [vmem:[%s19543_s1 + $0x300] sm:$0xff] }
 0xb82   :  { %12464 = vmatmul.mubr.msk.f32.vlgmr.msra.gmra.mxu0 %vm2057_vm3, %v10050_v37  ;;  %12469 = vmatprep.subr.mxu0 %v14514_v48 }
 0xb83   :  { %12470 = vmatpush3.msra.mxu0 %v14514_v48  ;;  %12466 = vmatprep.mubr.msk.f32.mxu0 %vm2057_vm3, %v10051_v39 }
 0xb84   :  { %12471 = vmatprep.subr.mxu0 %v14515_v50 }
 0xb85   :  { %12472 = vmatpush3.msra.mxu0 %v14515_v50 }
 0xb86   :  { %12467 = vmatmul.mubr.msk.f32.gmra.mxu0 %vm2057_vm3, %v10052_v49  ;;  %12473 = vmatprep.subr.mxu0 %v14516_v52 }
 0xb87   :  { %12474 = vmatpush3.msra.mxu0 %v14516_v52  ;;  %12501 = vmatprep.mubr.f32.mxu0 %v16138_v7 }
 0xb88   :  { %12475 = vmatprep.subr.mxu0 %v14517_v53 }
 0xb89   :  { %12476 = vmatpush3.msra.mxu0 %v14517_v53 }
 0xb8a   :  { %12477 = vmatprep.subr.mxu0 %v14518_v55 }
 0xb8b   :  { %12478 = vmatpush3.msra.mxu0 %v14518_v55 }
 0xb8c   :  { %12479 = vmatprep.subr.mxu0 %v14519_v56 }
 0xb8d   :  { %12480 = vmatpush3.msra.mxu0 %v14519_v56 }
 0xb8e   :  { %12481 = vmatprep.subr.mxu0 %v14520_v57 }
 0xb8f   :  { %12482 = vmatpush3.msra.mxu0 %v14520_v57  ;;  %v10058_v57 = vld [vmem:[%s19546_s4 + $0xc8] sm:$0xff] }
 0xb90   :  { %12483 = vmatprep.subr.mxu0 %v14521_v58 }
 0xb91   :  { %12484 = vmatpush3.msra.mxu0 %v14521_v58  ;;  %v10059_v58 = vld [vmem:[%s19546_s4 + $0xd0] sm:$0xff] }
 0xb92   :  { %12485 = vmatprep.subr.mxu0 %v14522_v59 }
 0xb93   :  { %12486 = vmatpush3.msra.mxu0 %v14522_v59  ;;  %v14546_v59 = vld [vmem:[%s19543_s1 + $0x3f8] sm:$0xff] }
 0xb94   :  { %12487 = vmatprep.subr.mxu0 %v14523_v60 }
 0xb95   :  { %12488 = vmatpush3.msra.mxu0 %v14523_v60  ;;  %v10060_v60 = vld [vmem:[%s19546_s4 + $0xd8] sm:$0xff] }
 0xb96   :  { %12489 = vmatprep.subr.mxu0 %v14524_v61 }
 0xb97   :  { %12490 = vmatpush3.msra.mxu0 %v14524_v61  ;;  %v14547_v61 = vld [vmem:[%s19543_s1 + $0x3f0] sm:$0xff] }
 0xb98   :  { %12491 = vmatprep.subr.mxu0 %v14525_v62 }
 0xb99   :  { %12492 = vmatpush3.msra.mxu0 %v14525_v62  ;;  %v14548_v62 = vld [vmem:[%s19543_s1 + $0x3e8] sm:$0xff] }
 0xb9a   :  { %12493 = vmatprep.subr.mxu0 %v14526_v1 }
 0xb9b   :  { %12494 = vmatpush3.msra.mxu0 %v14526_v1  ;;  %v14549_v1 = vld [vmem:[%s19543_s1 + $0x3e0] sm:$0xff] }
 0xb9c   :  { %12495 = vmatprep.subr.mxu0 %v14527_v6 }
 0xb9d   :  { %12496 = vmatpush3.msra.mxu0 %v14527_v6  ;;  %v14550_v6 = vld [vmem:[%s19543_s1 + $0x3d8] sm:$0xff] }
 0xb9e   :  { %12497 = vmatprep.subr.mxu0 %v14528_v9 }
 0xb9f   :  { %12498 = vmatpush3.msra.mxu0 %v14528_v9  ;;  %v14551_v9 = vld [vmem:[%s19543_s1 + $0x3d0] sm:$0xff] }
 0xba0   :  { %12499 = vmatprep.subr.mxu0 %v14529_v41 }
 0xba1   :  { %12500 = vmatpush3.msra.mxu0 %v14529_v41  ;;  %v14552_v41 = vld [vmem:[%s19543_s1 + $0x3c8] sm:$0xff] }
 0xba2   :  { %12502 = vmatmul.mubr.f32.vlgmr.msra.gmra.mxu0 %v16140_v51 }
 0xba3   :  { %12504 = vmatprep.mubr.f32.mxu0 %v16146_v42 }
 0xba6   :  { %12505 = vmatmul.mubr.f32.gmra.mxu0 %v16148_v54 }
 0xba7   :  { %12567 = vmatprep.mubr.msk.f32.mxu0 %vm2057_vm3, %v10057_v0  ;;  %v14567_v0 = vld [vmem:[%s19543_s1 + $0x450] sm:$0xff] }
 0xc42   :  { %v12465_v11 = vpop.f32.mrf.mxu0 }
 0xc43   :  { %v16479_v12 = vadd.f32 %v12465_v11, %v16401_v31  ;;  %v14541_v31 = vld [vmem:[%s19543_s1 + $0x320] sm:$0xff]  ;;  %v14554_v11 = vld [vmem:[%s19543_s1 + $0x3b8] sm:$0xff] }
 0xc44   :  { %v16481_v13 = vpop.f32.mrf.mxu0 }
 0xc46   :  { %v12468_v14 = vpop.f32.mrf.mxu0 }
 0xc47   :  { %v16484_v15 = vadd.f32 %v12468_v14, %v16406_v32  ;;  %v14543_v32 = vld [vmem:[%s19543_s1 + $0x310] sm:$0xff]  ;;  %v14556_v14 = vld [vmem:[%s19543_s1 + $0x3a8] sm:$0xff] }
 0xc48   :  { %v16486_v16 = vpop.f32.mrf.mxu0 }
 0xc62   :  { %v12503_v17 = vpop.f32.mrf.mxu0 }
 0xc64   :  { %v2876_v18 = vpop.f32.mrf.mxu0 }
 0xc66   :  { %v12506_v19 = vpop.f32.mrf.mxu0 }
 0xc67   :  { %12507 = vmatprep.subr.mxu1 %v12506_v19 }
 0xc68   :  { %v2886_v20 = vpop.f32.mrf.mxu0  ;;  %12508 = vmatpush3.msra.mxu1 %v12506_v19  ;;  %v14560_v19 = vld [vmem:[%s19543_s1 + $0x388] sm:$0xff] }
 0xc69   :  { %12509 = vmatprep.subr.mxu1 %v2886_v20 }
 0xc6a   :  { %12510 = vmatpush3.msra.mxu1 %v2886_v20  ;;  %v14561_v20 = vld [vmem:[%s19543_s1 + $0x380] sm:$0xff] }
 0xc6b   :  { %12511 = vmatprep.subr.mxu1 %v12503_v17 }
 0xc6c   :  { %12512 = vmatpush3.msra.mxu1 %v12503_v17  ;;  %v14558_v17 = vld [vmem:[%s19543_s1 + $0x398] sm:$0xff] }
 0xc6d   :  { %12513 = vmatprep.subr.mxu1 %v2876_v18 }
 0xc6e   :  { %12514 = vmatpush3.msra.mxu1 %v2876_v18  ;;  %v14559_v18 = vld [vmem:[%s19543_s1 + $0x390] sm:$0xff] }
 0xc6f   :  { %12516 = vmatmul.mubr.msk.f32.vlgmr.msra.gmra.mxu1 %vm2057_vm3, %v10054_v21  ;;  %12521 = vmatprep.subr.mxu1 %v14530_v23  ;;  %v10061_v21 = vld [vmem:[%s19546_s4 + $0xe0] sm:$0xff] }
 0xc70   :  { %12522 = vmatpush3.msra.mxu1 %v14530_v23  ;;  %12518 = vmatprep.mubr.msk.f32.mxu1 %vm2057_vm3, %v10055_v22 }
 0xc71   :  { %12523 = vmatprep.subr.mxu1 %v14531_v25 }
 0xc72   :  { %12524 = vmatpush3.msra.mxu1 %v14531_v25 }
 0xc73   :  { %12519 = vmatmul.mubr.msk.f32.gmra.mxu1 %vm2057_vm3, %v10056_v24  ;;  %12525 = vmatprep.subr.mxu1 %v14532_v26 }
 0xc74   :  { %12526 = vmatpush3.msra.mxu1 %v14532_v26  ;;  %12553 = vmatprep.mubr.f32.mxu1 %v16138_v7 }
 0xc75   :  { %12527 = vmatprep.subr.mxu1 %v14533_v27 }
 0xc76   :  { %12528 = vmatpush3.msra.mxu1 %v14533_v27 }
 0xc77   :  { %12529 = vmatprep.subr.mxu1 %v14534_v28 }
 0xc78   :  { %12530 = vmatpush3.msra.mxu1 %v14534_v28 }
 0xc79   :  { %12531 = vmatprep.subr.mxu1 %v14535_v29 }
 0xc7a   :  { %12532 = vmatpush3.msra.mxu1 %v14535_v29 }
 0xc7b   :  { %12533 = vmatprep.subr.mxu1 %v14536_v34 }
 0xc7c   :  { %12534 = vmatpush3.msra.mxu1 %v14536_v34 }
 0xc7d   :  { %12535 = vmatprep.subr.mxu1 %v14537_v43 }
 0xc7e   :  { %12536 = vmatpush3.msra.mxu1 %v14537_v43 }
 0xc7f   :  { %12537 = vmatprep.subr.mxu1 %v14538_v44 }
 0xc80   :  { %12538 = vmatpush3.msra.mxu1 %v14538_v44  ;;  %v10062_v44 = vld [vmem:[%s19546_s4 + $0xe8] sm:$0xff] }
 0xc81   :  { %12539 = vmatprep.subr.mxu1 %v14539_v4 }
 0xc82   :  { %12540 = vmatpush3.msra.mxu1 %v14539_v4  ;;  %v10063_v4 = vld [vmem:[%s19546_s4 + $0xf0] sm:$0xff] }
 0xc83   :  { %12541 = vmatprep.subr.mxu1 %v14540_v35 }
 0xc84   :  { %12542 = vmatpush3.msra.mxu1 %v14540_v35  ;;  %v14562_v35 = vld [vmem:[%s19543_s1 + $0x478] sm:$0xff] }
 0xc85   :  { %12543 = vmatprep.subr.mxu1 %v14541_v31 }
 0xc86   :  { %12544 = vmatpush3.msra.mxu1 %v14541_v31  ;;  %v10064_v31 = vld [vmem:[%s19546_s4 + $0xf8] sm:$0xff] }
 0xc87   :  { %12545 = vmatprep.subr.mxu1 %v14542_v38 }
 0xc88   :  { %12546 = vmatpush3.msra.mxu1 %v14542_v38  ;;  %v14563_v38 = vld [vmem:[%s19543_s1 + $0x470] sm:$0xff] }
 0xc89   :  { %12547 = vmatprep.subr.mxu1 %v14543_v32 }
 0xc8a   :  { %12548 = vmatpush3.msra.mxu1 %v14543_v32  ;;  %v14564_v32 = vld [vmem:[%s19543_s1 + $0x468] sm:$0xff] }
 0xc8b   :  { %12549 = vmatprep.subr.mxu1 %v14544_v5 }
 0xc8c   :  { %12550 = vmatpush3.msra.mxu1 %v14544_v5  ;;  %v14565_v5 = vld [vmem:[%s19543_s1 + $0x460] sm:$0xff] }
 0xc8d   :  { %12551 = vmatprep.subr.mxu1 %v14545_v46 }
 0xc8e   :  { %12552 = vmatpush3.msra.mxu1 %v14545_v46  ;;  %v14566_v46 = vld [vmem:[%s19543_s1 + $0x458] sm:$0xff] }
 0xc8f   :  { %12554 = vmatmul.mubr.f32.vlgmr.msra.gmra.mxu1 %v16140_v51 }
 0xc90   :  { %12556 = vmatprep.mubr.f32.mxu1 %v16146_v42 }
 0xc93   :  { %12557 = vmatmul.mubr.f32.gmra.mxu1 %v16148_v54 }
 0xc94   :  { %12619 = vmatprep.mubr.msk.f32.mxu1 %vm2057_vm3, %v10061_v21 }
 0xd2f   :  { %v12517_v47 = vpop.f32.mrf.mxu1 }
 0xd30   :  { %v16557_v37 = vadd.f32 %v12517_v47, %v16479_v12  ;;  %v14555_v12 = vld [vmem:[%s19543_s1 + $0x3b0] sm:$0xff]  ;;  %v14568_v47 = vld [vmem:[%s19543_s1 + $0x448] sm:$0xff] }
 0xd31   :  { %v16559_v39 = vpop.f32.mrf.mxu1 }
 0xd33   :  { %v12520_v48 = vpop.f32.mrf.mxu1 }
 0xd34   :  { %v16562_v49 = vadd.f32 %v12520_v48, %v16484_v15  ;;  %v14557_v15 = vld [vmem:[%s19543_s1 + $0x3a0] sm:$0xff]  ;;  %v14570_v48 = vld [vmem:[%s19543_s1 + $0x438] sm:$0xff] }
 0xd35   :  { %v16564_v50 = vpop.f32.mrf.mxu1 }
 0xd4f   :  { %v12555_v52 = vpop.f32.mrf.mxu1 }
 0xd51   :  { %v3062_v53 = vpop.f32.mrf.mxu1 }
 0xd53   :  { %v12558_v55 = vpop.f32.mrf.mxu1 }
 0xd54   :  { %12559 = vmatprep.subr.mxu0 %v12558_v55 }
 0xd55   :  { %v3072_v56 = vpop.f32.mrf.mxu1  ;;  %12560 = vmatpush3.msra.mxu0 %v12558_v55  ;;  %v14574_v55 = vld [vmem:[%s19543_s1 + $0x418] sm:$0xff] }
 0xd56   :  { %12561 = vmatprep.subr.mxu0 %v3072_v56 }
 0xd57   :  { %12562 = vmatpush3.msra.mxu0 %v3072_v56  ;;  %v14575_v56 = vld [vmem:[%s19543_s1 + $0x410] sm:$0xff] }
 0xd58   :  { %12563 = vmatprep.subr.mxu0 %v12555_v52 }
 0xd59   :  { %12564 = vmatpush3.msra.mxu0 %v12555_v52  ;;  %v14572_v52 = vld [vmem:[%s19543_s1 + $0x428] sm:$0xff] }
 0xd5a   :  { %12565 = vmatprep.subr.mxu0 %v3062_v53 }
 0xd5b   :  { %12566 = vmatpush3.msra.mxu0 %v3062_v53  ;;  %v14573_v53 = vld [vmem:[%s19543_s1 + $0x420] sm:$0xff] }
 0xd5c   :  { %12568 = vmatmul.mubr.msk.f32.vlgmr.msra.gmra.mxu0 %vm2057_vm3, %v10058_v57  ;;  %12573 = vmatprep.subr.mxu0 %v14546_v59  ;;  %v14576_v57 = vld [vmem:[%s19543_s1 + $0x408] sm:$0xff] }
 0xd5d   :  { %12574 = vmatpush3.msra.mxu0 %v14546_v59  ;;  %12570 = vmatprep.mubr.msk.f32.mxu0 %vm2057_vm3, %v10059_v58  ;;  %v14577_v58 = vld [vmem:[%s19543_s1 + $0x400] sm:$0xff]  ;;  %v14578_v59 = vld [vmem:[%s19543_s1 + $0xf8] sm:$0xff] }
 0xd5e   :  { %12575 = vmatprep.subr.mxu0 %v14547_v61 }
 0xd5f   :  { %12576 = vmatpush3.msra.mxu0 %v14547_v61  ;;  %v14580_v61 = vld [vmem:[%s19543_s1 + $0xe8] sm:$0xff] }
 0xd60   :  { %12571 = vmatmul.mubr.msk.f32.gmra.mxu0 %vm2057_vm3, %v10060_v60  ;;  %12577 = vmatprep.subr.mxu0 %v14548_v62  ;;  %v14579_v60 = vld [vmem:[%s19543_s1 + $0xf0] sm:$0xff] }
 0xd61   :  { %12578 = vmatpush3.msra.mxu0 %v14548_v62  ;;  %12605 = vmatprep.mubr.f32.mxu0 %v16138_v7  ;;  %v14581_v62 = vld [vmem:[%s19543_s1 + $0xe0] sm:$0xff] }
 0xd62   :  { %12579 = vmatprep.subr.mxu0 %v14549_v1 }
 0xd63   :  { %12580 = vmatpush3.msra.mxu0 %v14549_v1  ;;  %v14582_v1 = vld [vmem:[%s19543_s1 + $0xd8] sm:$0xff] }
 0xd64   :  { %12581 = vmatprep.subr.mxu0 %v14550_v6 }
 0xd65   :  { %12582 = vmatpush3.msra.mxu0 %v14550_v6  ;;  %v14583_v6 = vld [vmem:[%s19543_s1 + $0xd0] sm:$0xff] }
 0xd66   :  { %12583 = vmatprep.subr.mxu0 %v14551_v9 }
 0xd67   :  { %12584 = vmatpush3.msra.mxu0 %v14551_v9  ;;  %v14584_v9 = vld [vmem:[%s19543_s1 + $0xc8] sm:$0xff] }
 0xd68   :  { %12585 = vmatprep.subr.mxu0 %v14552_v41 }
 0xd69   :  { %12586 = vmatpush3.msra.mxu0 %v14552_v41  ;;  %v14585_v41 = vld [vmem:[%s19543_s1 + $0xc0] sm:$0xff] }
 0xd6a   :  { %12587 = vmatprep.subr.mxu0 %v14553_v33 }
 0xd6b   :  { %12588 = vmatpush3.msra.mxu0 %v14553_v33  ;;  %v14586_v33 = vld [vmem:[%s19543_s1 + $0xb8] sm:$0xff] }
 0xd6c   :  { %12589 = vmatprep.subr.mxu0 %v14554_v11 }
 0xd6d   :  { %12590 = vmatpush3.msra.mxu0 %v14554_v11  ;;  %v14587_v11 = vld [vmem:[%s19543_s1 + $0xb0] sm:$0xff] }
 0xd6e   :  { %12591 = vmatprep.subr.mxu0 %v14555_v12 }
 0xd6f   :  { %12592 = vmatpush3.msra.mxu0 %v14555_v12  ;;  %v14588_v12 = vld [vmem:[%s19543_s1 + $0xa8] sm:$0xff] }
 0xd70   :  { %12593 = vmatprep.subr.mxu0 %v14556_v14 }
 0xd71   :  { %12594 = vmatpush3.msra.mxu0 %v14556_v14  ;;  %v14589_v14 = vld [vmem:[%s19543_s1 + $0xa0] sm:$0xff] }
 0xd72   :  { %12595 = vmatprep.subr.mxu0 %v14557_v15 }
 0xd73   :  { %12596 = vmatpush3.msra.mxu0 %v14557_v15  ;;  %v14590_v15 = vld [vmem:[%s19543_s1 + $0x98] sm:$0xff] }
 0xd74   :  { %12597 = vmatprep.subr.mxu0 %v14558_v17 }
 0xd75   :  { %12598 = vmatpush3.msra.mxu0 %v14558_v17  ;;  %v14591_v17 = vld [vmem:[%s19543_s1 + $0x90] sm:$0xff] }
 0xd76   :  { %12599 = vmatprep.subr.mxu0 %v14559_v18 }
 0xd77   :  { %12600 = vmatpush3.msra.mxu0 %v14559_v18  ;;  %v14592_v18 = vld [vmem:[%s19543_s1 + $0x88] sm:$0xff] }
 0xd78   :  { %12601 = vmatprep.subr.mxu0 %v14560_v19 }
 0xd79   :  { %12602 = vmatpush3.msra.mxu0 %v14560_v19  ;;  %v14593_v19 = vld [vmem:[%s19543_s1 + $0x80] sm:$0xff] }
 0xd7a   :  { %12603 = vmatprep.subr.mxu0 %v14561_v20 }
 0xd7b   :  { %12604 = vmatpush3.msra.mxu0 %v14561_v20  ;;  %v10065_v20 = vld [vmem:[%s19546_s4 + $0x100] sm:$0xff] }
 0xd7c   :  { %12606 = vmatmul.mubr.f32.vlgmr.msra.gmra.mxu0 %v16140_v51 }
 0xd7d   :  { %12608 = vmatprep.mubr.f32.mxu0 %v16146_v42 }
 0xd80   :  { %12609 = vmatmul.mubr.f32.gmra.mxu0 %v16148_v54 }
 0xd81   :  { %12671 = vmatprep.mubr.msk.f32.mxu0 %vm2057_vm3, %v10065_v20 }
 0xe1c   :  { %v12569_v22 = vpop.f32.mrf.mxu0 }
 0xe1d   :  { %v16635_v23 = vadd.f32 %v12569_v22, %v16557_v37  ;;  %v14569_v37 = vld [vmem:[%s19543_s1 + $0x440] sm:$0xff] }
 0xe1e   :  { %v16637_v24 = vpop.f32.mrf.mxu0 }
 0xe20   :  { %v12572_v25 = vpop.f32.mrf.mxu0 }
 0xe21   :  { %v16640_v26 = vadd.f32 %v12572_v25, %v16562_v49  ;;  %v14571_v49 = vld [vmem:[%s19543_s1 + $0x430] sm:$0xff] }
 0xe22   :  { %v16642_v27 = vpop.f32.mrf.mxu0 }
 0xe3c   :  { %v12607_v28 = vpop.f32.mrf.mxu0 }
 0xe3e   :  { %v3248_v29 = vpop.f32.mrf.mxu0 }
 0xe40   :  { %v12610_v34 = vpop.f32.mrf.mxu0 }
 0xe41   :  { %12611 = vmatprep.subr.mxu1 %v12610_v34 }
 0xe42   :  { %v3258_v43 = vpop.f32.mrf.mxu0  ;;  %12612 = vmatpush3.msra.mxu1 %v12610_v34 }
 0xe43   :  { %12613 = vmatprep.subr.mxu1 %v3258_v43 }
 0xe44   :  { %12614 = vmatpush3.msra.mxu1 %v3258_v43 }
 0xe45   :  { %12615 = vmatprep.subr.mxu1 %v12607_v28 }
 0xe46   :  { %12616 = vmatpush3.msra.mxu1 %v12607_v28 }
 0xe47   :  { %12617 = vmatprep.subr.mxu1 %v3248_v29 }
 0xe48   :  { %12618 = vmatpush3.msra.mxu1 %v3248_v29 }
 0xe49   :  { %12620 = vmatmul.mubr.msk.f32.vlgmr.msra.gmra.mxu1 %vm2057_vm3, %v10062_v44  ;;  %12625 = vmatprep.subr.mxu1 %v14562_v35 }
 0xe4a   :  { %12626 = vmatpush3.msra.mxu1 %v14562_v35  ;;  %12622 = vmatprep.mubr.msk.f32.mxu1 %vm2057_vm3, %v10063_v4 }
 0xe4b   :  { %12627 = vmatprep.subr.mxu1 %v14563_v38 }
 0xe4c   :  { %12628 = vmatpush3.msra.mxu1 %v14563_v38  ;;  %v10068_v38 = vld [vmem:[%s19546_s4 + $0x118] sm:$0xff] }
 0xe4d   :  { %12623 = vmatmul.mubr.msk.f32.gmra.mxu1 %vm2057_vm3, %v10064_v31  ;;  %12629 = vmatprep.subr.mxu1 %v14564_v32  ;;  %v14594_v31 = vld [vmem:[%s19543_s1 + $0x78] sm:$0xff] }
 0xe4e   :  { %12630 = vmatpush3.msra.mxu1 %v14564_v32  ;;  %12657 = vmatprep.mubr.f32.mxu1 %v16138_v7  ;;  %v14595_v32 = vld [vmem:[%s19543_s1 + $0x70] sm:$0xff] }
 0xe4f   :  { %12631 = vmatprep.subr.mxu1 %v14565_v5 }
 0xe50   :  { %12632 = vmatpush3.msra.mxu1 %v14565_v5  ;;  %v14596_v5 = vld [vmem:[%s19543_s1 + $0x68] sm:$0xff] }
 0xe51   :  { %12633 = vmatprep.subr.mxu1 %v14566_v46 }
 0xe52   :  { %12634 = vmatpush3.msra.mxu1 %v14566_v46  ;;  %v14597_v46 = vld [vmem:[%s19543_s1 + $0x60] sm:$0xff] }
 0xe53   :  { %12635 = vmatprep.subr.mxu1 %v14567_v0 }
 0xe54   :  { %12636 = vmatpush3.msra.mxu1 %v14567_v0  ;;  %v14598_v0 = vld [vmem:[%s19543_s1 + $0x58] sm:$0xff] }
 0xe55   :  { %12637 = vmatprep.subr.mxu1 %v14568_v47 }
 0xe56   :  { %12638 = vmatpush3.msra.mxu1 %v14568_v47  ;;  %v14599_v47 = vld [vmem:[%s19543_s1 + $0x50] sm:$0xff] }
 0xe57   :  { %12639 = vmatprep.subr.mxu1 %v14569_v37 }
 0xe58   :  { %12640 = vmatpush3.msra.mxu1 %v14569_v37  ;;  %v14600_v37 = vld [vmem:[%s19543_s1 + $0x48] sm:$0xff] }
 0xe59   :  { %12641 = vmatprep.subr.mxu1 %v14570_v48 }
 0xe5a   :  { %12642 = vmatpush3.msra.mxu1 %v14570_v48  ;;  %v14601_v48 = vld [vmem:[%s19543_s1 + $0x40] sm:$0xff] }
 0xe5b   :  { %12643 = vmatprep.subr.mxu1 %v14571_v49 }
 0xe5c   :  { %12644 = vmatpush3.msra.mxu1 %v14571_v49  ;;  %v14602_v49 = vld [vmem:[%s19543_s1 + $0x38] sm:$0xff] }
 0xe5d   :  { %12645 = vmatprep.subr.mxu1 %v14572_v52 }
 0xe5e   :  { %12646 = vmatpush3.msra.mxu1 %v14572_v52  ;;  %v14603_v52 = vld [vmem:[%s19543_s1 + $0x30] sm:$0xff] }
 0xe5f   :  { %12647 = vmatprep.subr.mxu1 %v14573_v53 }
 0xe60   :  { %12648 = vmatpush3.msra.mxu1 %v14573_v53  ;;  %v14604_v53 = vld [vmem:[%s19543_s1 + $0x28] sm:$0xff] }
 0xe61   :  { %12649 = vmatprep.subr.mxu1 %v14574_v55 }
 0xe62   :  { %12650 = vmatpush3.msra.mxu1 %v14574_v55  ;;  %v14605_v55 = vld [vmem:[%s19543_s1 + $0x20] sm:$0xff] }
 0xe63   :  { %12651 = vmatprep.subr.mxu1 %v14575_v56 }
 0xe64   :  { %12652 = vmatpush3.msra.mxu1 %v14575_v56  ;;  %v14606_v56 = vld [vmem:[%s19543_s1 + $0x18] sm:$0xff] }
 0xe65   :  { %12653 = vmatprep.subr.mxu1 %v14576_v57 }
 0xe66   :  { %12654 = vmatpush3.msra.mxu1 %v14576_v57  ;;  %v14607_v57 = vld [vmem:[%s19543_s1 + $0x10] sm:$0xff] }
 0xe67   :  { %12655 = vmatprep.subr.mxu1 %v14577_v58 }
 0xe68   :  { %12656 = vmatpush3.msra.mxu1 %v14577_v58  ;;  %v14608_v58 = vld [vmem:[%s19543_s1 + $0x8] sm:$0xff] }
 0xe69   :  { %12658 = vmatmul.mubr.f32.vlgmr.msra.gmra.mxu1 %v16140_v51  ;;  %12715 = vmatprep.subr.mxu1 %v14578_v59 }
 0xe6a   :  { %12660 = vmatprep.mubr.f32.mxu1 %v16146_v42  ;;  %12716 = vmatpush3.msra.mxu1 %v14578_v59  ;;  %v14609_v59 = vld [vmem:[%s19543_s1] sm:$0xff] }
 0xe6b   :  { %12717 = vmatprep.subr.mxu1 %v14579_v60 }
 0xe6c   :  { %12718 = vmatpush3.msra.mxu1 %v14579_v60  ;;  %v2234_v60 = vadd.f32 %v16248_v3, %v16242_v30  ;;  %v3562_v3 = vpop.permute.xlu1 %3561 }
 0xe6d   :  { %12661 = vmatmul.mubr.f32.gmra.mxu1 %v16148_v54  ;;  %12719 = vmatprep.subr.mxu1 %v14580_v61 }
 0xe6e   :  { %12720 = vmatpush3.msra.mxu1 %v14580_v61  ;;  %v2434_v61 = vadd.f32 %v16325_v36, %v2234_v60  ;;  %v14619_v60 = vld [vmem:[%s19543_s1 + $0x130] sm:$0xff] }
 0xe6f   :  { %12721 = vmatprep.subr.mxu1 %v14581_v62 }
 0xe70   :  { %12722 = vmatpush3.msra.mxu1 %v14581_v62  ;;  %v2244_v62 = vadd.f32 %v16252_v8, %v16244_v40 }
 0xe71   :  { %12723 = vmatprep.subr.mxu1 %v14582_v1 }
 0xe72   :  { %12724 = vmatpush3.msra.mxu1 %v14582_v1  ;;  %v2620_v1 = vadd.f32 %v16403_v63, %v2434_v61  ;;  %v3557_v63 = vpop.permute.xlu0 %3556  ;;  %v14620_v61 = vld [vmem:[%s19543_s1 + $0x128] sm:$0xff] }
 0xe73   :  { %12725 = vmatprep.subr.mxu1 %v14583_v6 }
 0xe74   :  { %12726 = vmatpush3.msra.mxu1 %v14583_v6  ;;  %v2436_v6 = vadd.f32 %v16330_v10, %v2244_v62  ;;  %v14621_v62 = vld [vmem:[%s19543_s1 + $0x120] sm:$0xff] }
 0xe75   :  { %12727 = vmatprep.subr.mxu1 %v14584_v9 }
 0xe76   :  { %12728 = vmatpush3.msra.mxu1 %v14584_v9  ;;  %v2806_v9 = vadd.f32 %v16481_v13, %v2620_v1  ;;  %v3567_v20 = vpop.permute.xlu0 %3566  ;;  %v14622_v1 = vld [vmem:[%s19543_s1 + $0x118] sm:$0xff] }
 0xe77   :  { %12729 = vmatprep.subr.mxu1 %v14585_v41 }
 0xe78   :  { %12730 = vmatpush3.msra.mxu1 %v14585_v41  ;;  %v2622_v41 = vadd.f32 %v16408_v45, %v2436_v6  ;;  %v14623_v6 = vld [vmem:[%s19543_s1 + $0x110] sm:$0xff] }
 0xe79   :  { %12731 = vmatprep.subr.mxu1 %v14586_v33 }
 0xe7a   :  { %12732 = vmatpush3.msra.mxu1 %v14586_v33  ;;  %v2992_v33 = vadd.f32 %v16559_v39, %v2806_v9  ;;  %v14624_v9 = vld [vmem:[%s19543_s1 + $0x108] sm:$0xff] }
 0xe7b   :  { %12733 = vmatprep.subr.mxu1 %v14587_v11 }
 0xe7c   :  { %12734 = vmatpush3.msra.mxu1 %v14587_v11  ;;  %v2808_v11 = vadd.f32 %v16486_v16, %v2622_v41  ;;  %v14625_v41 = vld [vmem:[%s19543_s1 + $0x100] sm:$0xff] }
 0xe7d   :  { %12735 = vmatprep.subr.mxu1 %v14588_v12 }
 0xe7e   :  { %12736 = vmatpush3.msra.mxu1 %v14588_v12  ;;  %v3178_v12 = vadd.f32 %v16637_v24, %v2992_v33  ;;  %v2994_v36 = vadd.f32 %v16564_v50, %v2808_v11  ;;  %v10113_v33 = vld [vmem:[%s19546_s4 + $0x160] sm:$0xff] }
 0xe7f   :  { %12737 = vmatprep.subr.mxu1 %v14589_v14 }
 0xe80   :  { %12738 = vmatpush3.msra.mxu1 %v14589_v14  ;;  %v3180_v13 = vadd.f32 %v16642_v27, %v2994_v36 }
 0xe81   :  { %12739 = vmatprep.subr.mxu1 %v14590_v15 }
 0xe82   :  { %12740 = vmatpush3.msra.mxu1 %v14590_v15 }
 0xe83   :  { %12741 = vmatprep.subr.mxu1 %v14591_v17 }
 0xe84   :  { %12742 = vmatpush3.msra.mxu1 %v14591_v17 }
 0xe85   :  { %12743 = vmatprep.subr.mxu1 %v14592_v18 }
 0xe86   :  { %12744 = vmatpush3.msra.mxu1 %v14592_v18  ;;  %v3572_v18 = vpop.permute.xlu1 %3571 }
 0xe87   :  { %12745 = vmatprep.subr.mxu1 %v14593_v19 }
 0xe88   :  { %12746 = vmatpush3.msra.mxu1 %v14593_v19 }
 0xf09   :  { %v12621_v21 = vpop.f32.mrf.mxu1 }
 0xf0a   :  { %v16761_v22 = vadd.f32 %v12621_v21, %v16635_v23  ;;  %v10066_v23 = vld [vmem:[%s19546_s4 + $0x108] sm:$0xff] }
 0xf0b   :  { %v16763_v25 = vpop.f32.mrf.mxu1 }
 0xf0c   :  { %v3364_v40 = vadd.f32 %v16763_v25, %v3178_v12 }
 0xf0d   :  { %v12624_v28 = vpop.f32.mrf.mxu1 }
 0xf0e   :  { %v16766_v29 = vadd.f32 %v12624_v28, %v16640_v26  ;;  %v10067_v26 = vld [vmem:[%s19546_s4 + $0x110] sm:$0xff] }
 0xf0f   :  { %v16768_v34 = vpop.f32.mrf.mxu1 }
 0xf10   :  { %v3366_v39 = vadd.f32 %v16768_v34, %v3180_v13 }
 0xf29   :  { %v12659_v43 = vpop.f32.mrf.mxu1 }
 0xf2b   :  { %v3434_v44 = vpop.f32.mrf.mxu1 }
 0xf2d   :  { %v12662_v4 = vpop.f32.mrf.mxu1 }
 0xf2e   :  { %12663 = vmatprep.subr.mxu0 %v12662_v4 }
 0xf2f   :  { %v3444_v35 = vpop.f32.mrf.mxu1  ;;  %12664 = vmatpush3.msra.mxu0 %v12662_v4 }
 0xf30   :  { %12665 = vmatprep.subr.mxu0 %v3444_v35 }
 0xf31   :  { %12666 = vmatpush3.msra.mxu0 %v3444_v35 }
 0xf32   :  { %12667 = vmatprep.subr.mxu0 %v12659_v43 }
 0xf33   :  { %12668 = vmatpush3.msra.mxu0 %v12659_v43 }
 0xf34   :  { %12669 = vmatprep.subr.mxu0 %v3434_v44 }
 0xf35   :  { %12670 = vmatpush3.msra.mxu0 %v3434_v44 }
 0xf36   :  { %12672 = vmatmul.mubr.msk.f32.vlgmr.msra.gmra.mxu0 %vm2057_vm3, %v10066_v23  ;;  %12677 = vmatprep.subr.mxu0 %v14594_v31 }
 0xf37   :  { %12674 = vmatprep.mubr.msk.f32.mxu0 %vm2057_vm3, %v10067_v26  ;;  %12678 = vmatpush3.msra.mxu0 %v14594_v31  ;;  %v10110_v31 = vld [vmem:[%s19546_s4 + $0x148] sm:$0xff] }
 0xf38   :  { %12679 = vmatprep.subr.mxu0 %v14595_v32 }
 0xf39   :  { %12680 = vmatpush3.msra.mxu0 %v14595_v32 }
 0xf3a   :  { %12675 = vmatmul.mubr.msk.f32.gmra.mxu0 %vm2057_vm3, %v10068_v38  ;;  %12681 = vmatprep.subr.mxu0 %v14596_v5  ;;  %v10111_v38 = vld [vmem:[%s19546_s4 + $0x150] sm:$0xff] }
 0xf3b   :  { %12682 = vmatpush3.msra.mxu0 %v14596_v5  ;;  %v10112_v5 = vld [vmem:[%s19546_s4 + $0x158] sm:$0xff] }
 0xf3c   :  { %12683 = vmatprep.subr.mxu0 %v14597_v46 }
 0xf3d   :  { %12684 = vmatpush3.msra.mxu0 %v14597_v46  ;;  %v10105_v46 = vld [vmem:[%s19546_s4 + $0x120] sm:$0xff] }
 0xf3e   :  { %12685 = vmatprep.subr.mxu0 %v14598_v0 }
 0xf3f   :  { %12686 = vmatpush3.msra.mxu0 %v14598_v0  ;;  %v10106_v0 = vld [vmem:[%s19546_s4 + $0x128] sm:$0xff] }
 0xf40   :  { %12687 = vmatprep.subr.mxu0 %v14599_v47 }
 0xf41   :  { %12688 = vmatpush3.msra.mxu0 %v14599_v47  ;;  %v10107_v47 = vld [vmem:[%s19546_s4 + $0x130] sm:$0xff] }
 0xf42   :  { %12689 = vmatprep.subr.mxu0 %v14600_v37 }
 0xf43   :  { %12690 = vmatpush3.msra.mxu0 %v14600_v37  ;;  %v14610_v37 = vld [vmem:[%s19543_s1 + $0x178] sm:$0xff] }
 0xf44   :  { %12691 = vmatprep.subr.mxu0 %v14601_v48 }
 0xf45   :  { %12692 = vmatpush3.msra.mxu0 %v14601_v48  ;;  %v10108_v48 = vld [vmem:[%s19546_s4 + $0x138] sm:$0xff] }
 0xf46   :  { %12693 = vmatprep.subr.mxu0 %v14602_v49 }
 0xf47   :  { %12694 = vmatpush3.msra.mxu0 %v14602_v49  ;;  %v14611_v49 = vld [vmem:[%s19543_s1 + $0x170] sm:$0xff] }
 0xf48   :  { %12695 = vmatprep.subr.mxu0 %v14603_v52 }
 0xf49   :  { %12696 = vmatpush3.msra.mxu0 %v14603_v52  ;;  %v14612_v52 = vld [vmem:[%s19543_s1 + $0x168] sm:$0xff] }
 0xf4a   :  { %12697 = vmatprep.subr.mxu0 %v14604_v53 }
 0xf4b   :  { %12698 = vmatpush3.msra.mxu0 %v14604_v53  ;;  %v14613_v53 = vld [vmem:[%s19543_s1 + $0x160] sm:$0xff] }
 0xf4c   :  { %12699 = vmatprep.subr.mxu0 %v14605_v55 }
 0xf4d   :  { %12700 = vmatpush3.msra.mxu0 %v14605_v55  ;;  %v14614_v55 = vld [vmem:[%s19543_s1 + $0x158] sm:$0xff] }
 0xf4e   :  { %12701 = vmatprep.subr.mxu0 %v14606_v56 }
 0xf4f   :  { %12702 = vmatpush3.msra.mxu0 %v14606_v56  ;;  %v14615_v56 = vld [vmem:[%s19543_s1 + $0x150] sm:$0xff] }
 0xf50   :  { %12703 = vmatprep.subr.mxu0 %v14607_v57 }
 0xf51   :  { %12704 = vmatpush3.msra.mxu0 %v14607_v57  ;;  %v14616_v57 = vld [vmem:[%s19543_s1 + $0x148] sm:$0xff] }
 0xf52   :  { %12705 = vmatprep.subr.mxu0 %v14608_v58 }
 0xf53   :  { %12706 = vmatpush3.msra.mxu0 %v14608_v58  ;;  %v14617_v58 = vld [vmem:[%s19543_s1 + $0x140] sm:$0xff] }
 0xf54   :  { %12707 = vmatprep.subr.mxu0 %v14609_v59 }
 0xf55   :  { %12708 = vmatpush3.msra.mxu0 %v14609_v59  ;;  %v14618_v59 = vld [vmem:[%s19543_s1 + $0x138] sm:$0xff] }
 0xff6   :  { %v12673_v30 = vpop.f32.mrf.mxu0 }
 0xff7   :  { %v3551_v8 = vadd.f32 %v12673_v30, %v16761_v22 }
 0xff8   :  { %v3531_v10 = vpop.f32.mrf.mxu0 }
 0xff9   :  { %v3550_v14 = vadd.f32 %v3531_v10, %v3364_v40  ;;  %v3575_v45 = vadd.f32 %v3562_v3, %v3551_v8 }
 0xffa   :  { %v12676_v15 = vpop.f32.mrf.mxu0 }
 0xffb   :  { %v3574_v16 = vadd.f32 %v3557_v63, %v3550_v14  ;;  %v3553_v24 = vadd.f32 %v12676_v15, %v16766_v29  ;;  %v16850_v21 = vmax.f32 %v3575_v45, 0.0  ;;  %v10109_v29 = vld [vmem:[%s19546_s4 + $0x140] sm:$0xff] }
 0xffc   :  { %v3541_v17 = vpop.f32.mrf.mxu0 }
 0xffd   :  { %v16848_v19 = vmax.f32 %v3574_v16, 0.0  ;;  %v3552_v50 = vadd.f32 %v3541_v17, %v3366_v39  ;;  %v3577_v22 = vadd.f32 %v3572_v18, %v3553_v24  ;;  %v10114_v16 = vld [vmem:[%s19546_s4 + $0x168] sm:$0xff]  ;;  %v10115_v24 = vld [vmem:[%s19546_s4 + $0x170] sm:$0xff]  ;;  %v14626_v17 = vld [vmem:[%s19543_s1 + $0x1f8] sm:$0xff] }
 0xffe   :  { %v10116_v18 = vld [vmem:[%s19546_s4 + $0x178] sm:$0xff] }
 0xfff   :  { %v3576_v25 = vadd.f32 %v3567_v20, %v3552_v50  ;;  %12709 = vmatprep.mubr.f32.mxu0 %v16848_v19  ;;  %12747 = vmatprep.mubr.f32.mxu1 %v16848_v19  ;;  %v16858_v28 = vmax.f32 %v3577_v22, 0.0  ;;  %v14627_v50 = vld [vmem:[%s19543_s1 + $0x1f0] sm:$0xff]  ;;  %v14628_v20 = vld [vmem:[%s19543_s1 + $0x1e8] sm:$0xff]  ;;  %v14629_v22 = vld [vmem:[%s19543_s1 + $0x1e0] sm:$0xff] }
0x1000   :  { %12710 = vmatmul.mubr.f32.vlgmr.msra.gmra.mxu0 %v16850_v21  ;;  %12748 = vmatmul.mubr.f32.vlgmr.msra.gmra.mxu1 %v16850_v21 }
0x1001   :  { %v16856_v27 = vmax.f32 %v3576_v25, 0.0  ;;  %v14630_v25 = vld [vmem:[%s19543_s1 + $0x1d8] sm:$0xff] }
0x1003   :  { %12712 = vmatprep.mubr.f32.mxu0 %v16856_v27  ;;  %12750 = vmatprep.mubr.f32.mxu1 %v16856_v27 }
0x1004   :  { %12713 = vmatmul.mubr.f32.gmra.mxu0 %v16858_v28  ;;  %12751 = vmatmul.mubr.f32.gmra.mxu1 %v16858_v28 }
0x1005   :  { %12761 = vmatprep.mubr.msk.f32.mxu0 %vm2057_vm3, %v10109_v29  ;;  %12827 = vmatprep.mubr.msk.f32.mxu1 %vm2057_vm3, %v10113_v33  ;;  %v14631_v29 = vld [vmem:[%s19543_s1 + $0x1d0] sm:$0xff] }
0x1006   :  { %v14647_v33 = vld [vmem:[%s19543_s1 + $0x250] sm:$0xff] }
0x10c0   :  { %v12749_v34 = vpop.f32.mrf.mxu1  ;;  %v12711_v43 = vpop.f32.mrf.mxu0 }
0x10c2   :  { %v3783_v44 = vpop.f32.mrf.mxu1  ;;  %v3698_v35 = vpop.f32.mrf.mxu0 }
0x10c4   :  { %v12752_v4 = vpop.f32.mrf.mxu1  ;;  %v12714_v26 = vpop.f32.mrf.mxu0 }
0x10c5   :  { %12753 = vmatprep.subr.mxu0 %v12752_v4 }
0x10c6   :  { %v3793_v23 = vpop.f32.mrf.mxu1  ;;  %12754 = vmatpush3.msra.mxu0 %v12752_v4  ;;  %v3708_v32 = vpop.f32.mrf.mxu0  ;;  %v14635_v4 = vld [vmem:[%s19543_s1 + $0x1b0] sm:$0xff] }
0x10c7   :  { %12755 = vmatprep.subr.mxu0 %v3793_v23 }
0x10c8   :  { %12756 = vmatpush3.msra.mxu0 %v3793_v23  ;;  %v14637_v23 = vld [vmem:[%s19543_s1 + $0x1a0] sm:$0xff] }
0x10c9   :  { %12757 = vmatprep.subr.mxu0 %v12749_v34 }
0x10ca   :  { %12758 = vmatpush3.msra.mxu0 %v12749_v34  ;;  %v14632_v34 = vld [vmem:[%s19543_s1 + $0x1c8] sm:$0xff] }
0x10cb   :  { %12759 = vmatprep.subr.mxu0 %v3783_v44 }
0x10cc   :  { %12760 = vmatpush3.msra.mxu0 %v3783_v44  ;;  %v14634_v44 = vld [vmem:[%s19543_s1 + $0x1b8] sm:$0xff] }
0x10cd   :  { %12762 = vmatmul.mubr.msk.f32.vlgmr.msra.gmra.mxu0 %vm2057_vm3, %v10110_v31  ;;  %12767 = vmatprep.subr.mxu0 %v12714_v26  ;;  %v14639_v31 = vld [vmem:[%s19543_s1 + $0x190] sm:$0xff] }
0x10ce   :  { %12768 = vmatpush3.msra.mxu0 %v12714_v26  ;;  %12764 = vmatprep.mubr.msk.f32.mxu0 %vm2057_vm3, %v10111_v38  ;;  %v14638_v26 = vld [vmem:[%s19543_s1 + $0x198] sm:$0xff]  ;;  %v14640_v38 = vld [vmem:[%s19543_s1 + $0x188] sm:$0xff] }
0x10cf   :  { %12769 = vmatprep.subr.mxu0 %v3708_v32 }
0x10d0   :  { %12770 = vmatpush3.msra.mxu0 %v3708_v32  ;;  %v14641_v32 = vld [vmem:[%s19543_s1 + $0x180] sm:$0xff] }
0x10d1   :  { %12765 = vmatmul.mubr.msk.f32.gmra.mxu0 %vm2057_vm3, %v10112_v5  ;;  %12771 = vmatprep.subr.mxu0 %v12711_v43  ;;  %v10117_v5 = vld [vmem:[%s19546_s4 + $0x180] sm:$0xff] }
0x10d2   :  { %12772 = vmatpush3.msra.mxu0 %v12711_v43  ;;  %12775 = vmatprep.mubr.msk.f32.mxu0 %vm2057_vm3, %v10105_v46  ;;  %v14633_v43 = vld [vmem:[%s19543_s1 + $0x1c0] sm:$0xff] }
0x10d3   :  { %12773 = vmatprep.subr.mxu0 %v3698_v35 }
0x10d4   :  { %12774 = vmatpush3.msra.mxu0 %v3698_v35  ;;  %v14636_v35 = vld [vmem:[%s19543_s1 + $0x1a8] sm:$0xff] }
0x10d5   :  { %12776 = vmatmul.mubr.msk.f32.vlgmr.msra.gmra.mxu0 %vm2057_vm3, %v10106_v0  ;;  %12781 = vmatprep.subr.mxu0 %v14610_v37 }
0x10d6   :  { %12782 = vmatpush3.msra.mxu0 %v14610_v37  ;;  %12778 = vmatprep.mubr.msk.f32.mxu0 %vm2057_vm3, %v10107_v47 }
0x10d7   :  { %12783 = vmatprep.subr.mxu0 %v14611_v49 }
0x10d8   :  { %12784 = vmatpush3.msra.mxu0 %v14611_v49 }
0x10d9   :  { %12779 = vmatmul.mubr.msk.f32.gmra.mxu0 %vm2057_vm3, %v10108_v48  ;;  %12785 = vmatprep.subr.mxu0 %v14612_v52 }
0x10da   :  { %12786 = vmatpush3.msra.mxu0 %v14612_v52  ;;  %12813 = vmatprep.mubr.f32.mxu0 %v16848_v19 }
0x10db   :  { %12787 = vmatprep.subr.mxu0 %v14613_v53 }
0x10dc   :  { %12788 = vmatpush3.msra.mxu0 %v14613_v53 }
0x10dd   :  { %12789 = vmatprep.subr.mxu0 %v14614_v55 }
0x10de   :  { %12790 = vmatpush3.msra.mxu0 %v14614_v55 }
0x10df   :  { %12791 = vmatprep.subr.mxu0 %v14615_v56 }
0x10e0   :  { %12792 = vmatpush3.msra.mxu0 %v14615_v56 }
0x10e1   :  { %12793 = vmatprep.subr.mxu0 %v14616_v57 }
0x10e2   :  { %12794 = vmatpush3.msra.mxu0 %v14616_v57 }
0x10e3   :  { %12795 = vmatprep.subr.mxu0 %v14617_v58 }
0x10e4   :  { %12796 = vmatpush3.msra.mxu0 %v14617_v58 }
0x10e5   :  { %12797 = vmatprep.subr.mxu0 %v14618_v59 }
0x10e6   :  { %12798 = vmatpush3.msra.mxu0 %v14618_v59  ;;  %v10118_v59 = vld [vmem:[%s19546_s4 + $0x188] sm:$0xff] }
0x10e7   :  { %12799 = vmatprep.subr.mxu0 %v14619_v60 }
0x10e8   :  { %12800 = vmatpush3.msra.mxu0 %v14619_v60  ;;  %v10119_v60 = vld [vmem:[%s19546_s4 + $0x190] sm:$0xff] }
0x10e9   :  { %12801 = vmatprep.subr.mxu0 %v14620_v61 }
0x10ea   :  { %12802 = vmatpush3.msra.mxu0 %v14620_v61  ;;  %v14642_v61 = vld [vmem:[%s19543_s1 + $0x278] sm:$0xff] }
0x10eb   :  { %12803 = vmatprep.subr.mxu0 %v14621_v62 }
0x10ec   :  { %12804 = vmatpush3.msra.mxu0 %v14621_v62  ;;  %v10120_v62 = vld [vmem:[%s19546_s4 + $0x198] sm:$0xff] }
0x10ed   :  { %12805 = vmatprep.subr.mxu0 %v14622_v1 }
0x10ee   :  { %12806 = vmatpush3.msra.mxu0 %v14622_v1  ;;  %v14643_v1 = vld [vmem:[%s19543_s1 + $0x270] sm:$0xff] }
0x10ef   :  { %12807 = vmatprep.subr.mxu0 %v14623_v6 }
0x10f0   :  { %12808 = vmatpush3.msra.mxu0 %v14623_v6  ;;  %v14644_v6 = vld [vmem:[%s19543_s1 + $0x268] sm:$0xff] }
0x10f1   :  { %12809 = vmatprep.subr.mxu0 %v14624_v9 }
0x10f2   :  { %12810 = vmatpush3.msra.mxu0 %v14624_v9  ;;  %v14645_v9 = vld [vmem:[%s19543_s1 + $0x260] sm:$0xff] }
0x10f3   :  { %12811 = vmatprep.subr.mxu0 %v14625_v41 }
0x10f4   :  { %12812 = vmatpush3.msra.mxu0 %v14625_v41  ;;  %v14646_v41 = vld [vmem:[%s19543_s1 + $0x258] sm:$0xff] }
0x10f5   :  { %12814 = vmatmul.mubr.f32.vlgmr.msra.gmra.mxu0 %v16850_v21 }
0x10f6   :  { %12816 = vmatprep.mubr.f32.mxu0 %v16856_v27 }
0x10f9   :  { %12817 = vmatmul.mubr.f32.gmra.mxu0 %v16858_v28 }
0x10fa   :  { %12879 = vmatprep.mubr.msk.f32.mxu0 %vm2057_vm3, %v10117_v5  ;;  %v14663_v5 = vld [vmem:[%s19543_s1 + $0x2d0] sm:$0xff] }
0x118d   :  { %v12763_v11 = vpop.f32.mrf.mxu0 }
0x118f   :  { %v16952_v12 = vpop.f32.mrf.mxu0 }
0x1191   :  { %v12766_v30 = vpop.f32.mrf.mxu0 }
0x1193   :  { %v16954_v3 = vpop.f32.mrf.mxu0 }
0x1195   :  { %v12777_v36 = vpop.f32.mrf.mxu0 }
0x1196   :  { %v16956_v40 = vadd.f32 %v12777_v36, %v12763_v11  ;;  %v14648_v11 = vld [vmem:[%s19543_s1 + $0x248] sm:$0xff]  ;;  %v14651_v36 = vld [vmem:[%s19543_s1 + $0x230] sm:$0xff] }
0x1197   :  { %v16958_v8 = vpop.f32.mrf.mxu0 }
0x1199   :  { %v12780_v63 = vpop.f32.mrf.mxu0 }
0x119a   :  { %v16960_v10 = vadd.f32 %v12780_v63, %v12766_v30  ;;  %v14649_v30 = vld [vmem:[%s19543_s1 + $0x240] sm:$0xff] }
0x119b   :  { %v16962_v13 = vpop.f32.mrf.mxu0  ;;  %v14653_v63 = vld [vmem:[%s19543_s1 + $0x220] sm:$0xff] }
0x119c   :  { %v3988_v48 = vadd.f32 %v16962_v13, %v16954_v3  ;;  %v14650_v3 = vld [vmem:[%s19543_s1 + $0x238] sm:$0xff]  ;;  %v14655_v13 = vld [vmem:[%s19543_s1 + $0x210] sm:$0xff] }
0x11b5   :  { %v12815_v14 = vpop.f32.mrf.mxu0 }
0x11b7   :  { %v4062_v45 = vpop.f32.mrf.mxu0 }
0x11b9   :  { %v12818_v15 = vpop.f32.mrf.mxu0 }
0x11ba   :  { %12819 = vmatprep.subr.mxu1 %v12818_v15 }
0x11bb   :  { %v4072_v39 = vpop.f32.mrf.mxu0  ;;  %12820 = vmatpush3.msra.mxu1 %v12818_v15  ;;  %v10121_v15 = vld [vmem:[%s19546_s4 + $0x1a0] sm:$0xff] }
0x11bc   :  { %12821 = vmatprep.subr.mxu1 %v4072_v39 }
0x11bd   :  { %12822 = vmatpush3.msra.mxu1 %v4072_v39  ;;  %v3978_v39 = vadd.f32 %v16958_v8, %v16952_v12 }
0x11be   :  { %12823 = vmatprep.subr.mxu1 %v12815_v14 }
0x11bf   :  { %12824 = vmatpush3.msra.mxu1 %v12815_v14  ;;  %v14656_v14 = vld [vmem:[%s19543_s1 + $0x208] sm:$0xff] }
0x11c0   :  { %12825 = vmatprep.subr.mxu1 %v4062_v45 }
0x11c1   :  { %12826 = vmatpush3.msra.mxu1 %v4062_v45  ;;  %v14657_v45 = vld [vmem:[%s19543_s1 + $0x200] sm:$0xff] }
0x11c2   :  { %12828 = vmatmul.mubr.msk.f32.vlgmr.msra.gmra.mxu1 %vm2057_vm3, %v10114_v16  ;;  %12833 = vmatprep.subr.mxu1 %v14626_v17 }
0x11c3   :  { %12834 = vmatpush3.msra.mxu1 %v14626_v17  ;;  %12830 = vmatprep.mubr.msk.f32.mxu1 %vm2057_vm3, %v10115_v24 }
0x11c4   :  { %12835 = vmatprep.subr.mxu1 %v14627_v50 }
0x11c5   :  { %12836 = vmatpush3.msra.mxu1 %v14627_v50 }
0x11c6   :  { %12831 = vmatmul.mubr.msk.f32.gmra.mxu1 %vm2057_vm3, %v10116_v18  ;;  %12837 = vmatprep.subr.mxu1 %v14628_v20 }
0x11c7   :  { %12838 = vmatpush3.msra.mxu1 %v14628_v20  ;;  %12865 = vmatprep.mubr.f32.mxu1 %v16848_v19 }
0x11c8   :  { %12839 = vmatprep.subr.mxu1 %v14629_v22 }
0x11c9   :  { %12840 = vmatpush3.msra.mxu1 %v14629_v22 }
0x11ca   :  { %12841 = vmatprep.subr.mxu1 %v14630_v25 }
0x11cb   :  { %12842 = vmatpush3.msra.mxu1 %v14630_v25 }
0x11cc   :  { %12843 = vmatprep.subr.mxu1 %v14631_v29 }
0x11cd   :  { %12844 = vmatpush3.msra.mxu1 %v14631_v29 }
0x11ce   :  { %12845 = vmatprep.subr.mxu1 %v14632_v34 }
0x11cf   :  { %12846 = vmatpush3.msra.mxu1 %v14632_v34 }
0x11d0   :  { %12847 = vmatprep.subr.mxu1 %v14633_v43 }
0x11d1   :  { %12848 = vmatpush3.msra.mxu1 %v14633_v43 }
0x11d2   :  { %12849 = vmatprep.subr.mxu1 %v14634_v44 }
0x11d3   :  { %12850 = vmatpush3.msra.mxu1 %v14634_v44  ;;  %v10122_v44 = vld [vmem:[%s19546_s4 + $0x1a8] sm:$0xff] }
0x11d4   :  { %12851 = vmatprep.subr.mxu1 %v14635_v4 }
0x11d5   :  { %12852 = vmatpush3.msra.mxu1 %v14635_v4  ;;  %v10123_v4 = vld [vmem:[%s19546_s4 + $0x1b0] sm:$0xff] }
0x11d6   :  { %12853 = vmatprep.subr.mxu1 %v14636_v35 }
0x11d7   :  { %12854 = vmatpush3.msra.mxu1 %v14636_v35  ;;  %v14658_v35 = vld [vmem:[%s19543_s1 + $0x2f8] sm:$0xff] }
0x11d8   :  { %12855 = vmatprep.subr.mxu1 %v14637_v23 }
0x11d9   :  { %12856 = vmatpush3.msra.mxu1 %v14637_v23  ;;  %v10124_v23 = vld [vmem:[%s19546_s4 + $0x1b8] sm:$0xff] }
0x11da   :  { %12857 = vmatprep.subr.mxu1 %v14638_v26 }
0x11db   :  { %12858 = vmatpush3.msra.mxu1 %v14638_v26  ;;  %v14659_v26 = vld [vmem:[%s19543_s1 + $0x2f0] sm:$0xff] }
0x11dc   :  { %12859 = vmatprep.subr.mxu1 %v14639_v31 }
0x11dd   :  { %12860 = vmatpush3.msra.mxu1 %v14639_v31  ;;  %v14660_v31 = vld [vmem:[%s19543_s1 + $0x2e8] sm:$0xff] }
0x11de   :  { %12861 = vmatprep.subr.mxu1 %v14640_v38 }
0x11df   :  { %12862 = vmatpush3.msra.mxu1 %v14640_v38  ;;  %v14661_v38 = vld [vmem:[%s19543_s1 + $0x2e0] sm:$0xff] }
0x11e0   :  { %12863 = vmatprep.subr.mxu1 %v14641_v32 }
0x11e1   :  { %12864 = vmatpush3.msra.mxu1 %v14641_v32  ;;  %v14662_v32 = vld [vmem:[%s19543_s1 + $0x2d8] sm:$0xff] }
0x11e2   :  { %12866 = vmatmul.mubr.f32.vlgmr.msra.gmra.mxu1 %v16850_v21 }
0x11e3   :  { %12868 = vmatprep.mubr.f32.mxu1 %v16856_v27 }
0x11e6   :  { %12869 = vmatmul.mubr.f32.gmra.mxu1 %v16858_v28 }
0x11e7   :  { %12931 = vmatprep.mubr.msk.f32.mxu1 %vm2057_vm3, %v10121_v15  ;;  %v14679_v15 = vld [vmem:[%s19543_s1 + $0x350] sm:$0xff] }
0x1282   :  { %v12829_v46 = vpop.f32.mrf.mxu1 }
0x1283   :  { %v17033_v0 = vadd.f32 %v12829_v46, %v16956_v40  ;;  %v14652_v40 = vld [vmem:[%s19543_s1 + $0x228] sm:$0xff] }
0x1284   :  { %v17035_v47 = vpop.f32.mrf.mxu1  ;;  %v14664_v46 = vld [vmem:[%s19543_s1 + $0x2c8] sm:$0xff] }
0x1285   :  { %v4178_v24 = vadd.f32 %v17035_v47, %v3978_v39  ;;  %v14666_v47 = vld [vmem:[%s19543_s1 + $0x2b8] sm:$0xff]  ;;  %v14680_v39 = vld [vmem:[%s19543_s1 + $0x348] sm:$0xff] }
0x1286   :  { %v12832_v37 = vpop.f32.mrf.mxu1 }
0x1287   :  { %v17040_v49 = vadd.f32 %v12832_v37, %v16960_v10  ;;  %v14654_v10 = vld [vmem:[%s19543_s1 + $0x218] sm:$0xff]  ;;  %v14667_v37 = vld [vmem:[%s19543_s1 + $0x2b0] sm:$0xff] }
0x1288   :  { %v4169_v52 = vpop.f32.mrf.mxu1 }
0x1289   :  { %v17042_v53 = vadd.f32 %v4169_v52, %v3988_v48  ;;  %v14668_v48 = vld [vmem:[%s19543_s1 + $0x2a8] sm:$0xff]  ;;  %v14670_v52 = vld [vmem:[%s19543_s1 + $0x298] sm:$0xff] }
0x12a2   :  { %v12867_v55 = vpop.f32.mrf.mxu1 }
0x12a4   :  { %v4248_v56 = vpop.f32.mrf.mxu1 }
0x12a6   :  { %v12870_v57 = vpop.f32.mrf.mxu1 }
0x12a7   :  { %12871 = vmatprep.subr.mxu0 %v12870_v57 }
0x12a8   :  { %v4258_v58 = vpop.f32.mrf.mxu1  ;;  %12872 = vmatpush3.msra.mxu0 %v12870_v57  ;;  %v10125_v57 = vld [vmem:[%s19546_s4 + $0x1c0] sm:$0xff] }
0x12a9   :  { %12873 = vmatprep.subr.mxu0 %v4258_v58 }
0x12aa   :  { %12874 = vmatpush3.msra.mxu0 %v4258_v58 }
0x12ab   :  { %12875 = vmatprep.subr.mxu0 %v12867_v55 }
0x12ac   :  { %12876 = vmatpush3.msra.mxu0 %v12867_v55  ;;  %v14672_v55 = vld [vmem:[%s19543_s1 + $0x288] sm:$0xff] }
0x12ad   :  { %12877 = vmatprep.subr.mxu0 %v4248_v56 }
0x12ae   :  { %12878 = vmatpush3.msra.mxu0 %v4248_v56  ;;  %v14673_v56 = vld [vmem:[%s19543_s1 + $0x280] sm:$0xff] }
0x12af   :  { %12880 = vmatmul.mubr.msk.f32.vlgmr.msra.gmra.mxu0 %vm2057_vm3, %v10118_v59  ;;  %12885 = vmatprep.subr.mxu0 %v14642_v61 }
0x12b0   :  { %12886 = vmatpush3.msra.mxu0 %v14642_v61  ;;  %12882 = vmatprep.mubr.msk.f32.mxu0 %vm2057_vm3, %v10119_v60 }
0x12b1   :  { %12887 = vmatprep.subr.mxu0 %v14643_v1 }
0x12b2   :  { %12888 = vmatpush3.msra.mxu0 %v14643_v1 }
0x12b3   :  { %12883 = vmatmul.mubr.msk.f32.gmra.mxu0 %vm2057_vm3, %v10120_v62  ;;  %12889 = vmatprep.subr.mxu0 %v14644_v6 }
0x12b4   :  { %12890 = vmatpush3.msra.mxu0 %v14644_v6  ;;  %12917 = vmatprep.mubr.f32.mxu0 %v16848_v19 }
0x12b5   :  { %12891 = vmatprep.subr.mxu0 %v14645_v9 }
0x12b6   :  { %12892 = vmatpush3.msra.mxu0 %v14645_v9 }
0x12b7   :  { %12893 = vmatprep.subr.mxu0 %v14646_v41 }
0x12b8   :  { %12894 = vmatpush3.msra.mxu0 %v14646_v41 }
0x12b9   :  { %12895 = vmatprep.subr.mxu0 %v14647_v33 }
0x12ba   :  { %12896 = vmatpush3.msra.mxu0 %v14647_v33 }
0x12bb   :  { %12897 = vmatprep.subr.mxu0 %v14648_v11 }
0x12bc   :  { %12898 = vmatpush3.msra.mxu0 %v14648_v11 }
0x12bd   :  { %12899 = vmatprep.subr.mxu0 %v14649_v30 }
0x12be   :  { %12900 = vmatpush3.msra.mxu0 %v14649_v30 }
0x12bf   :  { %12901 = vmatprep.subr.mxu0 %v14650_v3 }
0x12c0   :  { %12902 = vmatpush3.msra.mxu0 %v14650_v3  ;;  %v10126_v3 = vld [vmem:[%s19546_s4 + $0x1c8] sm:$0xff] }
0x12c1   :  { %12903 = vmatprep.subr.mxu0 %v14651_v36 }
0x12c2   :  { %12904 = vmatpush3.msra.mxu0 %v14651_v36  ;;  %v10127_v36 = vld [vmem:[%s19546_s4 + $0x1d0] sm:$0xff] }
0x12c3   :  { %12905 = vmatprep.subr.mxu0 %v14652_v40 }
0x12c4   :  { %12906 = vmatpush3.msra.mxu0 %v14652_v40  ;;  %v14674_v40 = vld [vmem:[%s19543_s1 + $0x378] sm:$0xff] }
0x12c5   :  { %12907 = vmatprep.subr.mxu0 %v14653_v63 }
0x12c6   :  { %12908 = vmatpush3.msra.mxu0 %v14653_v63  ;;  %v10128_v63 = vld [vmem:[%s19546_s4 + $0x1d8] sm:$0xff] }
0x12c7   :  { %12909 = vmatprep.subr.mxu0 %v14654_v10 }
0x12c8   :  { %12910 = vmatpush3.msra.mxu0 %v14654_v10  ;;  %v14675_v10 = vld [vmem:[%s19543_s1 + $0x370] sm:$0xff] }
0x12c9   :  { %12911 = vmatprep.subr.mxu0 %v14655_v13 }
0x12ca   :  { %12912 = vmatpush3.msra.mxu0 %v14655_v13  ;;  %v14676_v13 = vld [vmem:[%s19543_s1 + $0x368] sm:$0xff] }
0x12cb   :  { %12913 = vmatprep.subr.mxu0 %v14656_v14 }
0x12cc   :  { %12914 = vmatpush3.msra.mxu0 %v14656_v14  ;;  %v14677_v14 = vld [vmem:[%s19543_s1 + $0x360] sm:$0xff] }
0x12cd   :  { %12915 = vmatprep.subr.mxu0 %v14657_v45 }
0x12ce   :  { %12916 = vmatpush3.msra.mxu0 %v14657_v45  ;;  %v14678_v45 = vld [vmem:[%s19543_s1 + $0x358] sm:$0xff] }
0x12cf   :  { %12918 = vmatmul.mubr.f32.vlgmr.msra.gmra.mxu0 %v16850_v21 }
0x12d0   :  { %12920 = vmatprep.mubr.f32.mxu0 %v16856_v27 }
0x12d3   :  { %12921 = vmatmul.mubr.f32.gmra.mxu0 %v16858_v28 }
0x12d4   :  { %12983 = vmatprep.mubr.msk.f32.mxu0 %vm2057_vm3, %v10125_v57  ;;  %v14697_v57 = vld [vmem:[%s19543_s1 + $0x3c0] sm:$0xff] }
0x136f   :  { %v12881_v16 = vpop.f32.mrf.mxu0 }
0x1370   :  { %v17116_v17 = vadd.f32 %v12881_v16, %v17033_v0  ;;  %v14665_v0 = vld [vmem:[%s19543_s1 + $0x2c0] sm:$0xff] }
0x1371   :  { %v4345_v18 = vpop.f32.mrf.mxu0  ;;  %v14681_v16 = vld [vmem:[%s19543_s1 + $0x340] sm:$0xff] }
0x1372   :  { %v17118_v50 = vadd.f32 %v4345_v18, %v4178_v24  ;;  %v14682_v24 = vld [vmem:[%s19543_s1 + $0x338] sm:$0xff]  ;;  %v14684_v18 = vld [vmem:[%s19543_s1 + $0x328] sm:$0xff] }
0x1373   :  { %v12884_v20 = vpop.f32.mrf.mxu0 }
0x1374   :  { %v17121_v22 = vadd.f32 %v12884_v20, %v17040_v49  ;;  %v14669_v49 = vld [vmem:[%s19543_s1 + $0x2a0] sm:$0xff]  ;;  %v14686_v20 = vld [vmem:[%s19543_s1 + $0x318] sm:$0xff] }
0x1375   :  { %v4355_v25 = vpop.f32.mrf.mxu0 }
0x1376   :  { %v17124_v29 = vadd.f32 %v4355_v25, %v17042_v53  ;;  %v14671_v53 = vld [vmem:[%s19543_s1 + $0x290] sm:$0xff]  ;;  %v14688_v25 = vld [vmem:[%s19543_s1 + $0x308] sm:$0xff] }
0x138f   :  { %v12919_v34 = vpop.f32.mrf.mxu0 }
0x1391   :  { %v4434_v43 = vpop.f32.mrf.mxu0 }
0x1393   :  { %v12922_v12 = vpop.f32.mrf.mxu0 }
0x1394   :  { %12923 = vmatprep.subr.mxu1 %v12922_v12 }
0x1395   :  { %v4444_v8 = vpop.f32.mrf.mxu0  ;;  %12924 = vmatpush3.msra.mxu1 %v12922_v12 }
0x1396   :  { %12925 = vmatprep.subr.mxu1 %v4444_v8 }
0x1397   :  { %12926 = vmatpush3.msra.mxu1 %v4444_v8 }
0x1398   :  { %12927 = vmatprep.subr.mxu1 %v12919_v34 }
0x1399   :  { %12928 = vmatpush3.msra.mxu1 %v12919_v34  ;;  %v10129_v34 = vld [vmem:[%s19546_s4 + $0x1e0] sm:$0xff] }
0x139a   :  { %12929 = vmatprep.subr.mxu1 %v4434_v43 }
0x139b   :  { %12930 = vmatpush3.msra.mxu1 %v4434_v43 }
0x139c   :  { %12932 = vmatmul.mubr.msk.f32.vlgmr.msra.gmra.mxu1 %vm2057_vm3, %v10122_v44  ;;  %12937 = vmatprep.subr.mxu1 %v14658_v35 }
0x139d   :  { %12938 = vmatpush3.msra.mxu1 %v14658_v35  ;;  %12934 = vmatprep.mubr.msk.f32.mxu1 %vm2057_vm3, %v10123_v4 }
0x139e   :  { %12939 = vmatprep.subr.mxu1 %v14659_v26 }
0x139f   :  { %12940 = vmatpush3.msra.mxu1 %v14659_v26 }
0x13a0   :  { %12935 = vmatmul.mubr.msk.f32.gmra.mxu1 %vm2057_vm3, %v10124_v23  ;;  %12941 = vmatprep.subr.mxu1 %v14660_v31 }
0x13a1   :  { %12942 = vmatpush3.msra.mxu1 %v14660_v31  ;;  %12969 = vmatprep.mubr.f32.mxu1 %v16848_v19 }
0x13a2   :  { %12943 = vmatprep.subr.mxu1 %v14661_v38 }
0x13a3   :  { %12944 = vmatpush3.msra.mxu1 %v14661_v38 }
0x13a4   :  { %12945 = vmatprep.subr.mxu1 %v14662_v32 }
0x13a5   :  { %12946 = vmatpush3.msra.mxu1 %v14662_v32 }
0x13a6   :  { %12947 = vmatprep.subr.mxu1 %v14663_v5 }
0x13a7   :  { %12948 = vmatpush3.msra.mxu1 %v14663_v5 }
0x13a8   :  { %12949 = vmatprep.subr.mxu1 %v14664_v46 }
0x13a9   :  { %12950 = vmatpush3.msra.mxu1 %v14664_v46  ;;  %v10130_v46 = vld [vmem:[%s19546_s4 + $0x1e8] sm:$0xff] }
0x13aa   :  { %12951 = vmatprep.subr.mxu1 %v14665_v0 }
0x13ab   :  { %12952 = vmatpush3.msra.mxu1 %v14665_v0  ;;  %v10131_v0 = vld [vmem:[%s19546_s4 + $0x1f0] sm:$0xff] }
0x13ac   :  { %12953 = vmatprep.subr.mxu1 %v14666_v47 }
0x13ad   :  { %12954 = vmatpush3.msra.mxu1 %v14666_v47  ;;  %v14690_v47 = vld [vmem:[%s19543_s1 + $0x3f8] sm:$0xff] }
0x13ae   :  { %12955 = vmatprep.subr.mxu1 %v14667_v37 }
0x13af   :  { %12956 = vmatpush3.msra.mxu1 %v14667_v37  ;;  %v10132_v37 = vld [vmem:[%s19546_s4 + $0x1f8] sm:$0xff] }
0x13b0   :  { %12957 = vmatprep.subr.mxu1 %v14668_v48 }
0x13b1   :  { %12958 = vmatpush3.msra.mxu1 %v14668_v48  ;;  %v14691_v48 = vld [vmem:[%s19543_s1 + $0x3f0] sm:$0xff] }
0x13b2   :  { %12959 = vmatprep.subr.mxu1 %v14669_v49 }
0x13b3   :  { %12960 = vmatpush3.msra.mxu1 %v14669_v49  ;;  %v14692_v49 = vld [vmem:[%s19543_s1 + $0x3e8] sm:$0xff] }
0x13b4   :  { %12961 = vmatprep.subr.mxu1 %v14670_v52 }
0x13b5   :  { %12962 = vmatpush3.msra.mxu1 %v14670_v52  ;;  %v14693_v52 = vld [vmem:[%s19543_s1 + $0x3e0] sm:$0xff] }
0x13b6   :  { %12963 = vmatprep.subr.mxu1 %v14671_v53 }
0x13b7   :  { %12964 = vmatpush3.msra.mxu1 %v14671_v53  ;;  %v14694_v53 = vld [vmem:[%s19543_s1 + $0x3d8] sm:$0xff] }
0x13b8   :  { %12965 = vmatprep.subr.mxu1 %v14672_v55 }
0x13b9   :  { %12966 = vmatpush3.msra.mxu1 %v14672_v55  ;;  %v14695_v55 = vld [vmem:[%s19543_s1 + $0x3d0] sm:$0xff] }
0x13ba   :  { %12967 = vmatprep.subr.mxu1 %v14673_v56 }
0x13bb   :  { %12968 = vmatpush3.msra.mxu1 %v14673_v56  ;;  %v14696_v56 = vld [vmem:[%s19543_s1 + $0x3c8] sm:$0xff] }
0x13bc   :  { %12970 = vmatmul.mubr.f32.vlgmr.msra.gmra.mxu1 %v16850_v21 }
0x13bd   :  { %12972 = vmatprep.mubr.f32.mxu1 %v16856_v27 }
0x13c0   :  { %12973 = vmatmul.mubr.f32.gmra.mxu1 %v16858_v28 }
0x13c1   :  { %13035 = vmatprep.mubr.msk.f32.mxu1 %vm2057_vm3, %v10129_v34  ;;  %v14714_v34 = vld [vmem:[%s19543_s1 + $0x438] sm:$0xff] }
0x145c   :  { %v12933_v58 = vpop.f32.mrf.mxu1 }
0x145d   :  { %v17195_v59 = vadd.f32 %v12933_v58, %v17116_v17  ;;  %v14683_v17 = vld [vmem:[%s19543_s1 + $0x330] sm:$0xff]  ;;  %v14698_v58 = vld [vmem:[%s19543_s1 + $0x3b8] sm:$0xff] }
0x145e   :  { %v4531_v60 = vpop.f32.mrf.mxu1 }
0x145f   :  { %v17198_v61 = vadd.f32 %v4531_v60, %v17118_v50  ;;  %v14685_v50 = vld [vmem:[%s19543_s1 + $0x320] sm:$0xff]  ;;  %v14700_v60 = vld [vmem:[%s19543_s1 + $0x3a8] sm:$0xff] }
0x1460   :  { %v12936_v62 = vpop.f32.mrf.mxu1 }
0x1461   :  { %v17201_v1 = vadd.f32 %v12936_v62, %v17121_v22  ;;  %v14687_v22 = vld [vmem:[%s19543_s1 + $0x310] sm:$0xff]  ;;  %v14702_v62 = vld [vmem:[%s19543_s1 + $0x398] sm:$0xff] }
0x1462   :  { %v4541_v6 = vpop.f32.mrf.mxu1 }
0x1463   :  { %v17204_v9 = vadd.f32 %v4541_v6, %v17124_v29  ;;  %v14689_v29 = vld [vmem:[%s19543_s1 + $0x300] sm:$0xff]  ;;  %v14704_v6 = vld [vmem:[%s19543_s1 + $0x388] sm:$0xff] }
0x147c   :  { %v12971_v41 = vpop.f32.mrf.mxu1 }
0x147e   :  { %v4620_v33 = vpop.f32.mrf.mxu1 }
0x1480   :  { %v12974_v11 = vpop.f32.mrf.mxu1 }
0x1481   :  { %12975 = vmatprep.subr.mxu0 %v12974_v11 }
0x1482   :  { %v4630_v30 = vpop.f32.mrf.mxu1  ;;  %12976 = vmatpush3.msra.mxu0 %v12974_v11 }
0x1483   :  { %12977 = vmatprep.subr.mxu0 %v4630_v30 }
0x1484   :  { %12978 = vmatpush3.msra.mxu0 %v4630_v30 }
0x1485   :  { %12979 = vmatprep.subr.mxu0 %v12971_v41 }
0x1486   :  { %12980 = vmatpush3.msra.mxu0 %v12971_v41  ;;  %v10133_v41 = vld [vmem:[%s19546_s4 + $0x200] sm:$0xff] }
0x1487   :  { %12981 = vmatprep.subr.mxu0 %v4620_v33 }
0x1488   :  { %12982 = vmatpush3.msra.mxu0 %v4620_v33 }
0x1489   :  { %12984 = vmatmul.mubr.msk.f32.vlgmr.msra.gmra.mxu0 %vm2057_vm3, %v10126_v3  ;;  %12989 = vmatprep.subr.mxu0 %v14674_v40 }
0x148a   :  { %12990 = vmatpush3.msra.mxu0 %v14674_v40  ;;  %12986 = vmatprep.mubr.msk.f32.mxu0 %vm2057_vm3, %v10127_v36 }
0x148b   :  { %12991 = vmatprep.subr.mxu0 %v14675_v10 }
0x148c   :  { %12992 = vmatpush3.msra.mxu0 %v14675_v10 }
0x148d   :  { %12987 = vmatmul.mubr.msk.f32.gmra.mxu0 %vm2057_vm3, %v10128_v63  ;;  %12993 = vmatprep.subr.mxu0 %v14676_v13 }
0x148e   :  { %12994 = vmatpush3.msra.mxu0 %v14676_v13  ;;  %13021 = vmatprep.mubr.f32.mxu0 %v16848_v19 }
0x148f   :  { %12995 = vmatprep.subr.mxu0 %v14677_v14 }
0x1490   :  { %12996 = vmatpush3.msra.mxu0 %v14677_v14 }
0x1491   :  { %12997 = vmatprep.subr.mxu0 %v14678_v45 }
0x1492   :  { %12998 = vmatpush3.msra.mxu0 %v14678_v45 }
0x1493   :  { %12999 = vmatprep.subr.mxu0 %v14679_v15 }
0x1494   :  { %13000 = vmatpush3.msra.mxu0 %v14679_v15 }
0x1495   :  { %13001 = vmatprep.subr.mxu0 %v14680_v39 }
0x1496   :  { %13002 = vmatpush3.msra.mxu0 %v14680_v39  ;;  %v10134_v39 = vld [vmem:[%s19546_s4 + $0x208] sm:$0xff] }
0x1497   :  { %13003 = vmatprep.subr.mxu0 %v14681_v16 }
0x1498   :  { %13004 = vmatpush3.msra.mxu0 %v14681_v16  ;;  %v10135_v16 = vld [vmem:[%s19546_s4 + $0x210] sm:$0xff] }
0x1499   :  { %13005 = vmatprep.subr.mxu0 %v14682_v24 }
0x149a   :  { %13006 = vmatpush3.msra.mxu0 %v14682_v24  ;;  %v14706_v24 = vld [vmem:[%s19543_s1 + $0x478] sm:$0xff] }
0x149b   :  { %13007 = vmatprep.subr.mxu0 %v14683_v17 }
0x149c   :  { %13008 = vmatpush3.msra.mxu0 %v14683_v17  ;;  %v10136_v17 = vld [vmem:[%s19546_s4 + $0x218] sm:$0xff] }
0x149d   :  { %13009 = vmatprep.subr.mxu0 %v14684_v18 }
0x149e   :  { %13010 = vmatpush3.msra.mxu0 %v14684_v18  ;;  %v14707_v18 = vld [vmem:[%s19543_s1 + $0x470] sm:$0xff] }
0x149f   :  { %13011 = vmatprep.subr.mxu0 %v14685_v50 }
0x14a0   :  { %13012 = vmatpush3.msra.mxu0 %v14685_v50  ;;  %v14708_v50 = vld [vmem:[%s19543_s1 + $0x468] sm:$0xff] }
0x14a1   :  { %13013 = vmatprep.subr.mxu0 %v14686_v20 }
0x14a2   :  { %13014 = vmatpush3.msra.mxu0 %v14686_v20  ;;  %v14709_v20 = vld [vmem:[%s19543_s1 + $0x460] sm:$0xff] }
0x14a3   :  { %13015 = vmatprep.subr.mxu0 %v14687_v22 }
0x14a4   :  { %13016 = vmatpush3.msra.mxu0 %v14687_v22  ;;  %v14710_v22 = vld [vmem:[%s19543_s1 + $0x458] sm:$0xff] }
0x14a5   :  { %13017 = vmatprep.subr.mxu0 %v14688_v25 }
0x14a6   :  { %13018 = vmatpush3.msra.mxu0 %v14688_v25  ;;  %v14711_v25 = vld [vmem:[%s19543_s1 + $0x450] sm:$0xff] }
0x14a7   :  { %13019 = vmatprep.subr.mxu0 %v14689_v29 }
0x14a8   :  { %13020 = vmatpush3.msra.mxu0 %v14689_v29  ;;  %v14713_v29 = vld [vmem:[%s19543_s1 + $0x440] sm:$0xff] }
0x14a9   :  { %13022 = vmatmul.mubr.f32.vlgmr.msra.gmra.mxu0 %v16850_v21 }
0x14aa   :  { %13024 = vmatprep.mubr.f32.mxu0 %v16856_v27 }
0x14ad   :  { %13025 = vmatmul.mubr.f32.gmra.mxu0 %v16858_v28 }
0x14ae   :  { %13087 = vmatprep.mubr.msk.f32.mxu0 %vm2057_vm3, %v10133_v41 }
0x1549   :  { %v12985_v43 = vpop.f32.mrf.mxu0 }
0x154a   :  { %v17275_v12 = vadd.f32 %v12985_v43, %v17195_v59  ;;  %v14699_v59 = vld [vmem:[%s19543_s1 + $0x3b0] sm:$0xff] }
0x154b   :  { %v4717_v8 = vpop.f32.mrf.mxu0  ;;  %v14715_v43 = vld [vmem:[%s19543_s1 + $0x430] sm:$0xff] }
0x154c   :  { %v17278_v44 = vadd.f32 %v4717_v8, %v17198_v61  ;;  %v14701_v61 = vld [vmem:[%s19543_s1 + $0x3a0] sm:$0xff] }
0x154d   :  { %v12988_v4 = vpop.f32.mrf.mxu0  ;;  %v14717_v8 = vld [vmem:[%s19543_s1 + $0x420] sm:$0xff] }
0x154e   :  { %v17281_v35 = vadd.f32 %v12988_v4, %v17201_v1  ;;  %v14703_v1 = vld [vmem:[%s19543_s1 + $0x390] sm:$0xff] }
0x154f   :  { %v4727_v23 = vpop.f32.mrf.mxu0  ;;  %v14719_v4 = vld [vmem:[%s19543_s1 + $0x410] sm:$0xff] }
0x1550   :  { %v17284_v26 = vadd.f32 %v4727_v23, %v17204_v9  ;;  %v14705_v9 = vld [vmem:[%s19543_s1 + $0x380] sm:$0xff] }
0x1551   :  { %v14721_v23 = vld [vmem:[%s19543_s1 + $0x400] sm:$0xff] }
0x1569   :  { %v13023_v31 = vpop.f32.mrf.mxu0 }
0x156b   :  { %v4806_v38 = vpop.f32.mrf.mxu0 }
0x156d   :  { %v13026_v32 = vpop.f32.mrf.mxu0 }
0x156e   :  { %13027 = vmatprep.subr.mxu1 %v13026_v32 }
0x156f   :  { %v4816_v5 = vpop.f32.mrf.mxu0  ;;  %13028 = vmatpush3.msra.mxu1 %v13026_v32  ;;  %v14728_v32 = vld [vmem:[%s19543_s1 + $0xc8] sm:$0xff] }
0x1570   :  { %13029 = vmatprep.subr.mxu1 %v4816_v5 }
0x1571   :  { %13030 = vmatpush3.msra.mxu1 %v4816_v5  ;;  %v14729_v5 = vld [vmem:[%s19543_s1 + $0xc0] sm:$0xff] }
0x1572   :  { %13031 = vmatprep.subr.mxu1 %v13023_v31 }
0x1573   :  { %13032 = vmatpush3.msra.mxu1 %v13023_v31  ;;  %v14723_v31 = vld [vmem:[%s19543_s1 + $0xf0] sm:$0xff] }
0x1574   :  { %13033 = vmatprep.subr.mxu1 %v4806_v38 }
0x1575   :  { %13034 = vmatpush3.msra.mxu1 %v4806_v38  ;;  %v14725_v38 = vld [vmem:[%s19543_s1 + $0xe0] sm:$0xff] }
0x1576   :  { %13036 = vmatmul.mubr.msk.f32.vlgmr.msra.gmra.mxu1 %vm2057_vm3, %v10130_v46  ;;  %13041 = vmatprep.subr.mxu1 %v14690_v47  ;;  %v14730_v46 = vld [vmem:[%s19543_s1 + $0xb8] sm:$0xff] }
0x1577   :  { %13042 = vmatpush3.msra.mxu1 %v14690_v47  ;;  %13038 = vmatprep.mubr.msk.f32.mxu1 %vm2057_vm3, %v10131_v0  ;;  %v14731_v0 = vld [vmem:[%s19543_s1 + $0xb0] sm:$0xff]  ;;  %v14732_v47 = vld [vmem:[%s19543_s1 + $0xa8] sm:$0xff] }
0x1578   :  { %13043 = vmatprep.subr.mxu1 %v14691_v48 }
0x1579   :  { %13044 = vmatpush3.msra.mxu1 %v14691_v48  ;;  %v14734_v48 = vld [vmem:[%s19543_s1 + $0x98] sm:$0xff] }
0x157a   :  { %13039 = vmatmul.mubr.msk.f32.gmra.mxu1 %vm2057_vm3, %v10132_v37  ;;  %13045 = vmatprep.subr.mxu1 %v14692_v49  ;;  %v14733_v37 = vld [vmem:[%s19543_s1 + $0xa0] sm:$0xff] }
0x157b   :  { %13046 = vmatpush3.msra.mxu1 %v14692_v49  ;;  %13073 = vmatprep.mubr.f32.mxu1 %v16848_v19  ;;  %v14735_v49 = vld [vmem:[%s19543_s1 + $0x90] sm:$0xff] }
0x157c   :  { %13047 = vmatprep.subr.mxu1 %v14693_v52 }
0x157d   :  { %13048 = vmatpush3.msra.mxu1 %v14693_v52  ;;  %v14736_v52 = vld [vmem:[%s19543_s1 + $0x88] sm:$0xff] }
0x157e   :  { %13049 = vmatprep.subr.mxu1 %v14694_v53 }
0x157f   :  { %13050 = vmatpush3.msra.mxu1 %v14694_v53  ;;  %v14737_v53 = vld [vmem:[%s19543_s1 + $0x80] sm:$0xff] }
0x1580   :  { %13051 = vmatprep.subr.mxu1 %v14695_v55 }
0x1581   :  { %13052 = vmatpush3.msra.mxu1 %v14695_v55  ;;  %v10137_v55 = vld [vmem:[%s19546_s4 + $0x220] sm:$0xff] }
0x1582   :  { %13053 = vmatprep.subr.mxu1 %v14696_v56 }
0x1583   :  { %13054 = vmatpush3.msra.mxu1 %v14696_v56 }
0x1584   :  { %13055 = vmatprep.subr.mxu1 %v14697_v57 }
0x1585   :  { %13056 = vmatpush3.msra.mxu1 %v14697_v57 }
0x1586   :  { %13057 = vmatprep.subr.mxu1 %v14698_v58 }
0x1587   :  { %13058 = vmatpush3.msra.mxu1 %v14698_v58 }
0x1588   :  { %13059 = vmatprep.subr.mxu1 %v14699_v59 }
0x1589   :  { %13060 = vmatpush3.msra.mxu1 %v14699_v59 }
0x158a   :  { %13061 = vmatprep.subr.mxu1 %v14700_v60 }
0x158b   :  { %13062 = vmatpush3.msra.mxu1 %v14700_v60 }
0x158c   :  { %13063 = vmatprep.subr.mxu1 %v14701_v61 }
0x158d   :  { %13064 = vmatpush3.msra.mxu1 %v14701_v61 }
0x158e   :  { %13065 = vmatprep.subr.mxu1 %v14702_v62 }
0x158f   :  { %13066 = vmatpush3.msra.mxu1 %v14702_v62 }
0x1590   :  { %13067 = vmatprep.subr.mxu1 %v14703_v1 }
0x1591   :  { %13068 = vmatpush3.msra.mxu1 %v14703_v1 }
0x1592   :  { %13069 = vmatprep.subr.mxu1 %v14704_v6 }
0x1593   :  { %13070 = vmatpush3.msra.mxu1 %v14704_v6 }
0x1594   :  { %13071 = vmatprep.subr.mxu1 %v14705_v9 }
0x1595   :  { %13072 = vmatpush3.msra.mxu1 %v14705_v9 }
0x1596   :  { %13074 = vmatmul.mubr.f32.vlgmr.msra.gmra.mxu1 %v16850_v21 }
0x1597   :  { %13076 = vmatprep.mubr.f32.mxu1 %v16856_v27 }
0x159a   :  { %13077 = vmatmul.mubr.f32.gmra.mxu1 %v16858_v28 }
0x159b   :  { %13139 = vmatprep.mubr.msk.f32.mxu1 %vm2057_vm3, %v10137_v55 }
0x1636   :  { %v13037_v33 = vpop.f32.mrf.mxu1 }
0x1637   :  { %v17355_v11 = vadd.f32 %v13037_v33, %v17275_v12  ;;  %v14716_v12 = vld [vmem:[%s19543_s1 + $0x428] sm:$0xff] }
0x1638   :  { %v4903_v30 = vpop.f32.mrf.mxu1 }
0x1639   :  { %v17358_v3 = vadd.f32 %v4903_v30, %v17278_v44  ;;  %v14718_v44 = vld [vmem:[%s19543_s1 + $0x418] sm:$0xff]  ;;  %v10139_v30 = vld [vmem:[%s19546_s4 + $0x230] sm:$0xff] }
0x163a   :  { %v13040_v36 = vpop.f32.mrf.mxu1 }
0x163b   :  { %v17361_v40 = vadd.f32 %v13040_v36, %v17281_v35  ;;  %v14720_v35 = vld [vmem:[%s19543_s1 + $0x408] sm:$0xff]  ;;  %v10140_v36 = vld [vmem:[%s19546_s4 + $0x238] sm:$0xff] }
0x163c   :  { %v4913_v63 = vpop.f32.mrf.mxu1 }
0x163d   :  { %v17364_v10 = vadd.f32 %v4913_v63, %v17284_v26  ;;  %v14722_v26 = vld [vmem:[%s19543_s1 + $0xf8] sm:$0xff]  ;;  %v14740_v63 = vld [vmem:[%s19543_s1 + $0x68] sm:$0xff] }
0x1656   :  { %v13075_v13 = vpop.f32.mrf.mxu1 }
0x1658   :  { %v4992_v14 = vpop.f32.mrf.mxu1 }
0x165a   :  { %v13078_v45 = vpop.f32.mrf.mxu1 }
0x165b   :  { %13079 = vmatprep.subr.mxu0 %v13078_v45 }
0x165c   :  { %v5002_v15 = vpop.f32.mrf.mxu1  ;;  %13080 = vmatpush3.msra.mxu0 %v13078_v45  ;;  %v14744_v45 = vld [vmem:[%s19543_s1 + $0x48] sm:$0xff] }
0x165d   :  { %13081 = vmatprep.subr.mxu0 %v5002_v15 }
0x165e   :  { %13082 = vmatpush3.msra.mxu0 %v5002_v15  ;;  %v14745_v15 = vld [vmem:[%s19543_s1 + $0x40] sm:$0xff] }
0x165f   :  { %13083 = vmatprep.subr.mxu0 %v13075_v13 }
0x1660   :  { %13084 = vmatpush3.msra.mxu0 %v13075_v13  ;;  %v14742_v13 = vld [vmem:[%s19543_s1 + $0x58] sm:$0xff] }
0x1661   :  { %13085 = vmatprep.subr.mxu0 %v4992_v14 }
0x1662   :  { %13086 = vmatpush3.msra.mxu0 %v4992_v14  ;;  %v14743_v14 = vld [vmem:[%s19543_s1 + $0x50] sm:$0xff] }
0x1663   :  { %13088 = vmatmul.mubr.msk.f32.vlgmr.msra.gmra.mxu0 %vm2057_vm3, %v10134_v39  ;;  %13093 = vmatprep.subr.mxu0 %v14706_v24  ;;  %v14746_v39 = vld [vmem:[%s19543_s1 + $0x38] sm:$0xff] }
0x1664   :  { %13094 = vmatpush3.msra.mxu0 %v14706_v24  ;;  %13090 = vmatprep.mubr.msk.f32.mxu0 %vm2057_vm3, %v10135_v16  ;;  %v14747_v16 = vld [vmem:[%s19543_s1 + $0x30] sm:$0xff]  ;;  %v14748_v24 = vld [vmem:[%s19543_s1 + $0x28] sm:$0xff] }
0x1665   :  { %13095 = vmatprep.subr.mxu0 %v14707_v18 }
0x1666   :  { %13096 = vmatpush3.msra.mxu0 %v14707_v18  ;;  %v14750_v18 = vld [vmem:[%s19543_s1 + $0x18] sm:$0xff] }
0x1667   :  { %13091 = vmatmul.mubr.msk.f32.gmra.mxu0 %vm2057_vm3, %v10136_v17  ;;  %13097 = vmatprep.subr.mxu0 %v14708_v50  ;;  %v14749_v17 = vld [vmem:[%s19543_s1 + $0x20] sm:$0xff] }
0x1668   :  { %13098 = vmatpush3.msra.mxu0 %v14708_v50  ;;  %13125 = vmatprep.mubr.f32.mxu0 %v16848_v19  ;;  %v14712_v19 = vld [vmem:[%s19543_s1 + $0x448] sm:$0xff]  ;;  %v14751_v50 = vld [vmem:[%s19543_s1 + $0x10] sm:$0xff] }
0x1669   :  { %13099 = vmatprep.subr.mxu0 %v14709_v20 }
0x166a   :  { %13100 = vmatpush3.msra.mxu0 %v14709_v20  ;;  %v14752_v20 = vld [vmem:[%s19543_s1 + $0x8] sm:$0xff] }
0x166b   :  { %13101 = vmatprep.subr.mxu0 %v14710_v22 }
0x166c   :  { %13102 = vmatpush3.msra.mxu0 %v14710_v22  ;;  %v14753_v22 = vld [vmem:[%s19543_s1] sm:$0xff] }
0x166d   :  { %13103 = vmatprep.subr.mxu0 %v14711_v25 }
0x166e   :  { %13104 = vmatpush3.msra.mxu0 %v14711_v25  ;;  %v5306_v25 = vpop.permute.xlu1 %5305 }
0x166f   :  { %13105 = vmatprep.subr.mxu0 %v14712_v19 }
0x1670   :  { %13106 = vmatpush3.msra.mxu0 %v14712_v19 }
0x1671   :  { %13107 = vmatprep.subr.mxu0 %v14713_v29 }
0x1672   :  { %13108 = vmatpush3.msra.mxu0 %v14713_v29 }
0x1673   :  { %13109 = vmatprep.subr.mxu0 %v14714_v34 }
0x1674   :  { %13110 = vmatpush3.msra.mxu0 %v14714_v34  ;;  %v5301_v34 = vpop.permute.xlu0 %5300 }
0x1675   :  { %13111 = vmatprep.subr.mxu0 %v14715_v43 }
0x1676   :  { %13112 = vmatpush3.msra.mxu0 %v14715_v43 }
0x1677   :  { %13113 = vmatprep.subr.mxu0 %v14716_v12 }
0x1678   :  { %13114 = vmatpush3.msra.mxu0 %v14716_v12 }
0x1679   :  { %13115 = vmatprep.subr.mxu0 %v14717_v8 }
0x167a   :  { %13116 = vmatpush3.msra.mxu0 %v14717_v8 }
0x167b   :  { %13117 = vmatprep.subr.mxu0 %v14718_v44 }
0x167c   :  { %13118 = vmatpush3.msra.mxu0 %v14718_v44 }
0x167d   :  { %13119 = vmatprep.subr.mxu0 %v14719_v4 }
0x167e   :  { %13120 = vmatpush3.msra.mxu0 %v14719_v4 }
0x167f   :  { %13121 = vmatprep.subr.mxu0 %v14720_v35 }
0x1680   :  { %13122 = vmatpush3.msra.mxu0 %v14720_v35 }
0x1681   :  { %13123 = vmatprep.subr.mxu0 %v14721_v23 }
0x1682   :  { %13124 = vmatpush3.msra.mxu0 %v14721_v23  ;;  %v5316_v23 = vpop.permute.xlu1 %5315 }
0x1683   :  { %13126 = vmatmul.mubr.f32.vlgmr.msra.gmra.mxu0 %v16850_v21  ;;  %13183 = vmatprep.subr.mxu0 %v14722_v26  ;;  %v14724_v21 = vld [vmem:[%s19543_s1 + $0xe8] sm:$0xff] }
0x1684   :  { %13128 = vmatprep.mubr.f32.mxu0 %v16856_v27  ;;  %13184 = vmatpush3.msra.mxu0 %v14722_v26  ;;  %v14726_v27 = vld [vmem:[%s19543_s1 + $0xd8] sm:$0xff] }
0x1685   :  { %13185 = vmatprep.subr.mxu0 %v14723_v31 }
0x1686   :  { %13186 = vmatpush3.msra.mxu0 %v14723_v31 }
0x1687   :  { %13129 = vmatmul.mubr.f32.gmra.mxu0 %v16858_v28  ;;  %13187 = vmatprep.subr.mxu0 %v14724_v21  ;;  %v14727_v28 = vld [vmem:[%s19543_s1 + $0xd0] sm:$0xff] }
0x1688   :  { %13188 = vmatpush3.msra.mxu0 %v14724_v21 }
0x1689   :  { %13189 = vmatprep.subr.mxu0 %v14725_v38 }
0x168a   :  { %13190 = vmatpush3.msra.mxu0 %v14725_v38 }
0x168b   :  { %13191 = vmatprep.subr.mxu0 %v14726_v27 }
0x168c   :  { %13192 = vmatpush3.msra.mxu0 %v14726_v27 }
0x168d   :  { %13193 = vmatprep.subr.mxu0 %v14727_v28 }
0x168e   :  { %13194 = vmatpush3.msra.mxu0 %v14727_v28  ;;  %v5311_v28 = vpop.permute.xlu0 %5310 }
0x168f   :  { %13195 = vmatprep.subr.mxu0 %v14728_v32 }
0x1690   :  { %13196 = vmatpush3.msra.mxu0 %v14728_v32 }
0x1691   :  { %13197 = vmatprep.subr.mxu0 %v14729_v5 }
0x1692   :  { %13198 = vmatpush3.msra.mxu0 %v14729_v5 }
0x1693   :  { %13199 = vmatprep.subr.mxu0 %v14730_v46 }
0x1694   :  { %13200 = vmatpush3.msra.mxu0 %v14730_v46 }
0x1695   :  { %13201 = vmatprep.subr.mxu0 %v14731_v0 }
0x1696   :  { %13202 = vmatpush3.msra.mxu0 %v14731_v0 }
0x1697   :  { %13203 = vmatprep.subr.mxu0 %v14732_v47 }
0x1698   :  { %13204 = vmatpush3.msra.mxu0 %v14732_v47 }
0x1699   :  { %13205 = vmatprep.subr.mxu0 %v14733_v37 }
0x169a   :  { %13206 = vmatpush3.msra.mxu0 %v14733_v37 }
0x169b   :  { %13207 = vmatprep.subr.mxu0 %v14734_v48 }
0x169c   :  { %13208 = vmatpush3.msra.mxu0 %v14734_v48 }
0x169d   :  { %13209 = vmatprep.subr.mxu0 %v14735_v49 }
0x169e   :  { %13210 = vmatpush3.msra.mxu0 %v14735_v49 }
0x169f   :  { %13211 = vmatprep.subr.mxu0 %v14736_v52 }
0x16a0   :  { %13212 = vmatpush3.msra.mxu0 %v14736_v52 }
0x16a1   :  { %13213 = vmatprep.subr.mxu0 %v14737_v53 }
0x16a2   :  { %13214 = vmatpush3.msra.mxu0 %v14737_v53 }
0x1723   :  { %v13089_v56 = vpop.f32.mrf.mxu0 }
0x1724   :  { %v17483_v57 = vadd.f32 %v13089_v56, %v17355_v11  ;;  %v10138_v11 = vld [vmem:[%s19546_s4 + $0x228] sm:$0xff] }
0x1725   :  { %v5089_v58 = vpop.f32.mrf.mxu0  ;;  %v10186_v56 = vld [vmem:[%s19546_s4 + $0x268] sm:$0xff] }
0x1726   :  { %v17486_v59 = vadd.f32 %v5089_v58, %v17358_v3  ;;  %v14738_v3 = vld [vmem:[%s19543_s1 + $0x78] sm:$0xff] }
0x1727   :  { %v13092_v60 = vpop.f32.mrf.mxu0 }
0x1728   :  { %v17489_v61 = vadd.f32 %v13092_v60, %v17361_v40  ;;  %v14739_v40 = vld [vmem:[%s19543_s1 + $0x70] sm:$0xff]  ;;  %v10181_v60 = vld [vmem:[%s19546_s4 + $0x240] sm:$0xff] }
0x1729   :  { %v5099_v62 = vpop.f32.mrf.mxu0 }
0x172a   :  { %v17492_v1 = vadd.f32 %v5099_v62, %v17364_v10  ;;  %v14741_v10 = vld [vmem:[%s19543_s1 + $0x60] sm:$0xff]  ;;  %v10183_v62 = vld [vmem:[%s19546_s4 + $0x250] sm:$0xff] }
0x1743   :  { %v13127_v6 = vpop.f32.mrf.mxu0 }
0x1745   :  { %v5178_v9 = vpop.f32.mrf.mxu0 }
0x1747   :  { %v13130_v41 = vpop.f32.mrf.mxu0 }
0x1748   :  { %13131 = vmatprep.subr.mxu1 %v13130_v41 }
0x1749   :  { %v5188_v33 = vpop.f32.mrf.mxu0  ;;  %13132 = vmatpush3.msra.mxu1 %v13130_v41  ;;  %v14756_v41 = vld [vmem:[%s19543_s1 + $0x168] sm:$0xff] }
0x174a   :  { %13133 = vmatprep.subr.mxu1 %v5188_v33 }
0x174b   :  { %13134 = vmatpush3.msra.mxu1 %v5188_v33  ;;  %v14757_v33 = vld [vmem:[%s19543_s1 + $0x160] sm:$0xff] }
0x174c   :  { %13135 = vmatprep.subr.mxu1 %v13127_v6 }
0x174d   :  { %13136 = vmatpush3.msra.mxu1 %v13127_v6  ;;  %v10184_v6 = vld [vmem:[%s19546_s4 + $0x258] sm:$0xff] }
0x174e   :  { %13137 = vmatprep.subr.mxu1 %v5178_v9 }
0x174f   :  { %13138 = vmatpush3.msra.mxu1 %v5178_v9  ;;  %v14755_v9 = vld [vmem:[%s19543_s1 + $0x170] sm:$0xff] }
0x1750   :  { %13140 = vmatmul.mubr.msk.f32.vlgmr.msra.gmra.mxu1 %vm2057_vm3, %v10138_v11  ;;  %13145 = vmatprep.subr.mxu1 %v14738_v3  ;;  %v14758_v11 = vld [vmem:[%s19543_s1 + $0x158] sm:$0xff] }
0x1751   :  { %13142 = vmatprep.mubr.msk.f32.mxu1 %vm2057_vm3, %v10139_v30  ;;  %13146 = vmatpush3.msra.mxu1 %v14738_v3  ;;  %v14759_v30 = vld [vmem:[%s19543_s1 + $0x150] sm:$0xff]  ;;  %v14760_v3 = vld [vmem:[%s19543_s1 + $0x148] sm:$0xff] }
0x1752   :  { %13147 = vmatprep.subr.mxu1 %v14739_v40 }
0x1753   :  { %13148 = vmatpush3.msra.mxu1 %v14739_v40  ;;  %v14762_v40 = vld [vmem:[%s19543_s1 + $0x138] sm:$0xff] }
0x1754   :  { %13143 = vmatmul.mubr.msk.f32.gmra.mxu1 %vm2057_vm3, %v10140_v36  ;;  %13149 = vmatprep.subr.mxu1 %v14740_v63  ;;  %v14761_v36 = vld [vmem:[%s19543_s1 + $0x140] sm:$0xff] }
0x1755   :  { %13150 = vmatpush3.msra.mxu1 %v14740_v63  ;;  %v14763_v63 = vld [vmem:[%s19543_s1 + $0x130] sm:$0xff] }
0x1756   :  { %13151 = vmatprep.subr.mxu1 %v14741_v10 }
0x1757   :  { %13152 = vmatpush3.msra.mxu1 %v14741_v10  ;;  %v14764_v10 = vld [vmem:[%s19543_s1 + $0x128] sm:$0xff] }
0x1758   :  { %13153 = vmatprep.subr.mxu1 %v14742_v13 }
0x1759   :  { %13154 = vmatpush3.msra.mxu1 %v14742_v13  ;;  %v14765_v13 = vld [vmem:[%s19543_s1 + $0x120] sm:$0xff] }
0x175a   :  { %13155 = vmatprep.subr.mxu1 %v14743_v14 }
0x175b   :  { %13156 = vmatpush3.msra.mxu1 %v14743_v14  ;;  %v14766_v14 = vld [vmem:[%s19543_s1 + $0x118] sm:$0xff] }
0x175c   :  { %13157 = vmatprep.subr.mxu1 %v14744_v45 }
0x175d   :  { %13158 = vmatpush3.msra.mxu1 %v14744_v45  ;;  %v14767_v45 = vld [vmem:[%s19543_s1 + $0x110] sm:$0xff] }
0x175e   :  { %13159 = vmatprep.subr.mxu1 %v14745_v15 }
0x175f   :  { %13160 = vmatpush3.msra.mxu1 %v14745_v15  ;;  %v14768_v15 = vld [vmem:[%s19543_s1 + $0x108] sm:$0xff] }
0x1760   :  { %13161 = vmatprep.subr.mxu1 %v14746_v39 }
0x1761   :  { %13162 = vmatpush3.msra.mxu1 %v14746_v39  ;;  %v14769_v39 = vld [vmem:[%s19543_s1 + $0x100] sm:$0xff] }
0x1762   :  { %13163 = vmatprep.subr.mxu1 %v14747_v16 }
0x1763   :  { %13164 = vmatpush3.msra.mxu1 %v14747_v16  ;;  %v10189_v16 = vld [vmem:[%s19546_s4 + $0x280] sm:$0xff] }
0x1764   :  { %13165 = vmatprep.subr.mxu1 %v14748_v24 }
0x1765   :  { %13166 = vmatpush3.msra.mxu1 %v14748_v24 }
0x1766   :  { %13167 = vmatprep.subr.mxu1 %v14749_v17 }
0x1767   :  { %13168 = vmatpush3.msra.mxu1 %v14749_v17 }
0x1768   :  { %13169 = vmatprep.subr.mxu1 %v14750_v18 }
0x1769   :  { %13170 = vmatpush3.msra.mxu1 %v14750_v18 }
0x176a   :  { %13171 = vmatprep.subr.mxu1 %v14751_v50 }
0x176b   :  { %13172 = vmatpush3.msra.mxu1 %v14751_v50 }
0x176c   :  { %13173 = vmatprep.subr.mxu1 %v14752_v20 }
0x176d   :  { %13174 = vmatpush3.msra.mxu1 %v14752_v20 }
0x176e   :  { %13175 = vmatprep.subr.mxu1 %v14753_v22 }
0x176f   :  { %13176 = vmatpush3.msra.mxu1 %v14753_v22 }
0x1810   :  { %v13141_v19 = vpop.f32.mrf.mxu1 }
0x1811   :  { %v5295_v29 = vadd.f32 %v13141_v19, %v17483_v57  ;;  %v10187_v57 = vld [vmem:[%s19546_s4 + $0x270] sm:$0xff] }
0x1812   :  { %v5275_v43 = vpop.f32.mrf.mxu1 }
0x1813   :  { %v5319_v12 = vadd.f32 %v5306_v25, %v5295_v29  ;;  %v5294_v8 = vadd.f32 %v5275_v43, %v17486_v59  ;;  %v10188_v59 = vld [vmem:[%s19546_s4 + $0x278] sm:$0xff] }
0x1814   :  { %v13144_v44 = vpop.f32.mrf.mxu1 }
0x1815   :  { %v5318_v4 = vadd.f32 %v5301_v34, %v5294_v8  ;;  %v5297_v35 = vadd.f32 %v13144_v44, %v17489_v61  ;;  %v5323_v26 = vadd.f32 %v5319_v12, %v16140_v51  ;;  %v10182_v61 = vld [vmem:[%s19546_s4 + $0x248] sm:$0xff] }
0x1816   :  { %v5285_v31 = vpop.f32.mrf.mxu1 }
0x1817   :  { %v5322_v21 = vadd.f32 %v5318_v4, %v16138_v7  ;;  %v5321_v38 = vadd.f32 %v5316_v23, %v5297_v35  ;;  %v5296_v27 = vadd.f32 %v5285_v31, %v17492_v1  ;;  %v17562_v46 = vmax.f32 %v5323_v26, 0.0  ;;  %v14754_v1 = vld [vmem:[%s19543_s1 + $0x178] sm:$0xff]  ;;  %v10190_v23 = vld [vmem:[%s19546_s4 + $0x288] sm:$0xff]  ;;  %v10191_v26 = vld [vmem:[%s19546_s4 + $0x290] sm:$0xff] }
0x1818   :  { %v14770_v31 = vld [vmem:[%s19543_s1 + $0x1f8] sm:$0xff] }
0x1819   :  { %v17560_v32 = vmax.f32 %v5322_v21, 0.0  ;;  %v5320_v5 = vadd.f32 %v5311_v28, %v5296_v27  ;;  %v5325_v0 = vadd.f32 %v5321_v38, %v16148_v54  ;;  %v10192_v21 = vld [vmem:[%s19546_s4 + $0x298] sm:$0xff]  ;;  %v14771_v38 = vld [vmem:[%s19543_s1 + $0x1f0] sm:$0xff]  ;;  %v14772_v27 = vld [vmem:[%s19543_s1 + $0x1e8] sm:$0xff] }
0x181a   :  { %v14773_v28 = vld [vmem:[%s19543_s1 + $0x1e0] sm:$0xff] }
0x181b   :  { %v5324_v47 = vadd.f32 %v5320_v5, %v16146_v42  ;;  %13177 = vmatprep.mubr.f32.mxu1 %v17560_v32  ;;  %13215 = vmatprep.mubr.f32.mxu0 %v17560_v32  ;;  %v17572_v51 = vmax.f32 %v5325_v0, 0.0  ;;  %v10185_v42 = vld [vmem:[%s19546_s4 + $0x260] sm:$0xff]  ;;  %v14774_v5 = vld [vmem:[%s19543_s1 + $0x1d8] sm:$0xff]  ;;  %v14775_v0 = vld [vmem:[%s19543_s1 + $0x1d0] sm:$0xff] }
0x181c   :  { %13178 = vmatmul.mubr.f32.vlgmr.msra.gmra.mxu1 %v17562_v46  ;;  %13216 = vmatmul.mubr.f32.vlgmr.msra.gmra.mxu0 %v17562_v46 }
0x181d   :  { %v17570_v7 = vmax.f32 %v5324_v47, 0.0  ;;  %v14776_v47 = vld [vmem:[%s19543_s1 + $0x1c8] sm:$0xff] }
0x181f   :  { %13180 = vmatprep.mubr.f32.mxu1 %v17570_v7  ;;  %13218 = vmatprep.mubr.f32.mxu0 %v17570_v7 }
0x1820   :  { %13181 = vmatmul.mubr.f32.gmra.mxu1 %v17572_v51  ;;  %13219 = vmatmul.mubr.f32.gmra.mxu0 %v17572_v51 }
0x1821   :  { %13229 = vmatprep.mubr.msk.f32.mxu1 %vm2057_vm3, %v10185_v42  ;;  %13295 = vmatprep.mubr.msk.f32.mxu0 %vm2057_vm3, %v10189_v16  ;;  %v14777_v42 = vld [vmem:[%s19543_s1 + $0x1c0] sm:$0xff] }
0x1822   :  { %v14793_v16 = vld [vmem:[%s19543_s1 + $0x240] sm:$0xff] }
0x18dc   :  { %v13217_v54 = vpop.f32.mrf.mxu0  ;;  %v13179_v37 = vpop.f32.mrf.mxu1 }
0x18de   :  { %v5531_v48 = vpop.f32.mrf.mxu0  ;;  %v5446_v52 = vpop.f32.mrf.mxu1 }
0x18e0   :  { %v13220_v49 = vpop.f32.mrf.mxu0  ;;  %v13182_v55 = vpop.f32.mrf.mxu1 }
0x18e1   :  { %13221 = vmatprep.subr.mxu1 %v13220_v49 }
0x18e2   :  { %v5541_v53 = vpop.f32.mrf.mxu0  ;;  %13222 = vmatpush3.msra.mxu1 %v13220_v49  ;;  %v5456_v58 = vpop.f32.mrf.mxu1  ;;  %v14781_v49 = vld [vmem:[%s19543_s1 + $0x1a0] sm:$0xff] }
0x18e3   :  { %13223 = vmatprep.subr.mxu1 %v5541_v53 }
0x18e4   :  { %13224 = vmatpush3.msra.mxu1 %v5541_v53  ;;  %v14783_v53 = vld [vmem:[%s19543_s1 + $0x190] sm:$0xff] }
0x18e5   :  { %13225 = vmatprep.subr.mxu1 %v13217_v54 }
0x18e6   :  { %13226 = vmatpush3.msra.mxu1 %v13217_v54  ;;  %v14778_v54 = vld [vmem:[%s19543_s1 + $0x1b8] sm:$0xff] }
0x18e7   :  { %13227 = vmatprep.subr.mxu1 %v5531_v48 }
0x18e8   :  { %13228 = vmatpush3.msra.mxu1 %v5531_v48  ;;  %v14780_v48 = vld [vmem:[%s19543_s1 + $0x1a8] sm:$0xff] }
0x18e9   :  { %13230 = vmatmul.mubr.msk.f32.vlgmr.msra.gmra.mxu1 %vm2057_vm3, %v10186_v56  ;;  %13235 = vmatprep.subr.mxu1 %v13182_v55  ;;  %v14785_v56 = vld [vmem:[%s19543_s1 + $0x180] sm:$0xff] }
0x18ea   :  { %13236 = vmatpush3.msra.mxu1 %v13182_v55  ;;  %13232 = vmatprep.mubr.msk.f32.mxu1 %vm2057_vm3, %v10187_v57  ;;  %v14784_v55 = vld [vmem:[%s19543_s1 + $0x188] sm:$0xff]  ;;  %v10193_v57 = vld [vmem:[%s19546_s4 + $0x2a0] sm:$0xff] }
0x18eb   :  { %13237 = vmatprep.subr.mxu1 %v5456_v58 }
0x18ec   :  { %13238 = vmatpush3.msra.mxu1 %v5456_v58 }
0x18ed   :  { %13233 = vmatmul.mubr.msk.f32.gmra.mxu1 %vm2057_vm3, %v10188_v59  ;;  %13239 = vmatprep.subr.mxu1 %v13179_v37 }
0x18ee   :  { %13240 = vmatpush3.msra.mxu1 %v13179_v37  ;;  %13243 = vmatprep.mubr.msk.f32.mxu1 %vm2057_vm3, %v10181_v60  ;;  %v14779_v37 = vld [vmem:[%s19543_s1 + $0x1b0] sm:$0xff] }
0x18ef   :  { %13241 = vmatprep.subr.mxu1 %v5446_v52 }
0x18f0   :  { %13242 = vmatpush3.msra.mxu1 %v5446_v52  ;;  %v14782_v52 = vld [vmem:[%s19543_s1 + $0x198] sm:$0xff] }
0x18f1   :  { %13244 = vmatmul.mubr.msk.f32.vlgmr.msra.gmra.mxu1 %vm2057_vm3, %v10182_v61  ;;  %13249 = vmatprep.subr.mxu1 %v14754_v1 }
0x18f2   :  { %13250 = vmatpush3.msra.mxu1 %v14754_v1  ;;  %13246 = vmatprep.mubr.msk.f32.mxu1 %vm2057_vm3, %v10183_v62 }
0x18f3   :  { %13251 = vmatprep.subr.mxu1 %v14755_v9 }
0x18f4   :  { %13252 = vmatpush3.msra.mxu1 %v14755_v9 }
0x18f5   :  { %13247 = vmatmul.mubr.msk.f32.gmra.mxu1 %vm2057_vm3, %v10184_v6  ;;  %13253 = vmatprep.subr.mxu1 %v14756_v41 }
0x18f6   :  { %13254 = vmatpush3.msra.mxu1 %v14756_v41  ;;  %13281 = vmatprep.mubr.f32.mxu1 %v17560_v32 }
0x18f7   :  { %13255 = vmatprep.subr.mxu1 %v14757_v33 }
0x18f8   :  { %13256 = vmatpush3.msra.mxu1 %v14757_v33 }
0x18f9   :  { %13257 = vmatprep.subr.mxu1 %v14758_v11 }
0x18fa   :  { %13258 = vmatpush3.msra.mxu1 %v14758_v11 }
0x18fb   :  { %13259 = vmatprep.subr.mxu1 %v14759_v30 }
0x18fc   :  { %13260 = vmatpush3.msra.mxu1 %v14759_v30 }
0x18fd   :  { %13261 = vmatprep.subr.mxu1 %v14760_v3 }
0x18fe   :  { %13262 = vmatpush3.msra.mxu1 %v14760_v3  ;;  %v10194_v3 = vld [vmem:[%s19546_s4 + $0x2a8] sm:$0xff] }
0x18ff   :  { %13263 = vmatprep.subr.mxu1 %v14761_v36 }
0x1900   :  { %13264 = vmatpush3.msra.mxu1 %v14761_v36  ;;  %v10195_v36 = vld [vmem:[%s19546_s4 + $0x2b0] sm:$0xff] }
0x1901   :  { %13265 = vmatprep.subr.mxu1 %v14762_v40 }
0x1902   :  { %13266 = vmatpush3.msra.mxu1 %v14762_v40  ;;  %v14786_v40 = vld [vmem:[%s19543_s1 + $0x278] sm:$0xff] }
0x1903   :  { %13267 = vmatprep.subr.mxu1 %v14763_v63 }
0x1904   :  { %13268 = vmatpush3.msra.mxu1 %v14763_v63  ;;  %v10196_v63 = vld [vmem:[%s19546_s4 + $0x2b8] sm:$0xff] }
0x1905   :  { %13269 = vmatprep.subr.mxu1 %v14764_v10 }
0x1906   :  { %13270 = vmatpush3.msra.mxu1 %v14764_v10  ;;  %v14787_v10 = vld [vmem:[%s19543_s1 + $0x270] sm:$0xff] }
0x1907   :  { %13271 = vmatprep.subr.mxu1 %v14765_v13 }
0x1908   :  { %13272 = vmatpush3.msra.mxu1 %v14765_v13  ;;  %v14788_v13 = vld [vmem:[%s19543_s1 + $0x268] sm:$0xff] }
0x1909   :  { %13273 = vmatprep.subr.mxu1 %v14766_v14 }
0x190a   :  { %13274 = vmatpush3.msra.mxu1 %v14766_v14  ;;  %v14789_v14 = vld [vmem:[%s19543_s1 + $0x260] sm:$0xff] }
0x190b   :  { %13275 = vmatprep.subr.mxu1 %v14767_v45 }
0x190c   :  { %13276 = vmatpush3.msra.mxu1 %v14767_v45  ;;  %v14790_v45 = vld [vmem:[%s19543_s1 + $0x258] sm:$0xff] }
0x190d   :  { %13277 = vmatprep.subr.mxu1 %v14768_v15 }
0x190e   :  { %13278 = vmatpush3.msra.mxu1 %v14768_v15  ;;  %v14791_v15 = vld [vmem:[%s19543_s1 + $0x250] sm:$0xff] }
0x190f   :  { %13279 = vmatprep.subr.mxu1 %v14769_v39 }
0x1910   :  { %13280 = vmatpush3.msra.mxu1 %v14769_v39  ;;  %v14792_v39 = vld [vmem:[%s19543_s1 + $0x248] sm:$0xff] }
0x1911   :  { %13282 = vmatmul.mubr.f32.vlgmr.msra.gmra.mxu1 %v17562_v46 }
0x1912   :  { %13284 = vmatprep.mubr.f32.mxu1 %v17570_v7 }
0x1915   :  { %13285 = vmatmul.mubr.f32.gmra.mxu1 %v17572_v51 }
0x1916   :  { %13347 = vmatprep.mubr.msk.f32.mxu1 %vm2057_vm3, %v10193_v57  ;;  %v14813_v57 = vld [vmem:[%s19543_s1 + $0x2a0] sm:$0xff] }
0x19a9   :  { %v13231_v24 = vpop.f32.mrf.mxu1 }
0x19ab   :  { %v5628_v17 = vpop.f32.mrf.mxu1 }
0x19ad   :  { %v13234_v18 = vpop.f32.mrf.mxu1 }
0x19af   :  { %v5638_v50 = vpop.f32.mrf.mxu1 }
0x19b1   :  { %v13245_v20 = vpop.f32.mrf.mxu1 }
0x19b2   :  { %v17666_v22 = vadd.f32 %v13245_v20, %v13231_v24  ;;  %v14794_v24 = vld [vmem:[%s19543_s1 + $0x238] sm:$0xff] }
0x19b3   :  { %v5725_v25 = vpop.f32.mrf.mxu1  ;;  %v14798_v20 = vld [vmem:[%s19543_s1 + $0x218] sm:$0xff] }
0x19b4   :  { %v17668_v19 = vadd.f32 %v5725_v25, %v5628_v17  ;;  %v14795_v17 = vld [vmem:[%s19543_s1 + $0x230] sm:$0xff]  ;;  %v14800_v25 = vld [vmem:[%s19543_s1 + $0x208] sm:$0xff] }
0x19b5   :  { %v13248_v29 = vpop.f32.mrf.mxu1 }
0x19b6   :  { %v17670_v34 = vadd.f32 %v13248_v29, %v13234_v18  ;;  %v14796_v18 = vld [vmem:[%s19543_s1 + $0x228] sm:$0xff]  ;;  %v10197_v29 = vld [vmem:[%s19546_s4 + $0x2c0] sm:$0xff] }
0x19b7   :  { %v5735_v43 = vpop.f32.mrf.mxu1 }
0x19b8   :  { %v17672_v12 = vadd.f32 %v5735_v43, %v5638_v50  ;;  %v14797_v50 = vld [vmem:[%s19543_s1 + $0x220] sm:$0xff] }
0x19d1   :  { %v13283_v8 = vpop.f32.mrf.mxu1 }
0x19d3   :  { %v5810_v44 = vpop.f32.mrf.mxu1 }
0x19d5   :  { %v13286_v4 = vpop.f32.mrf.mxu1 }
0x19d6   :  { %13287 = vmatprep.subr.mxu0 %v13286_v4 }
0x19d7   :  { %v5820_v35 = vpop.f32.mrf.mxu1  ;;  %13288 = vmatpush3.msra.mxu0 %v13286_v4 }
0x19d8   :  { %13289 = vmatprep.subr.mxu0 %v5820_v35 }
0x19d9   :  { %13290 = vmatpush3.msra.mxu0 %v5820_v35 }
0x19da   :  { %13291 = vmatprep.subr.mxu0 %v13283_v8 }
0x19db   :  { %13292 = vmatpush3.msra.mxu0 %v13283_v8 }
0x19dc   :  { %13293 = vmatprep.subr.mxu0 %v5810_v44 }
0x19dd   :  { %13294 = vmatpush3.msra.mxu0 %v5810_v44 }
0x19de   :  { %13296 = vmatmul.mubr.msk.f32.vlgmr.msra.gmra.mxu0 %vm2057_vm3, %v10190_v23  ;;  %13301 = vmatprep.subr.mxu0 %v14770_v31 }
0x19df   :  { %13302 = vmatpush3.msra.mxu0 %v14770_v31  ;;  %13298 = vmatprep.mubr.msk.f32.mxu0 %vm2057_vm3, %v10191_v26 }
0x19e0   :  { %13303 = vmatprep.subr.mxu0 %v14771_v38 }
0x19e1   :  { %13304 = vmatpush3.msra.mxu0 %v14771_v38 }
0x19e2   :  { %13299 = vmatmul.mubr.msk.f32.gmra.mxu0 %vm2057_vm3, %v10192_v21  ;;  %13305 = vmatprep.subr.mxu0 %v14772_v27 }
0x19e3   :  { %13306 = vmatpush3.msra.mxu0 %v14772_v27  ;;  %13333 = vmatprep.mubr.f32.mxu0 %v17560_v32  ;;  %v10198_v27 = vld [vmem:[%s19546_s4 + $0x2c8] sm:$0xff] }
0x19e4   :  { %13307 = vmatprep.subr.mxu0 %v14773_v28 }
0x19e5   :  { %13308 = vmatpush3.msra.mxu0 %v14773_v28  ;;  %v10199_v28 = vld [vmem:[%s19546_s4 + $0x2d0] sm:$0xff] }
0x19e6   :  { %13309 = vmatprep.subr.mxu0 %v14774_v5 }
0x19e7   :  { %13310 = vmatpush3.msra.mxu0 %v14774_v5  ;;  %v14802_v5 = vld [vmem:[%s19543_s1 + $0x2f8] sm:$0xff] }
0x19e8   :  { %13311 = vmatprep.subr.mxu0 %v14775_v0 }
0x19e9   :  { %13312 = vmatpush3.msra.mxu0 %v14775_v0  ;;  %v10200_v0 = vld [vmem:[%s19546_s4 + $0x2d8] sm:$0xff] }
0x19ea   :  { %13313 = vmatprep.subr.mxu0 %v14776_v47 }
0x19eb   :  { %13314 = vmatpush3.msra.mxu0 %v14776_v47  ;;  %v14803_v47 = vld [vmem:[%s19543_s1 + $0x2f0] sm:$0xff] }
0x19ec   :  { %13315 = vmatprep.subr.mxu0 %v14777_v42 }
0x19ed   :  { %13316 = vmatpush3.msra.mxu0 %v14777_v42  ;;  %v14804_v42 = vld [vmem:[%s19543_s1 + $0x2e8] sm:$0xff] }
0x19ee   :  { %13317 = vmatprep.subr.mxu0 %v14778_v54 }
0x19ef   :  { %13318 = vmatpush3.msra.mxu0 %v14778_v54  ;;  %v14805_v54 = vld [vmem:[%s19543_s1 + $0x2e0] sm:$0xff] }
0x19f0   :  { %13319 = vmatprep.subr.mxu0 %v14779_v37 }
0x19f1   :  { %13320 = vmatpush3.msra.mxu0 %v14779_v37  ;;  %v14806_v37 = vld [vmem:[%s19543_s1 + $0x2d8] sm:$0xff] }
0x19f2   :  { %13321 = vmatprep.subr.mxu0 %v14780_v48 }
0x19f3   :  { %13322 = vmatpush3.msra.mxu0 %v14780_v48  ;;  %v14807_v48 = vld [vmem:[%s19543_s1 + $0x2d0] sm:$0xff] }
0x19f4   :  { %13323 = vmatprep.subr.mxu0 %v14781_v49 }
0x19f5   :  { %13324 = vmatpush3.msra.mxu0 %v14781_v49  ;;  %v14808_v49 = vld [vmem:[%s19543_s1 + $0x2c8] sm:$0xff] }
0x19f6   :  { %13325 = vmatprep.subr.mxu0 %v14782_v52 }
0x19f7   :  { %13326 = vmatpush3.msra.mxu0 %v14782_v52  ;;  %v14809_v52 = vld [vmem:[%s19543_s1 + $0x2c0] sm:$0xff] }
0x19f8   :  { %13327 = vmatprep.subr.mxu0 %v14783_v53 }
0x19f9   :  { %13328 = vmatpush3.msra.mxu0 %v14783_v53  ;;  %v14810_v53 = vld [vmem:[%s19543_s1 + $0x2b8] sm:$0xff] }
0x19fa   :  { %13329 = vmatprep.subr.mxu0 %v14784_v55 }
0x19fb   :  { %13330 = vmatpush3.msra.mxu0 %v14784_v55  ;;  %v14811_v55 = vld [vmem:[%s19543_s1 + $0x2b0] sm:$0xff] }
0x19fc   :  { %13331 = vmatprep.subr.mxu0 %v14785_v56 }
0x19fd   :  { %13332 = vmatpush3.msra.mxu0 %v14785_v56  ;;  %v14812_v56 = vld [vmem:[%s19543_s1 + $0x2a8] sm:$0xff] }
0x19fe   :  { %13334 = vmatmul.mubr.f32.vlgmr.msra.gmra.mxu0 %v17562_v46 }
0x19ff   :  { %13336 = vmatprep.mubr.f32.mxu0 %v17570_v7 }
0x1a02   :  { %13337 = vmatmul.mubr.f32.gmra.mxu0 %v17572_v51 }
0x1a03   :  { %13399 = vmatprep.mubr.msk.f32.mxu0 %vm2057_vm3, %v10197_v29  ;;  %v14829_v29 = vld [vmem:[%s19543_s1 + $0x320] sm:$0xff] }
0x1a9e   :  { %v13297_v58 = vpop.f32.mrf.mxu0 }
0x1a9f   :  { %v17743_v59 = vadd.f32 %v13297_v58, %v17666_v22  ;;  %v14799_v22 = vld [vmem:[%s19543_s1 + $0x210] sm:$0xff]  ;;  %v14814_v58 = vld [vmem:[%s19543_s1 + $0x298] sm:$0xff] }
0x1aa0   :  { %v5907_v60 = vpop.f32.mrf.mxu0 }
0x1aa1   :  { %v17746_v61 = vadd.f32 %v5907_v60, %v17668_v19  ;;  %v14801_v19 = vld [vmem:[%s19543_s1 + $0x200] sm:$0xff]  ;;  %v14816_v60 = vld [vmem:[%s19543_s1 + $0x288] sm:$0xff] }
0x1aa2   :  { %v13300_v62 = vpop.f32.mrf.mxu0 }
0x1aa3   :  { %v17749_v1 = vadd.f32 %v13300_v62, %v17670_v34  ;;  %v10201_v62 = vld [vmem:[%s19546_s4 + $0x2e0] sm:$0xff] }
0x1aa4   :  { %v5917_v6 = vpop.f32.mrf.mxu0 }
0x1aa5   :  { %v17752_v9 = vadd.f32 %v5917_v6, %v17672_v12 }
0x1abe   :  { %v13335_v41 = vpop.f32.mrf.mxu0 }
0x1ac0   :  { %v5996_v33 = vpop.f32.mrf.mxu0 }
0x1ac2   :  { %v13338_v11 = vpop.f32.mrf.mxu0 }
0x1ac3   :  { %13339 = vmatprep.subr.mxu1 %v13338_v11 }
0x1ac4   :  { %v6006_v30 = vpop.f32.mrf.mxu0  ;;  %13340 = vmatpush3.msra.mxu1 %v13338_v11 }
0x1ac5   :  { %13341 = vmatprep.subr.mxu1 %v6006_v30 }
0x1ac6   :  { %13342 = vmatpush3.msra.mxu1 %v6006_v30 }
0x1ac7   :  { %13343 = vmatprep.subr.mxu1 %v13335_v41 }
0x1ac8   :  { %13344 = vmatpush3.msra.mxu1 %v13335_v41 }
0x1ac9   :  { %13345 = vmatprep.subr.mxu1 %v5996_v33 }
0x1aca   :  { %13346 = vmatpush3.msra.mxu1 %v5996_v33 }
0x1acb   :  { %13348 = vmatmul.mubr.msk.f32.vlgmr.msra.gmra.mxu1 %vm2057_vm3, %v10194_v3  ;;  %13353 = vmatprep.subr.mxu1 %v14786_v40 }
0x1acc   :  { %13354 = vmatpush3.msra.mxu1 %v14786_v40  ;;  %13350 = vmatprep.mubr.msk.f32.mxu1 %vm2057_vm3, %v10195_v36 }
0x1acd   :  { %13355 = vmatprep.subr.mxu1 %v14787_v10 }
0x1ace   :  { %13356 = vmatpush3.msra.mxu1 %v14787_v10 }
0x1acf   :  { %13351 = vmatmul.mubr.msk.f32.gmra.mxu1 %vm2057_vm3, %v10196_v63  ;;  %13357 = vmatprep.subr.mxu1 %v14788_v13 }
0x1ad0   :  { %13358 = vmatpush3.msra.mxu1 %v14788_v13  ;;  %13385 = vmatprep.mubr.f32.mxu1 %v17560_v32  ;;  %v10202_v13 = vld [vmem:[%s19546_s4 + $0x2e8] sm:$0xff] }
0x1ad1   :  { %13359 = vmatprep.subr.mxu1 %v14789_v14 }
0x1ad2   :  { %13360 = vmatpush3.msra.mxu1 %v14789_v14  ;;  %v10203_v14 = vld [vmem:[%s19546_s4 + $0x2f0] sm:$0xff] }
0x1ad3   :  { %13361 = vmatprep.subr.mxu1 %v14790_v45 }
0x1ad4   :  { %13362 = vmatpush3.msra.mxu1 %v14790_v45  ;;  %v14818_v45 = vld [vmem:[%s19543_s1 + $0x378] sm:$0xff] }
0x1ad5   :  { %13363 = vmatprep.subr.mxu1 %v14791_v15 }
0x1ad6   :  { %13364 = vmatpush3.msra.mxu1 %v14791_v15  ;;  %v10204_v15 = vld [vmem:[%s19546_s4 + $0x2f8] sm:$0xff] }
0x1ad7   :  { %13365 = vmatprep.subr.mxu1 %v14792_v39 }
0x1ad8   :  { %13366 = vmatpush3.msra.mxu1 %v14792_v39  ;;  %v14819_v39 = vld [vmem:[%s19543_s1 + $0x370] sm:$0xff] }
0x1ad9   :  { %13367 = vmatprep.subr.mxu1 %v14793_v16 }
0x1ada   :  { %13368 = vmatpush3.msra.mxu1 %v14793_v16  ;;  %v14820_v16 = vld [vmem:[%s19543_s1 + $0x368] sm:$0xff] }
0x1adb   :  { %13369 = vmatprep.subr.mxu1 %v14794_v24 }
0x1adc   :  { %13370 = vmatpush3.msra.mxu1 %v14794_v24  ;;  %v14821_v24 = vld [vmem:[%s19543_s1 + $0x360] sm:$0xff] }
0x1add   :  { %13371 = vmatprep.subr.mxu1 %v14795_v17 }
0x1ade   :  { %13372 = vmatpush3.msra.mxu1 %v14795_v17  ;;  %v14822_v17 = vld [vmem:[%s19543_s1 + $0x358] sm:$0xff] }
0x1adf   :  { %13373 = vmatprep.subr.mxu1 %v14796_v18 }
0x1ae0   :  { %13374 = vmatpush3.msra.mxu1 %v14796_v18  ;;  %v14823_v18 = vld [vmem:[%s19543_s1 + $0x350] sm:$0xff] }
0x1ae1   :  { %13375 = vmatprep.subr.mxu1 %v14797_v50 }
0x1ae2   :  { %13376 = vmatpush3.msra.mxu1 %v14797_v50  ;;  %v14824_v50 = vld [vmem:[%s19543_s1 + $0x348] sm:$0xff] }
0x1ae3   :  { %13377 = vmatprep.subr.mxu1 %v14798_v20 }
0x1ae4   :  { %13378 = vmatpush3.msra.mxu1 %v14798_v20  ;;  %v14825_v20 = vld [vmem:[%s19543_s1 + $0x340] sm:$0xff] }
0x1ae5   :  { %13379 = vmatprep.subr.mxu1 %v14799_v22 }
0x1ae6   :  { %13380 = vmatpush3.msra.mxu1 %v14799_v22  ;;  %v14826_v22 = vld [vmem:[%s19543_s1 + $0x338] sm:$0xff] }
0x1ae7   :  { %13381 = vmatprep.subr.mxu1 %v14800_v25 }
0x1ae8   :  { %13382 = vmatpush3.msra.mxu1 %v14800_v25  ;;  %v14827_v25 = vld [vmem:[%s19543_s1 + $0x330] sm:$0xff] }
0x1ae9   :  { %13383 = vmatprep.subr.mxu1 %v14801_v19 }
0x1aea   :  { %13384 = vmatpush3.msra.mxu1 %v14801_v19  ;;  %v14828_v19 = vld [vmem:[%s19543_s1 + $0x328] sm:$0xff] }
0x1aeb   :  { %13386 = vmatmul.mubr.f32.vlgmr.msra.gmra.mxu1 %v17562_v46 }
0x1aec   :  { %13388 = vmatprep.mubr.f32.mxu1 %v17570_v7 }
0x1aef   :  { %13389 = vmatmul.mubr.f32.gmra.mxu1 %v17572_v51 }
0x1af0   :  { %13451 = vmatprep.mubr.msk.f32.mxu1 %vm2057_vm3, %v10201_v62  ;;  %v14845_v62 = vld [vmem:[%s19543_s1 + $0x3a0] sm:$0xff] }
0x1b8b   :  { %v13349_v34 = vpop.f32.mrf.mxu1 }
0x1b8c   :  { %v17823_v43 = vadd.f32 %v13349_v34, %v17743_v59  ;;  %v14815_v59 = vld [vmem:[%s19543_s1 + $0x290] sm:$0xff]  ;;  %v14830_v34 = vld [vmem:[%s19543_s1 + $0x318] sm:$0xff] }
0x1b8d   :  { %v6093_v12 = vpop.f32.mrf.mxu1 }
0x1b8e   :  { %v17826_v8 = vadd.f32 %v6093_v12, %v17746_v61  ;;  %v14817_v61 = vld [vmem:[%s19543_s1 + $0x280] sm:$0xff]  ;;  %v14832_v12 = vld [vmem:[%s19543_s1 + $0x308] sm:$0xff] }
0x1b8f   :  { %v13352_v44 = vpop.f32.mrf.mxu1 }
0x1b90   :  { %v17829_v4 = vadd.f32 %v13352_v44, %v17749_v1  ;;  %v10205_v44 = vld [vmem:[%s19546_s4 + $0x300] sm:$0xff] }
0x1b91   :  { %v6103_v35 = vpop.f32.mrf.mxu1 }
0x1b92   :  { %v17832_v23 = vadd.f32 %v6103_v35, %v17752_v9 }
0x1bab   :  { %v13387_v26 = vpop.f32.mrf.mxu1 }
0x1bad   :  { %v6182_v31 = vpop.f32.mrf.mxu1 }
0x1baf   :  { %v13390_v21 = vpop.f32.mrf.mxu1 }
0x1bb0   :  { %13391 = vmatprep.subr.mxu0 %v13390_v21 }
0x1bb1   :  { %v6192_v38 = vpop.f32.mrf.mxu1  ;;  %13392 = vmatpush3.msra.mxu0 %v13390_v21 }
0x1bb2   :  { %13393 = vmatprep.subr.mxu0 %v6192_v38 }
0x1bb3   :  { %13394 = vmatpush3.msra.mxu0 %v6192_v38 }
0x1bb4   :  { %13395 = vmatprep.subr.mxu0 %v13387_v26 }
0x1bb5   :  { %13396 = vmatpush3.msra.mxu0 %v13387_v26 }
0x1bb6   :  { %13397 = vmatprep.subr.mxu0 %v6182_v31 }
0x1bb7   :  { %13398 = vmatpush3.msra.mxu0 %v6182_v31 }
0x1bb8   :  { %13400 = vmatmul.mubr.msk.f32.vlgmr.msra.gmra.mxu0 %vm2057_vm3, %v10198_v27  ;;  %13405 = vmatprep.subr.mxu0 %v14802_v5 }
0x1bb9   :  { %13406 = vmatpush3.msra.mxu0 %v14802_v5  ;;  %13402 = vmatprep.mubr.msk.f32.mxu0 %vm2057_vm3, %v10199_v28 }
0x1bba   :  { %13407 = vmatprep.subr.mxu0 %v14803_v47 }
0x1bbb   :  { %13408 = vmatpush3.msra.mxu0 %v14803_v47 }
0x1bbc   :  { %13403 = vmatmul.mubr.msk.f32.gmra.mxu0 %vm2057_vm3, %v10200_v0  ;;  %13409 = vmatprep.subr.mxu0 %v14804_v42 }
0x1bbd   :  { %13410 = vmatpush3.msra.mxu0 %v14804_v42  ;;  %13437 = vmatprep.mubr.f32.mxu0 %v17560_v32  ;;  %v10206_v42 = vld [vmem:[%s19546_s4 + $0x308] sm:$0xff] }
0x1bbe   :  { %13411 = vmatprep.subr.mxu0 %v14805_v54 }
0x1bbf   :  { %13412 = vmatpush3.msra.mxu0 %v14805_v54  ;;  %v10207_v54 = vld [vmem:[%s19546_s4 + $0x310] sm:$0xff] }
0x1bc0   :  { %13413 = vmatprep.subr.mxu0 %v14806_v37 }
0x1bc1   :  { %13414 = vmatpush3.msra.mxu0 %v14806_v37  ;;  %v14834_v37 = vld [vmem:[%s19543_s1 + $0x3f8] sm:$0xff] }
0x1bc2   :  { %13415 = vmatprep.subr.mxu0 %v14807_v48 }
0x1bc3   :  { %13416 = vmatpush3.msra.mxu0 %v14807_v48  ;;  %v10208_v48 = vld [vmem:[%s19546_s4 + $0x318] sm:$0xff] }
0x1bc4   :  { %13417 = vmatprep.subr.mxu0 %v14808_v49 }
0x1bc5   :  { %13418 = vmatpush3.msra.mxu0 %v14808_v49  ;;  %v14835_v49 = vld [vmem:[%s19543_s1 + $0x3f0] sm:$0xff] }
0x1bc6   :  { %13419 = vmatprep.subr.mxu0 %v14809_v52 }
0x1bc7   :  { %13420 = vmatpush3.msra.mxu0 %v14809_v52  ;;  %v14836_v52 = vld [vmem:[%s19543_s1 + $0x3e8] sm:$0xff] }
0x1bc8   :  { %13421 = vmatprep.subr.mxu0 %v14810_v53 }
0x1bc9   :  { %13422 = vmatpush3.msra.mxu0 %v14810_v53  ;;  %v14837_v53 = vld [vmem:[%s19543_s1 + $0x3e0] sm:$0xff] }
0x1bca   :  { %13423 = vmatprep.subr.mxu0 %v14811_v55 }
0x1bcb   :  { %13424 = vmatpush3.msra.mxu0 %v14811_v55  ;;  %v14838_v55 = vld [vmem:[%s19543_s1 + $0x3d8] sm:$0xff] }
0x1bcc   :  { %13425 = vmatprep.subr.mxu0 %v14812_v56 }
0x1bcd   :  { %13426 = vmatpush3.msra.mxu0 %v14812_v56  ;;  %v14839_v56 = vld [vmem:[%s19543_s1 + $0x3d0] sm:$0xff] }
0x1bce   :  { %13427 = vmatprep.subr.mxu0 %v14813_v57 }
0x1bcf   :  { %13428 = vmatpush3.msra.mxu0 %v14813_v57  ;;  %v14840_v57 = vld [vmem:[%s19543_s1 + $0x3c8] sm:$0xff] }
0x1bd0   :  { %13429 = vmatprep.subr.mxu0 %v14814_v58 }
0x1bd1   :  { %13430 = vmatpush3.msra.mxu0 %v14814_v58  ;;  %v14841_v58 = vld [vmem:[%s19543_s1 + $0x3c0] sm:$0xff] }
0x1bd2   :  { %13431 = vmatprep.subr.mxu0 %v14815_v59 }
0x1bd3   :  { %13432 = vmatpush3.msra.mxu0 %v14815_v59  ;;  %v14842_v59 = vld [vmem:[%s19543_s1 + $0x3b8] sm:$0xff] }
0x1bd4   :  { %13433 = vmatprep.subr.mxu0 %v14816_v60 }
0x1bd5   :  { %13434 = vmatpush3.msra.mxu0 %v14816_v60  ;;  %v14843_v60 = vld [vmem:[%s19543_s1 + $0x3b0] sm:$0xff] }
0x1bd6   :  { %13435 = vmatprep.subr.mxu0 %v14817_v61 }
0x1bd7   :  { %13436 = vmatpush3.msra.mxu0 %v14817_v61  ;;  %v14844_v61 = vld [vmem:[%s19543_s1 + $0x3a8] sm:$0xff] }
0x1bd8   :  { %13438 = vmatmul.mubr.f32.vlgmr.msra.gmra.mxu0 %v17562_v46 }
0x1bd9   :  { %13440 = vmatprep.mubr.f32.mxu0 %v17570_v7 }
0x1bdc   :  { %13441 = vmatmul.mubr.f32.gmra.mxu0 %v17572_v51 }
0x1bdd   :  { %13503 = vmatprep.mubr.msk.f32.mxu0 %vm2057_vm3, %v10205_v44  ;;  %v14861_v44 = vld [vmem:[%s19543_s1 + $0x420] sm:$0xff] }
0x1c78   :  { %v13401_v1 = vpop.f32.mrf.mxu0 }
0x1c79   :  { %v17903_v6 = vadd.f32 %v13401_v1, %v17823_v43  ;;  %v14831_v43 = vld [vmem:[%s19543_s1 + $0x310] sm:$0xff]  ;;  %v14846_v1 = vld [vmem:[%s19543_s1 + $0x398] sm:$0xff] }
0x1c7a   :  { %v6279_v9 = vpop.f32.mrf.mxu0 }
0x1c7b   :  { %v17906_v41 = vadd.f32 %v6279_v9, %v17826_v8  ;;  %v14833_v8 = vld [vmem:[%s19543_s1 + $0x300] sm:$0xff]  ;;  %v14848_v9 = vld [vmem:[%s19543_s1 + $0x388] sm:$0xff] }
0x1c7c   :  { %v13404_v33 = vpop.f32.mrf.mxu0 }
0x1c7d   :  { %v17909_v11 = vadd.f32 %v13404_v33, %v17829_v4  ;;  %v10209_v33 = vld [vmem:[%s19546_s4 + $0x320] sm:$0xff] }
0x1c7e   :  { %v6289_v30 = vpop.f32.mrf.mxu0 }
0x1c7f   :  { %v17912_v3 = vadd.f32 %v6289_v30, %v17832_v23 }
0x1c98   :  { %v13439_v36 = vpop.f32.mrf.mxu0 }
0x1c9a   :  { %v6368_v40 = vpop.f32.mrf.mxu0 }
0x1c9c   :  { %v13442_v63 = vpop.f32.mrf.mxu0 }
0x1c9d   :  { %13443 = vmatprep.subr.mxu1 %v13442_v63 }
0x1c9e   :  { %v6378_v10 = vpop.f32.mrf.mxu0  ;;  %13444 = vmatpush3.msra.mxu1 %v13442_v63 }
0x1c9f   :  { %13445 = vmatprep.subr.mxu1 %v6378_v10 }
0x1ca0   :  { %13446 = vmatpush3.msra.mxu1 %v6378_v10 }
0x1ca1   :  { %13447 = vmatprep.subr.mxu1 %v13439_v36 }
0x1ca2   :  { %13448 = vmatpush3.msra.mxu1 %v13439_v36 }
0x1ca3   :  { %13449 = vmatprep.subr.mxu1 %v6368_v40 }
0x1ca4   :  { %13450 = vmatpush3.msra.mxu1 %v6368_v40 }
0x1ca5   :  { %13452 = vmatmul.mubr.msk.f32.vlgmr.msra.gmra.mxu1 %vm2057_vm3, %v10202_v13  ;;  %13457 = vmatprep.subr.mxu1 %v14818_v45 }
0x1ca6   :  { %13458 = vmatpush3.msra.mxu1 %v14818_v45  ;;  %13454 = vmatprep.mubr.msk.f32.mxu1 %vm2057_vm3, %v10203_v14 }
0x1ca7   :  { %13459 = vmatprep.subr.mxu1 %v14819_v39 }
0x1ca8   :  { %13460 = vmatpush3.msra.mxu1 %v14819_v39 }
0x1ca9   :  { %13455 = vmatmul.mubr.msk.f32.gmra.mxu1 %vm2057_vm3, %v10204_v15  ;;  %13461 = vmatprep.subr.mxu1 %v14820_v16 }
0x1caa   :  { %13462 = vmatpush3.msra.mxu1 %v14820_v16  ;;  %13489 = vmatprep.mubr.f32.mxu1 %v17560_v32  ;;  %v10210_v16 = vld [vmem:[%s19546_s4 + $0x328] sm:$0xff] }
0x1cab   :  { %13463 = vmatprep.subr.mxu1 %v14821_v24 }
0x1cac   :  { %13464 = vmatpush3.msra.mxu1 %v14821_v24  ;;  %v10211_v24 = vld [vmem:[%s19546_s4 + $0x330] sm:$0xff] }
0x1cad   :  { %13465 = vmatprep.subr.mxu1 %v14822_v17 }
0x1cae   :  { %13466 = vmatpush3.msra.mxu1 %v14822_v17  ;;  %v14850_v17 = vld [vmem:[%s19543_s1 + $0x478] sm:$0xff] }
0x1caf   :  { %13467 = vmatprep.subr.mxu1 %v14823_v18 }
0x1cb0   :  { %13468 = vmatpush3.msra.mxu1 %v14823_v18  ;;  %v10212_v18 = vld [vmem:[%s19546_s4 + $0x338] sm:$0xff] }
0x1cb1   :  { %13469 = vmatprep.subr.mxu1 %v14824_v50 }
0x1cb2   :  { %13470 = vmatpush3.msra.mxu1 %v14824_v50  ;;  %v14851_v50 = vld [vmem:[%s19543_s1 + $0x470] sm:$0xff] }
0x1cb3   :  { %13471 = vmatprep.subr.mxu1 %v14825_v20 }
0x1cb4   :  { %13472 = vmatpush3.msra.mxu1 %v14825_v20  ;;  %v14852_v20 = vld [vmem:[%s19543_s1 + $0x468] sm:$0xff] }
0x1cb5   :  { %13473 = vmatprep.subr.mxu1 %v14826_v22 }
0x1cb6   :  { %13474 = vmatpush3.msra.mxu1 %v14826_v22  ;;  %v14853_v22 = vld [vmem:[%s19543_s1 + $0x460] sm:$0xff] }
0x1cb7   :  { %13475 = vmatprep.subr.mxu1 %v14827_v25 }
0x1cb8   :  { %13476 = vmatpush3.msra.mxu1 %v14827_v25  ;;  %v14854_v25 = vld [vmem:[%s19543_s1 + $0x458] sm:$0xff] }
0x1cb9   :  { %13477 = vmatprep.subr.mxu1 %v14828_v19 }
0x1cba   :  { %13478 = vmatpush3.msra.mxu1 %v14828_v19  ;;  %v14855_v19 = vld [vmem:[%s19543_s1 + $0x450] sm:$0xff] }
0x1cbb   :  { %13479 = vmatprep.subr.mxu1 %v14829_v29 }
0x1cbc   :  { %13480 = vmatpush3.msra.mxu1 %v14829_v29  ;;  %v14856_v29 = vld [vmem:[%s19543_s1 + $0x448] sm:$0xff] }
0x1cbd   :  { %13481 = vmatprep.subr.mxu1 %v14830_v34 }
0x1cbe   :  { %13482 = vmatpush3.msra.mxu1 %v14830_v34  ;;  %v14857_v34 = vld [vmem:[%s19543_s1 + $0x440] sm:$0xff] }
0x1cbf   :  { %13483 = vmatprep.subr.mxu1 %v14831_v43 }
0x1cc0   :  { %13484 = vmatpush3.msra.mxu1 %v14831_v43  ;;  %v14858_v43 = vld [vmem:[%s19543_s1 + $0x438] sm:$0xff] }
0x1cc1   :  { %13485 = vmatprep.subr.mxu1 %v14832_v12 }
0x1cc2   :  { %13486 = vmatpush3.msra.mxu1 %v14832_v12  ;;  %v14859_v12 = vld [vmem:[%s19543_s1 + $0x430] sm:$0xff] }
0x1cc3   :  { %13487 = vmatprep.subr.mxu1 %v14833_v8 }
0x1cc4   :  { %13488 = vmatpush3.msra.mxu1 %v14833_v8  ;;  %v14860_v8 = vld [vmem:[%s19543_s1 + $0x428] sm:$0xff] }
0x1cc5   :  { %13490 = vmatmul.mubr.f32.vlgmr.msra.gmra.mxu1 %v17562_v46 }
0x1cc6   :  { %13492 = vmatprep.mubr.f32.mxu1 %v17570_v7 }
0x1cc9   :  { %13493 = vmatmul.mubr.f32.gmra.mxu1 %v17572_v51 }
0x1cca   :  { %13555 = vmatprep.mubr.msk.f32.mxu1 %vm2057_vm3, %v10209_v33 }
0x1d65   :  { %v13453_v4 = vpop.f32.mrf.mxu1 }
0x1d66   :  { %v17983_v35 = vadd.f32 %v13453_v4, %v17903_v6  ;;  %v14847_v6 = vld [vmem:[%s19543_s1 + $0x390] sm:$0xff]  ;;  %v14862_v4 = vld [vmem:[%s19543_s1 + $0x418] sm:$0xff] }
0x1d67   :  { %v6465_v23 = vpop.f32.mrf.mxu1 }
0x1d68   :  { %v17986_v26 = vadd.f32 %v6465_v23, %v17906_v41  ;;  %v14849_v41 = vld [vmem:[%s19543_s1 + $0x380] sm:$0xff]  ;;  %v14864_v23 = vld [vmem:[%s19543_s1 + $0x408] sm:$0xff] }
0x1d69   :  { %v13456_v31 = vpop.f32.mrf.mxu1 }
0x1d6a   :  { %v17989_v21 = vadd.f32 %v13456_v31, %v17909_v11  ;;  %v14866_v31 = vld [vmem:[%s19543_s1 + $0xf8] sm:$0xff] }
0x1d6b   :  { %v6475_v38 = vpop.f32.mrf.mxu1 }
0x1d6c   :  { %v17992_v27 = vadd.f32 %v6475_v38, %v17912_v3  ;;  %v14868_v38 = vld [vmem:[%s19543_s1 + $0xe8] sm:$0xff] }
0x1d85   :  { %v13491_v28 = vpop.f32.mrf.mxu1 }
0x1d87   :  { %v6554_v5 = vpop.f32.mrf.mxu1 }
0x1d89   :  { %v13494_v0 = vpop.f32.mrf.mxu1 }
0x1d8a   :  { %13495 = vmatprep.subr.mxu0 %v13494_v0 }
0x1d8b   :  { %v6564_v47 = vpop.f32.mrf.mxu1  ;;  %13496 = vmatpush3.msra.mxu0 %v13494_v0  ;;  %v14872_v0 = vld [vmem:[%s19543_s1 + $0xc8] sm:$0xff] }
0x1d8c   :  { %13497 = vmatprep.subr.mxu0 %v6564_v47 }
0x1d8d   :  { %13498 = vmatpush3.msra.mxu0 %v6564_v47  ;;  %v14873_v47 = vld [vmem:[%s19543_s1 + $0xc0] sm:$0xff] }
0x1d8e   :  { %13499 = vmatprep.subr.mxu0 %v13491_v28 }
0x1d8f   :  { %13500 = vmatpush3.msra.mxu0 %v13491_v28  ;;  %v14870_v28 = vld [vmem:[%s19543_s1 + $0xd8] sm:$0xff] }
0x1d90   :  { %13501 = vmatprep.subr.mxu0 %v6554_v5 }
0x1d91   :  { %13502 = vmatpush3.msra.mxu0 %v6554_v5  ;;  %v14871_v5 = vld [vmem:[%s19543_s1 + $0xd0] sm:$0xff] }
0x1d92   :  { %13504 = vmatmul.mubr.msk.f32.vlgmr.msra.gmra.mxu0 %vm2057_vm3, %v10206_v42  ;;  %13509 = vmatprep.subr.mxu0 %v14834_v37  ;;  %v14874_v42 = vld [vmem:[%s19543_s1 + $0xb8] sm:$0xff] }
0x1d93   :  { %13510 = vmatpush3.msra.mxu0 %v14834_v37  ;;  %13506 = vmatprep.mubr.msk.f32.mxu0 %vm2057_vm3, %v10207_v54  ;;  %v14875_v54 = vld [vmem:[%s19543_s1 + $0xb0] sm:$0xff]  ;;  %v14876_v37 = vld [vmem:[%s19543_s1 + $0xa8] sm:$0xff] }
0x1d94   :  { %13511 = vmatprep.subr.mxu0 %v14835_v49 }
0x1d95   :  { %13512 = vmatpush3.msra.mxu0 %v14835_v49  ;;  %v14878_v49 = vld [vmem:[%s19543_s1 + $0x98] sm:$0xff] }
0x1d96   :  { %13507 = vmatmul.mubr.msk.f32.gmra.mxu0 %vm2057_vm3, %v10208_v48  ;;  %13513 = vmatprep.subr.mxu0 %v14836_v52  ;;  %v14877_v48 = vld [vmem:[%s19543_s1 + $0xa0] sm:$0xff] }
0x1d97   :  { %13514 = vmatpush3.msra.mxu0 %v14836_v52  ;;  %13541 = vmatprep.mubr.f32.mxu0 %v17560_v32  ;;  %v14879_v52 = vld [vmem:[%s19543_s1 + $0x90] sm:$0xff] }
0x1d98   :  { %13515 = vmatprep.subr.mxu0 %v14837_v53 }
0x1d99   :  { %13516 = vmatpush3.msra.mxu0 %v14837_v53  ;;  %v14880_v53 = vld [vmem:[%s19543_s1 + $0x88] sm:$0xff] }
0x1d9a   :  { %13517 = vmatprep.subr.mxu0 %v14838_v55 }
0x1d9b   :  { %13518 = vmatpush3.msra.mxu0 %v14838_v55  ;;  %v14881_v55 = vld [vmem:[%s19543_s1 + $0x80] sm:$0xff] }
0x1d9c   :  { %13519 = vmatprep.subr.mxu0 %v14839_v56 }
0x1d9d   :  { %13520 = vmatpush3.msra.mxu0 %v14839_v56  ;;  %v10213_v56 = vld [vmem:[%s19546_s4 + $0x340] sm:$0xff] }
0x1d9e   :  { %13521 = vmatprep.subr.mxu0 %v14840_v57 }
0x1d9f   :  { %13522 = vmatpush3.msra.mxu0 %v14840_v57 }
0x1da0   :  { %13523 = vmatprep.subr.mxu0 %v14841_v58 }
0x1da1   :  { %13524 = vmatpush3.msra.mxu0 %v14841_v58 }
0x1da2   :  { %13525 = vmatprep.subr.mxu0 %v14842_v59 }
0x1da3   :  { %13526 = vmatpush3.msra.mxu0 %v14842_v59 }
0x1da4   :  { %13527 = vmatprep.subr.mxu0 %v14843_v60 }
0x1da5   :  { %13528 = vmatpush3.msra.mxu0 %v14843_v60 }
0x1da6   :  { %13529 = vmatprep.subr.mxu0 %v14844_v61 }
0x1da7   :  { %13530 = vmatpush3.msra.mxu0 %v14844_v61 }
0x1da8   :  { %13531 = vmatprep.subr.mxu0 %v14845_v62 }
0x1da9   :  { %13532 = vmatpush3.msra.mxu0 %v14845_v62 }
0x1daa   :  { %13533 = vmatprep.subr.mxu0 %v14846_v1 }
0x1dab   :  { %13534 = vmatpush3.msra.mxu0 %v14846_v1 }
0x1dac   :  { %13535 = vmatprep.subr.mxu0 %v14847_v6 }
0x1dad   :  { %13536 = vmatpush3.msra.mxu0 %v14847_v6 }
0x1dae   :  { %13537 = vmatprep.subr.mxu0 %v14848_v9 }
0x1daf   :  { %13538 = vmatpush3.msra.mxu0 %v14848_v9 }
0x1db0   :  { %13539 = vmatprep.subr.mxu0 %v14849_v41 }
0x1db1   :  { %13540 = vmatpush3.msra.mxu0 %v14849_v41 }
0x1db2   :  { %13542 = vmatmul.mubr.f32.vlgmr.msra.gmra.mxu0 %v17562_v46 }
0x1db3   :  { %13544 = vmatprep.mubr.f32.mxu0 %v17570_v7 }
0x1db6   :  { %13545 = vmatmul.mubr.f32.gmra.mxu0 %v17572_v51 }
0x1db7   :  { %13607 = vmatprep.mubr.msk.f32.mxu0 %vm2057_vm3, %v10213_v56 }
0x1e52   :  { %v13505_v11 = vpop.f32.mrf.mxu0 }
0x1e53   :  { %v18063_v30 = vadd.f32 %v13505_v11, %v17983_v35  ;;  %v14863_v35 = vld [vmem:[%s19543_s1 + $0x410] sm:$0xff] }
0x1e54   :  { %v6651_v3 = vpop.f32.mrf.mxu0 }
0x1e55   :  { %v18066_v36 = vadd.f32 %v6651_v3, %v17986_v26  ;;  %v14865_v26 = vld [vmem:[%s19543_s1 + $0x400] sm:$0xff]  ;;  %v10215_v3 = vld [vmem:[%s19546_s4 + $0x350] sm:$0xff] }
0x1e56   :  { %v13508_v40 = vpop.f32.mrf.mxu0 }
0x1e57   :  { %v18069_v63 = vadd.f32 %v13508_v40, %v17989_v21  ;;  %v14867_v21 = vld [vmem:[%s19543_s1 + $0xf0] sm:$0xff]  ;;  %v10216_v40 = vld [vmem:[%s19546_s4 + $0x358] sm:$0xff] }
0x1e58   :  { %v6661_v10 = vpop.f32.mrf.mxu0 }
0x1e59   :  { %v18072_v13 = vadd.f32 %v6661_v10, %v17992_v27  ;;  %v14869_v27 = vld [vmem:[%s19543_s1 + $0xe0] sm:$0xff]  ;;  %v14884_v10 = vld [vmem:[%s19543_s1 + $0x68] sm:$0xff] }
0x1e72   :  { %v13543_v14 = vpop.f32.mrf.mxu0 }
0x1e74   :  { %v6740_v45 = vpop.f32.mrf.mxu0 }
0x1e76   :  { %v13546_v15 = vpop.f32.mrf.mxu0 }
0x1e77   :  { %13547 = vmatprep.subr.mxu1 %v13546_v15 }
0x1e78   :  { %v6750_v39 = vpop.f32.mrf.mxu0  ;;  %13548 = vmatpush3.msra.mxu1 %v13546_v15  ;;  %v14888_v15 = vld [vmem:[%s19543_s1 + $0x48] sm:$0xff] }
0x1e79   :  { %13549 = vmatprep.subr.mxu1 %v6750_v39 }
0x1e7a   :  { %13550 = vmatpush3.msra.mxu1 %v6750_v39  ;;  %v14889_v39 = vld [vmem:[%s19543_s1 + $0x40] sm:$0xff] }
0x1e7b   :  { %13551 = vmatprep.subr.mxu1 %v13543_v14 }
0x1e7c   :  { %13552 = vmatpush3.msra.mxu1 %v13543_v14  ;;  %v14886_v14 = vld [vmem:[%s19543_s1 + $0x58] sm:$0xff] }
0x1e7d   :  { %13553 = vmatprep.subr.mxu1 %v6740_v45 }
0x1e7e   :  { %13554 = vmatpush3.msra.mxu1 %v6740_v45  ;;  %v14887_v45 = vld [vmem:[%s19543_s1 + $0x50] sm:$0xff] }
0x1e7f   :  { %13556 = vmatmul.mubr.msk.f32.vlgmr.msra.gmra.mxu1 %vm2057_vm3, %v10210_v16  ;;  %13561 = vmatprep.subr.mxu1 %v14850_v17  ;;  %v14890_v16 = vld [vmem:[%s19543_s1 + $0x38] sm:$0xff] }
0x1e80   :  { %13562 = vmatpush3.msra.mxu1 %v14850_v17  ;;  %13558 = vmatprep.mubr.msk.f32.mxu1 %vm2057_vm3, %v10211_v24  ;;  %v14891_v24 = vld [vmem:[%s19543_s1 + $0x30] sm:$0xff]  ;;  %v14892_v17 = vld [vmem:[%s19543_s1 + $0x28] sm:$0xff] }
0x1e81   :  { %13563 = vmatprep.subr.mxu1 %v14851_v50 }
0x1e82   :  { %13564 = vmatpush3.msra.mxu1 %v14851_v50  ;;  %v14894_v50 = vld [vmem:[%s19543_s1 + $0x18] sm:$0xff] }
0x1e83   :  { %13559 = vmatmul.mubr.msk.f32.gmra.mxu1 %vm2057_vm3, %v10212_v18  ;;  %13565 = vmatprep.subr.mxu1 %v14852_v20  ;;  %v14893_v18 = vld [vmem:[%s19543_s1 + $0x20] sm:$0xff] }
0x1e84   :  { %13566 = vmatpush3.msra.mxu1 %v14852_v20  ;;  %13593 = vmatprep.mubr.f32.mxu1 %v17560_v32  ;;  %v14895_v20 = vld [vmem:[%s19543_s1 + $0x10] sm:$0xff] }
0x1e85   :  { %13567 = vmatprep.subr.mxu1 %v14853_v22 }
0x1e86   :  { %13568 = vmatpush3.msra.mxu1 %v14853_v22  ;;  %v14896_v22 = vld [vmem:[%s19543_s1 + $0x8] sm:$0xff] }
0x1e87   :  { %13569 = vmatprep.subr.mxu1 %v14854_v25 }
0x1e88   :  { %13570 = vmatpush3.msra.mxu1 %v14854_v25  ;;  %v14897_v25 = vld [vmem:[%s19543_s1] sm:$0xff] }
0x1e89   :  { %13571 = vmatprep.subr.mxu1 %v14855_v19 }
0x1e8a   :  { %13572 = vmatpush3.msra.mxu1 %v14855_v19 }
0x1e8b   :  { %13573 = vmatprep.subr.mxu1 %v14856_v29 }
0x1e8c   :  { %13574 = vmatpush3.msra.mxu1 %v14856_v29  ;;  %v7054_v29 = vpop.permute.xlu1 %7053 }
0x1e8d   :  { %13575 = vmatprep.subr.mxu1 %v14857_v34 }
0x1e8e   :  { %13576 = vmatpush3.msra.mxu1 %v14857_v34 }
0x1e8f   :  { %13577 = vmatprep.subr.mxu1 %v14858_v43 }
0x1e90   :  { %13578 = vmatpush3.msra.mxu1 %v14858_v43  ;;  %v7049_v43 = vpop.permute.xlu0 %7048 }
0x1e91   :  { %13579 = vmatprep.subr.mxu1 %v14859_v12 }
0x1e92   :  { %13580 = vmatpush3.msra.mxu1 %v14859_v12 }
0x1e93   :  { %13581 = vmatprep.subr.mxu1 %v14860_v8 }
0x1e94   :  { %13582 = vmatpush3.msra.mxu1 %v14860_v8 }
0x1e95   :  { %13583 = vmatprep.subr.mxu1 %v14861_v44 }
0x1e96   :  { %13584 = vmatpush3.msra.mxu1 %v14861_v44 }
0x1e97   :  { %13585 = vmatprep.subr.mxu1 %v14862_v4 }
0x1e98   :  { %13586 = vmatpush3.msra.mxu1 %v14862_v4 }
0x1e99   :  { %13587 = vmatprep.subr.mxu1 %v14863_v35 }
0x1e9a   :  { %13588 = vmatpush3.msra.mxu1 %v14863_v35 }
0x1e9b   :  { %13589 = vmatprep.subr.mxu1 %v14864_v23 }
0x1e9c   :  { %13590 = vmatpush3.msra.mxu1 %v14864_v23 }
0x1e9d   :  { %13591 = vmatprep.subr.mxu1 %v14865_v26 }
0x1e9e   :  { %13592 = vmatpush3.msra.mxu1 %v14865_v26 }
0x1e9f   :  { %13594 = vmatmul.mubr.f32.vlgmr.msra.gmra.mxu1 %v17562_v46  ;;  %13651 = vmatprep.subr.mxu1 %v14866_v31 }
0x1ea0   :  { %13596 = vmatprep.mubr.f32.mxu1 %v17570_v7  ;;  %13652 = vmatpush3.msra.mxu1 %v14866_v31  ;;  %v7064_v31 = vpop.permute.xlu1 %7063 }
0x1ea1   :  { %13653 = vmatprep.subr.mxu1 %v14867_v21 }
0x1ea2   :  { %13654 = vmatpush3.msra.mxu1 %v14867_v21 }
0x1ea3   :  { %13597 = vmatmul.mubr.f32.gmra.mxu1 %v17572_v51  ;;  %13655 = vmatprep.subr.mxu1 %v14868_v38 }
0x1ea4   :  { %13656 = vmatpush3.msra.mxu1 %v14868_v38 }
0x1ea5   :  { %13657 = vmatprep.subr.mxu1 %v14869_v27 }
0x1ea6   :  { %13658 = vmatpush3.msra.mxu1 %v14869_v27  ;;  %v7059_v27 = vpop.permute.xlu0 %7058 }
0x1ea7   :  { %13659 = vmatprep.subr.mxu1 %v14870_v28 }
0x1ea8   :  { %13660 = vmatpush3.msra.mxu1 %v14870_v28 }
0x1ea9   :  { %13661 = vmatprep.subr.mxu1 %v14871_v5 }
0x1eaa   :  { %13662 = vmatpush3.msra.mxu1 %v14871_v5 }
0x1eab   :  { %13663 = vmatprep.subr.mxu1 %v14872_v0 }
0x1eac   :  { %13664 = vmatpush3.msra.mxu1 %v14872_v0 }
0x1ead   :  { %13665 = vmatprep.subr.mxu1 %v14873_v47 }
0x1eae   :  { %13666 = vmatpush3.msra.mxu1 %v14873_v47 }
0x1eaf   :  { %13667 = vmatprep.subr.mxu1 %v14874_v42 }
0x1eb0   :  { %13668 = vmatpush3.msra.mxu1 %v14874_v42 }
0x1eb1   :  { %13669 = vmatprep.subr.mxu1 %v14875_v54 }
0x1eb2   :  { %13670 = vmatpush3.msra.mxu1 %v14875_v54  ;;  %v10261_v54 = vld [vmem:[%s19546_s4 + $0x380] sm:$0xff] }
0x1eb3   :  { %13671 = vmatprep.subr.mxu1 %v14876_v37 }
0x1eb4   :  { %13672 = vmatpush3.msra.mxu1 %v14876_v37 }
0x1eb5   :  { %13673 = vmatprep.subr.mxu1 %v14877_v48 }
0x1eb6   :  { %13674 = vmatpush3.msra.mxu1 %v14877_v48 }
0x1eb7   :  { %13675 = vmatprep.subr.mxu1 %v14878_v49 }
0x1eb8   :  { %13676 = vmatpush3.msra.mxu1 %v14878_v49 }
0x1eb9   :  { %13677 = vmatprep.subr.mxu1 %v14879_v52 }
0x1eba   :  { %13678 = vmatpush3.msra.mxu1 %v14879_v52 }
0x1ebb   :  { %13679 = vmatprep.subr.mxu1 %v14880_v53 }
0x1ebc   :  { %13680 = vmatpush3.msra.mxu1 %v14880_v53 }
0x1ebd   :  { %13681 = vmatprep.subr.mxu1 %v14881_v55 }
0x1ebe   :  { %13682 = vmatpush3.msra.mxu1 %v14881_v55 }
0x1f3f   :  { %v13557_v57 = vpop.f32.mrf.mxu1 }
0x1f40   :  { %v18191_v58 = vadd.f32 %v13557_v57, %v18063_v30  ;;  %v10214_v30 = vld [vmem:[%s19546_s4 + $0x348] sm:$0xff] }
0x1f41   :  { %v6837_v59 = vpop.f32.mrf.mxu1  ;;  %v10262_v57 = vld [vmem:[%s19546_s4 + $0x388] sm:$0xff] }
0x1f42   :  { %v18194_v60 = vadd.f32 %v6837_v59, %v18066_v36  ;;  %v14882_v36 = vld [vmem:[%s19543_s1 + $0x78] sm:$0xff] }
0x1f43   :  { %v13560_v61 = vpop.f32.mrf.mxu1 }
0x1f44   :  { %v18197_v62 = vadd.f32 %v13560_v61, %v18069_v63  ;;  %v14883_v63 = vld [vmem:[%s19543_s1 + $0x70] sm:$0xff]  ;;  %v10257_v61 = vld [vmem:[%s19546_s4 + $0x360] sm:$0xff] }
0x1f45   :  { %v6847_v1 = vpop.f32.mrf.mxu1 }
0x1f46   :  { %v18200_v6 = vadd.f32 %v6847_v1, %v18072_v13  ;;  %v14885_v13 = vld [vmem:[%s19543_s1 + $0x60] sm:$0xff]  ;;  %v10259_v1 = vld [vmem:[%s19546_s4 + $0x370] sm:$0xff] }
0x1f5f   :  { %v13595_v9 = vpop.f32.mrf.mxu1 }
0x1f61   :  { %v6926_v41 = vpop.f32.mrf.mxu1 }
0x1f63   :  { %v13598_v33 = vpop.f32.mrf.mxu1 }
0x1f64   :  { %13599 = vmatprep.subr.mxu0 %v13598_v33 }
0x1f65   :  { %v6936_v11 = vpop.f32.mrf.mxu1  ;;  %13600 = vmatpush3.msra.mxu0 %v13598_v33  ;;  %v14900_v33 = vld [vmem:[%s19543_s1 + $0x168] sm:$0xff] }
0x1f66   :  { %13601 = vmatprep.subr.mxu0 %v6936_v11 }
0x1f67   :  { %13602 = vmatpush3.msra.mxu0 %v6936_v11  ;;  %v14901_v11 = vld [vmem:[%s19543_s1 + $0x160] sm:$0xff] }
0x1f68   :  { %13603 = vmatprep.subr.mxu0 %v13595_v9 }
0x1f69   :  { %13604 = vmatpush3.msra.mxu0 %v13595_v9  ;;  %v10260_v9 = vld [vmem:[%s19546_s4 + $0x378] sm:$0xff] }
0x1f6a   :  { %13605 = vmatprep.subr.mxu0 %v6926_v41 }
0x1f6b   :  { %13606 = vmatpush3.msra.mxu0 %v6926_v41  ;;  %v14899_v41 = vld [vmem:[%s19543_s1 + $0x170] sm:$0xff] }
0x1f6c   :  { %13608 = vmatmul.mubr.msk.f32.vlgmr.msra.gmra.mxu0 %vm2057_vm3, %v10214_v30  ;;  %13613 = vmatprep.subr.mxu0 %v14882_v36  ;;  %v14902_v30 = vld [vmem:[%s19543_s1 + $0x158] sm:$0xff] }
0x1f6d   :  { %13610 = vmatprep.mubr.msk.f32.mxu0 %vm2057_vm3, %v10215_v3  ;;  %13614 = vmatpush3.msra.mxu0 %v14882_v36  ;;  %v14903_v3 = vld [vmem:[%s19543_s1 + $0x150] sm:$0xff]  ;;  %v14904_v36 = vld [vmem:[%s19543_s1 + $0x148] sm:$0xff] }
0x1f6e   :  { %13615 = vmatprep.subr.mxu0 %v14883_v63 }
0x1f6f   :  { %13616 = vmatpush3.msra.mxu0 %v14883_v63  ;;  %v14906_v63 = vld [vmem:[%s19543_s1 + $0x138] sm:$0xff] }
0x1f70   :  { %13611 = vmatmul.mubr.msk.f32.gmra.mxu0 %vm2057_vm3, %v10216_v40  ;;  %13617 = vmatprep.subr.mxu0 %v14884_v10  ;;  %v14905_v40 = vld [vmem:[%s19543_s1 + $0x140] sm:$0xff] }
0x1f71   :  { %13618 = vmatpush3.msra.mxu0 %v14884_v10  ;;  %v14907_v10 = vld [vmem:[%s19543_s1 + $0x130] sm:$0xff] }
0x1f72   :  { %13619 = vmatprep.subr.mxu0 %v14885_v13 }
0x1f73   :  { %13620 = vmatpush3.msra.mxu0 %v14885_v13  ;;  %v14908_v13 = vld [vmem:[%s19543_s1 + $0x128] sm:$0xff] }
0x1f74   :  { %13621 = vmatprep.subr.mxu0 %v14886_v14 }
0x1f75   :  { %13622 = vmatpush3.msra.mxu0 %v14886_v14  ;;  %v14909_v14 = vld [vmem:[%s19543_s1 + $0x120] sm:$0xff] }
0x1f76   :  { %13623 = vmatprep.subr.mxu0 %v14887_v45 }
0x1f77   :  { %13624 = vmatpush3.msra.mxu0 %v14887_v45  ;;  %v14910_v45 = vld [vmem:[%s19543_s1 + $0x118] sm:$0xff] }
0x1f78   :  { %13625 = vmatprep.subr.mxu0 %v14888_v15 }
0x1f79   :  { %13626 = vmatpush3.msra.mxu0 %v14888_v15  ;;  %v14911_v15 = vld [vmem:[%s19543_s1 + $0x110] sm:$0xff] }
0x1f7a   :  { %13627 = vmatprep.subr.mxu0 %v14889_v39 }
0x1f7b   :  { %13628 = vmatpush3.msra.mxu0 %v14889_v39  ;;  %v14912_v39 = vld [vmem:[%s19543_s1 + $0x108] sm:$0xff] }
0x1f7c   :  { %13629 = vmatprep.subr.mxu0 %v14890_v16 }
0x1f7d   :  { %13630 = vmatpush3.msra.mxu0 %v14890_v16  ;;  %v14913_v16 = vld [vmem:[%s19543_s1 + $0x100] sm:$0xff] }
0x1f7e   :  { %13631 = vmatprep.subr.mxu0 %v14891_v24 }
0x1f7f   :  { %13632 = vmatpush3.msra.mxu0 %v14891_v24  ;;  %v10265_v24 = vld [vmem:[%s19546_s4 + $0x3a0] sm:$0xff] }
0x1f80   :  { %13633 = vmatprep.subr.mxu0 %v14892_v17 }
0x1f81   :  { %13634 = vmatpush3.msra.mxu0 %v14892_v17 }
0x1f82   :  { %13635 = vmatprep.subr.mxu0 %v14893_v18 }
0x1f83   :  { %13636 = vmatpush3.msra.mxu0 %v14893_v18 }
0x1f84   :  { %13637 = vmatprep.subr.mxu0 %v14894_v50 }
0x1f85   :  { %13638 = vmatpush3.msra.mxu0 %v14894_v50 }
0x1f86   :  { %13639 = vmatprep.subr.mxu0 %v14895_v20 }
0x1f87   :  { %13640 = vmatpush3.msra.mxu0 %v14895_v20 }
0x1f88   :  { %13641 = vmatprep.subr.mxu0 %v14896_v22 }
0x1f89   :  { %13642 = vmatpush3.msra.mxu0 %v14896_v22 }
0x1f8a   :  { %13643 = vmatprep.subr.mxu0 %v14897_v25 }
0x1f8b   :  { %13644 = vmatpush3.msra.mxu0 %v14897_v25 }
0x202c   :  { %v13609_v19 = vpop.f32.mrf.mxu0 }
0x202d   :  { %v7043_v34 = vadd.f32 %v13609_v19, %v18191_v58  ;;  %v10263_v58 = vld [vmem:[%s19546_s4 + $0x390] sm:$0xff] }
0x202e   :  { %v7023_v12 = vpop.f32.mrf.mxu0 }
0x202f   :  { %v7042_v8 = vadd.f32 %v7023_v12, %v18194_v60  ;;  %v7067_v44 = vadd.f32 %v7054_v29, %v7043_v34  ;;  %v10264_v60 = vld [vmem:[%s19546_s4 + $0x398] sm:$0xff] }
0x2030   :  { %v13612_v4 = vpop.f32.mrf.mxu0 }
0x2031   :  { %v7066_v35 = vadd.f32 %v7049_v43, %v7042_v8  ;;  %v7045_v23 = vadd.f32 %v13612_v4, %v18197_v62  ;;  %v18268_v28 = vmax.f32 %v7067_v44, 0.0  ;;  %v10258_v62 = vld [vmem:[%s19546_s4 + $0x368] sm:$0xff] }
0x2032   :  { %v7033_v26 = vpop.f32.mrf.mxu0 }
0x2033   :  { %v18265_v21 = vmax.f32 %v7066_v35, 0.0  ;;  %v7044_v38 = vadd.f32 %v7033_v26, %v18200_v6  ;;  %v7069_v5 = vadd.f32 %v7064_v31, %v7045_v23  ;;  %v14898_v6 = vld [vmem:[%s19543_s1 + $0x178] sm:$0xff]  ;;  %v10266_v26 = vld [vmem:[%s19546_s4 + $0x3a8] sm:$0xff]  ;;  %v10267_v31 = vld [vmem:[%s19546_s4 + $0x3b0] sm:$0xff] }
0x2035   :  { %v7068_v0 = vadd.f32 %v7059_v27, %v7044_v38  ;;  %13645 = vmatprep.mubr.f32.mxu0 %v18265_v21  ;;  %13683 = vmatprep.mubr.f32.mxu1 %v18265_v21  ;;  %v18276_v42 = vmax.f32 %v7069_v5, 0.0  ;;  %v14914_v38 = vld [vmem:[%s19543_s1 + $0x1f8] sm:$0xff]  ;;  %v14915_v5 = vld [vmem:[%s19543_s1 + $0x1f0] sm:$0xff] }
0x2036   :  { %13646 = vmatmul.mubr.f32.vlgmr.msra.gmra.mxu0 %v18268_v28  ;;  %13684 = vmatmul.mubr.f32.vlgmr.msra.gmra.mxu1 %v18268_v28  ;;  %v10268_v27 = vld [vmem:[%s19546_s4 + $0x3b8] sm:$0xff] }
0x2037   :  { %v18274_v47 = vmax.f32 %v7068_v0, 0.0  ;;  %v14916_v0 = vld [vmem:[%s19543_s1 + $0x1e8] sm:$0xff] }
0x2039   :  { %13648 = vmatprep.mubr.f32.mxu0 %v18274_v47  ;;  %13686 = vmatprep.mubr.f32.mxu1 %v18274_v47 }
0x203a   :  { %13649 = vmatmul.mubr.f32.gmra.mxu0 %v18276_v42  ;;  %13687 = vmatmul.mubr.f32.gmra.mxu1 %v18276_v42 }
0x203b   :  { %13697 = vmatprep.mubr.msk.f32.mxu0 %vm2057_vm3, %v10261_v54  ;;  %13763 = vmatprep.mubr.msk.f32.mxu1 %vm2057_vm3, %v10265_v24  ;;  %v14917_v54 = vld [vmem:[%s19543_s1 + $0x1e0] sm:$0xff] }
0x203c   :  { %v14933_v24 = vld [vmem:[%s19543_s1 + $0x260] sm:$0xff] }
0x20f6   :  { %v13685_v37 = vpop.f32.mrf.mxu1  ;;  %v13647_v48 = vpop.f32.mrf.mxu0 }
0x20f8   :  { %v7275_v49 = vpop.f32.mrf.mxu1  ;;  %v7190_v53 = vpop.f32.mrf.mxu0 }
0x20fa   :  { %v13688_v52 = vpop.f32.mrf.mxu1  ;;  %v13650_v56 = vpop.f32.mrf.mxu0 }
0x20fb   :  { %13689 = vmatprep.subr.mxu0 %v13688_v52 }
0x20fc   :  { %v7285_v55 = vpop.f32.mrf.mxu1  ;;  %13690 = vmatpush3.msra.mxu0 %v13688_v52  ;;  %v7200_v59 = vpop.f32.mrf.mxu0  ;;  %v14921_v52 = vld [vmem:[%s19543_s1 + $0x1c0] sm:$0xff] }
0x20fd   :  { %13691 = vmatprep.subr.mxu0 %v7285_v55 }
0x20fe   :  { %13692 = vmatpush3.msra.mxu0 %v7285_v55  ;;  %v14923_v55 = vld [vmem:[%s19543_s1 + $0x1b0] sm:$0xff] }
0x20ff   :  { %13693 = vmatprep.subr.mxu0 %v13685_v37 }
0x2100   :  { %13694 = vmatpush3.msra.mxu0 %v13685_v37  ;;  %v14918_v37 = vld [vmem:[%s19543_s1 + $0x1d8] sm:$0xff] }
0x2101   :  { %13695 = vmatprep.subr.mxu0 %v7275_v49 }
0x2102   :  { %13696 = vmatpush3.msra.mxu0 %v7275_v49  ;;  %v14920_v49 = vld [vmem:[%s19543_s1 + $0x1c8] sm:$0xff] }
0x2103   :  { %13698 = vmatmul.mubr.msk.f32.vlgmr.msra.gmra.mxu0 %vm2057_vm3, %v10262_v57  ;;  %13703 = vmatprep.subr.mxu0 %v13650_v56  ;;  %v14925_v57 = vld [vmem:[%s19543_s1 + $0x1a0] sm:$0xff] }
0x2104   :  { %13704 = vmatpush3.msra.mxu0 %v13650_v56  ;;  %13700 = vmatprep.mubr.msk.f32.mxu0 %vm2057_vm3, %v10263_v58  ;;  %v14924_v56 = vld [vmem:[%s19543_s1 + $0x1a8] sm:$0xff]  ;;  %v14926_v58 = vld [vmem:[%s19543_s1 + $0x198] sm:$0xff] }
0x2105   :  { %13705 = vmatprep.subr.mxu0 %v7200_v59 }
0x2106   :  { %13706 = vmatpush3.msra.mxu0 %v7200_v59  ;;  %v14927_v59 = vld [vmem:[%s19543_s1 + $0x190] sm:$0xff] }
0x2107   :  { %13701 = vmatmul.mubr.msk.f32.gmra.mxu0 %vm2057_vm3, %v10264_v60  ;;  %13707 = vmatprep.subr.mxu0 %v13647_v48  ;;  %v14928_v60 = vld [vmem:[%s19543_s1 + $0x188] sm:$0xff] }
0x2108   :  { %13708 = vmatpush3.msra.mxu0 %v13647_v48  ;;  %13711 = vmatprep.mubr.msk.f32.mxu0 %vm2057_vm3, %v10257_v61  ;;  %v14919_v48 = vld [vmem:[%s19543_s1 + $0x1d0] sm:$0xff]  ;;  %v14929_v61 = vld [vmem:[%s19543_s1 + $0x180] sm:$0xff] }
0x2109   :  { %13709 = vmatprep.subr.mxu0 %v7190_v53 }
0x210a   :  { %13710 = vmatpush3.msra.mxu0 %v7190_v53  ;;  %v14922_v53 = vld [vmem:[%s19543_s1 + $0x1b8] sm:$0xff] }
0x210b   :  { %13712 = vmatmul.mubr.msk.f32.vlgmr.msra.gmra.mxu0 %vm2057_vm3, %v10258_v62  ;;  %13717 = vmatprep.subr.mxu0 %v14898_v6  ;;  %v10269_v62 = vld [vmem:[%s19546_s4 + $0x3c0] sm:$0xff] }
0x210c   :  { %13718 = vmatpush3.msra.mxu0 %v14898_v6  ;;  %13714 = vmatprep.mubr.msk.f32.mxu0 %vm2057_vm3, %v10259_v1 }
0x210d   :  { %13719 = vmatprep.subr.mxu0 %v14899_v41 }
0x210e   :  { %13720 = vmatpush3.msra.mxu0 %v14899_v41 }
0x210f   :  { %13715 = vmatmul.mubr.msk.f32.gmra.mxu0 %vm2057_vm3, %v10260_v9  ;;  %13721 = vmatprep.subr.mxu0 %v14900_v33 }
0x2110   :  { %13722 = vmatpush3.msra.mxu0 %v14900_v33  ;;  %13749 = vmatprep.mubr.f32.mxu0 %v18265_v21 }
0x2111   :  { %13723 = vmatprep.subr.mxu0 %v14901_v11 }
0x2112   :  { %13724 = vmatpush3.msra.mxu0 %v14901_v11 }
0x2113   :  { %13725 = vmatprep.subr.mxu0 %v14902_v30 }
0x2114   :  { %13726 = vmatpush3.msra.mxu0 %v14902_v30 }
0x2115   :  { %13727 = vmatprep.subr.mxu0 %v14903_v3 }
0x2116   :  { %13728 = vmatpush3.msra.mxu0 %v14903_v3 }
0x2117   :  { %13729 = vmatprep.subr.mxu0 %v14904_v36 }
0x2118   :  { %13730 = vmatpush3.msra.mxu0 %v14904_v36 }
0x2119   :  { %13731 = vmatprep.subr.mxu0 %v14905_v40 }
0x211a   :  { %13732 = vmatpush3.msra.mxu0 %v14905_v40 }
0x211b   :  { %13733 = vmatprep.subr.mxu0 %v14906_v63 }
0x211c   :  { %13734 = vmatpush3.msra.mxu0 %v14906_v63 }
0x211d   :  { %13735 = vmatprep.subr.mxu0 %v14907_v10 }
0x211e   :  { %13736 = vmatpush3.msra.mxu0 %v14907_v10 }
0x211f   :  { %13737 = vmatprep.subr.mxu0 %v14908_v13 }
0x2120   :  { %13738 = vmatpush3.msra.mxu0 %v14908_v13  ;;  %v10270_v13 = vld [vmem:[%s19546_s4 + $0x3c8] sm:$0xff] }
0x2121   :  { %13739 = vmatprep.subr.mxu0 %v14909_v14 }
0x2122   :  { %13740 = vmatpush3.msra.mxu0 %v14909_v14  ;;  %v10271_v14 = vld [vmem:[%s19546_s4 + $0x3d0] sm:$0xff] }
0x2123   :  { %13741 = vmatprep.subr.mxu0 %v14910_v45 }
0x2124   :  { %13742 = vmatpush3.msra.mxu0 %v14910_v45  ;;  %v14930_v45 = vld [vmem:[%s19543_s1 + $0x278] sm:$0xff] }
0x2125   :  { %13743 = vmatprep.subr.mxu0 %v14911_v15 }
0x2126   :  { %13744 = vmatpush3.msra.mxu0 %v14911_v15  ;;  %v10272_v15 = vld [vmem:[%s19546_s4 + $0x3d8] sm:$0xff] }
0x2127   :  { %13745 = vmatprep.subr.mxu0 %v14912_v39 }
0x2128   :  { %13746 = vmatpush3.msra.mxu0 %v14912_v39  ;;  %v14931_v39 = vld [vmem:[%s19543_s1 + $0x270] sm:$0xff] }
0x2129   :  { %13747 = vmatprep.subr.mxu0 %v14913_v16 }
0x212a   :  { %13748 = vmatpush3.msra.mxu0 %v14913_v16  ;;  %v14932_v16 = vld [vmem:[%s19543_s1 + $0x268] sm:$0xff] }
0x212b   :  { %13750 = vmatmul.mubr.f32.vlgmr.msra.gmra.mxu0 %v18268_v28 }
0x212c   :  { %13752 = vmatprep.mubr.f32.mxu0 %v18274_v47 }
0x212f   :  { %13753 = vmatmul.mubr.f32.gmra.mxu0 %v18276_v42 }
0x2130   :  { %13815 = vmatprep.mubr.msk.f32.mxu0 %vm2057_vm3, %v10269_v62  ;;  %v14953_v62 = vld [vmem:[%s19543_s1 + $0x2c0] sm:$0xff] }
0x21c3   :  { %v13699_v17 = vpop.f32.mrf.mxu0 }
0x21c5   :  { %v7372_v18 = vpop.f32.mrf.mxu0 }
0x21c7   :  { %v13702_v50 = vpop.f32.mrf.mxu0 }
0x21c9   :  { %v7382_v20 = vpop.f32.mrf.mxu0 }
0x21cb   :  { %v13713_v22 = vpop.f32.mrf.mxu0 }
0x21cc   :  { %v18370_v25 = vadd.f32 %v13713_v22, %v13699_v17  ;;  %v14934_v17 = vld [vmem:[%s19543_s1 + $0x258] sm:$0xff] }
0x21cd   :  { %v7469_v19 = vpop.f32.mrf.mxu0  ;;  %v14938_v22 = vld [vmem:[%s19543_s1 + $0x238] sm:$0xff] }
0x21ce   :  { %v18372_v29 = vadd.f32 %v7469_v19, %v7372_v18  ;;  %v14935_v18 = vld [vmem:[%s19543_s1 + $0x250] sm:$0xff]  ;;  %v14940_v19 = vld [vmem:[%s19543_s1 + $0x228] sm:$0xff] }
0x21cf   :  { %v13716_v34 = vpop.f32.mrf.mxu0 }
0x21d0   :  { %v18374_v43 = vadd.f32 %v13716_v34, %v13702_v50  ;;  %v14936_v50 = vld [vmem:[%s19543_s1 + $0x248] sm:$0xff]  ;;  %v14942_v34 = vld [vmem:[%s19543_s1 + $0x218] sm:$0xff] }
0x21d1   :  { %v7479_v12 = vpop.f32.mrf.mxu0 }
0x21d2   :  { %v18376_v8 = vadd.f32 %v7479_v12, %v7382_v20  ;;  %v14937_v20 = vld [vmem:[%s19543_s1 + $0x240] sm:$0xff]  ;;  %v14944_v12 = vld [vmem:[%s19543_s1 + $0x208] sm:$0xff] }
0x21eb   :  { %v13751_v44 = vpop.f32.mrf.mxu0 }
0x21ed   :  { %v7554_v4 = vpop.f32.mrf.mxu0 }
0x21ef   :  { %v13754_v35 = vpop.f32.mrf.mxu0 }
0x21f0   :  { %13755 = vmatprep.subr.mxu1 %v13754_v35 }
0x21f1   :  { %v7564_v23 = vpop.f32.mrf.mxu0  ;;  %13756 = vmatpush3.msra.mxu1 %v13754_v35 }
0x21f2   :  { %13757 = vmatprep.subr.mxu1 %v7564_v23 }
0x21f3   :  { %13758 = vmatpush3.msra.mxu1 %v7564_v23 }
0x21f4   :  { %13759 = vmatprep.subr.mxu1 %v13751_v44 }
0x21f5   :  { %13760 = vmatpush3.msra.mxu1 %v13751_v44  ;;  %v10273_v44 = vld [vmem:[%s19546_s4 + $0x3e0] sm:$0xff] }
0x21f6   :  { %13761 = vmatprep.subr.mxu1 %v7554_v4 }
0x21f7   :  { %13762 = vmatpush3.msra.mxu1 %v7554_v4 }
0x21f8   :  { %13764 = vmatmul.mubr.msk.f32.vlgmr.msra.gmra.mxu1 %vm2057_vm3, %v10266_v26  ;;  %13769 = vmatprep.subr.mxu1 %v14914_v38 }
0x21f9   :  { %13770 = vmatpush3.msra.mxu1 %v14914_v38  ;;  %13766 = vmatprep.mubr.msk.f32.mxu1 %vm2057_vm3, %v10267_v31 }
0x21fa   :  { %13771 = vmatprep.subr.mxu1 %v14915_v5 }
0x21fb   :  { %13772 = vmatpush3.msra.mxu1 %v14915_v5 }
0x21fc   :  { %13767 = vmatmul.mubr.msk.f32.gmra.mxu1 %vm2057_vm3, %v10268_v27  ;;  %13773 = vmatprep.subr.mxu1 %v14916_v0 }
0x21fd   :  { %13774 = vmatpush3.msra.mxu1 %v14916_v0  ;;  %13801 = vmatprep.mubr.f32.mxu1 %v18265_v21 }
0x21fe   :  { %13775 = vmatprep.subr.mxu1 %v14917_v54 }
0x21ff   :  { %13776 = vmatpush3.msra.mxu1 %v14917_v54 }
0x2200   :  { %13777 = vmatprep.subr.mxu1 %v14918_v37 }
0x2201   :  { %13778 = vmatpush3.msra.mxu1 %v14918_v37 }
0x2202   :  { %13779 = vmatprep.subr.mxu1 %v14919_v48 }
0x2203   :  { %13780 = vmatpush3.msra.mxu1 %v14919_v48 }
0x2204   :  { %13781 = vmatprep.subr.mxu1 %v14920_v49 }
0x2205   :  { %13782 = vmatpush3.msra.mxu1 %v14920_v49  ;;  %v10274_v49 = vld [vmem:[%s19546_s4 + $0x3e8] sm:$0xff] }
0x2206   :  { %13783 = vmatprep.subr.mxu1 %v14921_v52 }
0x2207   :  { %13784 = vmatpush3.msra.mxu1 %v14921_v52  ;;  %v10275_v52 = vld [vmem:[%s19546_s4 + $0x3f0] sm:$0xff] }
0x2208   :  { %13785 = vmatprep.subr.mxu1 %v14922_v53 }
0x2209   :  { %13786 = vmatpush3.msra.mxu1 %v14922_v53  ;;  %v14946_v53 = vld [vmem:[%s19543_s1 + $0x2f8] sm:$0xff] }
0x220a   :  { %13787 = vmatprep.subr.mxu1 %v14923_v55 }
0x220b   :  { %13788 = vmatpush3.msra.mxu1 %v14923_v55  ;;  %v10276_v55 = vld [vmem:[%s19546_s4 + $0x3f8] sm:$0xff] }
0x220c   :  { %13789 = vmatprep.subr.mxu1 %v14924_v56 }
0x220d   :  { %13790 = vmatpush3.msra.mxu1 %v14924_v56  ;;  %v14947_v56 = vld [vmem:[%s19543_s1 + $0x2f0] sm:$0xff] }
0x220e   :  { %13791 = vmatprep.subr.mxu1 %v14925_v57 }
0x220f   :  { %13792 = vmatpush3.msra.mxu1 %v14925_v57  ;;  %v14948_v57 = vld [vmem:[%s19543_s1 + $0x2e8] sm:$0xff] }
0x2210   :  { %13793 = vmatprep.subr.mxu1 %v14926_v58 }
0x2211   :  { %13794 = vmatpush3.msra.mxu1 %v14926_v58  ;;  %v14949_v58 = vld [vmem:[%s19543_s1 + $0x2e0] sm:$0xff] }
0x2212   :  { %13795 = vmatprep.subr.mxu1 %v14927_v59 }
0x2213   :  { %13796 = vmatpush3.msra.mxu1 %v14927_v59  ;;  %v14950_v59 = vld [vmem:[%s19543_s1 + $0x2d8] sm:$0xff] }
0x2214   :  { %13797 = vmatprep.subr.mxu1 %v14928_v60 }
0x2215   :  { %13798 = vmatpush3.msra.mxu1 %v14928_v60  ;;  %v14951_v60 = vld [vmem:[%s19543_s1 + $0x2d0] sm:$0xff] }
0x2216   :  { %13799 = vmatprep.subr.mxu1 %v14929_v61 }
0x2217   :  { %13800 = vmatpush3.msra.mxu1 %v14929_v61  ;;  %v14952_v61 = vld [vmem:[%s19543_s1 + $0x2c8] sm:$0xff] }
0x2218   :  { %13802 = vmatmul.mubr.f32.vlgmr.msra.gmra.mxu1 %v18268_v28 }
0x2219   :  { %13804 = vmatprep.mubr.f32.mxu1 %v18274_v47 }
0x221c   :  { %13805 = vmatmul.mubr.f32.gmra.mxu1 %v18276_v42 }
0x221d   :  { %13867 = vmatprep.mubr.msk.f32.mxu1 %vm2057_vm3, %v10273_v44  ;;  %v14969_v44 = vld [vmem:[%s19543_s1 + $0x340] sm:$0xff] }
0x22b8   :  { %v13765_v1 = vpop.f32.mrf.mxu1 }
0x22b9   :  { %v18447_v6 = vadd.f32 %v13765_v1, %v18370_v25  ;;  %v14939_v25 = vld [vmem:[%s19543_s1 + $0x230] sm:$0xff]  ;;  %v14954_v1 = vld [vmem:[%s19543_s1 + $0x2b8] sm:$0xff] }
0x22ba   :  { %v7651_v9 = vpop.f32.mrf.mxu1 }
0x22bb   :  { %v18450_v41 = vadd.f32 %v7651_v9, %v18372_v29  ;;  %v14941_v29 = vld [vmem:[%s19543_s1 + $0x220] sm:$0xff]  ;;  %v14956_v9 = vld [vmem:[%s19543_s1 + $0x2a8] sm:$0xff] }
0x22bc   :  { %v13768_v33 = vpop.f32.mrf.mxu1 }
0x22bd   :  { %v18453_v11 = vadd.f32 %v13768_v33, %v18374_v43  ;;  %v14943_v43 = vld [vmem:[%s19543_s1 + $0x210] sm:$0xff]  ;;  %v14958_v33 = vld [vmem:[%s19543_s1 + $0x298] sm:$0xff] }
0x22be   :  { %v7661_v30 = vpop.f32.mrf.mxu1 }
0x22bf   :  { %v18456_v3 = vadd.f32 %v7661_v30, %v18376_v8  ;;  %v14945_v8 = vld [vmem:[%s19543_s1 + $0x200] sm:$0xff]  ;;  %v14960_v30 = vld [vmem:[%s19543_s1 + $0x288] sm:$0xff] }
0x22d8   :  { %v13803_v36 = vpop.f32.mrf.mxu1 }
0x22da   :  { %v7740_v40 = vpop.f32.mrf.mxu1 }
0x22dc   :  { %v13806_v63 = vpop.f32.mrf.mxu1 }
0x22dd   :  { %13807 = vmatprep.subr.mxu0 %v13806_v63 }
0x22de   :  { %v7750_v10 = vpop.f32.mrf.mxu1  ;;  %13808 = vmatpush3.msra.mxu0 %v13806_v63 }
0x22df   :  { %13809 = vmatprep.subr.mxu0 %v7750_v10 }
0x22e0   :  { %13810 = vmatpush3.msra.mxu0 %v7750_v10 }
0x22e1   :  { %13811 = vmatprep.subr.mxu0 %v13803_v36 }
0x22e2   :  { %13812 = vmatpush3.msra.mxu0 %v13803_v36  ;;  %v10277_v36 = vld [vmem:[%s19546_s4 + $0x400] sm:$0xff] }
0x22e3   :  { %13813 = vmatprep.subr.mxu0 %v7740_v40 }
0x22e4   :  { %13814 = vmatpush3.msra.mxu0 %v7740_v40 }
0x22e5   :  { %13816 = vmatmul.mubr.msk.f32.vlgmr.msra.gmra.mxu0 %vm2057_vm3, %v10270_v13  ;;  %13821 = vmatprep.subr.mxu0 %v14930_v45 }
0x22e6   :  { %13822 = vmatpush3.msra.mxu0 %v14930_v45  ;;  %13818 = vmatprep.mubr.msk.f32.mxu0 %vm2057_vm3, %v10271_v14 }
0x22e7   :  { %13823 = vmatprep.subr.mxu0 %v14931_v39 }
0x22e8   :  { %13824 = vmatpush3.msra.mxu0 %v14931_v39 }
0x22e9   :  { %13819 = vmatmul.mubr.msk.f32.gmra.mxu0 %vm2057_vm3, %v10272_v15  ;;  %13825 = vmatprep.subr.mxu0 %v14932_v16 }
0x22ea   :  { %13826 = vmatpush3.msra.mxu0 %v14932_v16  ;;  %13853 = vmatprep.mubr.f32.mxu0 %v18265_v21 }
0x22eb   :  { %13827 = vmatprep.subr.mxu0 %v14933_v24 }
0x22ec   :  { %13828 = vmatpush3.msra.mxu0 %v14933_v24 }
0x22ed   :  { %13829 = vmatprep.subr.mxu0 %v14934_v17 }
0x22ee   :  { %13830 = vmatpush3.msra.mxu0 %v14934_v17 }
0x22ef   :  { %13831 = vmatprep.subr.mxu0 %v14935_v18 }
0x22f0   :  { %13832 = vmatpush3.msra.mxu0 %v14935_v18 }
0x22f1   :  { %13833 = vmatprep.subr.mxu0 %v14936_v50 }
0x22f2   :  { %13834 = vmatpush3.msra.mxu0 %v14936_v50  ;;  %v10278_v50 = vld [vmem:[%s19546_s4 + $0x408] sm:$0xff] }
0x22f3   :  { %13835 = vmatprep.subr.mxu0 %v14937_v20 }
0x22f4   :  { %13836 = vmatpush3.msra.mxu0 %v14937_v20  ;;  %v10279_v20 = vld [vmem:[%s19546_s4 + $0x410] sm:$0xff] }
0x22f5   :  { %13837 = vmatprep.subr.mxu0 %v14938_v22 }
0x22f6   :  { %13838 = vmatpush3.msra.mxu0 %v14938_v22  ;;  %v14962_v22 = vld [vmem:[%s19543_s1 + $0x378] sm:$0xff] }
0x22f7   :  { %13839 = vmatprep.subr.mxu0 %v14939_v25 }
0x22f8   :  { %13840 = vmatpush3.msra.mxu0 %v14939_v25  ;;  %v10280_v25 = vld [vmem:[%s19546_s4 + $0x418] sm:$0xff] }
0x22f9   :  { %13841 = vmatprep.subr.mxu0 %v14940_v19 }
0x22fa   :  { %13842 = vmatpush3.msra.mxu0 %v14940_v19  ;;  %v14963_v19 = vld [vmem:[%s19543_s1 + $0x370] sm:$0xff] }
0x22fb   :  { %13843 = vmatprep.subr.mxu0 %v14941_v29 }
0x22fc   :  { %13844 = vmatpush3.msra.mxu0 %v14941_v29  ;;  %v14964_v29 = vld [vmem:[%s19543_s1 + $0x368] sm:$0xff] }
0x22fd   :  { %13845 = vmatprep.subr.mxu0 %v14942_v34 }
0x22fe   :  { %13846 = vmatpush3.msra.mxu0 %v14942_v34  ;;  %v14965_v34 = vld [vmem:[%s19543_s1 + $0x360] sm:$0xff] }
0x22ff   :  { %13847 = vmatprep.subr.mxu0 %v14943_v43 }
0x2300   :  { %13848 = vmatpush3.msra.mxu0 %v14943_v43  ;;  %v14966_v43 = vld [vmem:[%s19543_s1 + $0x358] sm:$0xff] }
0x2301   :  { %13849 = vmatprep.subr.mxu0 %v14944_v12 }
0x2302   :  { %13850 = vmatpush3.msra.mxu0 %v14944_v12  ;;  %v14967_v12 = vld [vmem:[%s19543_s1 + $0x350] sm:$0xff] }
0x2303   :  { %13851 = vmatprep.subr.mxu0 %v14945_v8 }
0x2304   :  { %13852 = vmatpush3.msra.mxu0 %v14945_v8  ;;  %v14968_v8 = vld [vmem:[%s19543_s1 + $0x348] sm:$0xff] }
0x2305   :  { %13854 = vmatmul.mubr.f32.vlgmr.msra.gmra.mxu0 %v18268_v28 }
0x2306   :  { %13856 = vmatprep.mubr.f32.mxu0 %v18274_v47 }
0x2309   :  { %13857 = vmatmul.mubr.f32.gmra.mxu0 %v18276_v42 }
0x230a   :  { %13919 = vmatprep.mubr.msk.f32.mxu0 %vm2057_vm3, %v10277_v36  ;;  %v14985_v36 = vld [vmem:[%s19543_s1 + $0x3c0] sm:$0xff] }
0x23a5   :  { %v13817_v4 = vpop.f32.mrf.mxu0 }
0x23a6   :  { %v18527_v35 = vadd.f32 %v13817_v4, %v18447_v6  ;;  %v14955_v6 = vld [vmem:[%s19543_s1 + $0x2b0] sm:$0xff]  ;;  %v14970_v4 = vld [vmem:[%s19543_s1 + $0x338] sm:$0xff] }
0x23a7   :  { %v7837_v23 = vpop.f32.mrf.mxu0 }
0x23a8   :  { %v18530_v26 = vadd.f32 %v7837_v23, %v18450_v41  ;;  %v14957_v41 = vld [vmem:[%s19543_s1 + $0x2a0] sm:$0xff]  ;;  %v14972_v23 = vld [vmem:[%s19543_s1 + $0x328] sm:$0xff] }
0x23a9   :  { %v13820_v31 = vpop.f32.mrf.mxu0 }
0x23aa   :  { %v18533_v38 = vadd.f32 %v13820_v31, %v18453_v11  ;;  %v14959_v11 = vld [vmem:[%s19543_s1 + $0x290] sm:$0xff]  ;;  %v14974_v31 = vld [vmem:[%s19543_s1 + $0x318] sm:$0xff] }
0x23ab   :  { %v7847_v27 = vpop.f32.mrf.mxu0 }
0x23ac   :  { %v18536_v5 = vadd.f32 %v7847_v27, %v18456_v3  ;;  %v14961_v3 = vld [vmem:[%s19543_s1 + $0x280] sm:$0xff]  ;;  %v14976_v27 = vld [vmem:[%s19543_s1 + $0x308] sm:$0xff] }
0x23c5   :  { %v13855_v0 = vpop.f32.mrf.mxu0 }
0x23c7   :  { %v7926_v54 = vpop.f32.mrf.mxu0 }
0x23c9   :  { %v13858_v37 = vpop.f32.mrf.mxu0 }
0x23ca   :  { %13859 = vmatprep.subr.mxu1 %v13858_v37 }
0x23cb   :  { %v7936_v48 = vpop.f32.mrf.mxu0  ;;  %13860 = vmatpush3.msra.mxu1 %v13858_v37 }
0x23cc   :  { %13861 = vmatprep.subr.mxu1 %v7936_v48 }
0x23cd   :  { %13862 = vmatpush3.msra.mxu1 %v7936_v48 }
0x23ce   :  { %13863 = vmatprep.subr.mxu1 %v13855_v0 }
0x23cf   :  { %13864 = vmatpush3.msra.mxu1 %v13855_v0  ;;  %v10281_v0 = vld [vmem:[%s19546_s4 + $0x420] sm:$0xff] }
0x23d0   :  { %13865 = vmatprep.subr.mxu1 %v7926_v54 }
0x23d1   :  { %13866 = vmatpush3.msra.mxu1 %v7926_v54 }
0x23d2   :  { %13868 = vmatmul.mubr.msk.f32.vlgmr.msra.gmra.mxu1 %vm2057_vm3, %v10274_v49  ;;  %13873 = vmatprep.subr.mxu1 %v14946_v53 }
0x23d3   :  { %13874 = vmatpush3.msra.mxu1 %v14946_v53  ;;  %13870 = vmatprep.mubr.msk.f32.mxu1 %vm2057_vm3, %v10275_v52 }
0x23d4   :  { %13875 = vmatprep.subr.mxu1 %v14947_v56 }
0x23d5   :  { %13876 = vmatpush3.msra.mxu1 %v14947_v56 }
0x23d6   :  { %13871 = vmatmul.mubr.msk.f32.gmra.mxu1 %vm2057_vm3, %v10276_v55  ;;  %13877 = vmatprep.subr.mxu1 %v14948_v57 }
0x23d7   :  { %13878 = vmatpush3.msra.mxu1 %v14948_v57  ;;  %13905 = vmatprep.mubr.f32.mxu1 %v18265_v21 }
0x23d8   :  { %13879 = vmatprep.subr.mxu1 %v14949_v58 }
0x23d9   :  { %13880 = vmatpush3.msra.mxu1 %v14949_v58 }
0x23da   :  { %13881 = vmatprep.subr.mxu1 %v14950_v59 }
0x23db   :  { %13882 = vmatpush3.msra.mxu1 %v14950_v59 }
0x23dc   :  { %13883 = vmatprep.subr.mxu1 %v14951_v60 }
0x23dd   :  { %13884 = vmatpush3.msra.mxu1 %v14951_v60 }
0x23de   :  { %13885 = vmatprep.subr.mxu1 %v14952_v61 }
0x23df   :  { %13886 = vmatpush3.msra.mxu1 %v14952_v61  ;;  %v10282_v61 = vld [vmem:[%s19546_s4 + $0x428] sm:$0xff] }
0x23e0   :  { %13887 = vmatprep.subr.mxu1 %v14953_v62 }
0x23e1   :  { %13888 = vmatpush3.msra.mxu1 %v14953_v62  ;;  %v10283_v62 = vld [vmem:[%s19546_s4 + $0x430] sm:$0xff] }
0x23e2   :  { %13889 = vmatprep.subr.mxu1 %v14954_v1 }
0x23e3   :  { %13890 = vmatpush3.msra.mxu1 %v14954_v1  ;;  %v14978_v1 = vld [vmem:[%s19543_s1 + $0x3f8] sm:$0xff] }
0x23e4   :  { %13891 = vmatprep.subr.mxu1 %v14955_v6 }
0x23e5   :  { %13892 = vmatpush3.msra.mxu1 %v14955_v6  ;;  %v10284_v6 = vld [vmem:[%s19546_s4 + $0x438] sm:$0xff] }
0x23e6   :  { %13893 = vmatprep.subr.mxu1 %v14956_v9 }
0x23e7   :  { %13894 = vmatpush3.msra.mxu1 %v14956_v9  ;;  %v14979_v9 = vld [vmem:[%s19543_s1 + $0x3f0] sm:$0xff] }
0x23e8   :  { %13895 = vmatprep.subr.mxu1 %v14957_v41 }
0x23e9   :  { %13896 = vmatpush3.msra.mxu1 %v14957_v41  ;;  %v14980_v41 = vld [vmem:[%s19543_s1 + $0x3e8] sm:$0xff] }
0x23ea   :  { %13897 = vmatprep.subr.mxu1 %v14958_v33 }
0x23eb   :  { %13898 = vmatpush3.msra.mxu1 %v14958_v33  ;;  %v14981_v33 = vld [vmem:[%s19543_s1 + $0x3e0] sm:$0xff] }
0x23ec   :  { %13899 = vmatprep.subr.mxu1 %v14959_v11 }
0x23ed   :  { %13900 = vmatpush3.msra.mxu1 %v14959_v11  ;;  %v14982_v11 = vld [vmem:[%s19543_s1 + $0x3d8] sm:$0xff] }
0x23ee   :  { %13901 = vmatprep.subr.mxu1 %v14960_v30 }
0x23ef   :  { %13902 = vmatpush3.msra.mxu1 %v14960_v30  ;;  %v14983_v30 = vld [vmem:[%s19543_s1 + $0x3d0] sm:$0xff] }
0x23f0   :  { %13903 = vmatprep.subr.mxu1 %v14961_v3 }
0x23f1   :  { %13904 = vmatpush3.msra.mxu1 %v14961_v3  ;;  %v14984_v3 = vld [vmem:[%s19543_s1 + $0x3c8] sm:$0xff] }
0x23f2   :  { %13906 = vmatmul.mubr.f32.vlgmr.msra.gmra.mxu1 %v18268_v28 }
0x23f3   :  { %13908 = vmatprep.mubr.f32.mxu1 %v18274_v47 }
0x23f6   :  { %13909 = vmatmul.mubr.f32.gmra.mxu1 %v18276_v42 }
0x23f7   :  { %13971 = vmatprep.mubr.msk.f32.mxu1 %vm2057_vm3, %v10281_v0  ;;  %v15002_v0 = vld [vmem:[%s19543_s1 + $0x438] sm:$0xff] }
0x2492   :  { %v13869_v40 = vpop.f32.mrf.mxu1 }
0x2493   :  { %v18607_v63 = vadd.f32 %v13869_v40, %v18527_v35  ;;  %v14971_v35 = vld [vmem:[%s19543_s1 + $0x330] sm:$0xff]  ;;  %v14986_v40 = vld [vmem:[%s19543_s1 + $0x3b8] sm:$0xff] }
0x2494   :  { %v8023_v10 = vpop.f32.mrf.mxu1 }
0x2495   :  { %v18610_v13 = vadd.f32 %v8023_v10, %v18530_v26  ;;  %v14973_v26 = vld [vmem:[%s19543_s1 + $0x320] sm:$0xff]  ;;  %v14988_v10 = vld [vmem:[%s19543_s1 + $0x3a8] sm:$0xff] }
0x2496   :  { %v13872_v14 = vpop.f32.mrf.mxu1 }
0x2497   :  { %v18613_v45 = vadd.f32 %v13872_v14, %v18533_v38  ;;  %v14975_v38 = vld [vmem:[%s19543_s1 + $0x310] sm:$0xff]  ;;  %v14990_v14 = vld [vmem:[%s19543_s1 + $0x398] sm:$0xff] }
0x2498   :  { %v8033_v15 = vpop.f32.mrf.mxu1 }
0x2499   :  { %v18616_v39 = vadd.f32 %v8033_v15, %v18536_v5  ;;  %v14977_v5 = vld [vmem:[%s19543_s1 + $0x300] sm:$0xff]  ;;  %v14992_v15 = vld [vmem:[%s19543_s1 + $0x388] sm:$0xff] }
0x24b2   :  { %v13907_v16 = vpop.f32.mrf.mxu1 }
0x24b4   :  { %v8112_v24 = vpop.f32.mrf.mxu1 }
0x24b6   :  { %v13910_v17 = vpop.f32.mrf.mxu1 }
0x24b7   :  { %13911 = vmatprep.subr.mxu0 %v13910_v17 }
0x24b8   :  { %v8122_v18 = vpop.f32.mrf.mxu1  ;;  %13912 = vmatpush3.msra.mxu0 %v13910_v17 }
0x24b9   :  { %13913 = vmatprep.subr.mxu0 %v8122_v18 }
0x24ba   :  { %13914 = vmatpush3.msra.mxu0 %v8122_v18 }
0x24bb   :  { %13915 = vmatprep.subr.mxu0 %v13907_v16 }
0x24bc   :  { %13916 = vmatpush3.msra.mxu0 %v13907_v16  ;;  %v10285_v16 = vld [vmem:[%s19546_s4 + $0x440] sm:$0xff] }
0x24bd   :  { %13917 = vmatprep.subr.mxu0 %v8112_v24 }
0x24be   :  { %13918 = vmatpush3.msra.mxu0 %v8112_v24 }
0x24bf   :  { %13920 = vmatmul.mubr.msk.f32.vlgmr.msra.gmra.mxu0 %vm2057_vm3, %v10278_v50  ;;  %13925 = vmatprep.subr.mxu0 %v14962_v22 }
0x24c0   :  { %13926 = vmatpush3.msra.mxu0 %v14962_v22  ;;  %13922 = vmatprep.mubr.msk.f32.mxu0 %vm2057_vm3, %v10279_v20 }
0x24c1   :  { %13927 = vmatprep.subr.mxu0 %v14963_v19 }
0x24c2   :  { %13928 = vmatpush3.msra.mxu0 %v14963_v19 }
0x24c3   :  { %13923 = vmatmul.mubr.msk.f32.gmra.mxu0 %vm2057_vm3, %v10280_v25  ;;  %13929 = vmatprep.subr.mxu0 %v14964_v29 }
0x24c4   :  { %13930 = vmatpush3.msra.mxu0 %v14964_v29  ;;  %13957 = vmatprep.mubr.f32.mxu0 %v18265_v21 }
0x24c5   :  { %13931 = vmatprep.subr.mxu0 %v14965_v34 }
0x24c6   :  { %13932 = vmatpush3.msra.mxu0 %v14965_v34 }
0x24c7   :  { %13933 = vmatprep.subr.mxu0 %v14966_v43 }
0x24c8   :  { %13934 = vmatpush3.msra.mxu0 %v14966_v43 }
0x24c9   :  { %13935 = vmatprep.subr.mxu0 %v14967_v12 }
0x24ca   :  { %13936 = vmatpush3.msra.mxu0 %v14967_v12 }
0x24cb   :  { %13937 = vmatprep.subr.mxu0 %v14968_v8 }
0x24cc   :  { %13938 = vmatpush3.msra.mxu0 %v14968_v8  ;;  %v10286_v8 = vld [vmem:[%s19546_s4 + $0x448] sm:$0xff] }
0x24cd   :  { %13939 = vmatprep.subr.mxu0 %v14969_v44 }
0x24ce   :  { %13940 = vmatpush3.msra.mxu0 %v14969_v44  ;;  %v10287_v44 = vld [vmem:[%s19546_s4 + $0x450] sm:$0xff] }
0x24cf   :  { %13941 = vmatprep.subr.mxu0 %v14970_v4 }
0x24d0   :  { %13942 = vmatpush3.msra.mxu0 %v14970_v4  ;;  %v14994_v4 = vld [vmem:[%s19543_s1 + $0x478] sm:$0xff] }
0x24d1   :  { %13943 = vmatprep.subr.mxu0 %v14971_v35 }
0x24d2   :  { %13944 = vmatpush3.msra.mxu0 %v14971_v35  ;;  %v10288_v35 = vld [vmem:[%s19546_s4 + $0x458] sm:$0xff] }
0x24d3   :  { %13945 = vmatprep.subr.mxu0 %v14972_v23 }
0x24d4   :  { %13946 = vmatpush3.msra.mxu0 %v14972_v23  ;;  %v14995_v23 = vld [vmem:[%s19543_s1 + $0x470] sm:$0xff] }
0x24d5   :  { %13947 = vmatprep.subr.mxu0 %v14973_v26 }
0x24d6   :  { %13948 = vmatpush3.msra.mxu0 %v14973_v26  ;;  %v14996_v26 = vld [vmem:[%s19543_s1 + $0x468] sm:$0xff] }
0x24d7   :  { %13949 = vmatprep.subr.mxu0 %v14974_v31 }
0x24d8   :  { %13950 = vmatpush3.msra.mxu0 %v14974_v31  ;;  %v14997_v31 = vld [vmem:[%s19543_s1 + $0x460] sm:$0xff] }
0x24d9   :  { %13951 = vmatprep.subr.mxu0 %v14975_v38 }
0x24da   :  { %13952 = vmatpush3.msra.mxu0 %v14975_v38  ;;  %v14998_v38 = vld [vmem:[%s19543_s1 + $0x458] sm:$0xff] }
0x24db   :  { %13953 = vmatprep.subr.mxu0 %v14976_v27 }
0x24dc   :  { %13954 = vmatpush3.msra.mxu0 %v14976_v27  ;;  %v14999_v27 = vld [vmem:[%s19543_s1 + $0x450] sm:$0xff] }
0x24dd   :  { %13955 = vmatprep.subr.mxu0 %v14977_v5 }
0x24de   :  { %13956 = vmatpush3.msra.mxu0 %v14977_v5  ;;  %v15001_v5 = vld [vmem:[%s19543_s1 + $0x440] sm:$0xff] }
0x24df   :  { %13958 = vmatmul.mubr.f32.vlgmr.msra.gmra.mxu0 %v18268_v28 }
0x24e0   :  { %13960 = vmatprep.mubr.f32.mxu0 %v18274_v47 }
0x24e3   :  { %13961 = vmatmul.mubr.f32.gmra.mxu0 %v18276_v42 }
0x24e4   :  { %14023 = vmatprep.mubr.msk.f32.mxu0 %vm2057_vm3, %v10285_v16  ;;  %v10340_v16 = vld [vmem:[%s19550_s8 + $0xa8] sm:$0xff] }
0x257f   :  { %v13921_v54 = vpop.f32.mrf.mxu0 }
0x2580   :  { %v18687_v37 = vadd.f32 %v13921_v54, %v18607_v63  ;;  %v14987_v63 = vld [vmem:[%s19543_s1 + $0x3b0] sm:$0xff] }
0x2581   :  { %v8209_v48 = vpop.f32.mrf.mxu0  ;;  %v15003_v54 = vld [vmem:[%s19543_s1 + $0x430] sm:$0xff] }
0x2582   :  { %v18690_v49 = vadd.f32 %v8209_v48, %v18610_v13  ;;  %v14989_v13 = vld [vmem:[%s19543_s1 + $0x3a0] sm:$0xff] }
0x2583   :  { %v13924_v52 = vpop.f32.mrf.mxu0  ;;  %v15005_v48 = vld [vmem:[%s19543_s1 + $0x420] sm:$0xff] }
0x2584   :  { %v18693_v53 = vadd.f32 %v13924_v52, %v18613_v45  ;;  %v14991_v45 = vld [vmem:[%s19543_s1 + $0x390] sm:$0xff] }
0x2585   :  { %v8219_v55 = vpop.f32.mrf.mxu0  ;;  %v15007_v52 = vld [vmem:[%s19543_s1 + $0x410] sm:$0xff] }
0x2586   :  { %v18696_v56 = vadd.f32 %v8219_v55, %v18616_v39  ;;  %v14993_v39 = vld [vmem:[%s19543_s1 + $0x380] sm:$0xff] }
0x2587   :  { %v15009_v55 = vld [vmem:[%s19543_s1 + $0x400] sm:$0xff] }
0x259f   :  { %v13959_v57 = vpop.f32.mrf.mxu0 }
0x25a1   :  { %v8298_v58 = vpop.f32.mrf.mxu0 }
0x25a3   :  { %v13962_v59 = vpop.f32.mrf.mxu0 }
0x25a4   :  { %13963 = vmatprep.subr.mxu1 %v13962_v59 }
0x25a5   :  { %v8308_v60 = vpop.f32.mrf.mxu0  ;;  %13964 = vmatpush3.msra.mxu1 %v13962_v59 }
0x25a6   :  { %13965 = vmatprep.subr.mxu1 %v8308_v60 }
0x25a7   :  { %13966 = vmatpush3.msra.mxu1 %v8308_v60 }
0x25a8   :  { %13967 = vmatprep.subr.mxu1 %v13959_v57 }
0x25a9   :  { %13968 = vmatpush3.msra.mxu1 %v13959_v57 }
0x25aa   :  { %13969 = vmatprep.subr.mxu1 %v8298_v58 }
0x25ab   :  { %13970 = vmatpush3.msra.mxu1 %v8298_v58 }
0x25ac   :  { %13972 = vmatmul.mubr.msk.f32.vlgmr.msra.gmra.mxu1 %vm2057_vm3, %v10282_v61  ;;  %13977 = vmatprep.subr.mxu1 %v14978_v1 }
0x25ad   :  { %13978 = vmatpush3.msra.mxu1 %v14978_v1  ;;  %13974 = vmatprep.mubr.msk.f32.mxu1 %vm2057_vm3, %v10283_v62 }
0x25ae   :  { %13979 = vmatprep.subr.mxu1 %v14979_v9 }
0x25af   :  { %13980 = vmatpush3.msra.mxu1 %v14979_v9 }
0x25b0   :  { %13975 = vmatmul.mubr.msk.f32.gmra.mxu1 %vm2057_vm3, %v10284_v6  ;;  %13981 = vmatprep.subr.mxu1 %v14980_v41 }
0x25b1   :  { %13982 = vmatpush3.msra.mxu1 %v14980_v41  ;;  %14009 = vmatprep.mubr.f32.mxu1 %v18265_v21  ;;  %v10290_v41 = vld [vmem:[%s19546_s4 + $0x468] sm:$0xff] }
0x25b2   :  { %13983 = vmatprep.subr.mxu1 %v14981_v33 }
0x25b3   :  { %13984 = vmatpush3.msra.mxu1 %v14981_v33  ;;  %v10291_v33 = vld [vmem:[%s19546_s4 + $0x470] sm:$0xff] }
0x25b4   :  { %13985 = vmatprep.subr.mxu1 %v14982_v11 }
0x25b5   :  { %13986 = vmatpush3.msra.mxu1 %v14982_v11  ;;  %v10292_v11 = vld [vmem:[%s19546_s4 + $0x478] sm:$0xff] }
0x25b6   :  { %13987 = vmatprep.subr.mxu1 %v14983_v30 }
0x25b7   :  { %13988 = vmatpush3.msra.mxu1 %v14983_v30  ;;  %v8822_v30 = vld [vmem:[%s19548_s6] sm:$0xff] }
0x25b8   :  { %13989 = vmatprep.subr.mxu1 %v14984_v3 }
0x25b9   :  { %13990 = vmatpush3.msra.mxu1 %v14984_v3  ;;  %v10350_v3 = vld [vmem:[%s19550_s8 + $0xf8] sm:$0xff] }
0x25ba   :  { %13991 = vmatprep.subr.mxu1 %v14985_v36 }
0x25bb   :  { %13992 = vmatpush3.msra.mxu1 %v14985_v36  ;;  %v10349_v36 = vld [vmem:[%s19550_s8 + $0xf0] sm:$0xff] }
0x25bc   :  { %13993 = vmatprep.subr.mxu1 %v14986_v40 }
0x25bd   :  { %13994 = vmatpush3.msra.mxu1 %v14986_v40  ;;  %v10348_v40 = vld [vmem:[%s19550_s8 + $0xe8] sm:$0xff] }
0x25be   :  { %13995 = vmatprep.subr.mxu1 %v14987_v63 }
0x25bf   :  { %13996 = vmatpush3.msra.mxu1 %v14987_v63  ;;  %v10347_v63 = vld [vmem:[%s19550_s8 + $0xe0] sm:$0xff] }
0x25c0   :  { %13997 = vmatprep.subr.mxu1 %v14988_v10 }
0x25c1   :  { %13998 = vmatpush3.msra.mxu1 %v14988_v10  ;;  %v10346_v10 = vld [vmem:[%s19550_s8 + $0xd8] sm:$0xff] }
0x25c2   :  { %13999 = vmatprep.subr.mxu1 %v14989_v13 }
0x25c3   :  { %14000 = vmatpush3.msra.mxu1 %v14989_v13  ;;  %v10345_v13 = vld [vmem:[%s19550_s8 + $0xd0] sm:$0xff] }
0x25c4   :  { %14001 = vmatprep.subr.mxu1 %v14990_v14 }
0x25c5   :  { %14002 = vmatpush3.msra.mxu1 %v14990_v14  ;;  %v10344_v14 = vld [vmem:[%s19550_s8 + $0xc8] sm:$0xff] }
0x25c6   :  { %14003 = vmatprep.subr.mxu1 %v14991_v45 }
0x25c7   :  { %14004 = vmatpush3.msra.mxu1 %v14991_v45  ;;  %v10343_v45 = vld [vmem:[%s19550_s8 + $0xc0] sm:$0xff] }
0x25c8   :  { %14005 = vmatprep.subr.mxu1 %v14992_v15 }
0x25c9   :  { %14006 = vmatpush3.msra.mxu1 %v14992_v15  ;;  %v10342_v15 = vld [vmem:[%s19550_s8 + $0xb8] sm:$0xff] }
0x25ca   :  { %14007 = vmatprep.subr.mxu1 %v14993_v39 }
0x25cb   :  { %14008 = vmatpush3.msra.mxu1 %v14993_v39  ;;  %v10341_v39 = vld [vmem:[%s19550_s8 + $0xb0] sm:$0xff] }
0x25cc   :  { %14010 = vmatmul.mubr.f32.vlgmr.msra.gmra.mxu1 %v18268_v28 }
0x25cd   :  { %14012 = vmatprep.mubr.f32.mxu1 %v18274_v47 }
0x25d0   :  { %14013 = vmatmul.mubr.f32.gmra.mxu1 %v18276_v42 }
0x266c   :  { %v13973_v24 = vpop.f32.mrf.mxu1 }
0x266d   :  { %v18767_v17 = vadd.f32 %v13973_v24, %v18687_v37  ;;  %v15004_v37 = vld [vmem:[%s19543_s1 + $0x428] sm:$0xff]  ;;  %v10339_v24 = vld [vmem:[%s19550_s8 + $0xa0] sm:$0xff] }
0x266e   :  { %v8395_v18 = vpop.f32.mrf.mxu1 }
0x266f   :  { %v18770_v50 = vadd.f32 %v8395_v18, %v18690_v49  ;;  %v15006_v49 = vld [vmem:[%s19543_s1 + $0x418] sm:$0xff] }
0x2670   :  { %v13976_v20 = vpop.f32.mrf.mxu1 }
0x2671   :  { %v18773_v22 = vadd.f32 %v13976_v20, %v18693_v53  ;;  %v15008_v53 = vld [vmem:[%s19543_s1 + $0x408] sm:$0xff] }
0x2672   :  { %v8405_v25 = vpop.f32.mrf.mxu1 }
0x2673   :  { %v18776_v19 = vadd.f32 %v8405_v25, %v18696_v56  ;;  %v10289_v56 = vld [vmem:[%s19546_s4 + $0x460] sm:$0xff] }
0x2674   :  { %14075 = vmatprep.mubr.msk.f32.mxu1 %vm2057_vm3, %v10289_v56  ;;  %v8926_v56 = vld [vmem:[%s19550_s8 + $0x30] sm:$0xff] }
0x268c   :  { %v14011_v29 = vpop.f32.mrf.mxu1 }
0x268e   :  { %v8484_v34 = vpop.f32.mrf.mxu1 }
0x2690   :  { %v14014_v43 = vpop.f32.mrf.mxu1 }
0x2691   :  { %14015 = vmatprep.subr.mxu0 %v14014_v43 }
0x2692   :  { %v8494_v12 = vpop.f32.mrf.mxu1  ;;  %14016 = vmatpush3.msra.mxu0 %v14014_v43 }
0x2693   :  { %14017 = vmatprep.subr.mxu0 %v8494_v12 }
0x2694   :  { %14018 = vmatpush3.msra.mxu0 %v8494_v12 }
0x2695   :  { %14019 = vmatprep.subr.mxu0 %v14011_v29 }
0x2696   :  { %14020 = vmatpush3.msra.mxu0 %v14011_v29 }
0x2697   :  { %14021 = vmatprep.subr.mxu0 %v8484_v34 }
0x2698   :  { %14022 = vmatpush3.msra.mxu0 %v8484_v34 }
0x2699   :  { %14024 = vmatmul.mubr.msk.f32.vlgmr.msra.gmra.mxu0 %vm2057_vm3, %v10286_v8  ;;  %14029 = vmatprep.subr.mxu0 %v14994_v4 }
0x269a   :  { %14030 = vmatpush3.msra.mxu0 %v14994_v4  ;;  %14026 = vmatprep.mubr.msk.f32.mxu0 %vm2057_vm3, %v10287_v44 }
0x269b   :  { %14031 = vmatprep.subr.mxu0 %v14995_v23 }
0x269c   :  { %14032 = vmatpush3.msra.mxu0 %v14995_v23 }
0x269d   :  { %14027 = vmatmul.mubr.msk.f32.gmra.mxu0 %vm2057_vm3, %v10288_v35  ;;  %14033 = vmatprep.subr.mxu0 %v14996_v26 }
0x269e   :  { %14034 = vmatpush3.msra.mxu0 %v14996_v26  ;;  %14061 = vmatprep.mubr.f32.mxu0 %v18265_v21  ;;  %v15000_v21 = vld [vmem:[%s19543_s1 + $0x448] sm:$0xff] }
0x269f   :  { %14035 = vmatprep.subr.mxu0 %v14997_v31 }
0x26a0   :  { %14036 = vmatpush3.msra.mxu0 %v14997_v31 }
0x26a1   :  { %14037 = vmatprep.subr.mxu0 %v14998_v38 }
0x26a2   :  { %14038 = vmatpush3.msra.mxu0 %v14998_v38 }
0x26a3   :  { %14039 = vmatprep.subr.mxu0 %v14999_v27 }
0x26a4   :  { %14040 = vmatpush3.msra.mxu0 %v14999_v27 }
0x26a5   :  { %14041 = vmatprep.subr.mxu0 %v15000_v21 }
0x26a6   :  { %14042 = vmatpush3.msra.mxu0 %v15000_v21 }
0x26a7   :  { %14043 = vmatprep.subr.mxu0 %v15001_v5 }
0x26a8   :  { %14044 = vmatpush3.msra.mxu0 %v15001_v5 }
0x26a9   :  { %14045 = vmatprep.subr.mxu0 %v15002_v0 }
0x26aa   :  { %14046 = vmatpush3.msra.mxu0 %v15002_v0 }
0x26ab   :  { %14047 = vmatprep.subr.mxu0 %v15003_v54 }
0x26ac   :  { %14048 = vmatpush3.msra.mxu0 %v15003_v54 }
0x26ad   :  { %14049 = vmatprep.subr.mxu0 %v15004_v37 }
0x26ae   :  { %14050 = vmatpush3.msra.mxu0 %v15004_v37  ;;  %v8932_v37 = vld [vmem:[%s19550_s8 + $0x60] sm:$0xff] }
0x26af   :  { %14051 = vmatprep.subr.mxu0 %v15005_v48 }
0x26b0   :  { %14052 = vmatpush3.msra.mxu0 %v15005_v48  ;;  %v8931_v48 = vld [vmem:[%s19550_s8 + $0x58] sm:$0xff] }
0x26b1   :  { %14053 = vmatprep.subr.mxu0 %v15006_v49 }
0x26b2   :  { %14054 = vmatpush3.msra.mxu0 %v15006_v49  ;;  %v8930_v49 = vld [vmem:[%s19550_s8 + $0x50] sm:$0xff] }
0x26b3   :  { %14055 = vmatprep.subr.mxu0 %v15007_v52 }
0x26b4   :  { %14056 = vmatpush3.msra.mxu0 %v15007_v52  ;;  %v8929_v52 = vld [vmem:[%s19550_s8 + $0x48] sm:$0xff] }
0x26b5   :  { %14057 = vmatprep.subr.mxu0 %v15008_v53 }
0x26b6   :  { %14058 = vmatpush3.msra.mxu0 %v15008_v53  ;;  %v8928_v53 = vld [vmem:[%s19550_s8 + $0x40] sm:$0xff] }
0x26b7   :  { %14059 = vmatprep.subr.mxu0 %v15009_v55 }
0x26b8   :  { %14060 = vmatpush3.msra.mxu0 %v15009_v55  ;;  %v8927_v55 = vld [vmem:[%s19550_s8 + $0x38] sm:$0xff] }
0x26b9   :  { %14062 = vmatmul.mubr.f32.vlgmr.msra.gmra.mxu0 %v18268_v28  ;;  %14127 = vmatprep.subr.mxu0 %v15032_v2 }
0x26ba   :  { %14064 = vmatprep.mubr.f32.mxu0 %v18274_v47  ;;  %14128 = vmatpush3.msra.mxu0 %v10350_v3 }
0x26bb   :  { %14129 = vmatprep.subr.mxu0 %v15032_v2 }
0x26bc   :  { %14130 = vmatpush3.msra.mxu0 %v10349_v36  ;;  %v10365_v36 = vld [vmem:[%s19550_s8 + $0x170] sm:$0xff] }
0x26bd   :  { %14065 = vmatmul.mubr.f32.gmra.mxu0 %v18276_v42  ;;  %14131 = vmatprep.subr.mxu0 %v15032_v2 }
0x26be   :  { %14159 = vmatprep.mubr.msk.f32.mxu0 %vm15033_vm0, %v15032_v2  ;;  %14132 = vmatpush3.msra.mxu0 %v10348_v40  ;;  %v10382_v40 = vld [vmem:[%s19550_s8 + $0x1f8] sm:$0xff] }
0x26bf   :  { %14133 = vmatprep.subr.mxu0 %v15032_v2 }
0x26c0   :  { %14134 = vmatpush3.msra.mxu0 %v10347_v63  ;;  %v10364_v63 = vld [vmem:[%s19550_s8 + $0x168] sm:$0xff] }
0x26c1   :  { %14135 = vmatprep.subr.mxu0 %v15032_v2 }
0x26c2   :  { %14136 = vmatpush3.msra.mxu0 %v10346_v10  ;;  %v10381_v10 = vld [vmem:[%s19550_s8 + $0x1f0] sm:$0xff] }
0x26c3   :  { %14137 = vmatprep.subr.mxu0 %v15032_v2 }
0x26c4   :  { %14138 = vmatpush3.msra.mxu0 %v10345_v13  ;;  %v10363_v13 = vld [vmem:[%s19550_s8 + $0x160] sm:$0xff] }
0x26c5   :  { %14139 = vmatprep.subr.mxu0 %v15032_v2 }
0x26c6   :  { %14140 = vmatpush3.msra.mxu0 %v10344_v14  ;;  %v10380_v14 = vld [vmem:[%s19550_s8 + $0x1e8] sm:$0xff] }
0x26c7   :  { %14141 = vmatprep.subr.mxu0 %v15032_v2 }
0x26c8   :  { %14142 = vmatpush3.msra.mxu0 %v10343_v45  ;;  %v10362_v45 = vld [vmem:[%s19550_s8 + $0x158] sm:$0xff] }
0x26c9   :  { %14143 = vmatprep.subr.mxu0 %v15032_v2 }
0x26ca   :  { %14144 = vmatpush3.msra.mxu0 %v10342_v15  ;;  %v10379_v15 = vld [vmem:[%s19550_s8 + $0x1e0] sm:$0xff] }
0x26cb   :  { %14145 = vmatprep.subr.mxu0 %v15032_v2 }
0x26cc   :  { %14146 = vmatpush3.msra.mxu0 %v10341_v39  ;;  %v10361_v39 = vld [vmem:[%s19550_s8 + $0x150] sm:$0xff] }
0x26cd   :  { %14147 = vmatprep.subr.mxu0 %v15032_v2 }
0x26ce   :  { %14148 = vmatpush3.msra.mxu0 %v10340_v16  ;;  %v10378_v16 = vld [vmem:[%s19550_s8 + $0x1d8] sm:$0xff] }
0x26cf   :  { %14149 = vmatprep.subr.mxu0 %v15032_v2 }
0x26d0   :  { %14150 = vmatpush3.msra.mxu0 %v10339_v24  ;;  %v10360_v24 = vld [vmem:[%s19550_s8 + $0x148] sm:$0xff] }
0x26d1   :  { %14151 = vmatprep.subr.mxu0 %v15032_v2 }
0x2759   :  { %v14025_v57 = vpop.f32.mrf.mxu0 }
0x275a   :  { %v18850_v58 = vadd.f32 %v14025_v57, %v18767_v17  ;;  %v8808_v17 = vpop.permute.xlu0 %8807  ;;  %v8925_v57 = vld [vmem:[%s19550_s8 + $0x28] sm:$0xff] }
0x275b   :  { %v8581_v28 = vpop.f32.mrf.mxu0 }
0x275c   :  { %v18853_v59 = vadd.f32 %v8581_v28, %v18770_v50  ;;  %v8803_v50 = vpop.permute.xlu1 %8802  ;;  %v8923_v28 = vld [vmem:[%s19550_s8 + $0x18] sm:$0xff] }
0x275d   :  { %v14028_v47 = vpop.f32.mrf.mxu0 }
0x275e   :  { %v18856_v42 = vadd.f32 %v14028_v47, %v18773_v22  ;;  %v8798_v34 = vpop.permute.xlu0 %8797  ;;  %v10338_v47 = vld [vmem:[%s19550_s8 + $0x98] sm:$0xff] }
0x275f   :  { %v8591_v60 = vpop.f32.mrf.mxu0  ;;  %14152 = vmatpush3.msra.mxu0 %v10338_v47  ;;  %v10389_v47 = vld [vmem:[%s19550_s8 + $0x230] sm:$0xff] }
0x2760   :  { %v18859_v61 = vadd.f32 %v8591_v60, %v18776_v19  ;;  %v8793_v4 = vpop.permute.xlu1 %8792  ;;  %14153 = vmatprep.subr.mxu0 %v15032_v2  ;;  %v10337_v60 = vld [vmem:[%s19550_s8 + $0x90] sm:$0xff] }
0x2761   :  { %14154 = vmatpush3.msra.mxu0 %v10337_v60  ;;  %v10388_v60 = vld [vmem:[%s19550_s8 + $0x228] sm:$0xff] }
0x2762   :  { %14155 = vmatprep.subr.mxu0 %v15032_v2 }
0x2779   :  { %v14063_v62 = vpop.f32.mrf.mxu0 }
0x277b   :  { %v8670_v1 = vpop.f32.mrf.mxu0 }
0x277d   :  { %v14066_v6 = vpop.f32.mrf.mxu0 }
0x277e   :  { %14067 = vmatprep.subr.mxu1 %v14066_v6 }
0x277f   :  { %v8680_v9 = vpop.f32.mrf.mxu0  ;;  %14068 = vmatpush3.msra.mxu1 %v14066_v6 }
0x2780   :  { %14069 = vmatprep.subr.mxu1 %v8680_v9 }
0x2781   :  { %14070 = vmatpush3.msra.mxu1 %v8680_v9  ;;  %v8829_v9 = vpop.permute.xlu0 %8828 }
0x2782   :  { %14071 = vmatprep.subr.mxu1 %v14063_v62 }
0x2783   :  { %14072 = vmatpush3.msra.mxu1 %v14063_v62  ;;  %v10336_v62 = vld [vmem:[%s19550_s8 + $0x88] sm:$0xff] }
0x2784   :  { %14073 = vmatprep.subr.mxu1 %v8670_v1  ;;  %14156 = vmatpush3.msra.mxu0 %v10336_v62  ;;  %v10387_v62 = vld [vmem:[%s19550_s8 + $0x220] sm:$0xff] }
0x2785   :  { %14074 = vmatpush3.msra.mxu1 %v8670_v1  ;;  %14157 = vmatprep.subr.mxu0 %v15032_v2  ;;  %v10335_v1 = vld [vmem:[%s19550_s8 + $0x80] sm:$0xff] }
0x2786   :  { %14076 = vmatmul.mubr.msk.f32.vlgmr.msra.gmra.mxu1 %vm2057_vm3, %v10290_v41  ;;  %14158 = vmatpush3.msra.mxu0 %v10335_v1  ;;  %v10404_v1 = vld [vmem:[%s19550_s8 + $0x2a8] sm:$0xff] }
0x2787   :  { %14078 = vmatprep.mubr.msk.f32.mxu1 %vm2057_vm3, %v10291_v33  ;;  %14197 = vmatprep.subr.mxu0 %v15032_v2 }
0x278a   :  { %14079 = vmatmul.mubr.msk.f32.gmra.mxu1 %vm2057_vm3, %v10292_v11 }
0x278b   :  { %14089 = vmatprep.mubr.msk.f32.mxu1 %vm2057_vm3, %v8822_v30  ;;  %v10366_v30 = vld [vmem:[%s19550_s8 + $0x178] sm:$0xff] }
0x2846   :  { %v14077_v18 = vpop.f32.mrf.mxu1 }
0x2847   :  { %v8787_v22 = vadd.f32 %v14077_v18, %v18850_v58  ;;  %v8924_v58 = vld [vmem:[%s19550_s8 + $0x20] sm:$0xff] }
0x2848   :  { %v8767_v20 = vpop.f32.mrf.mxu1  ;;  %v10359_v18 = vld [vmem:[%s19550_s8 + $0x140] sm:$0xff] }
0x2849   :  { %v8786_v19 = vadd.f32 %v8767_v20, %v18853_v59  ;;  %v8811_v12 = vadd.f32 %v8798_v34, %v8787_v22  ;;  %v8922_v59 = vld [vmem:[%s19550_s8 + $0x10] sm:$0xff]  ;;  %v10358_v20 = vld [vmem:[%s19550_s8 + $0x138] sm:$0xff]  ;;  %v10375_v22 = vld [vmem:[%s19550_s8 + $0x1c0] sm:$0xff] }
0x284a   :  { %v14080_v25 = vpop.f32.mrf.mxu1  ;;  %v10373_v34 = vld [vmem:[%s19550_s8 + $0x1b0] sm:$0xff] }
0x284b   :  { %v8789_v29 = vadd.f32 %v14080_v25, %v18856_v42  ;;  %v8810_v35 = vadd.f32 %v8793_v4, %v8786_v19  ;;  %v8815_v27 = vadd.f32 %v8811_v12, %v17562_v46  ;;  %v8935_v46 = vld [vmem:[%s19550_s8 + $0x78] sm:$0xff]  ;;  %v8921_v42 = vld [vmem:[%s19550_s8 + $0x8] sm:$0xff]  ;;  %v10357_v25 = vld [vmem:[%s19550_s8 + $0x130] sm:$0xff] }
0x284c   :  { %v8777_v43 = vpop.f32.mrf.mxu1  ;;  %v10374_v19 = vld [vmem:[%s19550_s8 + $0x1b8] sm:$0xff]  ;;  %v10372_v12 = vld [vmem:[%s19550_s8 + $0x1a8] sm:$0xff]  ;;  %v10353_v4 = vld [vmem:[%s19550_s8 + $0x110] sm:$0xff] }
0x284d   :  { %v8813_v8 = vadd.f32 %v8808_v17, %v8789_v29  ;;  %v8788_v44 = vadd.f32 %v8777_v43, %v18859_v61  ;;  %v8814_v5 = vadd.f32 %v8810_v35, %v17560_v32  ;;  %v8819_v0 = vmax.f32 %v8815_v27, 0.0  ;;  %v8934_v32 = vld [vmem:[%s19550_s8 + $0x70] sm:$0xff]  ;;  %v8920_v61 = vld [vmem:[%s19550_s8] sm:$0xff]  ;;  %v10356_v29 = vld [vmem:[%s19550_s8 + $0x128] sm:$0xff] }
0x284e   :  { %v10377_v17 = vld [vmem:[%s19550_s8 + $0x1d0] sm:$0xff]  ;;  %v10355_v43 = vld [vmem:[%s19550_s8 + $0x120] sm:$0xff]  ;;  %v10370_v35 = vld [vmem:[%s19550_s8 + $0x198] sm:$0xff] }
0x284f   :  { %v8812_v23 = vadd.f32 %v8803_v50, %v8788_v44  ;;  %v8817_v26 = vadd.f32 %v8813_v8, %v17572_v51  ;;  %v8818_v54 = vmax.f32 %v8814_v5, 0.0  ;;  %v8823_v51 = vld [vmem:[%s19548_s6 + $0x8] sm:$0x1]  ;;  %v10354_v8 = vld [vmem:[%s19550_s8 + $0x118] sm:$0xff]  ;;  %v10371_v44 = vld [vmem:[%s19550_s8 + $0x1a0] sm:$0xff] }
0x2850   :  { %v10376_v50 = vld [vmem:[%s19550_s8 + $0x1c8] sm:$0xff]  ;;  %v10398_v5 = vld [vmem:[%s19550_s8 + $0x278] sm:$0xff] }
0x2851   :  { %v8821_v31 = vmax.f32 %v8817_v26, 0.0  ;;  %v8816_v38 = vadd.f32 %v8812_v23, %v17570_v7  ;;  %v8933_v7 = vld [vmem:[%s19550_s8 + $0x68] sm:$0xff]  ;;  %v10369_v26 = vld [vmem:[%s19550_s8 + $0x190] sm:$0xff] }
0x2852   :  { %v10352_v23 = vld [vmem:[%s19550_s8 + $0x108] sm:$0xff] }
0x2853   :  { %14081 = vmatprep.subr.mxu1 %v8821_v31  ;;  %v8820_v21 = vmax.f32 %v8816_v38, 0.0  ;;  %v10368_v38 = vld [vmem:[%s19550_s8 + $0x188] sm:$0xff] }
0x2854   :  { %14082 = vmatpush3.msra.mxu1 %v8821_v31  ;;  %v10351_v31 = vld [vmem:[%s19550_s8 + $0x100] sm:$0xff] }
0x2855   :  { %14083 = vmatprep.subr.mxu1 %v8820_v21 }
0x2856   :  { %14084 = vmatpush3.msra.mxu1 %v8820_v21  ;;  %v10367_v21 = vld [vmem:[%s19550_s8 + $0x180] sm:$0xff] }
0x2857   :  { %14085 = vmatprep.subr.mxu1 %v8819_v0 }
0x2858   :  { %14086 = vmatpush3.msra.mxu1 %v8819_v0 }
0x2859   :  { %14087 = vmatprep.subr.mxu1 %v8818_v54 }
0x285a   :  { %14088 = vmatpush3.msra.mxu1 %v8818_v54  ;;  %v10397_v54 = vld [vmem:[%s19550_s8 + $0x270] sm:$0xff] }
0x285b   :  { %14090 = vmatmul.mubr.msk.f32.vlgmr.msra.gmra.mxu1 %vm2057_vm3, %v8823_v51  ;;  %14092 = vmatprep.subr.mxu1 %v15032_v2  ;;  %v10414_v51 = vld [vmem:[%s19550_s8 + $0x2f8] sm:$0xff] }
0x285c   :  { %14093 = vmatpush3.msra.mxu1 %v8935_v46  ;;  %14124 = vmatprep.mubr.msk.f32.mxu1 %vm15033_vm0, %v15032_v2  ;;  %v10396_v46 = vld [vmem:[%s19550_s8 + $0x268] sm:$0xff] }
0x285d   :  { %14094 = vmatprep.subr.mxu1 %v15032_v2 }
0x285e   :  { %14095 = vmatpush3.msra.mxu1 %v8934_v32  ;;  %v10413_v32 = vld [vmem:[%s19550_s8 + $0x2f0] sm:$0xff] }
0x285f   :  { %14096 = vmatprep.subr.mxu1 %v15032_v2 }
0x2860   :  { %14097 = vmatpush3.msra.mxu1 %v8933_v7  ;;  %v10395_v7 = vld [vmem:[%s19550_s8 + $0x260] sm:$0xff] }
0x2861   :  { %14098 = vmatprep.subr.mxu1 %v15032_v2 }
0x2862   :  { %14099 = vmatpush3.msra.mxu1 %v8932_v37  ;;  %v10412_v37 = vld [vmem:[%s19550_s8 + $0x2e8] sm:$0xff] }
0x2863   :  { %14100 = vmatprep.subr.mxu1 %v15032_v2 }
0x2864   :  { %14101 = vmatpush3.msra.mxu1 %v8931_v48  ;;  %v10394_v48 = vld [vmem:[%s19550_s8 + $0x258] sm:$0xff] }
0x2865   :  { %14102 = vmatprep.subr.mxu1 %v15032_v2 }
0x2866   :  { %14103 = vmatpush3.msra.mxu1 %v8930_v49  ;;  %v10411_v49 = vld [vmem:[%s19550_s8 + $0x2e0] sm:$0xff] }
0x2867   :  { %14104 = vmatprep.subr.mxu1 %v15032_v2 }
0x2868   :  { %14105 = vmatpush3.msra.mxu1 %v8929_v52  ;;  %v10393_v52 = vld [vmem:[%s19550_s8 + $0x250] sm:$0xff] }
0x2869   :  { %14106 = vmatprep.subr.mxu1 %v15032_v2 }
0x286a   :  { %14107 = vmatpush3.msra.mxu1 %v8928_v53  ;;  %v10410_v53 = vld [vmem:[%s19550_s8 + $0x2d8] sm:$0xff] }
0x286b   :  { %14108 = vmatprep.subr.mxu1 %v15032_v2 }
0x286c   :  { %14109 = vmatpush3.msra.mxu1 %v8927_v55  ;;  %v10392_v55 = vld [vmem:[%s19550_s8 + $0x248] sm:$0xff] }
0x286d   :  { %14110 = vmatprep.subr.mxu1 %v15032_v2 }
0x286e   :  { %14111 = vmatpush3.msra.mxu1 %v8926_v56  ;;  %v10409_v56 = vld [vmem:[%s19550_s8 + $0x2d0] sm:$0xff] }
0x286f   :  { %14112 = vmatprep.subr.mxu1 %v15032_v2 }
0x2870   :  { %14113 = vmatpush3.msra.mxu1 %v8925_v57  ;;  %v10391_v57 = vld [vmem:[%s19550_s8 + $0x240] sm:$0xff] }
0x2871   :  { %14114 = vmatprep.subr.mxu1 %v15032_v2 }
0x2872   :  { %14115 = vmatpush3.msra.mxu1 %v8924_v58  ;;  %v10408_v58 = vld [vmem:[%s19550_s8 + $0x2c8] sm:$0xff] }
0x2873   :  { %14116 = vmatprep.subr.mxu1 %v15032_v2 }
0x2874   :  { %14117 = vmatpush3.msra.mxu1 %v8923_v28  ;;  %v10390_v28 = vld [vmem:[%s19550_s8 + $0x238] sm:$0xff] }
0x2875   :  { %14118 = vmatprep.subr.mxu1 %v15032_v2 }
0x2876   :  { %14119 = vmatpush3.msra.mxu1 %v8922_v59  ;;  %v10407_v59 = vld [vmem:[%s19550_s8 + $0x2c0] sm:$0xff] }
0x2877   :  { %14120 = vmatprep.subr.mxu1 %v15032_v2 }
0x2878   :  { %14121 = vmatpush3.msra.mxu1 %v8921_v42  ;;  %v10406_v42 = vld [vmem:[%s19550_s8 + $0x2b8] sm:$0xff] }
0x2879   :  { %14122 = vmatprep.subr.mxu1 %v15032_v2 }
0x287a   :  { %14123 = vmatpush3.msra.mxu1 %v8920_v61  ;;  %v10405_v61 = vld [vmem:[%s19550_s8 + $0x2b0] sm:$0xff] }
0x287b   :  { %14162 = vmatprep.subr.mxu1 %v15032_v2 }
0x291b   :  { %v19020_v6 = vpop.f32.mrf.mxu1 }
0x291d   :  { %v8908_v41 = vpop.f32.mrf.mxu1 }
0x291e   :  { %v8909_v33 = vadd.f32 %v8908_v41, %v8829_v9  ;;  %v10386_v9 = vld [vmem:[%s19550_s8 + $0x218] sm:$0xff]  ;;  %v10403_v41 = vld [vmem:[%s19550_s8 + $0x2a0] sm:$0xff] }
0x2920   :  { %v19022_v11 = vmax.f32 %v8909_v33, 0.0  ;;  %v10385_v33 = vld [vmem:[%s19550_s8 + $0x210] sm:$0xff] }
0x2922   :  { %14125 = vmatmul.mubr.f32.vlgmr.msra.gmra.mxu1 %v19022_v11  ;;  %v9025_v3 = vrot.slane %v19022_v11, 1  ;;  %v9115_v27 = vrot.slane %v19022_v11, 2  ;;  %v9205_v0 = vrot.slane %v19022_v11, 3 }
0x2923   :  { %14163 = vmatpush3.msra.mxu1 %v10366_v30  ;;  %14194 = vmatprep.mubr.msk.f32.mxu1 %vm15033_vm0, %v15032_v2  ;;  %v10402_v30 = vld [vmem:[%s19550_s8 + $0x298] sm:$0xff] }
0x2924   :  { %14164 = vmatprep.subr.mxu1 %v15032_v2  ;;  %14160 = vmatmul.mubr.f32.vlgmr.msra.gmra.mxu0 %v9025_v3  ;;  %v10384_v3 = vld [vmem:[%s19550_s8 + $0x208] sm:$0xff] }
0x2925   :  { %14165 = vmatpush3.msra.mxu1 %v10365_v36  ;;  %14198 = vmatpush3.msra.mxu0 %v10382_v40  ;;  %v10401_v36 = vld [vmem:[%s19550_s8 + $0x290] sm:$0xff]  ;;  %v10383_v40 = vld [vmem:[%s19550_s8 + $0x200] sm:$0xff] }
0x2926   :  { %14166 = vmatprep.subr.mxu1 %v15032_v2  ;;  %14199 = vmatprep.subr.mxu0 %v15032_v2 }
0x2927   :  { %14167 = vmatpush3.msra.mxu1 %v10364_v63  ;;  %14200 = vmatpush3.msra.mxu0 %v10381_v10  ;;  %v10400_v63 = vld [vmem:[%s19550_s8 + $0x288] sm:$0xff]  ;;  %v9295_v10 = vrot.slane %v19022_v11, 4 }
0x2928   :  { %14168 = vmatprep.subr.mxu1 %v15032_v2  ;;  %14201 = vmatprep.subr.mxu0 %v15032_v2 }
0x2929   :  { %14169 = vmatpush3.msra.mxu1 %v10363_v13  ;;  %14202 = vmatpush3.msra.mxu0 %v10380_v14  ;;  %v10399_v13 = vld [vmem:[%s19550_s8 + $0x280] sm:$0xff]  ;;  %v10430_v14 = vld [vmem:[%s19550_s8 + $0x378] sm:$0xff] }
0x292a   :  { %14170 = vmatprep.subr.mxu1 %v15032_v2  ;;  %14203 = vmatprep.subr.mxu0 %v15032_v2 }
0x292b   :  { %14171 = vmatpush3.msra.mxu1 %v10362_v45  ;;  %14204 = vmatpush3.msra.mxu0 %v10379_v15  ;;  %v9385_v45 = vrot.slane %v19022_v11, 5  ;;  %v10429_v15 = vld [vmem:[%s19550_s8 + $0x370] sm:$0xff] }
0x292c   :  { %14172 = vmatprep.subr.mxu1 %v15032_v2  ;;  %14205 = vmatprep.subr.mxu0 %v15032_v2 }
0x292d   :  { %14173 = vmatpush3.msra.mxu1 %v10361_v39  ;;  %14206 = vmatpush3.msra.mxu0 %v10378_v16  ;;  %v10446_v39 = vld [vmem:[%s19550_s8 + $0x3f8] sm:$0xff]  ;;  %v10428_v16 = vld [vmem:[%s19550_s8 + $0x368] sm:$0xff] }
0x292e   :  { %14174 = vmatprep.subr.mxu1 %v15032_v2  ;;  %14207 = vmatprep.subr.mxu0 %v15032_v2 }
0x292f   :  { %14175 = vmatpush3.msra.mxu1 %v10360_v24  ;;  %14208 = vmatpush3.msra.mxu0 %v10377_v17  ;;  %v10445_v24 = vld [vmem:[%s19550_s8 + $0x3f0] sm:$0xff]  ;;  %v10427_v17 = vld [vmem:[%s19550_s8 + $0x360] sm:$0xff] }
0x2930   :  { %14176 = vmatprep.subr.mxu1 %v15032_v2  ;;  %14209 = vmatprep.subr.mxu0 %v15032_v2 }
0x2931   :  { %14177 = vmatpush3.msra.mxu1 %v10359_v18  ;;  %14210 = vmatpush3.msra.mxu0 %v10376_v50  ;;  %v10444_v18 = vld [vmem:[%s19550_s8 + $0x3e8] sm:$0xff]  ;;  %v10426_v50 = vld [vmem:[%s19550_s8 + $0x358] sm:$0xff] }
0x2932   :  { %14178 = vmatprep.subr.mxu1 %v15032_v2  ;;  %14211 = vmatprep.subr.mxu0 %v15032_v2 }
0x2933   :  { %14179 = vmatpush3.msra.mxu1 %v10358_v20  ;;  %14212 = vmatpush3.msra.mxu0 %v10375_v22  ;;  %v10443_v20 = vld [vmem:[%s19550_s8 + $0x3e0] sm:$0xff]  ;;  %v10425_v22 = vld [vmem:[%s19550_s8 + $0x350] sm:$0xff] }
0x2934   :  { %14180 = vmatprep.subr.mxu1 %v15032_v2  ;;  %14213 = vmatprep.subr.mxu0 %v15032_v2 }
0x2935   :  { %14181 = vmatpush3.msra.mxu1 %v10357_v25  ;;  %14214 = vmatpush3.msra.mxu0 %v10374_v19  ;;  %v10442_v25 = vld [vmem:[%s19550_s8 + $0x3d8] sm:$0xff]  ;;  %v10424_v19 = vld [vmem:[%s19550_s8 + $0x348] sm:$0xff] }
0x2936   :  { %14182 = vmatprep.subr.mxu1 %v15032_v2  ;;  %14215 = vmatprep.subr.mxu0 %v15032_v2 }
0x2937   :  { %14183 = vmatpush3.msra.mxu1 %v10356_v29  ;;  %14216 = vmatpush3.msra.mxu0 %v10373_v34  ;;  %v10441_v29 = vld [vmem:[%s19550_s8 + $0x3d0] sm:$0xff]  ;;  %v10423_v34 = vld [vmem:[%s19550_s8 + $0x340] sm:$0xff] }
0x2938   :  { %14184 = vmatprep.subr.mxu1 %v15032_v2  ;;  %14217 = vmatprep.subr.mxu0 %v15032_v2 }
0x2939   :  { %14185 = vmatpush3.msra.mxu1 %v10355_v43  ;;  %14218 = vmatpush3.msra.mxu0 %v10372_v12  ;;  %v10440_v43 = vld [vmem:[%s19550_s8 + $0x3c8] sm:$0xff]  ;;  %v10422_v12 = vld [vmem:[%s19550_s8 + $0x338] sm:$0xff] }
0x293a   :  { %14186 = vmatprep.subr.mxu1 %v15032_v2  ;;  %14219 = vmatprep.subr.mxu0 %v15032_v2 }
0x293b   :  { %14187 = vmatpush3.msra.mxu1 %v10354_v8  ;;  %14220 = vmatpush3.msra.mxu0 %v10371_v44  ;;  %v10439_v8 = vld [vmem:[%s19550_s8 + $0x3c0] sm:$0xff]  ;;  %v10421_v44 = vld [vmem:[%s19550_s8 + $0x330] sm:$0xff] }
0x293c   :  { %14188 = vmatprep.subr.mxu1 %v15032_v2  ;;  %14221 = vmatprep.subr.mxu0 %v15032_v2 }
0x293d   :  { %14189 = vmatpush3.msra.mxu1 %v10353_v4  ;;  %14222 = vmatpush3.msra.mxu0 %v10370_v35  ;;  %v10438_v4 = vld [vmem:[%s19550_s8 + $0x3b8] sm:$0xff]  ;;  %v10420_v35 = vld [vmem:[%s19550_s8 + $0x328] sm:$0xff] }
0x293e   :  { %14190 = vmatprep.subr.mxu1 %v15032_v2  ;;  %14223 = vmatprep.subr.mxu0 %v15032_v2 }
0x293f   :  { %14191 = vmatpush3.msra.mxu1 %v10352_v23  ;;  %14224 = vmatpush3.msra.mxu0 %v10369_v26  ;;  %v10437_v23 = vld [vmem:[%s19550_s8 + $0x3b0] sm:$0xff]  ;;  %v10419_v26 = vld [vmem:[%s19550_s8 + $0x320] sm:$0xff] }
0x2940   :  { %14192 = vmatprep.subr.mxu1 %v15032_v2  ;;  %14225 = vmatprep.subr.mxu0 %v15032_v2 }
0x2941   :  { %14193 = vmatpush3.msra.mxu1 %v10351_v31  ;;  %14226 = vmatpush3.msra.mxu0 %v10368_v38  ;;  %v10436_v31 = vld [vmem:[%s19550_s8 + $0x3a8] sm:$0xff]  ;;  %v10418_v38 = vld [vmem:[%s19550_s8 + $0x318] sm:$0xff] }
0x2942   :  { %14195 = vmatmul.mubr.f32.vlgmr.msra.gmra.mxu1 %v9115_v27  ;;  %14227 = vmatprep.subr.mxu0 %v15032_v2  ;;  %v10435_v27 = vld [vmem:[%s19550_s8 + $0x3a0] sm:$0xff] }
0x2943   :  { %14232 = vmatprep.subr.mxu1 %v15032_v2  ;;  %14228 = vmatpush3.msra.mxu0 %v10367_v21  ;;  %v10417_v21 = vld [vmem:[%s19550_s8 + $0x310] sm:$0xff] }
0x2944   :  { %14229 = vmatprep.mubr.msk.f32.mxu0 %vm15033_vm0, %v15032_v2  ;;  %14233 = vmatpush3.msra.mxu1 %v10398_v5  ;;  %v10434_v5 = vld [vmem:[%s19550_s8 + $0x398] sm:$0xff] }
0x2945   :  { %14230 = vmatmul.mubr.f32.vlgmr.msra.gmra.mxu0 %v9205_v0  ;;  %14234 = vmatprep.subr.mxu1 %v15032_v2  ;;  %v10416_v0 = vld [vmem:[%s19550_s8 + $0x308] sm:$0xff] }
0x2946   :  { %14267 = vmatprep.subr.mxu0 %v15032_v2  ;;  %14235 = vmatpush3.msra.mxu1 %v10397_v54  ;;  %v10433_v54 = vld [vmem:[%s19550_s8 + $0x390] sm:$0xff] }
0x2947   :  { %14268 = vmatpush3.msra.mxu0 %v10414_v51  ;;  %14236 = vmatprep.subr.mxu1 %v15032_v2  ;;  %v10415_v51 = vld [vmem:[%s19550_s8 + $0x300] sm:$0xff] }
0x2948   :  { %14269 = vmatprep.subr.mxu0 %v15032_v2  ;;  %14237 = vmatpush3.msra.mxu1 %v10396_v46  ;;  %v10432_v46 = vld [vmem:[%s19550_s8 + $0x388] sm:$0xff] }
0x2949   :  { %14270 = vmatpush3.msra.mxu0 %v10413_v32  ;;  %14238 = vmatprep.subr.mxu1 %v15032_v2  ;;  %v9475_v32 = vrot.slane %v19022_v11, 6 }
0x294a   :  { %14271 = vmatprep.subr.mxu0 %v15032_v2  ;;  %14239 = vmatpush3.msra.mxu1 %v10395_v7  ;;  %v10431_v7 = vld [vmem:[%s19550_s8 + $0x380] sm:$0xff] }
0x294b   :  { %14272 = vmatpush3.msra.mxu0 %v10412_v37  ;;  %14240 = vmatprep.subr.mxu1 %v15032_v2  ;;  %v9655_v37 = vld [vmem:[%s19552_s10 + $0x78] sm:$0xff] }
0x294c   :  { %14273 = vmatprep.subr.mxu0 %v15032_v2  ;;  %14241 = vmatpush3.msra.mxu1 %v10394_v48  ;;  %v9565_v48 = vrot.slane %v19022_v11, 7  ;;  %v9652_v11 = vld [vmem:[%s19552_s10 + $0x60] sm:$0xff] }
0x294d   :  { %14274 = vmatpush3.msra.mxu0 %v10411_v49  ;;  %14242 = vmatprep.subr.mxu1 %v15032_v2  ;;  %v9654_v49 = vld [vmem:[%s19552_s10 + $0x70] sm:$0xff] }
0x294e   :  { %14275 = vmatprep.subr.mxu0 %v15032_v2  ;;  %14243 = vmatpush3.msra.mxu1 %v10393_v52  ;;  %v9653_v52 = vld [vmem:[%s19552_s10 + $0x68] sm:$0xff] }
0x294f   :  { %14276 = vmatpush3.msra.mxu0 %v10410_v53  ;;  %14244 = vmatprep.subr.mxu1 %v15032_v2  ;;  %v9651_v53 = vld [vmem:[%s19552_s10 + $0x58] sm:$0xff] }
0x2950   :  { %14277 = vmatprep.subr.mxu0 %v15032_v2  ;;  %14245 = vmatpush3.msra.mxu1 %v10392_v55  ;;  %v9650_v55 = vld [vmem:[%s19552_s10 + $0x50] sm:$0xff] }
0x2951   :  { %14278 = vmatpush3.msra.mxu0 %v10409_v56  ;;  %14246 = vmatprep.subr.mxu1 %v15032_v2  ;;  %v9649_v56 = vld [vmem:[%s19552_s10 + $0x48] sm:$0xff] }
0x2952   :  { %14279 = vmatprep.subr.mxu0 %v15032_v2  ;;  %14247 = vmatpush3.msra.mxu1 %v10391_v57  ;;  %v9648_v57 = vld [vmem:[%s19552_s10 + $0x40] sm:$0xff] }
0x2953   :  { %14280 = vmatpush3.msra.mxu0 %v10408_v58  ;;  %14248 = vmatprep.subr.mxu1 %v15032_v2  ;;  %v9647_v58 = vld [vmem:[%s19552_s10 + $0x38] sm:$0xff] }
0x2954   :  { %14281 = vmatprep.subr.mxu0 %v15032_v2  ;;  %14249 = vmatpush3.msra.mxu1 %v10390_v28  ;;  %v9646_v28 = vld [vmem:[%s19552_s10 + $0x30] sm:$0xff] }
0x2955   :  { %14282 = vmatpush3.msra.mxu0 %v10407_v59  ;;  %14250 = vmatprep.subr.mxu1 %v15032_v2  ;;  %v9645_v59 = vld [vmem:[%s19552_s10 + $0x28] sm:$0xff] }
0x2956   :  { %14283 = vmatprep.subr.mxu0 %v15032_v2  ;;  %14251 = vmatpush3.msra.mxu1 %v10389_v47  ;;  %v9644_v47 = vld [vmem:[%s19552_s10 + $0x20] sm:$0xff] }
0x2957   :  { %14284 = vmatpush3.msra.mxu0 %v10406_v42  ;;  %14252 = vmatprep.subr.mxu1 %v15032_v2  ;;  %v9643_v42 = vld [vmem:[%s19552_s10 + $0x18] sm:$0xff] }
0x2958   :  { %14285 = vmatprep.subr.mxu0 %v15032_v2  ;;  %14253 = vmatpush3.msra.mxu1 %v10388_v60  ;;  %v9642_v60 = vld [vmem:[%s19552_s10 + $0x10] sm:$0xff] }
0x2959   :  { %14286 = vmatpush3.msra.mxu0 %v10405_v61  ;;  %14254 = vmatprep.subr.mxu1 %v15032_v2  ;;  %v8834_v61 = vpop.permute.xlu1 %8833 }
0x295a   :  { %14287 = vmatprep.subr.mxu0 %v15032_v2  ;;  %14255 = vmatpush3.msra.mxu1 %v10387_v62  ;;  %v8914_v62 = vadd.f32 %v19020_v6, %v8834_v61  ;;  %v9735_v6 = vld [vmem:[%s19554_s12 + $0x38] sm:$0xff] }
0x295b   :  { %14288 = vmatpush3.msra.mxu0 %v10404_v1  ;;  %14256 = vmatprep.subr.mxu1 %v15032_v2  ;;  %v9641_v1 = vld [vmem:[%s19552_s10 + $0x8] sm:$0xff] }
0x295c   :  { %14289 = vmatprep.subr.mxu0 %v15032_v2  ;;  %14257 = vmatpush3.msra.mxu1 %v10386_v9  ;;  %v9640_v9 = vld [vmem:[%s19552_s10] sm:$0xff] }
0x295d   :  { %14290 = vmatpush3.msra.mxu0 %v10403_v41  ;;  %14258 = vmatprep.subr.mxu1 %v15032_v2  ;;  %v8918_v41 = vmax.f32 %v8914_v62, 0.0 }
0x295e   :  { %14291 = vmatprep.subr.mxu0 %v15032_v2  ;;  %14259 = vmatpush3.msra.mxu1 %v10385_v33  ;;  %v9734_v33 = vld [vmem:[%s19554_s12 + $0x30] sm:$0xff] }
0x295f   :  { %14292 = vmatpush3.msra.mxu0 %v10402_v30  ;;  %14260 = vmatprep.subr.mxu1 %v15032_v2  ;;  %v9733_v30 = vld [vmem:[%s19554_s12 + $0x28] sm:$0xff] }
0x2960   :  { %14293 = vmatprep.subr.mxu0 %v15032_v2  ;;  %14261 = vmatpush3.msra.mxu1 %v10384_v3  ;;  %v9732_v3 = vld [vmem:[%s19554_s12 + $0x20] sm:$0xff] }
0x2961   :  { %14294 = vmatpush3.msra.mxu0 %v10401_v36  ;;  %14262 = vmatprep.subr.mxu1 %v15032_v2  ;;  %v9731_v36 = vld [vmem:[%s19554_s12 + $0x18] sm:$0xff] }
0x2962   :  { %14295 = vmatprep.subr.mxu0 %v15032_v2  ;;  %14263 = vmatpush3.msra.mxu1 %v10383_v40  ;;  %v8919_v40 = vld [vmem:[%s19551_s9] sm:$0x1] }
0x2963   :  { %14264 = vmatprep.mubr.msk.f32.mxu1 %vm15033_vm0, %v15032_v2  ;;  %14296 = vmatpush3.msra.mxu0 %v10400_v63 }
0x2964   :  { %14265 = vmatmul.mubr.f32.vlgmr.msra.gmra.mxu1 %v9295_v10  ;;  %14297 = vmatprep.subr.mxu0 %v15032_v2 }
0x2965   :  { %14302 = vmatprep.subr.mxu1 %v15032_v2  ;;  %14298 = vmatpush3.msra.mxu0 %v10399_v13 }
0x2966   :  { %14299 = vmatprep.mubr.msk.f32.mxu0 %vm15033_vm0, %v15032_v2  ;;  %14303 = vmatpush3.msra.mxu1 %v10430_v14 }
0x2967   :  { %14300 = vmatmul.mubr.f32.vlgmr.msra.gmra.mxu0 %v9385_v45  ;;  %14304 = vmatprep.subr.mxu1 %v15032_v2 }
0x2968   :  { %14337 = vmatprep.subr.mxu0 %v15032_v2  ;;  %14305 = vmatpush3.msra.mxu1 %v10429_v15 }
0x2969   :  { %14338 = vmatpush3.msra.mxu0 %v10446_v39  ;;  %14306 = vmatprep.subr.mxu1 %v15032_v2  ;;  %v9730_v39 = vld [vmem:[%s19554_s12 + $0x10] sm:$0xff] }
0x296a   :  { %14339 = vmatprep.subr.mxu0 %v15032_v2  ;;  %14307 = vmatpush3.msra.mxu1 %v10428_v16  ;;  %v9729_v16 = vld [vmem:[%s19554_s12 + $0x8] sm:$0xff] }
0x296b   :  { %14340 = vmatpush3.msra.mxu0 %v10445_v24  ;;  %14308 = vmatprep.subr.mxu1 %v15032_v2  ;;  %v9728_v24 = vld [vmem:[%s19554_s12] sm:$0xff] }
0x296c   :  { %14341 = vmatprep.subr.mxu0 %v15032_v2  ;;  %14309 = vmatpush3.msra.mxu1 %v10427_v17 }
0x296d   :  { %14342 = vmatpush3.msra.mxu0 %v10444_v18  ;;  %14310 = vmatprep.subr.mxu1 %v15032_v2 }
0x296e   :  { %14343 = vmatprep.subr.mxu0 %v15032_v2  ;;  %14311 = vmatpush3.msra.mxu1 %v10426_v50 }
0x296f   :  { %14344 = vmatpush3.msra.mxu0 %v10443_v20  ;;  %14312 = vmatprep.subr.mxu1 %v15032_v2 }
0x2970   :  { %14345 = vmatprep.subr.mxu0 %v15032_v2  ;;  %14313 = vmatpush3.msra.mxu1 %v10425_v22 }
0x2971   :  { %14346 = vmatpush3.msra.mxu0 %v10442_v25  ;;  %14314 = vmatprep.subr.mxu1 %v15032_v2 }
0x2972   :  { %14347 = vmatprep.subr.mxu0 %v15032_v2  ;;  %14315 = vmatpush3.msra.mxu1 %v10424_v19 }
0x2973   :  { %14348 = vmatpush3.msra.mxu0 %v10441_v29  ;;  %14316 = vmatprep.subr.mxu1 %v15032_v2 }
0x2974   :  { %14349 = vmatprep.subr.mxu0 %v15032_v2  ;;  %14317 = vmatpush3.msra.mxu1 %v10423_v34 }
0x2975   :  { %14350 = vmatpush3.msra.mxu0 %v10440_v43  ;;  %14318 = vmatprep.subr.mxu1 %v15032_v2 }
0x2976   :  { %14351 = vmatprep.subr.mxu0 %v15032_v2  ;;  %14319 = vmatpush3.msra.mxu1 %v10422_v12 }
0x2977   :  { %14352 = vmatpush3.msra.mxu0 %v10439_v8  ;;  %14320 = vmatprep.subr.mxu1 %v15032_v2 }
0x2978   :  { %14353 = vmatprep.subr.mxu0 %v15032_v2  ;;  %14321 = vmatpush3.msra.mxu1 %v10421_v44 }
0x2979   :  { %14354 = vmatpush3.msra.mxu0 %v10438_v4  ;;  %14322 = vmatprep.subr.mxu1 %v15032_v2 }
0x297a   :  { %14355 = vmatprep.subr.mxu0 %v15032_v2  ;;  %14323 = vmatpush3.msra.mxu1 %v10420_v35 }
0x297b   :  { %14356 = vmatpush3.msra.mxu0 %v10437_v23  ;;  %14324 = vmatprep.subr.mxu1 %v15032_v2 }
0x297c   :  { %14357 = vmatprep.subr.mxu0 %v15032_v2  ;;  %14325 = vmatpush3.msra.mxu1 %v10419_v26 }
0x297d   :  { %14358 = vmatpush3.msra.mxu0 %v10436_v31  ;;  %14326 = vmatprep.subr.mxu1 %v15032_v2  ;;  %v9656_v31 = vld [vmem:[%s19553_s11] sm:$0x1] }
0x297e   :  { %14359 = vmatprep.subr.mxu0 %v15032_v2  ;;  %14327 = vmatpush3.msra.mxu1 %v10418_v38 }
0x297f   :  { %14360 = vmatpush3.msra.mxu0 %v10435_v27  ;;  %14328 = vmatprep.subr.mxu1 %v15032_v2 }
0x2980   :  { %14361 = vmatprep.subr.mxu0 %v15032_v2  ;;  %14329 = vmatpush3.msra.mxu1 %v10417_v21 }
0x2981   :  { %14362 = vmatpush3.msra.mxu0 %v10434_v5  ;;  %14330 = vmatprep.subr.mxu1 %v15032_v2 }
0x2982   :  { %14363 = vmatprep.subr.mxu0 %v15032_v2  ;;  %14331 = vmatpush3.msra.mxu1 %v10416_v0  ;;  %v9736_v0 = vld [vmem:[%s19555_s13] sm:$0x1] }
0x2983   :  { %14364 = vmatpush3.msra.mxu0 %v10433_v54  ;;  %14332 = vmatprep.subr.mxu1 %v15032_v2 }
0x2984   :  { %14365 = vmatprep.subr.mxu0 %v15032_v2  ;;  %14333 = vmatpush3.msra.mxu1 %v10415_v51 }
0x2985   :  { %14334 = vmatprep.mubr.msk.f32.mxu1 %vm15033_vm0, %v15032_v2  ;;  %14366 = vmatpush3.msra.mxu0 %v10432_v46 }
0x2986   :  { %14335 = vmatmul.mubr.f32.vlgmr.msra.gmra.mxu1 %v9475_v32  ;;  %14367 = vmatprep.subr.mxu0 %v15032_v2 }
0x2987   :  { %14372 = vmatprep.subr.mxu1 %v15032_v2  ;;  %14368 = vmatpush3.msra.mxu0 %v10431_v7 }
0x2988   :  { %14369 = vmatprep.mubr.msk.f32.mxu0 %vm15033_vm0, %v15032_v2  ;;  %14373 = vmatpush3.msra.mxu1 %v9655_v37 }
0x2989   :  { %14370 = vmatmul.mubr.f32.vlgmr.msra.gmra.mxu0 %v9565_v48  ;;  %14374 = vmatprep.subr.mxu1 %v15032_v2 }
0x298a   :  { %14375 = vmatpush3.msra.mxu1 %v9654_v49  ;;  %14404 = vmatprep.mubr.msk.f32.mxu1 %vm15033_vm0, %v15032_v2 }
0x298b   :  { %14376 = vmatprep.subr.mxu1 %v15032_v2  ;;  %14407 = vmatprep.subr.mxu0 %v15032_v2 }
0x298c   :  { %14377 = vmatpush3.msra.mxu1 %v9653_v52  ;;  %14423 = vmatprep.mubr.msk.f32.mxu0 %vm15033_vm0, %v15032_v2 }
0x298d   :  { %14378 = vmatprep.subr.mxu1 %v15032_v2  ;;  %14408 = vmatpush3.msra.mxu0 %v9735_v6 }
0x298e   :  { %14379 = vmatpush3.msra.mxu1 %v9652_v11  ;;  %14409 = vmatprep.subr.mxu0 %v15032_v2 }
0x298f   :  { %14380 = vmatprep.subr.mxu1 %v15032_v2  ;;  %14410 = vmatpush3.msra.mxu0 %v9734_v33 }
0x2990   :  { %14381 = vmatpush3.msra.mxu1 %v9651_v53  ;;  %14411 = vmatprep.subr.mxu0 %v15032_v2 }
0x2991   :  { %14382 = vmatprep.subr.mxu1 %v15032_v2  ;;  %14412 = vmatpush3.msra.mxu0 %v9733_v30 }
0x2992   :  { %14383 = vmatpush3.msra.mxu1 %v9650_v55  ;;  %14413 = vmatprep.subr.mxu0 %v15032_v2 }
0x2993   :  { %14384 = vmatprep.subr.mxu1 %v15032_v2  ;;  %14414 = vmatpush3.msra.mxu0 %v9732_v3 }
0x2994   :  { %14385 = vmatpush3.msra.mxu1 %v9649_v56  ;;  %14415 = vmatprep.subr.mxu0 %v15032_v2 }
0x2995   :  { %14386 = vmatprep.subr.mxu1 %v15032_v2  ;;  %14416 = vmatpush3.msra.mxu0 %v9731_v36 }
0x2996   :  { %14387 = vmatpush3.msra.mxu1 %v9648_v57  ;;  %14417 = vmatprep.subr.mxu0 %v15032_v2 }
0x2997   :  { %14388 = vmatprep.subr.mxu1 %v15032_v2  ;;  %14418 = vmatpush3.msra.mxu0 %v9730_v39 }
0x2998   :  { %14389 = vmatpush3.msra.mxu1 %v9647_v58  ;;  %14419 = vmatprep.subr.mxu0 %v15032_v2 }
0x2999   :  { %14390 = vmatprep.subr.mxu1 %v15032_v2  ;;  %14420 = vmatpush3.msra.mxu0 %v9729_v16 }
0x299a   :  { %14391 = vmatpush3.msra.mxu1 %v9646_v28  ;;  %14421 = vmatprep.subr.mxu0 %v15032_v2 }
0x299b   :  { %14392 = vmatprep.subr.mxu1 %v15032_v2  ;;  %14422 = vmatpush3.msra.mxu0 %v9728_v24 }
0x299c   :  { %14393 = vmatpush3.msra.mxu1 %v9645_v59 }
0x299d   :  { %14394 = vmatprep.subr.mxu1 %v15032_v2 }
0x299e   :  { %14395 = vmatpush3.msra.mxu1 %v9644_v47 }
0x299f   :  { %14396 = vmatprep.subr.mxu1 %v15032_v2 }
0x29a0   :  { %14397 = vmatpush3.msra.mxu1 %v9643_v42 }
0x29a1   :  { %14398 = vmatprep.subr.mxu1 %v15032_v2 }
0x29a2   :  { %14399 = vmatpush3.msra.mxu1 %v9642_v60 }
0x29a3   :  { %14400 = vmatprep.subr.mxu1 %v15032_v2 }
0x29a4   :  { %14401 = vmatpush3.msra.mxu1 %v9641_v1 }
0x29a5   :  { %14402 = vmatprep.subr.mxu1 %v15032_v2 }
0x29a6   :  { %14403 = vmatpush3.msra.mxu1 %v9640_v9 }
0x29a7   :  { %14405 = vmatmul.mubr.f32.vlgmr.msra.gmra.mxu1 %v8918_v41 }
0x29e2   :  { %v9002_v63 = vpop.f32.mrf.mxu1 }
0x29e3   :  { %v9006_v10 = vadd.f32 %v9002_v63, %v8919_v40 }
0x29e4   :  { %v14126_v13 = vpop.f32.mrf.mxu1  ;;  %v9093_v14 = vpop.f32.mrf.mxu0 }
0x29e5   :  { %v9097_v45 = vadd.f32 %v9093_v14, %v9006_v10 }
0x29e6   :  { %v14161_v15 = vpop.f32.mrf.mxu0 }
0x2a02   :  { %v9183_v17 = vpop.f32.mrf.mxu1 }
0x2a03   :  { %v9187_v34 = vadd.f32 %v9183_v17, %v9097_v45 }
0x2a04   :  { %v14196_v18 = vpop.f32.mrf.mxu1 }
0x2a05   :  { %v9273_v50 = vpop.f32.mrf.mxu0 }
0x2a06   :  { %v9277_v43 = vadd.f32 %v9273_v50, %v9187_v34 }
0x2a07   :  { %v14231_v20 = vpop.f32.mrf.mxu0 }
0x2a24   :  { %v9363_v22 = vpop.f32.mrf.mxu1 }
0x2a25   :  { %v9367_v12 = vadd.f32 %v9363_v22, %v9277_v43 }
0x2a26   :  { %v14266_v25 = vpop.f32.mrf.mxu1 }
0x2a27   :  { %v9453_v19 = vpop.f32.mrf.mxu0 }
0x2a28   :  { %v9457_v8 = vadd.f32 %v9453_v19, %v9367_v12 }
0x2a29   :  { %v14301_v29 = vpop.f32.mrf.mxu0 }
0x2a46   :  { %v9543_v44 = vpop.f32.mrf.mxu1 }
0x2a47   :  { %v9547_v4 = vadd.f32 %v9543_v44, %v9457_v8 }
0x2a48   :  { %v14336_v2 = vpop.f32.mrf.mxu1 }
0x2a49   :  { %v9633_v35 = vpop.f32.mrf.mxu0 }
0x2a4a   :  { %v9637_v23 = vadd.f32 %v9633_v35, %v9547_v4 }
0x2a4b   :  { %v14371_v26 = vpop.f32.mrf.mxu0 }
0x2a4c   :  { %9639 = vst.msk [vmem:[%s19556_s14] sm:$0x1] %vm9638_vm4, %v9637_v23  ;;  %s9822_s14 = sshll.u32 %s15035_s21, 4  ;;  %s9823_s14 = int_to_ptr.vmem [resolvable:$true] %s9822_s14 }
0x2a4d   :  { %s15010_s11 = scalar_lea.vmem %s9823_s14, 16  ;;  %s15014_s22 = scalar_lea.vmem %s9823_s14, 32 }
0x2a4e   :  { %p15011_p0 = scmp.ne.s32.totalorder %s9823_s14, %s15010_s11  ;;  %p15015_p1 = scmp.lt.s32.totalorder %s9823_s14, %s9823_s14 }
0x2a4f   :  { %p15016_p2 = scmp.lt.s32.totalorder %s15014_s22, %s15010_s11 }
0x2a51   :  { %p15017_p3 = por %p15016_p2, %p15015_p1 }
0x2a53   :  { %p15018_p4 = pnand %p15017_p3, %p15011_p0 }
0x2a67   :  { %v9723_v38 = vpop.f32.mrf.mxu1 }
0x2a68   :  { %v9724_v27 = vadd.f32 %v9723_v38, %v9656_v31 }
0x2a69   :  { %v14406_v21 = vpop.f32.mrf.mxu1 }
0x2a6a   :  { %v9727_v5 = vmax.f32 %v9724_v27, 0.0 }
0x2a6c   :  { %14424 = vmatmul.mubr.msk.f32.vlgmr.msra.gmra.mxu0 %vm9737_vm5, %v9727_v5 }
0x2b2c   :  { %v9807_v54 = vpop.f32.mrf.mxu0 }
0x2b2d   :  { %v9808_v51 = vadd.f32 %v9807_v54, %v9736_v0 }
0x2b2e   :  { %v14425_v46 = vpop.f32.mrf.mxu0 }
0x2b2f   :  { %14432 = vtanh.f32 %v9808_v51 }
0x2b3c   :  { %v14433_v32 = vpop.eup %14432 }
0x2b3d   :  { %9813 = vst.msk [vmem:[#allocation2] sm:$0x1] %vm9812_vm6, %v14433_v32 }
0x2b3e   :  { %15021 = shalt.err (!%p15018_p4)
}
0x2b3f   :  { %9825 = dma.vmem_to_hbm [thread:$0]  %s9823_s14, 16, %s19557_s15, [#allocation3]  }
0x2b40   :  { %15030 = dma.done.wait [#allocation3], 16  }
0x2b41   :  { %15031 = vsyncadd [#allocation3], 4294967280 }
0x2b42   :  { %9831 = vsyncpa [#allocation3], 1 }

</bundles_post_ra>
